<compile_context>
chip_gen: v7x
topology: tpu7x:2x2x1
jax: 0.10.0
libtpu: 0.0.40
codegen_flags: <defaults>
</compile_context>

<pallas_src>
import jax
import jax.numpy as jnp
from jax.experimental import pallas as pl
from jax.experimental.pallas import tpu as pltpu


_M1 = 27 * 30 + 28   # 838 flat rows covering the 28x28 conv1 output grid (stride 30)
_M2 = 13 * 16 + 14   # 222 flat rows covering the 14x14 conv2 output grid (stride 16)


# ---------------------------------------------------------------------------
# Fused kernel: whole Net1 forward for one image (everything in VMEM / vregs)
# ---------------------------------------------------------------------------
def _net1_kernel(x_ref, w1_ref, b1_ref, w2_ref, b2_ref, scl_ref, sft_ref,
                 wfc_ref, bfc_ref, o_ref, y1_ref, p1_ref, y2_ref, flat_ref):
    f32 = jnp.float32
    bf16 = jnp.bfloat16

    # ---- conv1 (1->16, 3x3, SAME) + bias + ReLU ------------------------------
    # x_ref[h*30 + w, c] == padded_image[h, w] (broadcast over the 16 lanes).
    # Accumulator row k is output pixel (h, w) with k = h*30 + w; the 2 junk
    # columns per row (w = 28, 29) are never read downstream.
    acc1 = x_ref[pl.ds(0, _M1), :] * w1_ref[pl.ds(0, 1), :]
    for tap in range(1, 9):
        dh, dw = divmod(tap, 3)
        acc1 += x_ref[pl.ds(dh * 30 + dw, _M1), :] * w1_ref[pl.ds(tap, 1), :]
    y1_ref[pl.ds(0, _M1), :] = jnp.maximum(acc1 + b1_ref[...], 0.0)

    # ---- maxpool 2x2/2 -> zero-padded pooled-1 map (channels-last, in VMEM) --
    # p1_ref[hp*16 + wp, c] = pooled1[hp-1, wp-1, c]; the zero border implements
    # conv2's SAME padding.
    p1_ref[...] = jnp.zeros_like(p1_ref)
    for po in range(14):
        r = 60 * po                                   # conv1 row 2*po starts here
        q00 = y1_ref[pl.ds(r,      14, 2), :]         # (h=2po  , even w)
        q01 = y1_ref[pl.ds(r + 1,  14, 2), :]         # (h=2po  , odd  w)
        q10 = y1_ref[pl.ds(r + 30, 14, 2), :]         # (h=2po+1, even w)
        q11 = y1_ref[pl.ds(r + 31, 14, 2), :]         # (h=2po+1, odd  w)
        p1_ref[pl.ds((po + 1) * 16 + 1, 14), :] = jnp.maximum(
            jnp.maximum(q00, q01), jnp.maximum(q10, q11))

    # ---- conv2 (16->32, 3x3, SAME) + bias + ReLU + BatchNorm(eval) -----------
    # In-VMEM im2col: 9 shifted (222,16) row-blocks of p1_ref, bf16 MXU matmuls,
    # f32 accumulation. Junk columns (wp = 14, 15) never read downstream.
    acc2 = jnp.zeros((_M2, 32), f32)
    for tap in range(9):
        dh, dw = divmod(tap, 3)
        lhs = p1_ref[pl.ds(dh * 16 + dw, _M2), :].astype(bf16)
        rhs = w2_ref[pl.ds(16 * tap, 16), :]                     # (16, 32) bf16
        acc2 += jnp.dot(lhs, rhs, preferred_element_type=f32)
    y2 = jnp.maximum(acc2 + b2_ref[...], 0.0) * scl_ref[...] + sft_ref[...]
    y2_ref[pl.ds(0, _M2), :] = y2

    # ---- maxpool 2x2/2 + flatten in (h, w, c) order --------------------------
    for po in range(7):
        r = 32 * po
        q00 = y2_ref[pl.ds(r,      7, 2), :]
        q01 = y2_ref[pl.ds(r + 1,  7, 2), :]
        q10 = y2_ref[pl.ds(r + 16, 7, 2), :]
        q11 = y2_ref[pl.ds(r + 17, 7, 2), :]
        prow = jnp.maximum(jnp.maximum(q00, q01), jnp.maximum(q10, q11))  # (7,32)
        for qo in range(7):
            flat_ref[:, pl.ds((po * 7 + qo) * 32, 32)] = prow[qo:qo + 1, :]

    # ---- fc1: (1, 1568) @ (1568, 10) + bias -----------------------------------
    flat = flat_ref[...].astype(bf16)
    out = jnp.dot(flat, wfc_ref[...], preferred_element_type=f32) + bfc_ref[...]
    o_ref[...] = out.astype(o_ref.dtype)


# ---------------------------------------------------------------------------
# Wrapper: one-time param repacking + layout plumbing, then one pallas_call
# ---------------------------------------------------------------------------
def _prep_params(params):
    f32, bf16 = jnp.float32, jnp.bfloat16
    scale = params["bn_gamma"] / jnp.sqrt(params["bn_var"] + 1e-5)
    shift = params["bn_beta"] - params["bn_mean"] * scale
    # fc1 weight: PyTorch flattens (C,H,W); the kernel flattens (H,W,C) -> permute rows.
    wfc = (params["fc_w"].reshape(32, 7, 7, 10)
           .transpose(1, 2, 0, 3).reshape(7 * 7 * 32, 10))
    return dict(
        w1=params["w1"].reshape(9, 16).astype(f32),       # (kh*kw, cout)
        b1=params["b1"].reshape(1, 16).astype(f32),
        w2=params["w2"].reshape(9 * 16, 32).astype(bf16),  # (kh*kw*cin, cout)
        b2=params["b2"].reshape(1, 32).astype(f32),
        scl=scale.reshape(1, 32).astype(f32),
        sft=shift.reshape(1, 32).astype(f32),
        wfc=wfc.astype(bf16),
        bfc=params["fc_b"].reshape(1, 10).astype(f32),
    )


def net1_forward(x_nchw, params):
    B = x_nchw.shape[0]
    kp = _prep_params(params)

    # Layout plumbing (tiny, plain JAX): zero-pad for SAME conv1, flatten row-major
    # and broadcast the single input channel to the 16 output-channel lanes so the
    # kernel's shifted-window FMAs are straight (M,16)*(1,16) VPU ops.
    x = x_nchw[:, 0, :, :].astype(jnp.float32)                  # (B, 28, 28)
    xpad = jnp.pad(x, ((0, 0), (1, 1), (1, 1)))                 # (B, 30, 30)
    xflat = jnp.broadcast_to(xpad.reshape(B, 900, 1), (B, 900, 16))

    out = pl.pallas_call(
        _net1_kernel,
        out_shape=jax.ShapeDtypeStruct((B, 1, 10), jnp.float32),
        grid_spec=pltpu.PrefetchScalarGridSpec(
            num_scalar_prefetch=0,
            grid=(B,),
            in_specs=[
                pl.BlockSpec((None, 900, 16), lambda b: (b, 0, 0)),   # image (flat)
                pl.BlockSpec((9, 16),    lambda b: (0, 0)),           # conv1 w
                pl.BlockSpec((1, 16),    lambda b: (0, 0)),           # conv1 b
                pl.BlockSpec((144, 32),  lambda b: (0, 0)),           # conv2 w (bf16)
                pl.BlockSpec((1, 32),    lambda b: (0, 0)),           # conv2 b
                pl.BlockSpec((1, 32),    lambda b: (0, 0)),           # bn scale
                pl.BlockSpec((1, 32),    lambda b: (0, 0)),           # bn shift
                pl.BlockSpec((1568, 10), lambda b: (0, 0)),           # fc w (bf16)
                pl.BlockSpec((1, 10),    lambda b: (0, 0)),           # fc b
            ],
            out_specs=pl.BlockSpec((None, 1, 10), lambda b: (b, 0, 0)),
            scratch_shapes=[
                pltpu.VMEM((840, 16), jnp.float32),    # conv1+relu output (flat)
                pltpu.VMEM((256, 16), jnp.float32),    # zero-padded pooled-1 map
                pltpu.VMEM((224, 32), jnp.float32),    # conv2+relu+bn output (flat)
                pltpu.VMEM((1, 1568), jnp.float32),    # flattened pooled-2 map
            ],
        ),
        compiler_params=pltpu.CompilerParams(
            dimension_semantics=("parallel",),         # v7x: images across both TCs
        ),
    )(xflat, kp["w1"], kp["b1"], kp["w2"], kp["b2"], kp["scl"], kp["sft"],
      kp["wfc"], kp["bfc"])

    # TODO(synk): training-mode Dropout / batch-statistics BatchNorm not implemented
    # (inference semantics: dropout = identity, BN uses folded running stats).
    return out[:, 0, :]


# ---------------------------------------------------------------------------
# Pure-JAX reference (sanity check)
# ---------------------------------------------------------------------------
def net1_reference(x_nchw, params):
    x = jnp.transpose(x_nchw, (0, 2, 3, 1)).astype(jnp.float32)
    dn = ("NHWC", "HWIO", "NHWC")

    def pool(v):
        return jax.lax.reduce_window(v, -jnp.inf, jax.lax.max,
                                     (1, 2, 2, 1), (1, 2, 2, 1), "VALID")

    y = jax.lax.conv_general_dilated(x, params["w1"], (1, 1), "SAME",
                                     dimension_numbers=dn) + params["b1"]
    y = jax.nn.relu(y)
    y = pool(y)
    y = jax.lax.conv_general_dilated(y, params["w2"], (1, 1), "SAME",
                                     dimension_numbers=dn) + params["b2"]
    y = jax.nn.relu(y)
    scale = params["bn_gamma"] / jnp.sqrt(params["bn_var"] + 1e-5)
    shift = params["bn_beta"] - params["bn_mean"] * scale
    y = y * scale + shift
    y = pool(y)
    flat = jnp.transpose(y, (0, 3, 1, 2)).reshape(x.shape[0], -1)
    return flat @ params["fc_w"] + params["fc_b"]


# ---------------------------------------------------------------------------
if __name__ == "__main__":
    key = jax.random.PRNGKey(0)
    ks = jax.random.split(key, 11)

    params = {
        # conv weights stored HWIO (kh, kw, cin, cout)
        "w1": 0.10 * jax.random.normal(ks[0], (3, 3, 1, 16), jnp.float32),
        "b1": 0.10 * jax.random.normal(ks[1], (16,), jnp.float32),
        "w2": 0.05 * jax.random.normal(ks[2], (3, 3, 16, 32), jnp.float32),
        "b2": 0.10 * jax.random.normal(ks[3], (32,), jnp.float32),
        "bn_gamma": 1.0 + 0.1 * jax.random.normal(ks[4], (32,), jnp.float32),
        "bn_beta": 0.1 * jax.random.normal(ks[5], (32,), jnp.float32),
        "bn_mean": 0.1 * jax.random.normal(ks[6], (32,), jnp.float32),
        "bn_var": 1.0 + 0.1 * jnp.abs(jax.random.normal(ks[7], (32,), jnp.float32)),
        # fc weight rows in PyTorch's (C,H,W) flatten order
        "fc_w": 0.02 * jax.random.normal(ks[8], (32 * 7 * 7, 10), jnp.float32),
        "fc_b": 0.10 * jax.random.normal(ks[9], (10,), jnp.float32),
    }

    # Input shape implied by fc1 = Linear(32*7*7, 10): 1x28x28 images.
    x = jax.random.normal(ks[10], (2, 1, 28, 28), jnp.float32)

    out = jax.jit(net1_forward)(x, params)
    out = jax.block_until_ready(out)
    assert out.shape == (2, 10) and out.dtype == jnp.float32

    ref = net1_reference(x, params)
    err = float(jnp.max(jnp.abs(out - ref)) / (jnp.max(jnp.abs(ref)) + 1.0))
    assert err < 1e-2, f"mismatch vs reference: {err}"

    print("KERNEL_OK")
</pallas_src>

<mosaic_0001>
module attributes {stable_mosaic.version = 11 : i64} {
  func.func @_net1_kernel(%arg0: i32, %arg1: memref<1x900x16xf32, #tpu.memory_space<vmem>>, %arg2: memref<9x16xf32, #tpu.memory_space<vmem>>, %arg3: memref<1x16xf32, #tpu.memory_space<vmem>>, %arg4: memref<144x32xbf16, #tpu.memory_space<vmem>>, %arg5: memref<1x32xf32, #tpu.memory_space<vmem>>, %arg6: memref<1x32xf32, #tpu.memory_space<vmem>>, %arg7: memref<1x32xf32, #tpu.memory_space<vmem>>, %arg8: memref<1568x10xbf16, #tpu.memory_space<vmem>>, %arg9: memref<1x10xf32, #tpu.memory_space<vmem>>, %arg10: memref<1x1x10xf32, #tpu.memory_space<vmem>>, %arg11: memref<840x16xf32, #tpu.memory_space<vmem>>, %arg12: memref<256x16xf32, #tpu.memory_space<vmem>>, %arg13: memref<224x32xf32, #tpu.memory_space<vmem>>, %arg14: memref<1x1568xf32, #tpu.memory_space<vmem>>) attributes {dimension_semantics = [#tpu.dimension_semantics<parallel>], iteration_bounds = array<i64: 2>, scalar_prefetch = 0 : i64, scratch_operands = 4 : i64, tpu.core_type = #tpu.core_type<tc>, window_params = [{transform_indices = @transform_0, window_bounds = array<i64: 1, 900, 16>}, {pipeline_mode = #tpu.pipeline_mode<synchronous>, transform_indices = @transform_1, window_bounds = array<i64: 9, 16>}, {pipeline_mode = #tpu.pipeline_mode<synchronous>, transform_indices = @transform_2, window_bounds = array<i64: 1, 16>}, {pipeline_mode = #tpu.pipeline_mode<synchronous>, transform_indices = @transform_3, window_bounds = array<i64: 144, 32>}, {pipeline_mode = #tpu.pipeline_mode<synchronous>, transform_indices = @transform_4, window_bounds = array<i64: 1, 32>}, {pipeline_mode = #tpu.pipeline_mode<synchronous>, transform_indices = @transform_5, window_bounds = array<i64: 1, 32>}, {pipeline_mode = #tpu.pipeline_mode<synchronous>, transform_indices = @transform_6, window_bounds = array<i64: 1, 32>}, {pipeline_mode = #tpu.pipeline_mode<synchronous>, transform_indices = @transform_7, window_bounds = array<i64: 1568, 10>}, {pipeline_mode = #tpu.pipeline_mode<synchronous>, transform_indices = @transform_8, window_bounds = array<i64: 1, 10>}, {transform_indices = @transform_9, window_bounds = array<i64: 1, 1, 10>}]} {
    %c0 = arith.constant 0 : index
    %c0_0 = arith.constant 0 : index
    %c0_1 = arith.constant 0 : index
    %0 = vector.load %arg1[%c0, %c0_0, %c0_1] : memref<1x900x16xf32, #tpu.memory_space<vmem>>, vector<1x838x16xf32>
    %1 = vector.shape_cast %0 : vector<1x838x16xf32> to vector<838x16xf32>
    %c0_2 = arith.constant 0 : index
    %c0_3 = arith.constant 0 : index
    %2 = vector.load %arg2[%c0_2, %c0_3] : memref<9x16xf32, #tpu.memory_space<vmem>>, vector<1x16xf32>
    %3 = vector.broadcast %2 : vector<1x16xf32> to vector<838x16xf32>
    %4 = arith.mulf %1, %3 : vector<838x16xf32>
    %c0_4 = arith.constant 0 : index
    %c1 = arith.constant 1 : index
    %c0_5 = arith.constant 0 : index
    %5 = vector.load %arg1[%c0_4, %c1, %c0_5] : memref<1x900x16xf32, #tpu.memory_space<vmem>>, vector<1x838x16xf32>
    %6 = vector.shape_cast %5 : vector<1x838x16xf32> to vector<838x16xf32>
    %c1_6 = arith.constant 1 : index
    %c0_7 = arith.constant 0 : index
    %7 = vector.load %arg2[%c1_6, %c0_7] : memref<9x16xf32, #tpu.memory_space<vmem>>, vector<1x16xf32>
    %8 = vector.broadcast %7 : vector<1x16xf32> to vector<838x16xf32>
    %9 = arith.mulf %6, %8 : vector<838x16xf32>
    %10 = arith.addf %4, %9 : vector<838x16xf32>
    %c0_8 = arith.constant 0 : index
    %c2 = arith.constant 2 : index
    %c0_9 = arith.constant 0 : index
    %11 = vector.load %arg1[%c0_8, %c2, %c0_9] : memref<1x900x16xf32, #tpu.memory_space<vmem>>, vector<1x838x16xf32>
    %12 = vector.shape_cast %11 : vector<1x838x16xf32> to vector<838x16xf32>
    %c2_10 = arith.constant 2 : index
    %c0_11 = arith.constant 0 : index
    %13 = vector.load %arg2[%c2_10, %c0_11] : memref<9x16xf32, #tpu.memory_space<vmem>>, vector<1x16xf32>
    %14 = vector.broadcast %13 : vector<1x16xf32> to vector<838x16xf32>
    %15 = arith.mulf %12, %14 : vector<838x16xf32>
    %16 = arith.addf %10, %15 : vector<838x16xf32>
    %c0_12 = arith.constant 0 : index
    %c30 = arith.constant 30 : index
    %c0_13 = arith.constant 0 : index
    %17 = vector.load %arg1[%c0_12, %c30, %c0_13] : memref<1x900x16xf32, #tpu.memory_space<vmem>>, vector<1x838x16xf32>
    %18 = vector.shape_cast %17 : vector<1x838x16xf32> to vector<838x16xf32>
    %c3 = arith.constant 3 : index
    %c0_14 = arith.constant 0 : index
    %19 = vector.load %arg2[%c3, %c0_14] : memref<9x16xf32, #tpu.memory_space<vmem>>, vector<1x16xf32>
    %20 = vector.broadcast %19 : vector<1x16xf32> to vector<838x16xf32>
    %21 = arith.mulf %18, %20 : vector<838x16xf32>
    %22 = arith.addf %16, %21 : vector<838x16xf32>
    %c0_15 = arith.constant 0 : index
    %c31 = arith.constant 31 : index
    %c0_16 = arith.constant 0 : index
    %23 = vector.load %arg1[%c0_15, %c31, %c0_16] : memref<1x900x16xf32, #tpu.memory_space<vmem>>, vector<1x838x16xf32>
    %24 = vector.shape_cast %23 : vector<1x838x16xf32> to vector<838x16xf32>
    %c4 = arith.constant 4 : index
    %c0_17 = arith.constant 0 : index
    %25 = vector.load %arg2[%c4, %c0_17] : memref<9x16xf32, #tpu.memory_space<vmem>>, vector<1x16xf32>
    %26 = vector.broadcast %25 : vector<1x16xf32> to vector<838x16xf32>
    %27 = arith.mulf %24, %26 : vector<838x16xf32>
    %28 = arith.addf %22, %27 : vector<838x16xf32>
    %c0_18 = arith.constant 0 : index
    %c32 = arith.constant 32 : index
    %c0_19 = arith.constant 0 : index
    %29 = vector.load %arg1[%c0_18, %c32, %c0_19] : memref<1x900x16xf32, #tpu.memory_space<vmem>>, vector<1x838x16xf32>
    %30 = vector.shape_cast %29 : vector<1x838x16xf32> to vector<838x16xf32>
    %c5 = arith.constant 5 : index
    %c0_20 = arith.constant 0 : index
    %31 = vector.load %arg2[%c5, %c0_20] : memref<9x16xf32, #tpu.memory_space<vmem>>, vector<1x16xf32>
    %32 = vector.broadcast %31 : vector<1x16xf32> to vector<838x16xf32>
    %33 = arith.mulf %30, %32 : vector<838x16xf32>
    %34 = arith.addf %28, %33 : vector<838x16xf32>
    %c0_21 = arith.constant 0 : index
    %c60 = arith.constant 60 : index
    %c0_22 = arith.constant 0 : index
    %35 = vector.load %arg1[%c0_21, %c60, %c0_22] : memref<1x900x16xf32, #tpu.memory_space<vmem>>, vector<1x838x16xf32>
    %36 = vector.shape_cast %35 : vector<1x838x16xf32> to vector<838x16xf32>
    %c6 = arith.constant 6 : index
    %c0_23 = arith.constant 0 : index
    %37 = vector.load %arg2[%c6, %c0_23] : memref<9x16xf32, #tpu.memory_space<vmem>>, vector<1x16xf32>
    %38 = vector.broadcast %37 : vector<1x16xf32> to vector<838x16xf32>
    %39 = arith.mulf %36, %38 : vector<838x16xf32>
    %40 = arith.addf %34, %39 : vector<838x16xf32>
    %c0_24 = arith.constant 0 : index
    %c61 = arith.constant 61 : index
    %c0_25 = arith.constant 0 : index
    %41 = vector.load %arg1[%c0_24, %c61, %c0_25] : memref<1x900x16xf32, #tpu.memory_space<vmem>>, vector<1x838x16xf32>
    %42 = vector.shape_cast %41 : vector<1x838x16xf32> to vector<838x16xf32>
    %c7 = arith.constant 7 : index
    %c0_26 = arith.constant 0 : index
    %43 = vector.load %arg2[%c7, %c0_26] : memref<9x16xf32, #tpu.memory_space<vmem>>, vector<1x16xf32>
    %44 = vector.broadcast %43 : vector<1x16xf32> to vector<838x16xf32>
    %45 = arith.mulf %42, %44 : vector<838x16xf32>
    %46 = arith.addf %40, %45 : vector<838x16xf32>
    %c0_27 = arith.constant 0 : index
    %c62 = arith.constant 62 : index
    %c0_28 = arith.constant 0 : index
    %47 = vector.load %arg1[%c0_27, %c62, %c0_28] : memref<1x900x16xf32, #tpu.memory_space<vmem>>, vector<1x838x16xf32>
    %48 = vector.shape_cast %47 : vector<1x838x16xf32> to vector<838x16xf32>
    %c8 = arith.constant 8 : index
    %c0_29 = arith.constant 0 : index
    %49 = vector.load %arg2[%c8, %c0_29] : memref<9x16xf32, #tpu.memory_space<vmem>>, vector<1x16xf32>
    %50 = vector.broadcast %49 : vector<1x16xf32> to vector<838x16xf32>
    %51 = arith.mulf %48, %50 : vector<838x16xf32>
    %52 = arith.addf %46, %51 : vector<838x16xf32>
    %c0_30 = arith.constant 0 : index
    %c0_31 = arith.constant 0 : index
    %53 = vector.load %arg3[%c0_30, %c0_31] : memref<1x16xf32, #tpu.memory_space<vmem>>, vector<1x16xf32>
    %54 = vector.broadcast %53 : vector<1x16xf32> to vector<838x16xf32>
    %55 = arith.addf %52, %54 : vector<838x16xf32>
    %cst = arith.constant 0.000000e+00 : f32
    %56 = vector.broadcast %cst : f32 to vector<838x16xf32>
    %57 = arith.maximumf %55, %56 : vector<838x16xf32>
    %c0_32 = arith.constant 0 : index
    %c0_33 = arith.constant 0 : index
    %58 = vector.load %arg11[%c0_32, %c0_33] : memref<840x16xf32, #tpu.memory_space<vmem>>, vector<838x16xf32>
    tpu.vector_store %arg11[%c0_32, %c0_33], %57 {strides = array<i32>} : memref<840x16xf32, #tpu.memory_space<vmem>>, vector<838x16xf32>,
    %cst_34 = arith.constant 0.000000e+00 : f32
    %59 = vector.broadcast %cst_34 : f32 to vector<256x16xf32>
    %c0_35 = arith.constant 0 : index
    %c0_36 = arith.constant 0 : index
    %60 = vector.load %arg12[%c0_35, %c0_36] : memref<256x16xf32, #tpu.memory_space<vmem>>, vector<256x16xf32>
    tpu.vector_store %arg12[%c0_35, %c0_36], %59 {strides = array<i32>} : memref<256x16xf32, #tpu.memory_space<vmem>>, vector<256x16xf32>,
    %c0_37 = arith.constant 0 : index
    %c0_38 = arith.constant 0 : index
    %61 = tpu.strided_load %arg11[%c0_37, %c0_38] {strides = array<i32: 2, 1>} : memref<840x16xf32, #tpu.memory_space<vmem>>, vector<14x16xf32>
    %c1_39 = arith.constant 1 : index
    %c0_40 = arith.constant 0 : index
    %62 = tpu.strided_load %arg11[%c1_39, %c0_40] {strides = array<i32: 2, 1>} : memref<840x16xf32, #tpu.memory_space<vmem>>, vector<14x16xf32>
    %c30_41 = arith.constant 30 : index
    %c0_42 = arith.constant 0 : index
    %63 = tpu.strided_load %arg11[%c30_41, %c0_42] {strides = array<i32: 2, 1>} : memref<840x16xf32, #tpu.memory_space<vmem>>, vector<14x16xf32>
    %c31_43 = arith.constant 31 : index
    %c0_44 = arith.constant 0 : index
    %64 = tpu.strided_load %arg11[%c31_43, %c0_44] {strides = array<i32: 2, 1>} : memref<840x16xf32, #tpu.memory_space<vmem>>, vector<14x16xf32>
    %65 = arith.maximumf %61, %62 : vector<14x16xf32>
    %66 = arith.maximumf %63, %64 : vector<14x16xf32>
    %67 = arith.maximumf %65, %66 : vector<14x16xf32>
    %c17 = arith.constant 17 : index
    %c0_45 = arith.constant 0 : index
    %68 = vector.load %arg12[%c17, %c0_45] : memref<256x16xf32, #tpu.memory_space<vmem>>, vector<14x16xf32>
    tpu.vector_store %arg12[%c17, %c0_45], %67 {strides = array<i32>} : memref<256x16xf32, #tpu.memory_space<vmem>>, vector<14x16xf32>,
    %c60_46 = arith.constant 60 : index
    %c0_47 = arith.constant 0 : index
    %69 = tpu.strided_load %arg11[%c60_46, %c0_47] {strides = array<i32: 2, 1>} : memref<840x16xf32, #tpu.memory_space<vmem>>, vector<14x16xf32>
    %c61_48 = arith.constant 61 : index
    %c0_49 = arith.constant 0 : index
    %70 = tpu.strided_load %arg11[%c61_48, %c0_49] {strides = array<i32: 2, 1>} : memref<840x16xf32, #tpu.memory_space<vmem>>, vector<14x16xf32>
    %c90 = arith.constant 90 : index
    %c0_50 = arith.constant 0 : index
    %71 = tpu.strided_load %arg11[%c90, %c0_50] {strides = array<i32: 2, 1>} : memref<840x16xf32, #tpu.memory_space<vmem>>, vector<14x16xf32>
    %c91 = arith.constant 91 : index
    %c0_51 = arith.constant 0 : index
    %72 = tpu.strided_load %arg11[%c91, %c0_51] {strides = array<i32: 2, 1>} : memref<840x16xf32, #tpu.memory_space<vmem>>, vector<14x16xf32>
    %73 = arith.maximumf %69, %70 : vector<14x16xf32>
    %74 = arith.maximumf %71, %72 : vector<14x16xf32>
    %75 = arith.maximumf %73, %74 : vector<14x16xf32>
    %c33 = arith.constant 33 : index
    %c0_52 = arith.constant 0 : index
    %76 = vector.load %arg12[%c33, %c0_52] : memref<256x16xf32, #tpu.memory_space<vmem>>, vector<14x16xf32>
    tpu.vector_store %arg12[%c33, %c0_52], %75 {strides = array<i32>} : memref<256x16xf32, #tpu.memory_space<vmem>>, vector<14x16xf32>,
    %c120 = arith.constant 120 : index
    %c0_53 = arith.constant 0 : index
    %77 = tpu.strided_load %arg11[%c120, %c0_53] {strides = array<i32: 2, 1>} : memref<840x16xf32, #tpu.memory_space<vmem>>, vector<14x16xf32>
    %c121 = arith.constant 121 : index
    %c0_54 = arith.constant 0 : index
    %78 = tpu.strided_load %arg11[%c121, %c0_54] {strides = array<i32: 2, 1>} : memref<840x16xf32, #tpu.memory_space<vmem>>, vector<14x16xf32>
    %c150 = arith.constant 150 : index
    %c0_55 = arith.constant 0 : index
    %79 = tpu.strided_load %arg11[%c150, %c0_55] {strides = array<i32: 2, 1>} : memref<840x16xf32, #tpu.memory_space<vmem>>, vector<14x16xf32>
    %c151 = arith.constant 151 : index
    %c0_56 = arith.constant 0 : index
    %80 = tpu.strided_load %arg11[%c151, %c0_56] {strides = array<i32: 2, 1>} : memref<840x16xf32, #tpu.memory_space<vmem>>, vector<14x16xf32>
    %81 = arith.maximumf %77, %78 : vector<14x16xf32>
    %82 = arith.maximumf %79, %80 : vector<14x16xf32>
    %83 = arith.maximumf %81, %82 : vector<14x16xf32>
    %c49 = arith.constant 49 : index
    %c0_57 = arith.constant 0 : index
    %84 = vector.load %arg12[%c49, %c0_57] : memref<256x16xf32, #tpu.memory_space<vmem>>, vector<14x16xf32>
    tpu.vector_store %arg12[%c49, %c0_57], %83 {strides = array<i32>} : memref<256x16xf32, #tpu.memory_space<vmem>>, vector<14x16xf32>,
    %c180 = arith.constant 180 : index
    %c0_58 = arith.constant 0 : index
    %85 = tpu.strided_load %arg11[%c180, %c0_58] {strides = array<i32: 2, 1>} : memref<840x16xf32, #tpu.memory_space<vmem>>, vector<14x16xf32>
    %c181 = arith.constant 181 : index
    %c0_59 = arith.constant 0 : index
    %86 = tpu.strided_load %arg11[%c181, %c0_59] {strides = array<i32: 2, 1>} : memref<840x16xf32, #tpu.memory_space<vmem>>, vector<14x16xf32>
    %c210 = arith.constant 210 : index
    %c0_60 = arith.constant 0 : index
    %87 = tpu.strided_load %arg11[%c210, %c0_60] {strides = array<i32: 2, 1>} : memref<840x16xf32, #tpu.memory_space<vmem>>, vector<14x16xf32>
    %c211 = arith.constant 211 : index
    %c0_61 = arith.constant 0 : index
    %88 = tpu.strided_load %arg11[%c211, %c0_61] {strides = array<i32: 2, 1>} : memref<840x16xf32, #tpu.memory_space<vmem>>, vector<14x16xf32>
    %89 = arith.maximumf %85, %86 : vector<14x16xf32>
    %90 = arith.maximumf %87, %88 : vector<14x16xf32>
    %91 = arith.maximumf %89, %90 : vector<14x16xf32>
    %c65 = arith.constant 65 : index
    %c0_62 = arith.constant 0 : index
    %92 = vector.load %arg12[%c65, %c0_62] : memref<256x16xf32, #tpu.memory_space<vmem>>, vector<14x16xf32>
    tpu.vector_store %arg12[%c65, %c0_62], %91 {strides = array<i32>} : memref<256x16xf32, #tpu.memory_space<vmem>>, vector<14x16xf32>,
    %c240 = arith.constant 240 : index
    %c0_63 = arith.constant 0 : index
    %93 = tpu.strided_load %arg11[%c240, %c0_63] {strides = array<i32: 2, 1>} : memref<840x16xf32, #tpu.memory_space<vmem>>, vector<14x16xf32>
    %c241 = arith.constant 241 : index
    %c0_64 = arith.constant 0 : index
    %94 = tpu.strided_load %arg11[%c241, %c0_64] {strides = array<i32: 2, 1>} : memref<840x16xf32, #tpu.memory_space<vmem>>, vector<14x16xf32>
    %c270 = arith.constant 270 : index
    %c0_65 = arith.constant 0 : index
    %95 = tpu.strided_load %arg11[%c270, %c0_65] {strides = array<i32: 2, 1>} : memref<840x16xf32, #tpu.memory_space<vmem>>, vector<14x16xf32>
    %c271 = arith.constant 271 : index
    %c0_66 = arith.constant 0 : index
    %96 = tpu.strided_load %arg11[%c271, %c0_66] {strides = array<i32: 2, 1>} : memref<840x16xf32, #tpu.memory_space<vmem>>, vector<14x16xf32>
    %97 = arith.maximumf %93, %94 : vector<14x16xf32>
    %98 = arith.maximumf %95, %96 : vector<14x16xf32>
    %99 = arith.maximumf %97, %98 : vector<14x16xf32>
    %c81 = arith.constant 81 : index
    %c0_67 = arith.constant 0 : index
    %100 = vector.load %arg12[%c81, %c0_67] : memref<256x16xf32, #tpu.memory_space<vmem>>, vector<14x16xf32>
    tpu.vector_store %arg12[%c81, %c0_67], %99 {strides = array<i32>} : memref<256x16xf32, #tpu.memory_space<vmem>>, vector<14x16xf32>,
    %c300 = arith.constant 300 : index
    %c0_68 = arith.constant 0 : index
    %101 = tpu.strided_load %arg11[%c300, %c0_68] {strides = array<i32: 2, 1>} : memref<840x16xf32, #tpu.memory_space<vmem>>, vector<14x16xf32>
    %c301 = arith.constant 301 : index
    %c0_69 = arith.constant 0 : index
    %102 = tpu.strided_load %arg11[%c301, %c0_69] {strides = array<i32: 2, 1>} : memref<840x16xf32, #tpu.memory_space<vmem>>, vector<14x16xf32>
    %c330 = arith.constant 330 : index
    %c0_70 = arith.constant 0 : index
    %103 = tpu.strided_load %arg11[%c330, %c0_70] {strides = array<i32: 2, 1>} : memref<840x16xf32, #tpu.memory_space<vmem>>, vector<14x16xf32>
    %c331 = arith.constant 331 : index
    %c0_71 = arith.constant 0 : index
    %104 = tpu.strided_load %arg11[%c331, %c0_71] {strides = array<i32: 2, 1>} : memref<840x16xf32, #tpu.memory_space<vmem>>, vector<14x16xf32>
    %105 = arith.maximumf %101, %102 : vector<14x16xf32>
    %106 = arith.maximumf %103, %104 : vector<14x16xf32>
    %107 = arith.maximumf %105, %106 : vector<14x16xf32>
    %c97 = arith.constant 97 : index
    %c0_72 = arith.constant 0 : index
    %108 = vector.load %arg12[%c97, %c0_72] : memref<256x16xf32, #tpu.memory_space<vmem>>, vector<14x16xf32>
    tpu.vector_store %arg12[%c97, %c0_72], %107 {strides = array<i32>} : memref<256x16xf32, #tpu.memory_space<vmem>>, vector<14x16xf32>,
    %c360 = arith.constant 360 : index
    %c0_73 = arith.constant 0 : index
    %109 = tpu.strided_load %arg11[%c360, %c0_73] {strides = array<i32: 2, 1>} : memref<840x16xf32, #tpu.memory_space<vmem>>, vector<14x16xf32>
    %c361 = arith.constant 361 : index
    %c0_74 = arith.constant 0 : index
    %110 = tpu.strided_load %arg11[%c361, %c0_74] {strides = array<i32: 2, 1>} : memref<840x16xf32, #tpu.memory_space<vmem>>, vector<14x16xf32>
    %c390 = arith.constant 390 : index
    %c0_75 = arith.constant 0 : index
    %111 = tpu.strided_load %arg11[%c390, %c0_75] {strides = array<i32: 2, 1>} : memref<840x16xf32, #tpu.memory_space<vmem>>, vector<14x16xf32>
    %c391 = arith.constant 391 : index
    %c0_76 = arith.constant 0 : index
    %112 = tpu.strided_load %arg11[%c391, %c0_76] {strides = array<i32: 2, 1>} : memref<840x16xf32, #tpu.memory_space<vmem>>, vector<14x16xf32>
    %113 = arith.maximumf %109, %110 : vector<14x16xf32>
    %114 = arith.maximumf %111, %112 : vector<14x16xf32>
    %115 = arith.maximumf %113, %114 : vector<14x16xf32>
    %c113 = arith.constant 113 : index
    %c0_77 = arith.constant 0 : index
    %116 = vector.load %arg12[%c113, %c0_77] : memref<256x16xf32, #tpu.memory_space<vmem>>, vector<14x16xf32>
    tpu.vector_store %arg12[%c113, %c0_77], %115 {strides = array<i32>} : memref<256x16xf32, #tpu.memory_space<vmem>>, vector<14x16xf32>,
    %c420 = arith.constant 420 : index
    %c0_78 = arith.constant 0 : index
    %117 = tpu.strided_load %arg11[%c420, %c0_78] {strides = array<i32: 2, 1>} : memref<840x16xf32, #tpu.memory_space<vmem>>, vector<14x16xf32>
    %c421 = arith.constant 421 : index
    %c0_79 = arith.constant 0 : index
    %118 = tpu.strided_load %arg11[%c421, %c0_79] {strides = array<i32: 2, 1>} : memref<840x16xf32, #tpu.memory_space<vmem>>, vector<14x16xf32>
    %c450 = arith.constant 450 : index
    %c0_80 = arith.constant 0 : index
    %119 = tpu.strided_load %arg11[%c450, %c0_80] {strides = array<i32: 2, 1>} : memref<840x16xf32, #tpu.memory_space<vmem>>, vector<14x16xf32>
    %c451 = arith.constant 451 : index
    %c0_81 = arith.constant 0 : index
    %120 = tpu.strided_load %arg11[%c451, %c0_81] {strides = array<i32: 2, 1>} : memref<840x16xf32, #tpu.memory_space<vmem>>, vector<14x16xf32>
    %121 = arith.maximumf %117, %118 : vector<14x16xf32>
    %122 = arith.maximumf %119, %120 : vector<14x16xf32>
    %123 = arith.maximumf %121, %122 : vector<14x16xf32>
    %c129 = arith.constant 129 : index
    %c0_82 = arith.constant 0 : index
    %124 = vector.load %arg12[%c129, %c0_82] : memref<256x16xf32, #tpu.memory_space<vmem>>, vector<14x16xf32>
    tpu.vector_store %arg12[%c129, %c0_82], %123 {strides = array<i32>} : memref<256x16xf32, #tpu.memory_space<vmem>>, vector<14x16xf32>,
    %c480 = arith.constant 480 : index
    %c0_83 = arith.constant 0 : index
    %125 = tpu.strided_load %arg11[%c480, %c0_83] {strides = array<i32: 2, 1>} : memref<840x16xf32, #tpu.memory_space<vmem>>, vector<14x16xf32>
    %c481 = arith.constant 481 : index
    %c0_84 = arith.constant 0 : index
    %126 = tpu.strided_load %arg11[%c481, %c0_84] {strides = array<i32: 2, 1>} : memref<840x16xf32, #tpu.memory_space<vmem>>, vector<14x16xf32>
    %c510 = arith.constant 510 : index
    %c0_85 = arith.constant 0 : index
    %127 = tpu.strided_load %arg11[%c510, %c0_85] {strides = array<i32: 2, 1>} : memref<840x16xf32, #tpu.memory_space<vmem>>, vector<14x16xf32>
    %c511 = arith.constant 511 : index
    %c0_86 = arith.constant 0 : index
    %128 = tpu.strided_load %arg11[%c511, %c0_86] {strides = array<i32: 2, 1>} : memref<840x16xf32, #tpu.memory_space<vmem>>, vector<14x16xf32>
    %129 = arith.maximumf %125, %126 : vector<14x16xf32>
    %130 = arith.maximumf %127, %128 : vector<14x16xf32>
    %131 = arith.maximumf %129, %130 : vector<14x16xf32>
    %c145 = arith.constant 145 : index
    %c0_87 = arith.constant 0 : index
    %132 = vector.load %arg12[%c145, %c0_87] : memref<256x16xf32, #tpu.memory_space<vmem>>, vector<14x16xf32>
    tpu.vector_store %arg12[%c145, %c0_87], %131 {strides = array<i32>} : memref<256x16xf32, #tpu.memory_space<vmem>>, vector<14x16xf32>,
    %c540 = arith.constant 540 : index
    %c0_88 = arith.constant 0 : index
    %133 = tpu.strided_load %arg11[%c540, %c0_88] {strides = array<i32: 2, 1>} : memref<840x16xf32, #tpu.memory_space<vmem>>, vector<14x16xf32>
    %c541 = arith.constant 541 : index
    %c0_89 = arith.constant 0 : index
    %134 = tpu.strided_load %arg11[%c541, %c0_89] {strides = array<i32: 2, 1>} : memref<840x16xf32, #tpu.memory_space<vmem>>, vector<14x16xf32>
    %c570 = arith.constant 570 : index
    %c0_90 = arith.constant 0 : index
    %135 = tpu.strided_load %arg11[%c570, %c0_90] {strides = array<i32: 2, 1>} : memref<840x16xf32, #tpu.memory_space<vmem>>, vector<14x16xf32>
    %c571 = arith.constant 571 : index
    %c0_91 = arith.constant 0 : index
    %136 = tpu.strided_load %arg11[%c571, %c0_91] {strides = array<i32: 2, 1>} : memref<840x16xf32, #tpu.memory_space<vmem>>, vector<14x16xf32>
    %137 = arith.maximumf %133, %134 : vector<14x16xf32>
    %138 = arith.maximumf %135, %136 : vector<14x16xf32>
    %139 = arith.maximumf %137, %138 : vector<14x16xf32>
    %c161 = arith.constant 161 : index
    %c0_92 = arith.constant 0 : index
    %140 = vector.load %arg12[%c161, %c0_92] : memref<256x16xf32, #tpu.memory_space<vmem>>, vector<14x16xf32>
    tpu.vector_store %arg12[%c161, %c0_92], %139 {strides = array<i32>} : memref<256x16xf32, #tpu.memory_space<vmem>>, vector<14x16xf32>,
    %c600 = arith.constant 600 : index
    %c0_93 = arith.constant 0 : index
    %141 = tpu.strided_load %arg11[%c600, %c0_93] {strides = array<i32: 2, 1>} : memref<840x16xf32, #tpu.memory_space<vmem>>, vector<14x16xf32>
    %c601 = arith.constant 601 : index
    %c0_94 = arith.constant 0 : index
    %142 = tpu.strided_load %arg11[%c601, %c0_94] {strides = array<i32: 2, 1>} : memref<840x16xf32, #tpu.memory_space<vmem>>, vector<14x16xf32>
    %c630 = arith.constant 630 : index
    %c0_95 = arith.constant 0 : index
    %143 = tpu.strided_load %arg11[%c630, %c0_95] {strides = array<i32: 2, 1>} : memref<840x16xf32, #tpu.memory_space<vmem>>, vector<14x16xf32>
    %c631 = arith.constant 631 : index
    %c0_96 = arith.constant 0 : index
    %144 = tpu.strided_load %arg11[%c631, %c0_96] {strides = array<i32: 2, 1>} : memref<840x16xf32, #tpu.memory_space<vmem>>, vector<14x16xf32>
    %145 = arith.maximumf %141, %142 : vector<14x16xf32>
    %146 = arith.maximumf %143, %144 : vector<14x16xf32>
    %147 = arith.maximumf %145, %146 : vector<14x16xf32>
    %c177 = arith.constant 177 : index
    %c0_97 = arith.constant 0 : index
    %148 = vector.load %arg12[%c177, %c0_97] : memref<256x16xf32, #tpu.memory_space<vmem>>, vector<14x16xf32>
    tpu.vector_store %arg12[%c177, %c0_97], %147 {strides = array<i32>} : memref<256x16xf32, #tpu.memory_space<vmem>>, vector<14x16xf32>,
    %c660 = arith.constant 660 : index
    %c0_98 = arith.constant 0 : index
    %149 = tpu.strided_load %arg11[%c660, %c0_98] {strides = array<i32: 2, 1>} : memref<840x16xf32, #tpu.memory_space<vmem>>, vector<14x16xf32>
    %c661 = arith.constant 661 : index
    %c0_99 = arith.constant 0 : index
    %150 = tpu.strided_load %arg11[%c661, %c0_99] {strides = array<i32: 2, 1>} : memref<840x16xf32, #tpu.memory_space<vmem>>, vector<14x16xf32>
    %c690 = arith.constant 690 : index
    %c0_100 = arith.constant 0 : index
    %151 = tpu.strided_load %arg11[%c690, %c0_100] {strides = array<i32: 2, 1>} : memref<840x16xf32, #tpu.memory_space<vmem>>, vector<14x16xf32>
    %c691 = arith.constant 691 : index
    %c0_101 = arith.constant 0 : index
    %152 = tpu.strided_load %arg11[%c691, %c0_101] {strides = array<i32: 2, 1>} : memref<840x16xf32, #tpu.memory_space<vmem>>, vector<14x16xf32>
    %153 = arith.maximumf %149, %150 : vector<14x16xf32>
    %154 = arith.maximumf %151, %152 : vector<14x16xf32>
    %155 = arith.maximumf %153, %154 : vector<14x16xf32>
    %c193 = arith.constant 193 : index
    %c0_102 = arith.constant 0 : index
    %156 = vector.load %arg12[%c193, %c0_102] : memref<256x16xf32, #tpu.memory_space<vmem>>, vector<14x16xf32>
    tpu.vector_store %arg12[%c193, %c0_102], %155 {strides = array<i32>} : memref<256x16xf32, #tpu.memory_space<vmem>>, vector<14x16xf32>,
    %c720 = arith.constant 720 : index
    %c0_103 = arith.constant 0 : index
    %157 = tpu.strided_load %arg11[%c720, %c0_103] {strides = array<i32: 2, 1>} : memref<840x16xf32, #tpu.memory_space<vmem>>, vector<14x16xf32>
    %c721 = arith.constant 721 : index
    %c0_104 = arith.constant 0 : index
    %158 = tpu.strided_load %arg11[%c721, %c0_104] {strides = array<i32: 2, 1>} : memref<840x16xf32, #tpu.memory_space<vmem>>, vector<14x16xf32>
    %c750 = arith.constant 750 : index
    %c0_105 = arith.constant 0 : index
    %159 = tpu.strided_load %arg11[%c750, %c0_105] {strides = array<i32: 2, 1>} : memref<840x16xf32, #tpu.memory_space<vmem>>, vector<14x16xf32>
    %c751 = arith.constant 751 : index
    %c0_106 = arith.constant 0 : index
    %160 = tpu.strided_load %arg11[%c751, %c0_106] {strides = array<i32: 2, 1>} : memref<840x16xf32, #tpu.memory_space<vmem>>, vector<14x16xf32>
    %161 = arith.maximumf %157, %158 : vector<14x16xf32>
    %162 = arith.maximumf %159, %160 : vector<14x16xf32>
    %163 = arith.maximumf %161, %162 : vector<14x16xf32>
    %c209 = arith.constant 209 : index
    %c0_107 = arith.constant 0 : index
    %164 = vector.load %arg12[%c209, %c0_107] : memref<256x16xf32, #tpu.memory_space<vmem>>, vector<14x16xf32>
    tpu.vector_store %arg12[%c209, %c0_107], %163 {strides = array<i32>} : memref<256x16xf32, #tpu.memory_space<vmem>>, vector<14x16xf32>,
    %c780 = arith.constant 780 : index
    %c0_108 = arith.constant 0 : index
    %165 = tpu.strided_load %arg11[%c780, %c0_108] {strides = array<i32: 2, 1>} : memref<840x16xf32, #tpu.memory_space<vmem>>, vector<14x16xf32>
    %c781 = arith.constant 781 : index
    %c0_109 = arith.constant 0 : index
    %166 = tpu.strided_load %arg11[%c781, %c0_109] {strides = array<i32: 2, 1>} : memref<840x16xf32, #tpu.memory_space<vmem>>, vector<14x16xf32>
    %c810 = arith.constant 810 : index
    %c0_110 = arith.constant 0 : index
    %167 = tpu.strided_load %arg11[%c810, %c0_110] {strides = array<i32: 2, 1>} : memref<840x16xf32, #tpu.memory_space<vmem>>, vector<14x16xf32>
    %c811 = arith.constant 811 : index
    %c0_111 = arith.constant 0 : index
    %168 = tpu.strided_load %arg11[%c811, %c0_111] {strides = array<i32: 2, 1>} : memref<840x16xf32, #tpu.memory_space<vmem>>, vector<14x16xf32>
    %169 = arith.maximumf %165, %166 : vector<14x16xf32>
    %170 = arith.maximumf %167, %168 : vector<14x16xf32>
    %171 = arith.maximumf %169, %170 : vector<14x16xf32>
    %c225 = arith.constant 225 : index
    %c0_112 = arith.constant 0 : index
    %172 = vector.load %arg12[%c225, %c0_112] : memref<256x16xf32, #tpu.memory_space<vmem>>, vector<14x16xf32>
    tpu.vector_store %arg12[%c225, %c0_112], %171 {strides = array<i32>} : memref<256x16xf32, #tpu.memory_space<vmem>>, vector<14x16xf32>,
    %cst_113 = arith.constant 0.000000e+00 : f32
    %173 = vector.broadcast %cst_113 : f32 to vector<222x32xf32>
    %c0_114 = arith.constant 0 : index
    %c0_115 = arith.constant 0 : index
    %174 = vector.load %arg12[%c0_114, %c0_115] : memref<256x16xf32, #tpu.memory_space<vmem>>, vector<222x16xf32>
    %175 = arith.truncf %174 : vector<222x16xf32> to vector<222x16xbf16>
    %c0_116 = arith.constant 0 : index
    %c0_117 = arith.constant 0 : index
    %176 = vector.load %arg4[%c0_116, %c0_117] : memref<144x32xbf16, #tpu.memory_space<vmem>>, vector<16x32xbf16>
    %cst_118 = arith.constant dense<0.000000e+00> : vector<222x32xf32>
    %177 = tpu.matmul %175, %176, %cst_118 {dimension_numbers = #tpu.dot_dimension_numbers<[1], [0], [0], [1], [0, 0, 1, 1], [], []>} : vector<222x16xbf16>, vector<16x32xbf16>, vector<222x32xf32> -> vector<222x32xf32>
    %178 = arith.addf %173, %177 : vector<222x32xf32>
    %c1_119 = arith.constant 1 : index
    %c0_120 = arith.constant 0 : index
    %179 = vector.load %arg12[%c1_119, %c0_120] : memref<256x16xf32, #tpu.memory_space<vmem>>, vector<222x16xf32>
    %180 = arith.truncf %179 : vector<222x16xf32> to vector<222x16xbf16>
    %c16 = arith.constant 16 : index
    %c0_121 = arith.constant 0 : index
    %181 = vector.load %arg4[%c16, %c0_121] : memref<144x32xbf16, #tpu.memory_space<vmem>>, vector<16x32xbf16>
    %cst_122 = arith.constant dense<0.000000e+00> : vector<222x32xf32>
    %182 = tpu.matmul %180, %181, %cst_122 {dimension_numbers = #tpu.dot_dimension_numbers<[1], [0], [0], [1], [0, 0, 1, 1], [], []>} : vector<222x16xbf16>, vector<16x32xbf16>, vector<222x32xf32> -> vector<222x32xf32>
    %183 = arith.addf %178, %182 : vector<222x32xf32>
    %c2_123 = arith.constant 2 : index
    %c0_124 = arith.constant 0 : index
    %184 = vector.load %arg12[%c2_123, %c0_124] : memref<256x16xf32, #tpu.memory_space<vmem>>, vector<222x16xf32>
    %185 = arith.truncf %184 : vector<222x16xf32> to vector<222x16xbf16>
    %c32_125 = arith.constant 32 : index
    %c0_126 = arith.constant 0 : index
    %186 = vector.load %arg4[%c32_125, %c0_126] : memref<144x32xbf16, #tpu.memory_space<vmem>>, vector<16x32xbf16>
    %cst_127 = arith.constant dense<0.000000e+00> : vector<222x32xf32>
    %187 = tpu.matmul %185, %186, %cst_127 {dimension_numbers = #tpu.dot_dimension_numbers<[1], [0], [0], [1], [0, 0, 1, 1], [], []>} : vector<222x16xbf16>, vector<16x32xbf16>, vector<222x32xf32> -> vector<222x32xf32>
    %188 = arith.addf %183, %187 : vector<222x32xf32>
    %c16_128 = arith.constant 16 : index
    %c0_129 = arith.constant 0 : index
    %189 = vector.load %arg12[%c16_128, %c0_129] : memref<256x16xf32, #tpu.memory_space<vmem>>, vector<222x16xf32>
    %190 = arith.truncf %189 : vector<222x16xf32> to vector<222x16xbf16>
    %c48 = arith.constant 48 : index
    %c0_130 = arith.constant 0 : index
    %191 = vector.load %arg4[%c48, %c0_130] : memref<144x32xbf16, #tpu.memory_space<vmem>>, vector<16x32xbf16>
    %cst_131 = arith.constant dense<0.000000e+00> : vector<222x32xf32>
    %192 = tpu.matmul %190, %191, %cst_131 {dimension_numbers = #tpu.dot_dimension_numbers<[1], [0], [0], [1], [0, 0, 1, 1], [], []>} : vector<222x16xbf16>, vector<16x32xbf16>, vector<222x32xf32> -> vector<222x32xf32>
    %193 = arith.addf %188, %192 : vector<222x32xf32>
    %c17_132 = arith.constant 17 : index
    %c0_133 = arith.constant 0 : index
    %194 = vector.load %arg12[%c17_132, %c0_133] : memref<256x16xf32, #tpu.memory_space<vmem>>, vector<222x16xf32>
    %195 = arith.truncf %194 : vector<222x16xf32> to vector<222x16xbf16>
    %c64 = arith.constant 64 : index
    %c0_134 = arith.constant 0 : index
    %196 = vector.load %arg4[%c64, %c0_134] : memref<144x32xbf16, #tpu.memory_space<vmem>>, vector<16x32xbf16>
    %cst_135 = arith.constant dense<0.000000e+00> : vector<222x32xf32>
    %197 = tpu.matmul %195, %196, %cst_135 {dimension_numbers = #tpu.dot_dimension_numbers<[1], [0], [0], [1], [0, 0, 1, 1], [], []>} : vector<222x16xbf16>, vector<16x32xbf16>, vector<222x32xf32> -> vector<222x32xf32>
    %198 = arith.addf %193, %197 : vector<222x32xf32>
    %c18 = arith.constant 18 : index
    %c0_136 = arith.constant 0 : index
    %199 = vector.load %arg12[%c18, %c0_136] : memref<256x16xf32, #tpu.memory_space<vmem>>, vector<222x16xf32>
    %200 = arith.truncf %199 : vector<222x16xf32> to vector<222x16xbf16>
    %c80 = arith.constant 80 : index
    %c0_137 = arith.constant 0 : index
    %201 = vector.load %arg4[%c80, %c0_137] : memref<144x32xbf16, #tpu.memory_space<vmem>>, vector<16x32xbf16>
    %cst_138 = arith.constant dense<0.000000e+00> : vector<222x32xf32>
    %202 = tpu.matmul %200, %201, %cst_138 {dimension_numbers = #tpu.dot_dimension_numbers<[1], [0], [0], [1], [0, 0, 1, 1], [], []>} : vector<222x16xbf16>, vector<16x32xbf16>, vector<222x32xf32> -> vector<222x32xf32>
    %203 = arith.addf %198, %202 : vector<222x32xf32>
    %c32_139 = arith.constant 32 : index
    %c0_140 = arith.constant 0 : index
    %204 = vector.load %arg12[%c32_139, %c0_140] : memref<256x16xf32, #tpu.memory_space<vmem>>, vector<222x16xf32>
    %205 = arith.truncf %204 : vector<222x16xf32> to vector<222x16xbf16>
    %c96 = arith.constant 96 : index
    %c0_141 = arith.constant 0 : index
    %206 = vector.load %arg4[%c96, %c0_141] : memref<144x32xbf16, #tpu.memory_space<vmem>>, vector<16x32xbf16>
    %cst_142 = arith.constant dense<0.000000e+00> : vector<222x32xf32>
    %207 = tpu.matmul %205, %206, %cst_142 {dimension_numbers = #tpu.dot_dimension_numbers<[1], [0], [0], [1], [0, 0, 1, 1], [], []>} : vector<222x16xbf16>, vector<16x32xbf16>, vector<222x32xf32> -> vector<222x32xf32>
    %208 = arith.addf %203, %207 : vector<222x32xf32>
    %c33_143 = arith.constant 33 : index
    %c0_144 = arith.constant 0 : index
    %209 = vector.load %arg12[%c33_143, %c0_144] : memref<256x16xf32, #tpu.memory_space<vmem>>, vector<222x16xf32>
    %210 = arith.truncf %209 : vector<222x16xf32> to vector<222x16xbf16>
    %c112 = arith.constant 112 : index
    %c0_145 = arith.constant 0 : index
    %211 = vector.load %arg4[%c112, %c0_145] : memref<144x32xbf16, #tpu.memory_space<vmem>>, vector<16x32xbf16>
    %cst_146 = arith.constant dense<0.000000e+00> : vector<222x32xf32>
    %212 = tpu.matmul %210, %211, %cst_146 {dimension_numbers = #tpu.dot_dimension_numbers<[1], [0], [0], [1], [0, 0, 1, 1], [], []>} : vector<222x16xbf16>, vector<16x32xbf16>, vector<222x32xf32> -> vector<222x32xf32>
    %213 = arith.addf %208, %212 : vector<222x32xf32>
    %c34 = arith.constant 34 : index
    %c0_147 = arith.constant 0 : index
    %214 = vector.load %arg12[%c34, %c0_147] : memref<256x16xf32, #tpu.memory_space<vmem>>, vector<222x16xf32>
    %215 = arith.truncf %214 : vector<222x16xf32> to vector<222x16xbf16>
    %c128 = arith.constant 128 : index
    %c0_148 = arith.constant 0 : index
    %216 = vector.load %arg4[%c128, %c0_148] : memref<144x32xbf16, #tpu.memory_space<vmem>>, vector<16x32xbf16>
    %cst_149 = arith.constant dense<0.000000e+00> : vector<222x32xf32>
    %217 = tpu.matmul %215, %216, %cst_149 {dimension_numbers = #tpu.dot_dimension_numbers<[1], [0], [0], [1], [0, 0, 1, 1], [], []>} : vector<222x16xbf16>, vector<16x32xbf16>, vector<222x32xf32> -> vector<222x32xf32>
    %218 = arith.addf %213, %217 : vector<222x32xf32>
    %c0_150 = arith.constant 0 : index
    %c0_151 = arith.constant 0 : index
    %219 = vector.load %arg5[%c0_150, %c0_151] : memref<1x32xf32, #tpu.memory_space<vmem>>, vector<1x32xf32>
    %220 = vector.broadcast %219 : vector<1x32xf32> to vector<222x32xf32>
    %221 = arith.addf %218, %220 : vector<222x32xf32>
    %cst_152 = arith.constant 0.000000e+00 : f32
    %222 = vector.broadcast %cst_152 : f32 to vector<222x32xf32>
    %223 = arith.maximumf %221, %222 : vector<222x32xf32>
    %c0_153 = arith.constant 0 : index
    %c0_154 = arith.constant 0 : index
    %224 = vector.load %arg6[%c0_153, %c0_154] : memref<1x32xf32, #tpu.memory_space<vmem>>, vector<1x32xf32>
    %225 = vector.broadcast %224 : vector<1x32xf32> to vector<222x32xf32>
    %226 = arith.mulf %223, %225 : vector<222x32xf32>
    %c0_155 = arith.constant 0 : index
    %c0_156 = arith.constant 0 : index
    %227 = vector.load %arg7[%c0_155, %c0_156] : memref<1x32xf32, #tpu.memory_space<vmem>>, vector<1x32xf32>
    %228 = vector.broadcast %227 : vector<1x32xf32> to vector<222x32xf32>
    %229 = arith.addf %226, %228 : vector<222x32xf32>
    %c0_157 = arith.constant 0 : index
    %c0_158 = arith.constant 0 : index
    %230 = vector.load %arg13[%c0_157, %c0_158] : memref<224x32xf32, #tpu.memory_space<vmem>>, vector<222x32xf32>
    tpu.vector_store %arg13[%c0_157, %c0_158], %229 {strides = array<i32>} : memref<224x32xf32, #tpu.memory_space<vmem>>, vector<222x32xf32>,
    %c0_159 = arith.constant 0 : index
    %c0_160 = arith.constant 0 : index
    %231 = tpu.strided_load %arg13[%c0_159, %c0_160] {strides = array<i32: 2, 1>} : memref<224x32xf32, #tpu.memory_space<vmem>>, vector<7x32xf32>
    %c1_161 = arith.constant 1 : index
    %c0_162 = arith.constant 0 : index
    %232 = tpu.strided_load %arg13[%c1_161, %c0_162] {strides = array<i32: 2, 1>} : memref<224x32xf32, #tpu.memory_space<vmem>>, vector<7x32xf32>
    %c16_163 = arith.constant 16 : index
    %c0_164 = arith.constant 0 : index
    %233 = tpu.strided_load %arg13[%c16_163, %c0_164] {strides = array<i32: 2, 1>} : memref<224x32xf32, #tpu.memory_space<vmem>>, vector<7x32xf32>
    %c17_165 = arith.constant 17 : index
    %c0_166 = arith.constant 0 : index
    %234 = tpu.strided_load %arg13[%c17_165, %c0_166] {strides = array<i32: 2, 1>} : memref<224x32xf32, #tpu.memory_space<vmem>>, vector<7x32xf32>
    %235 = arith.maximumf %231, %232 : vector<7x32xf32>
    %236 = arith.maximumf %233, %234 : vector<7x32xf32>
    %237 = arith.maximumf %235, %236 : vector<7x32xf32>
    %238 = vector.extract_strided_slice %237 {offsets = [0, 0], sizes = [1, 32], strides = [1, 1]} : vector<7x32xf32> to vector<1x32xf32>
    %c0_167 = arith.constant 0 : index
    %c0_168 = arith.constant 0 : index
    %239 = vector.load %arg14[%c0_167, %c0_168] : memref<1x1568xf32, #tpu.memory_space<vmem>>, vector<1x32xf32>
    tpu.vector_store %arg14[%c0_167, %c0_168], %238 {strides = array<i32>} : memref<1x1568xf32, #tpu.memory_space<vmem>>, vector<1x32xf32>,
    %240 = vector.extract_strided_slice %237 {offsets = [1, 0], sizes = [1, 32], strides = [1, 1]} : vector<7x32xf32> to vector<1x32xf32>
    %c0_169 = arith.constant 0 : index
    %c32_170 = arith.constant 32 : index
    %241 = vector.load %arg14[%c0_169, %c32_170] : memref<1x1568xf32, #tpu.memory_space<vmem>>, vector<1x32xf32>
    tpu.vector_store %arg14[%c0_169, %c32_170], %240 {strides = array<i32>} : memref<1x1568xf32, #tpu.memory_space<vmem>>, vector<1x32xf32>,
    %242 = vector.extract_strided_slice %237 {offsets = [2, 0], sizes = [1, 32], strides = [1, 1]} : vector<7x32xf32> to vector<1x32xf32>
    %c0_171 = arith.constant 0 : index
    %c64_172 = arith.constant 64 : index
    %243 = vector.load %arg14[%c0_171, %c64_172] : memref<1x1568xf32, #tpu.memory_space<vmem>>, vector<1x32xf32>
    tpu.vector_store %arg14[%c0_171, %c64_172], %242 {strides = array<i32>} : memref<1x1568xf32, #tpu.memory_space<vmem>>, vector<1x32xf32>,
    %244 = vector.extract_strided_slice %237 {offsets = [3, 0], sizes = [1, 32], strides = [1, 1]} : vector<7x32xf32> to vector<1x32xf32>
    %c0_173 = arith.constant 0 : index
    %c96_174 = arith.constant 96 : index
    %245 = vector.load %arg14[%c0_173, %c96_174] : memref<1x1568xf32, #tpu.memory_space<vmem>>, vector<1x32xf32>
    tpu.vector_store %arg14[%c0_173, %c96_174], %244 {strides = array<i32>} : memref<1x1568xf32, #tpu.memory_space<vmem>>, vector<1x32xf32>,
    %246 = vector.extract_strided_slice %237 {offsets = [4, 0], sizes = [1, 32], strides = [1, 1]} : vector<7x32xf32> to vector<1x32xf32>
    %c0_175 = arith.constant 0 : index
    %c128_176 = arith.constant 128 : index
    %247 = vector.load %arg14[%c0_175, %c128_176] : memref<1x1568xf32, #tpu.memory_space<vmem>>, vector<1x32xf32>
    tpu.vector_store %arg14[%c0_175, %c128_176], %246 {strides = array<i32>} : memref<1x1568xf32, #tpu.memory_space<vmem>>, vector<1x32xf32>,
    %248 = vector.extract_strided_slice %237 {offsets = [5, 0], sizes = [1, 32], strides = [1, 1]} : vector<7x32xf32> to vector<1x32xf32>
    %c0_177 = arith.constant 0 : index
    %c160 = arith.constant 160 : index
    %249 = vector.load %arg14[%c0_177, %c160] : memref<1x1568xf32, #tpu.memory_space<vmem>>, vector<1x32xf32>
    tpu.vector_store %arg14[%c0_177, %c160], %248 {strides = array<i32>} : memref<1x1568xf32, #tpu.memory_space<vmem>>, vector<1x32xf32>,
    %250 = vector.extract_strided_slice %237 {offsets = [6, 0], sizes = [1, 32], strides = [1, 1]} : vector<7x32xf32> to vector<1x32xf32>
    %c0_178 = arith.constant 0 : index
    %c192 = arith.constant 192 : index
    %251 = vector.load %arg14[%c0_178, %c192] : memref<1x1568xf32, #tpu.memory_space<vmem>>, vector<1x32xf32>
    tpu.vector_store %arg14[%c0_178, %c192], %250 {strides = array<i32>} : memref<1x1568xf32, #tpu.memory_space<vmem>>, vector<1x32xf32>,
    %c32_179 = arith.constant 32 : index
    %c0_180 = arith.constant 0 : index
    %252 = tpu.strided_load %arg13[%c32_179, %c0_180] {strides = array<i32: 2, 1>} : memref<224x32xf32, #tpu.memory_space<vmem>>, vector<7x32xf32>
    %c33_181 = arith.constant 33 : index
    %c0_182 = arith.constant 0 : index
    %253 = tpu.strided_load %arg13[%c33_181, %c0_182] {strides = array<i32: 2, 1>} : memref<224x32xf32, #tpu.memory_space<vmem>>, vector<7x32xf32>
    %c48_183 = arith.constant 48 : index
    %c0_184 = arith.constant 0 : index
    %254 = tpu.strided_load %arg13[%c48_183, %c0_184] {strides = array<i32: 2, 1>} : memref<224x32xf32, #tpu.memory_space<vmem>>, vector<7x32xf32>
    %c49_185 = arith.constant 49 : index
    %c0_186 = arith.constant 0 : index
    %255 = tpu.strided_load %arg13[%c49_185, %c0_186] {strides = array<i32: 2, 1>} : memref<224x32xf32, #tpu.memory_space<vmem>>, vector<7x32xf32>
    %256 = arith.maximumf %252, %253 : vector<7x32xf32>
    %257 = arith.maximumf %254, %255 : vector<7x32xf32>
    %258 = arith.maximumf %256, %257 : vector<7x32xf32>
    %259 = vector.extract_strided_slice %258 {offsets = [0, 0], sizes = [1, 32], strides = [1, 1]} : vector<7x32xf32> to vector<1x32xf32>
    %c0_187 = arith.constant 0 : index
    %c224 = arith.constant 224 : index
    %260 = vector.load %arg14[%c0_187, %c224] : memref<1x1568xf32, #tpu.memory_space<vmem>>, vector<1x32xf32>
    tpu.vector_store %arg14[%c0_187, %c224], %259 {strides = array<i32>} : memref<1x1568xf32, #tpu.memory_space<vmem>>, vector<1x32xf32>,
    %261 = vector.extract_strided_slice %258 {offsets = [1, 0], sizes = [1, 32], strides = [1, 1]} : vector<7x32xf32> to vector<1x32xf32>
    %c0_188 = arith.constant 0 : index
    %c256 = arith.constant 256 : index
    %262 = vector.load %arg14[%c0_188, %c256] : memref<1x1568xf32, #tpu.memory_space<vmem>>, vector<1x32xf32>
    tpu.vector_store %arg14[%c0_188, %c256], %261 {strides = array<i32>} : memref<1x1568xf32, #tpu.memory_space<vmem>>, vector<1x32xf32>,
    %263 = vector.extract_strided_slice %258 {offsets = [2, 0], sizes = [1, 32], strides = [1, 1]} : vector<7x32xf32> to vector<1x32xf32>
    %c0_189 = arith.constant 0 : index
    %c288 = arith.constant 288 : index
    %264 = vector.load %arg14[%c0_189, %c288] : memref<1x1568xf32, #tpu.memory_space<vmem>>, vector<1x32xf32>
    tpu.vector_store %arg14[%c0_189, %c288], %263 {strides = array<i32>} : memref<1x1568xf32, #tpu.memory_space<vmem>>, vector<1x32xf32>,
    %265 = vector.extract_strided_slice %258 {offsets = [3, 0], sizes = [1, 32], strides = [1, 1]} : vector<7x32xf32> to vector<1x32xf32>
    %c0_190 = arith.constant 0 : index
    %c320 = arith.constant 320 : index
    %266 = vector.load %arg14[%c0_190, %c320] : memref<1x1568xf32, #tpu.memory_space<vmem>>, vector<1x32xf32>
    tpu.vector_store %arg14[%c0_190, %c320], %265 {strides = array<i32>} : memref<1x1568xf32, #tpu.memory_space<vmem>>, vector<1x32xf32>,
    %267 = vector.extract_strided_slice %258 {offsets = [4, 0], sizes = [1, 32], strides = [1, 1]} : vector<7x32xf32> to vector<1x32xf32>
    %c0_191 = arith.constant 0 : index
    %c352 = arith.constant 352 : index
    %268 = vector.load %arg14[%c0_191, %c352] : memref<1x1568xf32, #tpu.memory_space<vmem>>, vector<1x32xf32>
    tpu.vector_store %arg14[%c0_191, %c352], %267 {strides = array<i32>} : memref<1x1568xf32, #tpu.memory_space<vmem>>, vector<1x32xf32>,
    %269 = vector.extract_strided_slice %258 {offsets = [5, 0], sizes = [1, 32], strides = [1, 1]} : vector<7x32xf32> to vector<1x32xf32>
    %c0_192 = arith.constant 0 : index
    %c384 = arith.constant 384 : index
    %270 = vector.load %arg14[%c0_192, %c384] : memref<1x1568xf32, #tpu.memory_space<vmem>>, vector<1x32xf32>
    tpu.vector_store %arg14[%c0_192, %c384], %269 {strides = array<i32>} : memref<1x1568xf32, #tpu.memory_space<vmem>>, vector<1x32xf32>,
    %271 = vector.extract_strided_slice %258 {offsets = [6, 0], sizes = [1, 32], strides = [1, 1]} : vector<7x32xf32> to vector<1x32xf32>
    %c0_193 = arith.constant 0 : index
    %c416 = arith.constant 416 : index
    %272 = vector.load %arg14[%c0_193, %c416] : memref<1x1568xf32, #tpu.memory_space<vmem>>, vector<1x32xf32>
    tpu.vector_store %arg14[%c0_193, %c416], %271 {strides = array<i32>} : memref<1x1568xf32, #tpu.memory_space<vmem>>, vector<1x32xf32>,
    %c64_194 = arith.constant 64 : index
    %c0_195 = arith.constant 0 : index
    %273 = tpu.strided_load %arg13[%c64_194, %c0_195] {strides = array<i32: 2, 1>} : memref<224x32xf32, #tpu.memory_space<vmem>>, vector<7x32xf32>
    %c65_196 = arith.constant 65 : index
    %c0_197 = arith.constant 0 : index
    %274 = tpu.strided_load %arg13[%c65_196, %c0_197] {strides = array<i32: 2, 1>} : memref<224x32xf32, #tpu.memory_space<vmem>>, vector<7x32xf32>
    %c80_198 = arith.constant 80 : index
    %c0_199 = arith.constant 0 : index
    %275 = tpu.strided_load %arg13[%c80_198, %c0_199] {strides = array<i32: 2, 1>} : memref<224x32xf32, #tpu.memory_space<vmem>>, vector<7x32xf32>
    %c81_200 = arith.constant 81 : index
    %c0_201 = arith.constant 0 : index
    %276 = tpu.strided_load %arg13[%c81_200, %c0_201] {strides = array<i32: 2, 1>} : memref<224x32xf32, #tpu.memory_space<vmem>>, vector<7x32xf32>
    %277 = arith.maximumf %273, %274 : vector<7x32xf32>
    %278 = arith.maximumf %275, %276 : vector<7x32xf32>
    %279 = arith.maximumf %277, %278 : vector<7x32xf32>
    %280 = vector.extract_strided_slice %279 {offsets = [0, 0], sizes = [1, 32], strides = [1, 1]} : vector<7x32xf32> to vector<1x32xf32>
    %c0_202 = arith.constant 0 : index
    %c448 = arith.constant 448 : index
    %281 = vector.load %arg14[%c0_202, %c448] : memref<1x1568xf32, #tpu.memory_space<vmem>>, vector<1x32xf32>
    tpu.vector_store %arg14[%c0_202, %c448], %280 {strides = array<i32>} : memref<1x1568xf32, #tpu.memory_space<vmem>>, vector<1x32xf32>,
    %282 = vector.extract_strided_slice %279 {offsets = [1, 0], sizes = [1, 32], strides = [1, 1]} : vector<7x32xf32> to vector<1x32xf32>
    %c0_203 = arith.constant 0 : index
    %c480_204 = arith.constant 480 : index
    %283 = vector.load %arg14[%c0_203, %c480_204] : memref<1x1568xf32, #tpu.memory_space<vmem>>, vector<1x32xf32>
    tpu.vector_store %arg14[%c0_203, %c480_204], %282 {strides = array<i32>} : memref<1x1568xf32, #tpu.memory_space<vmem>>, vector<1x32xf32>,
    %284 = vector.extract_strided_slice %279 {offsets = [2, 0], sizes = [1, 32], strides = [1, 1]} : vector<7x32xf32> to vector<1x32xf32>
    %c0_205 = arith.constant 0 : index
    %c512 = arith.constant 512 : index
    %285 = vector.load %arg14[%c0_205, %c512] : memref<1x1568xf32, #tpu.memory_space<vmem>>, vector<1x32xf32>
    tpu.vector_store %arg14[%c0_205, %c512], %284 {strides = array<i32>} : memref<1x1568xf32, #tpu.memory_space<vmem>>, vector<1x32xf32>,
    %286 = vector.extract_strided_slice %279 {offsets = [3, 0], sizes = [1, 32], strides = [1, 1]} : vector<7x32xf32> to vector<1x32xf32>
    %c0_206 = arith.constant 0 : index
    %c544 = arith.constant 544 : index
    %287 = vector.load %arg14[%c0_206, %c544] : memref<1x1568xf32, #tpu.memory_space<vmem>>, vector<1x32xf32>
    tpu.vector_store %arg14[%c0_206, %c544], %286 {strides = array<i32>} : memref<1x1568xf32, #tpu.memory_space<vmem>>, vector<1x32xf32>,
    %288 = vector.extract_strided_slice %279 {offsets = [4, 0], sizes = [1, 32], strides = [1, 1]} : vector<7x32xf32> to vector<1x32xf32>
    %c0_207 = arith.constant 0 : index
    %c576 = arith.constant 576 : index
    %289 = vector.load %arg14[%c0_207, %c576] : memref<1x1568xf32, #tpu.memory_space<vmem>>, vector<1x32xf32>
    tpu.vector_store %arg14[%c0_207, %c576], %288 {strides = array<i32>} : memref<1x1568xf32, #tpu.memory_space<vmem>>, vector<1x32xf32>,
    %290 = vector.extract_strided_slice %279 {offsets = [5, 0], sizes = [1, 32], strides = [1, 1]} : vector<7x32xf32> to vector<1x32xf32>
    %c0_208 = arith.constant 0 : index
    %c608 = arith.constant 608 : index
    %291 = vector.load %arg14[%c0_208, %c608] : memref<1x1568xf32, #tpu.memory_space<vmem>>, vector<1x32xf32>
    tpu.vector_store %arg14[%c0_208, %c608], %290 {strides = array<i32>} : memref<1x1568xf32, #tpu.memory_space<vmem>>, vector<1x32xf32>,
    %292 = vector.extract_strided_slice %279 {offsets = [6, 0], sizes = [1, 32], strides = [1, 1]} : vector<7x32xf32> to vector<1x32xf32>
    %c0_209 = arith.constant 0 : index
    %c640 = arith.constant 640 : index
    %293 = vector.load %arg14[%c0_209, %c640] : memref<1x1568xf32, #tpu.memory_space<vmem>>, vector<1x32xf32>
    tpu.vector_store %arg14[%c0_209, %c640], %292 {strides = array<i32>} : memref<1x1568xf32, #tpu.memory_space<vmem>>, vector<1x32xf32>,
    %c96_210 = arith.constant 96 : index
    %c0_211 = arith.constant 0 : index
    %294 = tpu.strided_load %arg13[%c96_210, %c0_211] {strides = array<i32: 2, 1>} : memref<224x32xf32, #tpu.memory_space<vmem>>, vector<7x32xf32>
    %c97_212 = arith.constant 97 : index
    %c0_213 = arith.constant 0 : index
    %295 = tpu.strided_load %arg13[%c97_212, %c0_213] {strides = array<i32: 2, 1>} : memref<224x32xf32, #tpu.memory_space<vmem>>, vector<7x32xf32>
    %c112_214 = arith.constant 112 : index
    %c0_215 = arith.constant 0 : index
    %296 = tpu.strided_load %arg13[%c112_214, %c0_215] {strides = array<i32: 2, 1>} : memref<224x32xf32, #tpu.memory_space<vmem>>, vector<7x32xf32>
    %c113_216 = arith.constant 113 : index
    %c0_217 = arith.constant 0 : index
    %297 = tpu.strided_load %arg13[%c113_216, %c0_217] {strides = array<i32: 2, 1>} : memref<224x32xf32, #tpu.memory_space<vmem>>, vector<7x32xf32>
    %298 = arith.maximumf %294, %295 : vector<7x32xf32>
    %299 = arith.maximumf %296, %297 : vector<7x32xf32>
    %300 = arith.maximumf %298, %299 : vector<7x32xf32>
    %301 = vector.extract_strided_slice %300 {offsets = [0, 0], sizes = [1, 32], strides = [1, 1]} : vector<7x32xf32> to vector<1x32xf32>
    %c0_218 = arith.constant 0 : index
    %c672 = arith.constant 672 : index
    %302 = vector.load %arg14[%c0_218, %c672] : memref<1x1568xf32, #tpu.memory_space<vmem>>, vector<1x32xf32>
    tpu.vector_store %arg14[%c0_218, %c672], %301 {strides = array<i32>} : memref<1x1568xf32, #tpu.memory_space<vmem>>, vector<1x32xf32>,
    %303 = vector.extract_strided_slice %300 {offsets = [1, 0], sizes = [1, 32], strides = [1, 1]} : vector<7x32xf32> to vector<1x32xf32>
    %c0_219 = arith.constant 0 : index
    %c704 = arith.constant 704 : index
    %304 = vector.load %arg14[%c0_219, %c704] : memref<1x1568xf32, #tpu.memory_space<vmem>>, vector<1x32xf32>
    tpu.vector_store %arg14[%c0_219, %c704], %303 {strides = array<i32>} : memref<1x1568xf32, #tpu.memory_space<vmem>>, vector<1x32xf32>,
    %305 = vector.extract_strided_slice %300 {offsets = [2, 0], sizes = [1, 32], strides = [1, 1]} : vector<7x32xf32> to vector<1x32xf32>
    %c0_220 = arith.constant 0 : index
    %c736 = arith.constant 736 : index
    %306 = vector.load %arg14[%c0_220, %c736] : memref<1x1568xf32, #tpu.memory_space<vmem>>, vector<1x32xf32>
    tpu.vector_store %arg14[%c0_220, %c736], %305 {strides = array<i32>} : memref<1x1568xf32, #tpu.memory_space<vmem>>, vector<1x32xf32>,
    %307 = vector.extract_strided_slice %300 {offsets = [3, 0], sizes = [1, 32], strides = [1, 1]} : vector<7x32xf32> to vector<1x32xf32>
    %c0_221 = arith.constant 0 : index
    %c768 = arith.constant 768 : index
    %308 = vector.load %arg14[%c0_221, %c768] : memref<1x1568xf32, #tpu.memory_space<vmem>>, vector<1x32xf32>
    tpu.vector_store %arg14[%c0_221, %c768], %307 {strides = array<i32>} : memref<1x1568xf32, #tpu.memory_space<vmem>>, vector<1x32xf32>,
    %309 = vector.extract_strided_slice %300 {offsets = [4, 0], sizes = [1, 32], strides = [1, 1]} : vector<7x32xf32> to vector<1x32xf32>
    %c0_222 = arith.constant 0 : index
    %c800 = arith.constant 800 : index
    %310 = vector.load %arg14[%c0_222, %c800] : memref<1x1568xf32, #tpu.memory_space<vmem>>, vector<1x32xf32>
    tpu.vector_store %arg14[%c0_222, %c800], %309 {strides = array<i32>} : memref<1x1568xf32, #tpu.memory_space<vmem>>, vector<1x32xf32>,
    %311 = vector.extract_strided_slice %300 {offsets = [5, 0], sizes = [1, 32], strides = [1, 1]} : vector<7x32xf32> to vector<1x32xf32>
    %c0_223 = arith.constant 0 : index
    %c832 = arith.constant 832 : index
    %312 = vector.load %arg14[%c0_223, %c832] : memref<1x1568xf32, #tpu.memory_space<vmem>>, vector<1x32xf32>
    tpu.vector_store %arg14[%c0_223, %c832], %311 {strides = array<i32>} : memref<1x1568xf32, #tpu.memory_space<vmem>>, vector<1x32xf32>,
    %313 = vector.extract_strided_slice %300 {offsets = [6, 0], sizes = [1, 32], strides = [1, 1]} : vector<7x32xf32> to vector<1x32xf32>
    %c0_224 = arith.constant 0 : index
    %c864 = arith.constant 864 : index
    %314 = vector.load %arg14[%c0_224, %c864] : memref<1x1568xf32, #tpu.memory_space<vmem>>, vector<1x32xf32>
    tpu.vector_store %arg14[%c0_224, %c864], %313 {strides = array<i32>} : memref<1x1568xf32, #tpu.memory_space<vmem>>, vector<1x32xf32>,
    %c128_225 = arith.constant 128 : index
    %c0_226 = arith.constant 0 : index
    %315 = tpu.strided_load %arg13[%c128_225, %c0_226] {strides = array<i32: 2, 1>} : memref<224x32xf32, #tpu.memory_space<vmem>>, vector<7x32xf32>
    %c129_227 = arith.constant 129 : index
    %c0_228 = arith.constant 0 : index
    %316 = tpu.strided_load %arg13[%c129_227, %c0_228] {strides = array<i32: 2, 1>} : memref<224x32xf32, #tpu.memory_space<vmem>>, vector<7x32xf32>
    %c144 = arith.constant 144 : index
    %c0_229 = arith.constant 0 : index
    %317 = tpu.strided_load %arg13[%c144, %c0_229] {strides = array<i32: 2, 1>} : memref<224x32xf32, #tpu.memory_space<vmem>>, vector<7x32xf32>
    %c145_230 = arith.constant 145 : index
    %c0_231 = arith.constant 0 : index
    %318 = tpu.strided_load %arg13[%c145_230, %c0_231] {strides = array<i32: 2, 1>} : memref<224x32xf32, #tpu.memory_space<vmem>>, vector<7x32xf32>
    %319 = arith.maximumf %315, %316 : vector<7x32xf32>
    %320 = arith.maximumf %317, %318 : vector<7x32xf32>
    %321 = arith.maximumf %319, %320 : vector<7x32xf32>
    %322 = vector.extract_strided_slice %321 {offsets = [0, 0], sizes = [1, 32], strides = [1, 1]} : vector<7x32xf32> to vector<1x32xf32>
    %c0_232 = arith.constant 0 : index
    %c896 = arith.constant 896 : index
    %323 = vector.load %arg14[%c0_232, %c896] : memref<1x1568xf32, #tpu.memory_space<vmem>>, vector<1x32xf32>
    tpu.vector_store %arg14[%c0_232, %c896], %322 {strides = array<i32>} : memref<1x1568xf32, #tpu.memory_space<vmem>>, vector<1x32xf32>,
    %324 = vector.extract_strided_slice %321 {offsets = [1, 0], sizes = [1, 32], strides = [1, 1]} : vector<7x32xf32> to vector<1x32xf32>
    %c0_233 = arith.constant 0 : index
    %c928 = arith.constant 928 : index
    %325 = vector.load %arg14[%c0_233, %c928] : memref<1x1568xf32, #tpu.memory_space<vmem>>, vector<1x32xf32>
    tpu.vector_store %arg14[%c0_233, %c928], %324 {strides = array<i32>} : memref<1x1568xf32, #tpu.memory_space<vmem>>, vector<1x32xf32>,
    %326 = vector.extract_strided_slice %321 {offsets = [2, 0], sizes = [1, 32], strides = [1, 1]} : vector<7x32xf32> to vector<1x32xf32>
    %c0_234 = arith.constant 0 : index
    %c960 = arith.constant 960 : index
    %327 = vector.load %arg14[%c0_234, %c960] : memref<1x1568xf32, #tpu.memory_space<vmem>>, vector<1x32xf32>
    tpu.vector_store %arg14[%c0_234, %c960], %326 {strides = array<i32>} : memref<1x1568xf32, #tpu.memory_space<vmem>>, vector<1x32xf32>,
    %328 = vector.extract_strided_slice %321 {offsets = [3, 0], sizes = [1, 32], strides = [1, 1]} : vector<7x32xf32> to vector<1x32xf32>
    %c0_235 = arith.constant 0 : index
    %c992 = arith.constant 992 : index
    %329 = vector.load %arg14[%c0_235, %c992] : memref<1x1568xf32, #tpu.memory_space<vmem>>, vector<1x32xf32>
    tpu.vector_store %arg14[%c0_235, %c992], %328 {strides = array<i32>} : memref<1x1568xf32, #tpu.memory_space<vmem>>, vector<1x32xf32>,
    %330 = vector.extract_strided_slice %321 {offsets = [4, 0], sizes = [1, 32], strides = [1, 1]} : vector<7x32xf32> to vector<1x32xf32>
    %c0_236 = arith.constant 0 : index
    %c1024 = arith.constant 1024 : index
    %331 = vector.load %arg14[%c0_236, %c1024] : memref<1x1568xf32, #tpu.memory_space<vmem>>, vector<1x32xf32>
    tpu.vector_store %arg14[%c0_236, %c1024], %330 {strides = array<i32>} : memref<1x1568xf32, #tpu.memory_space<vmem>>, vector<1x32xf32>,
    %332 = vector.extract_strided_slice %321 {offsets = [5, 0], sizes = [1, 32], strides = [1, 1]} : vector<7x32xf32> to vector<1x32xf32>
    %c0_237 = arith.constant 0 : index
    %c1056 = arith.constant 1056 : index
    %333 = vector.load %arg14[%c0_237, %c1056] : memref<1x1568xf32, #tpu.memory_space<vmem>>, vector<1x32xf32>
    tpu.vector_store %arg14[%c0_237, %c1056], %332 {strides = array<i32>} : memref<1x1568xf32, #tpu.memory_space<vmem>>, vector<1x32xf32>,
    %334 = vector.extract_strided_slice %321 {offsets = [6, 0], sizes = [1, 32], strides = [1, 1]} : vector<7x32xf32> to vector<1x32xf32>
    %c0_238 = arith.constant 0 : index
    %c1088 = arith.constant 1088 : index
    %335 = vector.load %arg14[%c0_238, %c1088] : memref<1x1568xf32, #tpu.memory_space<vmem>>, vector<1x32xf32>
    tpu.vector_store %arg14[%c0_238, %c1088], %334 {strides = array<i32>} : memref<1x1568xf32, #tpu.memory_space<vmem>>, vector<1x32xf32>,
    %c160_239 = arith.constant 160 : index
    %c0_240 = arith.constant 0 : index
    %336 = tpu.strided_load %arg13[%c160_239, %c0_240] {strides = array<i32: 2, 1>} : memref<224x32xf32, #tpu.memory_space<vmem>>, vector<7x32xf32>
    %c161_241 = arith.constant 161 : index
    %c0_242 = arith.constant 0 : index
    %337 = tpu.strided_load %arg13[%c161_241, %c0_242] {strides = array<i32: 2, 1>} : memref<224x32xf32, #tpu.memory_space<vmem>>, vector<7x32xf32>
    %c176 = arith.constant 176 : index
    %c0_243 = arith.constant 0 : index
    %338 = tpu.strided_load %arg13[%c176, %c0_243] {strides = array<i32: 2, 1>} : memref<224x32xf32, #tpu.memory_space<vmem>>, vector<7x32xf32>
    %c177_244 = arith.constant 177 : index
    %c0_245 = arith.constant 0 : index
    %339 = tpu.strided_load %arg13[%c177_244, %c0_245] {strides = array<i32: 2, 1>} : memref<224x32xf32, #tpu.memory_space<vmem>>, vector<7x32xf32>
    %340 = arith.maximumf %336, %337 : vector<7x32xf32>
    %341 = arith.maximumf %338, %339 : vector<7x32xf32>
    %342 = arith.maximumf %340, %341 : vector<7x32xf32>
    %343 = vector.extract_strided_slice %342 {offsets = [0, 0], sizes = [1, 32], strides = [1, 1]} : vector<7x32xf32> to vector<1x32xf32>
    %c0_246 = arith.constant 0 : index
    %c1120 = arith.constant 1120 : index
    %344 = vector.load %arg14[%c0_246, %c1120] : memref<1x1568xf32, #tpu.memory_space<vmem>>, vector<1x32xf32>
    tpu.vector_store %arg14[%c0_246, %c1120], %343 {strides = array<i32>} : memref<1x1568xf32, #tpu.memory_space<vmem>>, vector<1x32xf32>,
    %345 = vector.extract_strided_slice %342 {offsets = [1, 0], sizes = [1, 32], strides = [1, 1]} : vector<7x32xf32> to vector<1x32xf32>
    %c0_247 = arith.constant 0 : index
    %c1152 = arith.constant 1152 : index
    %346 = vector.load %arg14[%c0_247, %c1152] : memref<1x1568xf32, #tpu.memory_space<vmem>>, vector<1x32xf32>
    tpu.vector_store %arg14[%c0_247, %c1152], %345 {strides = array<i32>} : memref<1x1568xf32, #tpu.memory_space<vmem>>, vector<1x32xf32>,
    %347 = vector.extract_strided_slice %342 {offsets = [2, 0], sizes = [1, 32], strides = [1, 1]} : vector<7x32xf32> to vector<1x32xf32>
    %c0_248 = arith.constant 0 : index
    %c1184 = arith.constant 1184 : index
    %348 = vector.load %arg14[%c0_248, %c1184] : memref<1x1568xf32, #tpu.memory_space<vmem>>, vector<1x32xf32>
    tpu.vector_store %arg14[%c0_248, %c1184], %347 {strides = array<i32>} : memref<1x1568xf32, #tpu.memory_space<vmem>>, vector<1x32xf32>,
    %349 = vector.extract_strided_slice %342 {offsets = [3, 0], sizes = [1, 32], strides = [1, 1]} : vector<7x32xf32> to vector<1x32xf32>
    %c0_249 = arith.constant 0 : index
    %c1216 = arith.constant 1216 : index
    %350 = vector.load %arg14[%c0_249, %c1216] : memref<1x1568xf32, #tpu.memory_space<vmem>>, vector<1x32xf32>
    tpu.vector_store %arg14[%c0_249, %c1216], %349 {strides = array<i32>} : memref<1x1568xf32, #tpu.memory_space<vmem>>, vector<1x32xf32>,
    %351 = vector.extract_strided_slice %342 {offsets = [4, 0], sizes = [1, 32], strides = [1, 1]} : vector<7x32xf32> to vector<1x32xf32>
    %c0_250 = arith.constant 0 : index
    %c1248 = arith.constant 1248 : index
    %352 = vector.load %arg14[%c0_250, %c1248] : memref<1x1568xf32, #tpu.memory_space<vmem>>, vector<1x32xf32>
    tpu.vector_store %arg14[%c0_250, %c1248], %351 {strides = array<i32>} : memref<1x1568xf32, #tpu.memory_space<vmem>>, vector<1x32xf32>,
    %353 = vector.extract_strided_slice %342 {offsets = [5, 0], sizes = [1, 32], strides = [1, 1]} : vector<7x32xf32> to vector<1x32xf32>
    %c0_251 = arith.constant 0 : index
    %c1280 = arith.constant 1280 : index
    %354 = vector.load %arg14[%c0_251, %c1280] : memref<1x1568xf32, #tpu.memory_space<vmem>>, vector<1x32xf32>
    tpu.vector_store %arg14[%c0_251, %c1280], %353 {strides = array<i32>} : memref<1x1568xf32, #tpu.memory_space<vmem>>, vector<1x32xf32>,
    %355 = vector.extract_strided_slice %342 {offsets = [6, 0], sizes = [1, 32], strides = [1, 1]} : vector<7x32xf32> to vector<1x32xf32>
    %c0_252 = arith.constant 0 : index
    %c1312 = arith.constant 1312 : index
    %356 = vector.load %arg14[%c0_252, %c1312] : memref<1x1568xf32, #tpu.memory_space<vmem>>, vector<1x32xf32>
    tpu.vector_store %arg14[%c0_252, %c1312], %355 {strides = array<i32>} : memref<1x1568xf32, #tpu.memory_space<vmem>>, vector<1x32xf32>,
    %c192_253 = arith.constant 192 : index
    %c0_254 = arith.constant 0 : index
    %357 = tpu.strided_load %arg13[%c192_253, %c0_254] {strides = array<i32: 2, 1>} : memref<224x32xf32, #tpu.memory_space<vmem>>, vector<7x32xf32>
    %c193_255 = arith.constant 193 : index
    %c0_256 = arith.constant 0 : index
    %358 = tpu.strided_load %arg13[%c193_255, %c0_256] {strides = array<i32: 2, 1>} : memref<224x32xf32, #tpu.memory_space<vmem>>, vector<7x32xf32>
    %c208 = arith.constant 208 : index
    %c0_257 = arith.constant 0 : index
    %359 = tpu.strided_load %arg13[%c208, %c0_257] {strides = array<i32: 2, 1>} : memref<224x32xf32, #tpu.memory_space<vmem>>, vector<7x32xf32>
    %c209_258 = arith.constant 209 : index
    %c0_259 = arith.constant 0 : index
    %360 = tpu.strided_load %arg13[%c209_258, %c0_259] {strides = array<i32: 2, 1>} : memref<224x32xf32, #tpu.memory_space<vmem>>, vector<7x32xf32>
    %361 = arith.maximumf %357, %358 : vector<7x32xf32>
    %362 = arith.maximumf %359, %360 : vector<7x32xf32>
    %363 = arith.maximumf %361, %362 : vector<7x32xf32>
    %364 = vector.extract_strided_slice %363 {offsets = [0, 0], sizes = [1, 32], strides = [1, 1]} : vector<7x32xf32> to vector<1x32xf32>
    %c0_260 = arith.constant 0 : index
    %c1344 = arith.constant 1344 : index
    %365 = vector.load %arg14[%c0_260, %c1344] : memref<1x1568xf32, #tpu.memory_space<vmem>>, vector<1x32xf32>
    tpu.vector_store %arg14[%c0_260, %c1344], %364 {strides = array<i32>} : memref<1x1568xf32, #tpu.memory_space<vmem>>, vector<1x32xf32>,
    %366 = vector.extract_strided_slice %363 {offsets = [1, 0], sizes = [1, 32], strides = [1, 1]} : vector<7x32xf32> to vector<1x32xf32>
    %c0_261 = arith.constant 0 : index
    %c1376 = arith.constant 1376 : index
    %367 = vector.load %arg14[%c0_261, %c1376] : memref<1x1568xf32, #tpu.memory_space<vmem>>, vector<1x32xf32>
    tpu.vector_store %arg14[%c0_261, %c1376], %366 {strides = array<i32>} : memref<1x1568xf32, #tpu.memory_space<vmem>>, vector<1x32xf32>,
    %368 = vector.extract_strided_slice %363 {offsets = [2, 0], sizes = [1, 32], strides = [1, 1]} : vector<7x32xf32> to vector<1x32xf32>
    %c0_262 = arith.constant 0 : index
    %c1408 = arith.constant 1408 : index
    %369 = vector.load %arg14[%c0_262, %c1408] : memref<1x1568xf32, #tpu.memory_space<vmem>>, vector<1x32xf32>
    tpu.vector_store %arg14[%c0_262, %c1408], %368 {strides = array<i32>} : memref<1x1568xf32, #tpu.memory_space<vmem>>, vector<1x32xf32>,
    %370 = vector.extract_strided_slice %363 {offsets = [3, 0], sizes = [1, 32], strides = [1, 1]} : vector<7x32xf32> to vector<1x32xf32>
    %c0_263 = arith.constant 0 : index
    %c1440 = arith.constant 1440 : index
    %371 = vector.load %arg14[%c0_263, %c1440] : memref<1x1568xf32, #tpu.memory_space<vmem>>, vector<1x32xf32>
    tpu.vector_store %arg14[%c0_263, %c1440], %370 {strides = array<i32>} : memref<1x1568xf32, #tpu.memory_space<vmem>>, vector<1x32xf32>,
    %372 = vector.extract_strided_slice %363 {offsets = [4, 0], sizes = [1, 32], strides = [1, 1]} : vector<7x32xf32> to vector<1x32xf32>
    %c0_264 = arith.constant 0 : index
    %c1472 = arith.constant 1472 : index
    %373 = vector.load %arg14[%c0_264, %c1472] : memref<1x1568xf32, #tpu.memory_space<vmem>>, vector<1x32xf32>
    tpu.vector_store %arg14[%c0_264, %c1472], %372 {strides = array<i32>} : memref<1x1568xf32, #tpu.memory_space<vmem>>, vector<1x32xf32>,
    %374 = vector.extract_strided_slice %363 {offsets = [5, 0], sizes = [1, 32], strides = [1, 1]} : vector<7x32xf32> to vector<1x32xf32>
    %c0_265 = arith.constant 0 : index
    %c1504 = arith.constant 1504 : index
    %375 = vector.load %arg14[%c0_265, %c1504] : memref<1x1568xf32, #tpu.memory_space<vmem>>, vector<1x32xf32>
    tpu.vector_store %arg14[%c0_265, %c1504], %374 {strides = array<i32>} : memref<1x1568xf32, #tpu.memory_space<vmem>>, vector<1x32xf32>,
    %376 = vector.extract_strided_slice %363 {offsets = [6, 0], sizes = [1, 32], strides = [1, 1]} : vector<7x32xf32> to vector<1x32xf32>
    %c0_266 = arith.constant 0 : index
    %c1536 = arith.constant 1536 : index
    %377 = vector.load %arg14[%c0_266, %c1536] : memref<1x1568xf32, #tpu.memory_space<vmem>>, vector<1x32xf32>
    tpu.vector_store %arg14[%c0_266, %c1536], %376 {strides = array<i32>} : memref<1x1568xf32, #tpu.memory_space<vmem>>, vector<1x32xf32>,
    %c0_267 = arith.constant 0 : index
    %c0_268 = arith.constant 0 : index
    %378 = vector.load %arg14[%c0_267, %c0_268] : memref<1x1568xf32, #tpu.memory_space<vmem>>, vector<1x1568xf32>
    %379 = arith.truncf %378 : vector<1x1568xf32> to vector<1x1568xbf16>
    %c0_269 = arith.constant 0 : index
    %c0_270 = arith.constant 0 : index
    %380 = vector.load %arg8[%c0_269, %c0_270] : memref<1568x10xbf16, #tpu.memory_space<vmem>>, vector<1568x10xbf16>
    %cst_271 = arith.constant dense<0.000000e+00> : vector<1x10xf32>
    %381 = tpu.matmul %379, %380, %cst_271 {dimension_numbers = #tpu.dot_dimension_numbers<[1], [0], [0], [1], [0, 0, 1, 1], [], []>} : vector<1x1568xbf16>, vector<1568x10xbf16>, vector<1x10xf32> -> vector<1x10xf32>
    %c0_272 = arith.constant 0 : index
    %c0_273 = arith.constant 0 : index
    %382 = vector.load %arg9[%c0_272, %c0_273] : memref<1x10xf32, #tpu.memory_space<vmem>>, vector<1x10xf32>
    %383 = arith.addf %381, %382 : vector<1x10xf32>
    %c0_274 = arith.constant 0 : index
    %c0_275 = arith.constant 0 : index
    %c0_276 = arith.constant 0 : index
    %384 = vector.load %arg10[%c0_274, %c0_275, %c0_276] : memref<1x1x10xf32, #tpu.memory_space<vmem>>, vector<1x1x10xf32>
    %385 = vector.shape_cast %384 : vector<1x1x10xf32> to vector<1x10xf32>
    %386 = vector.shape_cast %383 : vector<1x10xf32> to vector<1x1x10xf32>
    tpu.vector_store %arg10[%c0_274, %c0_275, %c0_276], %386 {strides = array<i32>} : memref<1x1x10xf32, #tpu.memory_space<vmem>>, vector<1x1x10xf32>,
    return
  }
  func.func @transform_0(%arg0: i32) -> (i32, i32, i32) {
    %c0_i32 = arith.constant 0 : i32
    %c0_i32_0 = arith.constant 0 : i32
    %c0_i32_1 = arith.constant 0 : i32
    return %arg0, %c0_i32, %c0_i32_0 : i32, i32, i32
  }
  func.func @transform_1(%arg0: i32) -> (i32, i32) {
    %c0_i32 = arith.constant 0 : i32
    %c0_i32_0 = arith.constant 0 : i32
    %c0_i32_1 = arith.constant 0 : i32
    return %c0_i32, %c0_i32_0 : i32, i32
  }
  func.func @transform_2(%arg0: i32) -> (i32, i32) {
    %c0_i32 = arith.constant 0 : i32
    %c0_i32_0 = arith.constant 0 : i32
    %c0_i32_1 = arith.constant 0 : i32
    return %c0_i32, %c0_i32_0 : i32, i32
  }
  func.func @transform_3(%arg0: i32) -> (i32, i32) {
    %c0_i32 = arith.constant 0 : i32
    %c0_i32_0 = arith.constant 0 : i32
    %c0_i32_1 = arith.constant 0 : i32
    return %c0_i32, %c0_i32_0 : i32, i32
  }
  func.func @transform_4(%arg0: i32) -> (i32, i32) {
    %c0_i32 = arith.constant 0 : i32
    %c0_i32_0 = arith.constant 0 : i32
    %c0_i32_1 = arith.constant 0 : i32
    return %c0_i32, %c0_i32_0 : i32, i32
  }
  func.func @transform_5(%arg0: i32) -> (i32, i32) {
    %c0_i32 = arith.constant 0 : i32
    %c0_i32_0 = arith.constant 0 : i32
    %c0_i32_1 = arith.constant 0 : i32
    return %c0_i32, %c0_i32_0 : i32, i32
  }
  func.func @transform_6(%arg0: i32) -> (i32, i32) {
    %c0_i32 = arith.constant 0 : i32
    %c0_i32_0 = arith.constant 0 : i32
    %c0_i32_1 = arith.constant 0 : i32
    return %c0_i32, %c0_i32_0 : i32, i32
  }
  func.func @transform_7(%arg0: i32) -> (i32, i32) {
    %c0_i32 = arith.constant 0 : i32
    %c0_i32_0 = arith.constant 0 : i32
    %c0_i32_1 = arith.constant 0 : i32
    return %c0_i32, %c0_i32_0 : i32, i32
  }
  func.func @transform_8(%arg0: i32) -> (i32, i32) {
    %c0_i32 = arith.constant 0 : i32
    %c0_i32_0 = arith.constant 0 : i32
    %c0_i32_1 = arith.constant 0 : i32
    return %c0_i32, %c0_i32_0 : i32, i32
  }
  func.func @transform_9(%arg0: i32) -> (i32, i32, i32) {
    %c0_i32 = arith.constant 0 : i32
    %c0_i32_0 = arith.constant 0 : i32
    %c0_i32_1 = arith.constant 0 : i32
    return %arg0, %c0_i32, %c0_i32_0 : i32, i32, i32
  }
}

</mosaic_0001>

<bundles_post_ra>
// kernel: net1_forward.1
= control target key start
LH: loop header
LB: loop body
LE: loop exit
PB: predicated region body
PF: predicated region fallthrough
CT: control target
= control target key end

     0   :  { %14 = vsyncpa [#allocation7], 0  ;;  %s13666_s0 = inlined_call_operand.vmem [shape: f32[2,900,16], index: 0, kind: input, shape index: {}]   ;;  %s13667_s1 = inlined_call_operand.vmem [shape: f32[9,16], index: 1, kind: input, shape index: {}]   ;;  %s13668_s2 = inlined_call_operand.vmem [shape: f32[1,16], index: 2, kind: input, shape index: {}]   ;;  %s13669_s3 = inlined_call_operand.vmem [shape: bf16[144,32], index: 3, kind: input, shape index: {}]   ;;  %s13670_s4 = inlined_call_operand.vmem [shape: f32[1,32], index: 4, kind: input, shape index: {}]   ;;  %s13671_s5 = inlined_call_operand.vmem [shape: f32[1,32], index: 5, kind: input, shape index: {}]   ;;  %s13672_s6 = inlined_call_operand.vmem [shape: f32[1,32], index: 6, kind: input, shape index: {}]   ;;  %s13673_s7 = inlined_call_operand.vmem [shape: bf16[1568,10], index: 7, kind: input, shape index: {}]   ;;  %s13674_s8 = inlined_call_operand.vmem [shape: f32[1,10], index: 8, kind: input, shape index: {}]   ;;  %s13675_s9 = inlined_call_operand.hbm [shape: f32[2,1,10], index: 9, kind: output, shape index: {}]  }
   0x1   :  { %16 = vsyncpa [#allocation7 + $0x1], 0  ;;  %s9262_s30 = smov 0   ;;  %s9264_s10 = smov 0  }
   0x2   :  { %s9266_s11 = smov 0   ;;  %s9268_s12 = smov 0  }
   0x3 LB: > { %s9283_s13 = sadd.s32 4294967295, %s9203_s12   ;;  %s7909_s14 = sadd.s32 4294967294, %s9203_s12   ;;  %s9203_s12 = sphi %s9268_s12, %s13757_s12   ;;  %s9199_s11 = sphi %s9266_s11, %s13756_s11   ;;  %s9195_s10 = sphi %s9264_s10, %s13755_s10   ;;  %s9191_s30 = sphi %s9262_s30, %s13754_s30  }
   0x4   : > { %s9287_s15 = sadd.s32 1, %s9203_s12   ;;  %s223_s16 = sadd.s32 1, %s9199_s11 }
   0x5   : > { %s220_s17 = ssub.s32 %s9203_s12, %s9287_s15  ;;  %p233_p0 = scmp.ne.s32.totalorder %s9199_s11, %s9195_s10 }
   0x6   : > { %p221_p1 = scmp.eq.s32.totalorder %s220_s17, 0  ;;  %p234_p2 = scmp.eq.s32.totalorder %s9283_s13, 1 }
   0x7   : > { %p239_p3 = scmp.ne.s32.totalorder %s9195_s10, %s9191_s30  ;;  %p240_p4 = scmp.eq.s32.totalorder %s7909_s14, 1 }
   0x8   : > { %s9298_s18 = scalar_select %p221_p1, %s9199_s11, %s223_s16  }
   0x9   : > { %p9300_p5 = por %p234_p2, %p233_p0  ;;  %p9304_p6 = por %p240_p4, %p239_p3 }
   0xa   : > { %p7912_p7 = scmp.ge.s32.totalorder %s9203_s12, 1  ;;  %p290_p8 = scmp.lt.s32.totalorder %s9203_s12, 3 }
   0xc   : > { %p291_p9 = pnand %p7912_p7, %p290_p8 }
   0xe   : > { %294 = sbr.rel (%p291_p9) target bundleno = 1638 (0x666), region = 56 }
  0x15   : > { %v8982_v0 = vld [vmem:[%s13669_s3 + $0x18] sm:$0xff]   ;;  %p325_p10 = scmp.lt.s32.totalorder %s9283_s13, 1  ;;  %v9318_v1 = vld [vmem:[%s13667_s1] ss:$0 sm:$0xff]  ;;  %v9323_v2 = vld [vmem:[%s13667_s1 + $0x5] ss:$0 sm:$0xff] }
  0x16   : > { %8524 = vmatprep.subr.bf16.mxu0 %v8982_v0  ;;  %13707 = vst [vmem:[#allocation9_spill] sm:$0xff] %v9318_v1  ;;  %vm3123_vm0 = vcmask 130048   ;;  %v8983_v3 = vld [vmem:[%s13669_s3 + $0x20] sm:$0xff]   ;;  %v13676_v4 = vmov 0.0   ;;  %vm3228_vm1 = vcmask 128000   ;;  %vm6059_vm2 = vcmask 261120  }
  0x17   : > { %s326_s23 = scalar_select %p325_p10, %s9283_s13, 1  ;;  %8525 = vmatpush3.bf16.msra.mxu0 %v8982_v0  ;;  %3232 = vst.msk [vmem:[#allocation3 + $0x10] sm:$0xff] %vm3123_vm0, %v13676_v4  ;;  %3233 = vst.msk [vmem:[#allocation3 + $0x18] sm:$0xff] %vm3123_vm0, %v13676_v4  ;;  %v9409_v14 = vld [vmem:[%s13667_s1 + $0x1] ss:$0 sm:$0xff]  ;;  %vm6087_vm4 = vcmask 259072  }
  0x18   : > { %3230 = vst.msk [vmem:[#allocation3] sm:$0xff] %vm3123_vm0, %v13676_v4  ;;  %3231 = vst.msk [vmem:[#allocation3 + $0x8] sm:$0xff] %vm3123_vm0, %v13676_v4  ;;  %8554 = vmatprep.subr.bf16.mxu0 %v8983_v3  ;;  %v9498_v0 = vld [vmem:[%s13667_s1 + $0x2] ss:$0 sm:$0xff]  ;;  %s9208_s25 = smov 64   ;;  %s9209_s14 = smov 96  }
  0x19   : > { %s8936_s24 = smul.u32 904, %s326_s23  ;;  %3234 = vst.msk [vmem:[#allocation3 + $0x20] sm:$0xff] %vm3123_vm0, %v13676_v4  ;;  %3235 = vst.msk [vmem:[#allocation3 + $0x28] sm:$0xff] %vm3123_vm0, %v13676_v4  ;;  %vm9210_vm14 = vmmov 0   ;;  %s323_s16 = sand.u32 1, %s9195_s10   ;;  %vm7839_vm15 = vcmask 73728  }
  0x1a   : > { %3236 = vst.msk [vmem:[#allocation3 + $0x30] sm:$0xff] %vm3123_vm0, %v13676_v4  ;;  %3237 = vst.msk [vmem:[#allocation3 + $0x38] sm:$0xff] %vm3123_vm0, %v13676_v4  ;;  %s8161_s17 = sshll.u32 %s9283_s13, 4  ;;  %s324_s22 = scalar_lea.vmem [#allocation6], %s323_s16 }
  0x1b   : > { %s9331_s21 = scalar_lea.vmem %s13666_s0, %s8936_s24  ;;  %3238 = vst.msk [vmem:[#allocation3 + $0x40] sm:$0xff] %vm3123_vm0, %v13676_v4  ;;  %3239 = vst.msk [vmem:[#allocation3 + $0x48] sm:$0xff] %vm3123_vm0, %v13676_v4  ;;  %s9207_s24 = smov 32  }
  0x1c   : > { %3240 = vst.msk [vmem:[#allocation3 + $0x50] sm:$0xff] %vm3123_vm0, %v13676_v4  ;;  %3241 = vst.msk [vmem:[#allocation3 + $0x58] sm:$0xff] %vm3123_vm0, %v13676_v4  ;;  %v331_v5 = vld [vmem:[%s9331_s21] sm:$0xff]  ;;  %v332_v6 = vld [vmem:[%s9331_s21 + $0x8] sm:$0xff]  ;;  %s7842_s13 = scalar_lea.sflag [#allocation7], %s323_s16  ;;  %s9211_s26 = smov [#allocation6]  }
  0x1d   : > { %3242 = vst.msk [vmem:[#allocation3 + $0x60] sm:$0xff] %vm3123_vm0, %v13676_v4  ;;  %3243 = vst.msk [vmem:[#allocation3 + $0x68] sm:$0xff] %vm3123_vm0, %v13676_v4  ;;  %v333_v7 = vld [vmem:[%s9331_s21 + $0x10] sm:$0xff]  ;;  %v334_v8 = vld [vmem:[%s9331_s21 + $0x18] sm:$0xff]  ;;  %v441_v11 = vmul.f32 %v9318_v1, %v331_v5  ;;  %v442_v12 = vmul.f32 %v9318_v1, %v332_v6  ;;  %s9145_s27 = sshll.u32 %s9211_s26, 4  ;;  %s9146_s27 = int_to_ptr.vmem [resolvable:$false] %s9145_s27 }
  0x1e   : > { %3244 = vst.msk [vmem:[#allocation3 + $0x70] sm:$0xff] %vm3123_vm0, %v13676_v4  ;;  %3245 = vst.msk [vmem:[#allocation3 + $0x78] sm:$0xff] %vm3123_vm0, %v13676_v4  ;;  %v335_v9 = vld [vmem:[%s9331_s21 + $0x20] sm:$0xff]  ;;  %v336_v10 = vld [vmem:[%s9331_s21 + $0x28] sm:$0xff]  ;;  %v443_v13 = vmul.f32 %v9318_v1, %v333_v7  ;;  %v444_v18 = vmul.f32 %v9318_v1, %v334_v8  ;;  %s9147_s28 = scalar_lea.vmem %s9146_s27, 32 }
  0x1f   : > { %3246 = vst.msk [vmem:[#allocation3 + $0x80] sm:$0xff] %vm3123_vm0, %v13676_v4  ;;  %3247 = vst.msk [vmem:[#allocation3 + $0x88] sm:$0xff] %vm3123_vm0, %v13676_v4  ;;  %v337_v15 = vld [vmem:[%s9331_s21 + $0x30] sm:$0xff]  ;;  %v338_v16 = vld [vmem:[%s9331_s21 + $0x38] sm:$0xff]  ;;  %v445_v19 = vmul.f32 %v9318_v1, %v335_v9  ;;  %v446_v20 = vmul.f32 %v9318_v1, %v336_v10  ;;  %v9418_v21 = vmul.f32 %v9323_v2, %v335_v9 }
  0x20   : > { %3248 = vst.msk [vmem:[#allocation3 + $0x90] sm:$0xff] %vm3123_vm0, %v13676_v4  ;;  %3249 = vst.msk [vmem:[#allocation3 + $0x98] sm:$0xff] %vm3123_vm0, %v13676_v4  ;;  %v339_v17 = vld [vmem:[%s9331_s21 + $0x40] sm:$0xff]  ;;  %v340_v22 = vld [vmem:[%s9331_s21 + $0x48] sm:$0xff]  ;;  %v447_v25 = vmul.f32 %v9318_v1, %v337_v15  ;;  %v448_v26 = vmul.f32 %v9318_v1, %v338_v16  ;;  %v9431_v28 = vmul.f32 %v9323_v2, %v336_v10 }
  0x21   : > { %3250 = vst.msk [vmem:[#allocation3 + $0xa0] sm:$0xff] %vm3123_vm0, %v13676_v4  ;;  %3251 = vst.msk [vmem:[#allocation3 + $0xa8] sm:$0xff] %vm3123_vm0, %v13676_v4  ;;  %v9422_v23 = vld [vmem:[%s9331_s21 + $0x50] sm:$0xff]  ;;  %v9425_v24 = vld [vmem:[%s9331_s21 + $0x58] sm:$0xff]  ;;  %v449_v27 = vmul.f32 %v9318_v1, %v339_v17  ;;  %v450_v32 = vmul.f32 %v9318_v1, %v340_v22  ;;  %v9448_v35 = vmul.f32 %v9323_v2, %v337_v15 }
  0x22   : > { %3252 = vst.msk [vmem:[#allocation3 + $0xb0] sm:$0xff] %vm3123_vm0, %v13676_v4  ;;  %3253 = vst.msk [vmem:[#allocation3 + $0xb8] sm:$0xff] %vm3123_vm0, %v13676_v4  ;;  %v9434_v29 = vld [vmem:[%s9331_s21 + $0x60] sm:$0xff]  ;;  %v9437_v30 = vld [vmem:[%s9331_s21 + $0x68] sm:$0xff]  ;;  %v451_v33 = vmul.f32 %v9318_v1, %v9422_v23  ;;  %v452_v34 = vmul.f32 %v9318_v1, %v9425_v24  ;;  %v9468_v42 = vmul.f32 %v9323_v2, %v338_v16 }
  0x23   : > { %3254 = vst.msk [vmem:[#allocation3 + $0xc0] sm:$0xff] %vm3123_vm0, %v13676_v4  ;;  %3255 = vst.msk [vmem:[#allocation3 + $0xc8] sm:$0xff] %vm3123_vm0, %v13676_v4  ;;  %v9440_v31 = vld [vmem:[%s9331_s21 + $0x70] sm:$0xff]  ;;  %v9451_v36 = vld [vmem:[%s9331_s21 + $0x78] sm:$0xff]  ;;  %v9455_v37 = vmul.f32 %v9318_v1, %v9434_v29  ;;  %v9459_v38 = vmul.f32 %v9318_v1, %v9437_v30  ;;  %v9478_v49 = vmul.f32 %v9323_v2, %v339_v17 }
  0x24   : > { %3256 = vst.msk [vmem:[#allocation3 + $0xd0] sm:$0xff] %vm3123_vm0, %v13676_v4  ;;  %3257 = vst.msk [vmem:[#allocation3 + $0xd8] sm:$0xff] %vm3123_vm0, %v13676_v4  ;;  %v9463_v39 = vmul.f32 %v9318_v1, %v9440_v31  ;;  %v546_v40 = vld [vmem:[%s9331_s21 + $0x1] sm:$0xff]  ;;  %v547_v41 = vld [vmem:[%s9331_s21 + $0x9] sm:$0xff]  ;;  %v456_v43 = vmul.f32 %v9318_v1, %v9451_v36  ;;  %v9487_v56 = vmul.f32 %v9323_v2, %v340_v22 }
  0x25   : > { %3258 = vst.msk [vmem:[#allocation3 + $0xe0] sm:$0xff] %vm3123_vm0, %v13676_v4  ;;  %3259 = vst.msk [vmem:[#allocation3 + $0xe8] sm:$0xff] %vm3123_vm0, %v13676_v4  ;;  %v548_v44 = vld [vmem:[%s9331_s21 + $0x11] sm:$0xff]  ;;  %v549_v45 = vld [vmem:[%s9331_s21 + $0x19] sm:$0xff]  ;;  %v656_v47 = vmul.f32 %v9409_v14, %v546_v40  ;;  %v657_v48 = vmul.f32 %v9409_v14, %v547_v41 }
  0x26   : > { %3260 = vst.msk [vmem:[#allocation3 + $0xf0] sm:$0xff] %vm3123_vm0, %v13676_v4  ;;  %3261 = vst.msk [vmem:[#allocation3 + $0xf8] sm:$0xff] %vm3123_vm0, %v13676_v4  ;;  %v550_v46 = vld [vmem:[%s9331_s21 + $0x21] sm:$0xff]  ;;  %v551_v50 = vld [vmem:[%s9331_s21 + $0x29] sm:$0xff]  ;;  %v658_v53 = vmul.f32 %v9409_v14, %v548_v44  ;;  %v659_v54 = vmul.f32 %v9409_v14, %v549_v45 }
  0x27   : > { %13708 = vst [vmem:[#allocation10_spill] sm:$0xff] %v9409_v14  ;;  %13709 = vst [vmem:[#allocation11_spill] sm:$0xff] %v9455_v37  ;;  %v552_v51 = vld [vmem:[%s9331_s21 + $0x31] sm:$0xff]  ;;  %v553_v52 = vld [vmem:[%s9331_s21 + $0x39] sm:$0xff]  ;;  %v660_v55 = vmul.f32 %v9409_v14, %v550_v46  ;;  %v661_v60 = vmul.f32 %v9409_v14, %v551_v50  ;;  %v761_v63 = vadd.f32 %v656_v47, %v441_v11 }
  0x28   : > { %13710 = vst [vmem:[#allocation12_spill] sm:$0xff] %v9459_v38  ;;  %13711 = vst [vmem:[#allocation13_spill] sm:$0xff] %v9463_v39  ;;  %v554_v57 = vld [vmem:[%s9331_s21 + $0x41] sm:$0xff]  ;;  %v555_v58 = vld [vmem:[%s9331_s21 + $0x49] sm:$0xff]  ;;  %v662_v61 = vmul.f32 %v9409_v14, %v552_v51  ;;  %v663_v62 = vmul.f32 %v9409_v14, %v553_v52  ;;  %v762_v9 = vadd.f32 %v657_v48, %v442_v12 }
  0x29   : > { %v556_v59 = vld [vmem:[%s9331_s21 + $0x51] sm:$0xff]  ;;  %13712 = vst [vmem:[#allocation14_spill] sm:$0xff] %v9498_v0  ;;  %v557_v3 = vld [vmem:[%s9331_s21 + $0x59] sm:$0xff]  ;;  %v664_v6 = vmul.f32 %v9409_v14, %v554_v57  ;;  %v665_v7 = vmul.f32 %v9409_v14, %v555_v58  ;;  %v866_v10 = vld [vmem:[%s9331_s21 + $0x2] sm:$0xff]  ;;  %v763_v16 = vadd.f32 %v658_v53, %v443_v13  ;;  %v764_v17 = vadd.f32 %v659_v54, %v444_v18 }
  0x2a   : > { %v561_v5 = vld [vmem:[%s9331_s21 + $0x79] sm:$0xff]  ;;  %v666_v8 = vmul.f32 %v9409_v14, %v556_v59  ;;  %v667_v11 = vmul.f32 %v9409_v14, %v557_v3  ;;  %v867_v22 = vld [vmem:[%s9331_s21 + $0xa] sm:$0xff]  ;;  %v765_v44 = vadd.f32 %v660_v55, %v445_v19  ;;  %v766_v45 = vadd.f32 %v661_v60, %v446_v20  ;;  %v870_v12 = vld [vmem:[%s9331_s21 + $0x22] sm:$0xff] }
  0x2b   : > { %v671_v15 = vmul.f32 %v9409_v14, %v561_v5  ;;  %v868_v40 = vld [vmem:[%s9331_s21 + $0x12] sm:$0xff]  ;;  %v869_v41 = vld [vmem:[%s9331_s21 + $0x1a] sm:$0xff]  ;;  %v767_v46 = vadd.f32 %v662_v61, %v447_v25  ;;  %v768_v47 = vadd.f32 %v663_v62, %v448_v26  ;;  %v871_v48 = vld [vmem:[%s9331_s21 + $0x2a] sm:$0xff]  ;;  %v769_v51 = vadd.f32 %v664_v6, %v449_v27 }
  0x2c   : > { %v872_v50 = vld [vmem:[%s9331_s21 + $0x32] sm:$0xff]  ;;  %v770_v52 = vadd.f32 %v665_v7, %v450_v32  ;;  %v771_v57 = vadd.f32 %v666_v8, %v451_v33  ;;  %v772_v13 = vadd.f32 %v667_v11, %v452_v34  ;;  %v873_v53 = vld [vmem:[%s9331_s21 + $0x3a] sm:$0xff]  ;;  %v874_v18 = vld [vmem:[%s9331_s21 + $0x42] sm:$0xff]  ;;  %v976_v20 = vmul.f32 %v9498_v0, %v866_v10 }
  0x2d   : > { %v875_v54 = vld [vmem:[%s9331_s21 + $0x4a] sm:$0xff]  ;;  %v9517_v58 = vadd.f32 %v671_v15, %v456_v43  ;;  %v876_v59 = vld [vmem:[%s9331_s21 + $0x52] sm:$0xff]  ;;  %v877_v19 = vld [vmem:[%s9331_s21 + $0x5a] sm:$0xff]  ;;  %v977_v25 = vmul.f32 %v9498_v0, %v867_v22  ;;  %v978_v26 = vmul.f32 %v9498_v0, %v868_v40  ;;  %v979_v27 = vmul.f32 %v9498_v0, %v869_v41 }
  0x2e   : > { %v980_v32 = vmul.f32 %v9498_v0, %v870_v12  ;;  %v981_v33 = vmul.f32 %v9498_v0, %v871_v48  ;;  %v982_v34 = vmul.f32 %v9498_v0, %v872_v50  ;;  %v983_v43 = vmul.f32 %v9498_v0, %v873_v53  ;;  %v1186_v62 = vld [vmem:[%s9331_s21 + $0x1e] sm:$0xff]  ;;  %v1187_v3 = vld [vmem:[%s9331_s21 + $0x26] sm:$0xff]  ;;  %v1188_v11 = vld [vmem:[%s9331_s21 + $0x2e] sm:$0xff] }
  0x2f   : > { %13713 = vst [vmem:[#allocation15_spill] sm:$0xff] %v9517_v58  ;;  %v984_v55 = vmul.f32 %v9498_v0, %v874_v18  ;;  %v985_v60 = vmul.f32 %v9498_v0, %v875_v54  ;;  %v986_v61 = vmul.f32 %v9498_v0, %v876_v59  ;;  %v9537_v5 = vld [vmem:[%s13667_s1 + $0x3] ss:$0 sm:$0xff]  ;;  %v987_v6 = vmul.f32 %v9498_v0, %v877_v19  ;;  %v1189_v15 = vld [vmem:[%s9331_s21 + $0x36] sm:$0xff]  ;;  %v9546_v50 = vld [vmem:[%s9331_s21 + $0x46] sm:$0xff] }
  0x30   : > { %13714 = vst [vmem:[#allocation16_spill] sm:$0xff] %v9537_v5  ;;  %v1081_v7 = vadd.f32 %v976_v20, %v761_v63  ;;  %v1082_v8 = vadd.f32 %v977_v25, %v762_v9  ;;  %v1083_v10 = vadd.f32 %v978_v26, %v763_v16  ;;  %v9543_v22 = vld [vmem:[%s9331_s21 + $0x3e] sm:$0xff]  ;;  %v1084_v40 = vadd.f32 %v979_v27, %v764_v17  ;;  %v9549_v53 = vld [vmem:[%s9331_s21 + $0x4e] sm:$0xff]  ;;  %v9552_v18 = vld [vmem:[%s9331_s21 + $0x56] sm:$0xff] }
  0x31   : > { %v1085_v41 = vadd.f32 %v980_v32, %v765_v44  ;;  %v1086_v12 = vadd.f32 %v981_v33, %v766_v45  ;;  %v1087_v48 = vadd.f32 %v982_v34, %v767_v46  ;;  %v1088_v63 = vadd.f32 %v983_v43, %v768_v47  ;;  %v9555_v59 = vld [vmem:[%s9331_s21 + $0x5e] sm:$0xff]  ;;  %v9558_v19 = vld [vmem:[%s9331_s21 + $0x66] sm:$0xff]  ;;  %v9561_v17 = vld [vmem:[%s9331_s21 + $0x6e] sm:$0xff] }
  0x32   : > { %v1089_v9 = vadd.f32 %v984_v55, %v769_v51  ;;  %v1090_v16 = vadd.f32 %v985_v60, %v770_v52  ;;  %v1091_v54 = vadd.f32 %v986_v61, %v771_v57  ;;  %13715 = vst [vmem:[#allocation17_spill] sm:$0xff] %v9561_v17  ;;  %v1092_v44 = vadd.f32 %v987_v6, %v772_v13  ;;  %v9564_v45 = vld [vmem:[%s9331_s21 + $0x76] sm:$0xff]  ;;  %v1506_v33 = vld [vmem:[%s9331_s21 + $0x1f] sm:$0xff]  ;;  %v1507_v34 = vld [vmem:[%s9331_s21 + $0x27] sm:$0xff] }
  0x33   : > { %13716 = vst [vmem:[#allocation18_spill] sm:$0xff] %v9564_v45  ;;  %v1296_v46 = vmul.f32 %v9537_v5, %v1186_v62  ;;  %v1297_v20 = vmul.f32 %v9537_v5, %v1187_v3  ;;  %v1298_v47 = vmul.f32 %v9537_v5, %v1188_v11  ;;  %v1299_v51 = vmul.f32 %v9537_v5, %v1189_v15  ;;  %v9589_v43 = vld [vmem:[%s13667_s1 + $0x4] ss:$0 sm:$0xff]  ;;  %v1508_v3 = vld [vmem:[%s9331_s21 + $0x2f] sm:$0xff]  ;;  %v1509_v6 = vld [vmem:[%s9331_s21 + $0x37] sm:$0xff] }
  0x34   : > { %v1300_v52 = vmul.f32 %v9537_v5, %v9543_v22  ;;  %v1301_v57 = vmul.f32 %v9537_v5, %v9546_v50  ;;  %v1302_v13 = vmul.f32 %v9537_v5, %v9549_v53  ;;  %v1303_v25 = vmul.f32 %v9537_v5, %v9552_v18  ;;  %v1510_v11 = vld [vmem:[%s9331_s21 + $0x3f] sm:$0xff]  ;;  %v1511_v38 = vld [vmem:[%s9331_s21 + $0x47] sm:$0xff]  ;;  %v1512_v37 = vld [vmem:[%s9331_s21 + $0x4f] sm:$0xff] }
  0x35   : > { %v1304_v26 = vmul.f32 %v9537_v5, %v9555_v59  ;;  %v1305_v27 = vmul.f32 %v9537_v5, %v9558_v19  ;;  %v1306_v32 = vmul.f32 %v9537_v5, %v9561_v17  ;;  %v1307_v55 = vmul.f32 %v9537_v5, %v9564_v45  ;;  %v1513_v0 = vld [vmem:[%s9331_s21 + $0x57] sm:$0xff] }
  0x36   : > { %v1401_v60 = vadd.f32 %v1296_v46, %v1081_v7  ;;  %v1402_v61 = vadd.f32 %v1297_v20, %v1082_v8  ;;  %v1403_v62 = vadd.f32 %v1298_v47, %v1083_v10  ;;  %v1404_v15 = vadd.f32 %v1299_v51, %v1084_v40  ;;  %v1514_v8 = vld [vmem:[%s9331_s21 + $0x5f] sm:$0xff]  ;;  %v1515_v46 = vld [vmem:[%s9331_s21 + $0x67] sm:$0xff]  ;;  %v1516_v10 = vld [vmem:[%s9331_s21 + $0x6f] sm:$0xff] }
  0x37   : > { %v1405_v4 = vadd.f32 %v1300_v52, %v1085_v41  ;;  %v1406_v58 = vadd.f32 %v1301_v57, %v1086_v12  ;;  %v1407_v39 = vadd.f32 %v1302_v13, %v1087_v48  ;;  %v1408_v14 = vadd.f32 %v1303_v25, %v1088_v63  ;;  %v1517_v47 = vld [vmem:[%s9331_s21 + $0x77] sm:$0xff] }
  0x38   : > { %v1409_v1 = vadd.f32 %v1304_v26, %v1089_v9  ;;  %v1410_v5 = vadd.f32 %v1305_v27, %v1090_v16  ;;  %v1411_v7 = vadd.f32 %v1306_v32, %v1091_v54  ;;  %v1412_v20 = vadd.f32 %v1307_v55, %v1092_v44 }
  0x39   : > { %v1616_v45 = vmul.f32 %v9589_v43, %v1506_v33  ;;  %v1617_v17 = vmul.f32 %v9589_v43, %v1507_v34  ;;  %v1618_v40 = vmul.f32 %v9589_v43, %v1508_v3  ;;  %v1619_v41 = vmul.f32 %v9589_v43, %v1509_v6  ;;  %v2051_v3 = vld [vmem:[%s9331_s21 + $0x64] sm:$0xff] }
  0x3a   : > { %v1620_v12 = vmul.f32 %v9589_v43, %v1510_v11  ;;  %v1621_v48 = vmul.f32 %v9589_v43, %v1511_v38  ;;  %v1622_v63 = vmul.f32 %v9589_v43, %v1512_v37  ;;  %v1623_v9 = vmul.f32 %v9589_v43, %v1513_v0 }
  0x3b   : > { %v1624_v16 = vmul.f32 %v9589_v43, %v1514_v8  ;;  %v1625_v54 = vmul.f32 %v9589_v43, %v1515_v46  ;;  %v1626_v44 = vmul.f32 %v9589_v43, %v1516_v10  ;;  %v1627_v51 = vmul.f32 %v9589_v43, %v1517_v47  ;;  %v2366_v47 = vld [vmem:[%s9331_s21 + $0x3d] sm:$0xff] }
  0x3c   : > { %v1721_v52 = vadd.f32 %v1616_v45, %v1401_v60  ;;  %v1722_v57 = vadd.f32 %v1617_v17, %v1402_v61  ;;  %v1723_v13 = vadd.f32 %v1618_v40, %v1403_v62  ;;  %v1724_v25 = vadd.f32 %v1619_v41, %v1404_v15  ;;  %v2050_v62 = vld [vmem:[%s9331_s21 + $0x5c] sm:$0xff]  ;;  %v2052_v15 = vld [vmem:[%s9331_s21 + $0x6c] sm:$0xff]  ;;  %v9662_v40 = vld [vmem:[%s13667_s1 + $0x7] ss:$0 sm:$0xff] }
  0x3d   : > { %v1725_v26 = vadd.f32 %v1620_v12, %v1405_v4  ;;  %v1726_v27 = vadd.f32 %v1621_v48, %v1406_v58  ;;  %v1727_v38 = vadd.f32 %v1622_v63, %v1407_v39  ;;  %v1728_v37 = vadd.f32 %v1623_v9, %v1408_v14  ;;  %v9624_v14 = vld [vmem:[%s13667_s1 + $0x6] ss:$0 sm:$0xff]  ;;  %v2046_v58 = vld [vmem:[%s9331_s21 + $0x3c] sm:$0xff] }
  0x3e   : > { %v1729_v0 = vadd.f32 %v1624_v16, %v1409_v1  ;;  %v1730_v32 = vadd.f32 %v1625_v54, %v1410_v5  ;;  %v1731_v33 = vadd.f32 %v1626_v44, %v1411_v7  ;;  %v1732_v34 = vadd.f32 %v1627_v51, %v1412_v20  ;;  %v2048_v5 = vld [vmem:[%s9331_s21 + $0x4c] sm:$0xff]  ;;  %v2053_v7 = vld [vmem:[%s9331_s21 + $0x74] sm:$0xff] }
  0x3f   : > { %v1842_v55 = vmul.f32 %v9323_v2, %v9422_v23  ;;  %v1843_v17 = vmul.f32 %v9323_v2, %v9425_v24  ;;  %v1844_v4 = vmul.f32 %v9323_v2, %v9434_v29  ;;  %v1845_v1 = vmul.f32 %v9323_v2, %v9437_v30  ;;  %v2047_v29 = vld [vmem:[%s9331_s21 + $0x44] sm:$0xff]  ;;  %v2368_v16 = vld [vmem:[%s9331_s21 + $0x4d] sm:$0xff]  ;;  %v2369_v54 = vld [vmem:[%s9331_s21 + $0x55] sm:$0xff] }
  0x40   : > { %v1846_v39 = vmul.f32 %v9323_v2, %v9440_v31  ;;  %v1847_v23 = vmul.f32 %v9323_v2, %v9451_v36  ;;  %v1941_v24 = vadd.f32 %v9418_v21, %v1721_v52  ;;  %v1942_v45 = vadd.f32 %v9431_v28, %v1722_v57  ;;  %v2049_v31 = vld [vmem:[%s9331_s21 + $0x54] sm:$0xff]  ;;  %v2367_v9 = vld [vmem:[%s9331_s21 + $0x45] sm:$0xff] }
  0x41   : > { %v1943_v60 = vadd.f32 %v9448_v35, %v1723_v13  ;;  %v1944_v30 = vadd.f32 %v9468_v42, %v1724_v25  ;;  %v1945_v61 = vadd.f32 %v9478_v49, %v1725_v26  ;;  %v1946_v36 = vadd.f32 %v9487_v56, %v1726_v27  ;;  %v2057_v28 = vld [vmem:[%s9331_s21 + $0x94] sm:$0xff]  ;;  %v2370_v13 = vld [vmem:[%s9331_s21 + $0x5d] sm:$0xff]  ;;  %v2371_v25 = vld [vmem:[%s9331_s21 + $0x65] sm:$0xff] }
  0x42   : > { %v1947_v21 = vadd.f32 %v1842_v55, %v1727_v38  ;;  %v1948_v6 = vadd.f32 %v1843_v17, %v1728_v37  ;;  %v9644_v11 = vadd.f32 %v1844_v4, %v1729_v0  ;;  %v9649_v35 = vadd.f32 %v1845_v1, %v1730_v32  ;;  %v2372_v26 = vld [vmem:[%s9331_s21 + $0x6d] sm:$0xff]  ;;  %v2373_v32 = vld [vmem:[%s9331_s21 + $0x75] sm:$0xff] }
  0x43   : > { %v9651_v42 = vadd.f32 %v1846_v39, %v1731_v33  ;;  %v1952_v49 = vadd.f32 %v1847_v23, %v1732_v34  ;;  %v2156_v8 = vmul.f32 %v9624_v14, %v2046_v58  ;;  %v2157_v46 = vmul.f32 %v9624_v14, %v2047_v29 }
  0x44   : > { %v2158_v56 = vmul.f32 %v9624_v14, %v2048_v5  ;;  %v2159_v10 = vmul.f32 %v9624_v14, %v2049_v31  ;;  %v2160_v20 = vmul.f32 %v9624_v14, %v2050_v62  ;;  %v2161_v41 = vmul.f32 %v9624_v14, %v2051_v3 }
  0x45   : > { %v2162_v12 = vmul.f32 %v9624_v14, %v2052_v15  ;;  %v2163_v48 = vmul.f32 %v9624_v14, %v2053_v7  ;;  %v2167_v63 = vmul.f32 %v9624_v14, %v2057_v28  ;;  %v2261_v44 = vadd.f32 %v2156_v8, %v1941_v24  ;;  %v9687_v24 = vld [vmem:[%s13667_s1 + $0x8] ss:$0 sm:$0xff]  ;;  %v13717_v28 = vld [vmem:[#allocation17_spill] sm:$0xff] }
  0x46   : > { %v2262_v51 = vadd.f32 %v2157_v46, %v1942_v45  ;;  %v2263_v52 = vadd.f32 %v2158_v56, %v1943_v60  ;;  %v2264_v57 = vadd.f32 %v2159_v10, %v1944_v30  ;;  %v2265_v27 = vadd.f32 %v2160_v20, %v1945_v61 }
  0x47   : > { %v2266_v38 = vadd.f32 %v2161_v41, %v1946_v36  ;;  %v2267_v37 = vadd.f32 %v2162_v12, %v1947_v21  ;;  %v2268_v0 = vadd.f32 %v2163_v48, %v1948_v6  ;;  %v9675_v33 = vadd.f32 %v2167_v63, %v1952_v49  ;;  %v9715_v48 = vld [vmem:[%s9331_s21 + $0x80] sm:$0xff]  ;;  %v9718_v63 = vld [vmem:[%s9331_s21 + $0x88] sm:$0xff] }
  0x48   : > { %v2476_v34 = vmul.f32 %v9662_v40, %v2366_v47  ;;  %v2477_v55 = vmul.f32 %v9662_v40, %v2367_v9  ;;  %v2478_v17 = vmul.f32 %v9662_v40, %v2368_v16  ;;  %v2479_v4 = vmul.f32 %v9662_v40, %v2369_v54  ;;  %v9721_v9 = vld [vmem:[%s9331_s21 + $0x90] sm:$0xff] }
  0x49   : > { %v2480_v1 = vmul.f32 %v9662_v40, %v2370_v13  ;;  %v2481_v39 = vmul.f32 %v9662_v40, %v2371_v25  ;;  %v2482_v23 = vmul.f32 %v9662_v40, %v2372_v26  ;;  %v2483_v58 = vmul.f32 %v9662_v40, %v2373_v32  ;;  %v560_v13 = vld [vmem:[%s9331_s21 + $0x71] sm:$0xff] }
  0x4a   : > { %v2581_v29 = vadd.f32 %v2476_v34, %v2261_v44  ;;  %v2582_v5 = vadd.f32 %v2477_v55, %v2262_v51  ;;  %v2583_v45 = vadd.f32 %v2478_v17, %v2263_v52  ;;  %v2584_v60 = vadd.f32 %v2479_v4, %v2264_v57  ;;  %v558_v52 = vld [vmem:[%s9331_s21 + $0x61] sm:$0xff]  ;;  %v559_v57 = vld [vmem:[%s9331_s21 + $0x69] sm:$0xff]  ;;  %v564_v32 = vld [vmem:[%s9331_s21 + $0x91] sm:$0xff] }
  0x4b   : > { %v2585_v30 = vadd.f32 %v2480_v1, %v2265_v27  ;;  %v2586_v61 = vadd.f32 %v2481_v39, %v2266_v38  ;;  %v2587_v31 = vadd.f32 %v2482_v23, %v2267_v37  ;;  %v2588_v62 = vadd.f32 %v2483_v58, %v2268_v0  ;;  %v562_v37 = vld [vmem:[%s9331_s21 + $0x81] sm:$0xff]  ;;  %v563_v0 = vld [vmem:[%s9331_s21 + $0x89] sm:$0xff]  ;;  %v13720_v58 = vld [vmem:[#allocation9_spill] sm:$0xff] }
  0x4c   : > { %v2696_v3 = vmul.f32 %v9687_v24, %v9543_v22  ;;  %v2697_v36 = vmul.f32 %v9687_v24, %v9546_v50  ;;  %v2698_v21 = vmul.f32 %v9687_v24, %v9549_v53  ;;  %v2699_v6 = vmul.f32 %v9687_v24, %v9552_v18  ;;  %v9707_v50 = vld [vmem:[%s13668_s2] ss:$0 sm:$0xff]  ;;  %v878_v1 = vld [vmem:[%s9331_s21 + $0x62] sm:$0xff]  ;;  %v879_v39 = vld [vmem:[%s9331_s21 + $0x6a] sm:$0xff] }
  0x4d   : > { %v2700_v15 = vmul.f32 %v9687_v24, %v9555_v59  ;;  %v2701_v7 = vmul.f32 %v9687_v24, %v9558_v19  ;;  %v2702_v22 = vmul.f32 %v9687_v24, %v13717_v28  ;;  %13718 = vst [vmem:[#allocation17_spill] sm:$0xff] %v9707_v50  ;;  %v13719_v53 = vld [vmem:[#allocation18_spill] sm:$0xff]  ;;  %v884_v28 = vld [vmem:[%s9331_s21 + $0x92] sm:$0xff] }
  0x4e   : > { %v2703_v18 = vmul.f32 %v9687_v24, %v13719_v53  ;;  %v2801_v49 = vadd.f32 %v2696_v3, %v2581_v29  ;;  %v2802_v8 = vadd.f32 %v2697_v36, %v2582_v5  ;;  %v2803_v59 = vadd.f32 %v2698_v21, %v2583_v45  ;;  %v880_v3 = vld [vmem:[%s9331_s21 + $0x72] sm:$0xff]  ;;  %v881_v36 = vld [vmem:[%s9331_s21 + $0x7a] sm:$0xff] }
  0x4f   : > { %v2804_v46 = vadd.f32 %v2699_v6, %v2584_v60  ;;  %v2805_v19 = vadd.f32 %v2700_v15, %v2585_v30  ;;  %v2806_v56 = vadd.f32 %v2701_v7, %v2586_v61  ;;  %v2807_v10 = vadd.f32 %v2702_v22, %v2587_v31  ;;  %v13721_v60 = vld [vmem:[#allocation10_spill] sm:$0xff]  ;;  %v883_v7 = vld [vmem:[%s9331_s21 + $0x8a] sm:$0xff] }
  0x50   : > { %v2808_v20 = vadd.f32 %v2703_v18, %v2588_v62  ;;  %v2913_v47 = vadd.f32 %v9707_v50, %v2801_v49  ;;  %v2914_v41 = vadd.f32 %v9707_v50, %v2802_v8  ;;  %v2915_v12 = vadd.f32 %v9707_v50, %v2803_v59  ;;  %v882_v15 = vld [vmem:[%s9331_s21 + $0x82] sm:$0xff]  ;;  %v13724_v59 = vld [vmem:[#allocation12_spill] sm:$0xff] }
  0x51   : > { %v2916_v16 = vadd.f32 %v9707_v50, %v2804_v46  ;;  %v2917_v54 = vadd.f32 %v9707_v50, %v2805_v19  ;;  %v2918_v44 = vadd.f32 %v9707_v50, %v2806_v56  ;;  %v2919_v51 = vadd.f32 %v9707_v50, %v2807_v10  ;;  %v13722_v22 = vld [vmem:[#allocation14_spill] sm:$0xff]  ;;  %v13723_v49 = vld [vmem:[#allocation11_spill] sm:$0xff]  ;;  %v13725_v19 = vld [vmem:[#allocation13_spill] sm:$0xff] }
  0x52   : > { %v2920_v25 = vadd.f32 %v9707_v50, %v2808_v20  ;;  %v3018_v26 = vmax.f32 %v2913_v47, 0.0  ;;  %v3019_v27 = vmax.f32 %v2914_v41, 0.0  ;;  %v3020_v38 = vmax.f32 %v2915_v12, 0.0  ;;  %v9767_v20 = vld [vmem:[%s9331_s21 + $0x7e] sm:$0xff] }
  0x53   : > { %v3021_v34 = vmax.f32 %v2916_v16, 0.0  ;;  %v3022_v55 = vmax.f32 %v2917_v54, 0.0  ;;  %v3023_v17 = vmax.f32 %v2918_v44, 0.0  ;;  %v3024_v4 = vmax.f32 %v2919_v51, 0.0  ;;  %v9772_v54 = vld [vmem:[%s9331_s21 + $0x86] sm:$0xff] }
  0x54   : > { %v3025_v23 = vmax.f32 %v2920_v25, 0.0  ;;  %3124 = vst.msk [vmem:[#allocation2] sm:$0xff] %vm3123_vm0, %v3018_v26  ;;  %3125 = vst.msk [vmem:[#allocation2 + $0x8] sm:$0xff] %vm3123_vm0, %v3019_v27  ;;  %v457_v29 = vmul.f32 %v13720_v58, %v9715_v48  ;;  %v458_v5 = vmul.f32 %v13720_v58, %v9718_v63  ;;  %v459_v45 = vmul.f32 %v13720_v58, %v9721_v9  ;;  %v9781_v25 = vld [vmem:[%s9331_s21 + $0x96] sm:$0xff]  ;;  %v9784_v26 = vld [vmem:[%s9331_s21 + $0x9e] sm:$0xff] }
  0x55   : > { %3126 = vst.msk [vmem:[#allocation2 + $0x10] sm:$0xff] %vm3123_vm0, %v3020_v38  ;;  %3127 = vst.msk [vmem:[#allocation2 + $0x18] sm:$0xff] %vm3123_vm0, %v3021_v34  ;;  %v668_v30 = vmul.f32 %v13721_v60, %v558_v52  ;;  %v669_v61 = vmul.f32 %v13721_v60, %v559_v57  ;;  %v670_v31 = vmul.f32 %v13721_v60, %v560_v13  ;;  %v9778_v13 = vld [vmem:[%s9331_s21 + $0x8e] sm:$0xff] }
  0x56   : > { %3128 = vst.msk [vmem:[#allocation2 + $0x20] sm:$0xff] %vm3123_vm0, %v3022_v55  ;;  %3129 = vst.msk [vmem:[#allocation2 + $0x28] sm:$0xff] %vm3123_vm0, %v3023_v17  ;;  %v672_v62 = vmul.f32 %v13721_v60, %v562_v37  ;;  %v673_v21 = vmul.f32 %v13721_v60, %v563_v0  ;;  %v674_v6 = vmul.f32 %v13721_v60, %v564_v32  ;;  %v13726_v37 = vld [vmem:[#allocation15_spill] sm:$0xff]  ;;  %v13727_v55 = vld [vmem:[#allocation16_spill] sm:$0xff] }
  0x57   : > { %3130 = vst.msk [vmem:[#allocation2 + $0x30] sm:$0xff] %vm3123_vm0, %v3024_v4  ;;  %3131 = vst.msk [vmem:[#allocation2 + $0x38] sm:$0xff] %vm3123_vm0, %v3025_v23  ;;  %v988_v53 = vmul.f32 %v13722_v22, %v878_v1  ;;  %v989_v18 = vmul.f32 %v13722_v22, %v879_v39  ;;  %v773_v8 = vadd.f32 %v668_v30, %v13723_v49  ;;  %v9788_v32 = vld [vmem:[%s9331_s21 + $0xa6] sm:$0xff]  ;;  %v9791_v34 = vld [vmem:[%s9331_s21 + $0xae] sm:$0xff] }
  0x58   : > { %v774_v46 = vadd.f32 %v669_v61, %v13724_v59  ;;  %v775_v56 = vadd.f32 %v670_v31, %v13725_v19  ;;  %v777_v10 = vadd.f32 %v672_v62, %v457_v29  ;;  %v778_v47 = vadd.f32 %v673_v21, %v458_v5  ;;  %v1519_v30 = vld [vmem:[%s9331_s21 + $0x87] sm:$0xff]  ;;  %v1520_v49 = vld [vmem:[%s9331_s21 + $0x8f] sm:$0xff] }
  0x59   : > { %v779_v41 = vadd.f32 %v674_v6, %v459_v45  ;;  %v990_v12 = vmul.f32 %v13722_v22, %v880_v3  ;;  %v991_v16 = vmul.f32 %v13722_v22, %v881_v36  ;;  %v992_v44 = vmul.f32 %v13722_v22, %v882_v15  ;;  %v1518_v45 = vld [vmem:[%s9331_s21 + $0x7f] sm:$0xff] }
  0x5a   : > { %v993_v51 = vmul.f32 %v13722_v22, %v883_v7  ;;  %v994_v52 = vmul.f32 %v13722_v22, %v884_v28  ;;  %v1093_v57 = vadd.f32 %v988_v53, %v773_v8  ;;  %v1094_v27 = vadd.f32 %v989_v18, %v774_v46 }
  0x5b   : > { %v1095_v38 = vadd.f32 %v990_v12, %v775_v56  ;;  %v1096_v0 = vadd.f32 %v991_v16, %v13726_v37  ;;  %v1308_v17 = vmul.f32 %v13727_v55, %v9767_v20  ;;  %v3262_v4 = vld [vmem:[#allocation2] ss:$2 sm:$0xff]  ;;  %v3266_v1 = vld [vmem:[#allocation2 + $0x1] ss:$2 sm:$0xff]  ;;  %v1097_v39 = vadd.f32 %v992_v44, %v777_v10 }
  0x5c   : > { %v1098_v23 = vadd.f32 %v993_v51, %v778_v47  ;;  %v1099_v29 = vadd.f32 %v994_v52, %v779_v41  ;;  %v1309_v5 = vmul.f32 %v13727_v55, %v9772_v54  ;;  %v3264_v61 = vld [vmem:[#allocation2 + $0x10] ss:$2 sm:$0x3f]  ;;  %v3268_v31 = vld [vmem:[#allocation2 + $0x11] ss:$2 sm:$0x3f]  ;;  %v3277_v62 = vmax.f32 %v3262_v4, %v3266_v1 }
  0x5d   : > { %v1310_v3 = vmul.f32 %v13727_v55, %v9778_v13  ;;  %v1311_v36 = vmul.f32 %v13727_v55, %v9781_v25  ;;  %v1312_v21 = vmul.f32 %v13727_v55, %v9784_v26  ;;  %v3270_v6 = vld [vmem:[#allocation2 + $0x1e] ss:$2 sm:$0xff]  ;;  %v3278_v7 = vmax.f32 %v3264_v61, %v3268_v31  ;;  %v3274_v8 = vld [vmem:[#allocation2 + $0x1f] ss:$2 sm:$0xff] }
  0x5e   : > { %v3272_v15 = vld [vmem:[#allocation2 + $0x2e] ss:$2 sm:$0x3f]  ;;  %v1313_v28 = vmul.f32 %v13727_v55, %v9788_v32  ;;  %v1314_v53 = vmul.f32 %v13727_v55, %v9791_v34  ;;  %v1413_v18 = vadd.f32 %v1308_v17, %v1093_v57  ;;  %v3276_v59 = vld [vmem:[#allocation2 + $0x2f] ss:$2 sm:$0x3f]  ;;  %v1414_v46 = vadd.f32 %v1309_v5, %v1094_v27 }
  0x5f   : > { %v1415_v19 = vadd.f32 %v1310_v3, %v1095_v38  ;;  %v9810_v56 = vadd.f32 %v1311_v36, %v1096_v0  ;;  %v9812_v10 = vadd.f32 %v1312_v21, %v1097_v39  ;;  %v3279_v47 = vmax.f32 %v3270_v6, %v3274_v8  ;;  %v2054_v44 = vld [vmem:[%s9331_s21 + $0x7c] sm:$0xff]  ;;  %v2055_v51 = vld [vmem:[%s9331_s21 + $0x84] sm:$0xff]  ;;  %v2056_v37 = vld [vmem:[%s9331_s21 + $0x8c] sm:$0xff] }
  0x60   : > { %v3280_v41 = vmax.f32 %v3272_v15, %v3276_v59  ;;  %v9814_v12 = vadd.f32 %v1313_v28, %v1098_v23  ;;  %v9816_v16 = vadd.f32 %v1314_v53, %v1099_v29  ;;  %v1628_v52 = vmul.f32 %v9589_v43, %v1518_v45  ;;  %v2058_v0 = vld [vmem:[%s9331_s21 + $0x9c] sm:$0xff]  ;;  %v2059_v17 = vld [vmem:[%s9331_s21 + $0xa4] sm:$0xff]  ;;  %v2060_v29 = vld [vmem:[%s9331_s21 + $0xac] sm:$0xff] }
  0x61   : > { %v1629_v57 = vmul.f32 %v9589_v43, %v1519_v30  ;;  %v1630_v27 = vmul.f32 %v9589_v43, %v1520_v49  ;;  %v1848_v38 = vmul.f32 %v9323_v2, %v9715_v48  ;;  %v3281_v4 = vmax.f32 %v3277_v62, %v3279_v47  ;;  %v2374_v61 = vld [vmem:[%s9331_s21 + $0x7d] sm:$0xff]  ;;  %v2375_v62 = vld [vmem:[%s9331_s21 + $0x85] sm:$0xff]  ;;  %v2376_v3 = vld [vmem:[%s9331_s21 + $0x8d] sm:$0xff] }
  0x62   : > { %v3282_v1 = vmax.f32 %v3278_v7, %v3280_v41  ;;  %v1849_v39 = vmul.f32 %v9323_v2, %v9718_v63  ;;  %v1850_v23 = vmul.f32 %v9323_v2, %v9721_v9  ;;  %v1733_v5 = vadd.f32 %v1628_v52, %v1413_v18  ;;  %v2377_v7 = vld [vmem:[%s9331_s21 + $0x95] sm:$0xff]  ;;  %v2378_v28 = vld [vmem:[%s9331_s21 + $0x9d] sm:$0xff]  ;;  %v2379_v53 = vld [vmem:[%s9331_s21 + $0xa5] sm:$0xff] }
  0x63   : > { %v1734_v45 = vadd.f32 %v1629_v57, %v1414_v46  ;;  %v1735_v30 = vadd.f32 %v1630_v27, %v1415_v19  ;;  %v2164_v48 = vmul.f32 %v9624_v14, %v2054_v44  ;;  %3283 = vst.msk [vmem:[#allocation3 + $0x11] sm:$0xff] %vm3123_vm0, %v3281_v4  ;;  %v2165_v31 = vmul.f32 %v9624_v14, %v2055_v51  ;;  %v2380_v59 = vld [vmem:[%s9331_s21 + $0xad] sm:$0xff] }
  0x64   : > { %3284 = vst.msk [vmem:[#allocation3 + $0x19] sm:$0x3f] %vm3228_vm1, %v3282_v1  ;;  %v2166_v63 = vmul.f32 %v9624_v14, %v2056_v37  ;;  %v2168_v2 = vmul.f32 %v9624_v14, %v2058_v0  ;;  %v2169_v9 = vmul.f32 %v9624_v14, %v2059_v17  ;;  %v1953_v36 = vadd.f32 %v1848_v38, %v1733_v5 }
  0x65   : > { %v1954_v21 = vadd.f32 %v1849_v39, %v1734_v45  ;;  %v1955_v6 = vadd.f32 %v1850_v23, %v1735_v30  ;;  %v2170_v15 = vmul.f32 %v9624_v14, %v2060_v29  ;;  %v2269_v18 = vadd.f32 %v2164_v48, %v9644_v11 }
  0x66   : > { %v2270_v49 = vadd.f32 %v2165_v31, %v9649_v35  ;;  %v2271_v8 = vadd.f32 %v2166_v63, %v9651_v42  ;;  %v2484_v46 = vmul.f32 %v9662_v40, %v2374_v61  ;;  %v2273_v19 = vadd.f32 %v2168_v2, %v1953_v36  ;;  %v9877_v63 = vld [vmem:[%s9331_s21 + $0xa0] sm:$0xff] }
  0x67   : > { %v2274_v47 = vadd.f32 %v2169_v9, %v1954_v21  ;;  %v2275_v41 = vadd.f32 %v2170_v15, %v1955_v6  ;;  %v2485_v44 = vmul.f32 %v9662_v40, %v2375_v62  ;;  %v2486_v51 = vmul.f32 %v9662_v40, %v2376_v3  ;;  %v9881_v62 = vld [vmem:[%s9331_s21 + $0xa8] sm:$0xff]  ;;  %v9893_v15 = vld [vmem:[%s9331_s21 + $0xb8] sm:$0xff] }
  0x68   : > { %v2487_v52 = vmul.f32 %v9662_v40, %v2377_v7  ;;  %v2488_v57 = vmul.f32 %v9662_v40, %v2378_v28  ;;  %v2489_v11 = vmul.f32 %v9662_v40, %v2379_v53  ;;  %v2490_v35 = vmul.f32 %v9662_v40, %v2380_v59  ;;  %v9896_v7 = vld [vmem:[%s9331_s21 + $0xc0] sm:$0xff]  ;;  %v9899_v28 = vld [vmem:[%s9331_s21 + $0xc8] sm:$0xff] }
  0x69   : > { %v2589_v42 = vadd.f32 %v2484_v46, %v2269_v18  ;;  %v2590_v27 = vadd.f32 %v2485_v44, %v2270_v49  ;;  %v2704_v38 = vmul.f32 %v9687_v24, %v9767_v20  ;;  %v2591_v37 = vadd.f32 %v2486_v51, %v2271_v8  ;;  %v9868_v20 = vld [vmem:[%s9331_s21 + $0x98] sm:$0xff]  ;;  %v9905_v49 = vld [vmem:[%s9331_s21 + $0xd0] sm:$0xff]  ;;  %v9910_v8 = vld [vmem:[%s13667_s1] ss:$0 sm:$0xff] }
  0x6a   : > { %v2592_v0 = vadd.f32 %v2487_v52, %v9675_v33  ;;  %v2593_v17 = vadd.f32 %v2488_v57, %v2273_v19  ;;  %v2594_v4 = vadd.f32 %v2489_v11, %v2274_v47  ;;  %v4336_v1 = vld [vmem:[#allocation3 + $0x10] sm:$0xff]  ;;  %v2595_v23 = vadd.f32 %v2490_v35, %v2275_v41  ;;  %13728 = vst [vmem:[#allocation18_spill] sm:$0xff] %v9910_v8  ;;  %v566_v19 = vld [vmem:[%s9331_s21 + $0xa1] sm:$0xff]  ;;  %v567_v52 = vld [vmem:[%s9331_s21 + $0xa9] sm:$0xff] }
  0x6b   : > { %v4337_v39 = vld [vmem:[#allocation3 + $0x18] sm:$0xff]  ;;  %v2705_v29 = vmul.f32 %v9687_v24, %v9772_v54  ;;  %v2706_v5 = vmul.f32 %v9687_v24, %v9778_v13  ;;  %v2707_v45 = vmul.f32 %v9687_v24, %v9781_v25  ;;  %v2708_v30 = vmul.f32 %v9687_v24, %v9784_v26  ;;  %v568_v57 = vld [vmem:[%s9331_s21 + $0xb1] sm:$0xff] }
  0x6c   : > { %v4364_v33 = vpack.c.bf16 %v4337_v39, %v4336_v1  ;;  %v2709_v48 = vmul.f32 %v9687_v24, %v9788_v32  ;;  %v2710_v54 = vmul.f32 %v9687_v24, %v9791_v34  ;;  %v2809_v61 = vadd.f32 %v2704_v38, %v2589_v42  ;;  %v9884_v32 = vld [vmem:[%s9331_s21 + $0xb0] sm:$0xff]  ;;  %v565_v46 = vld [vmem:[%s9331_s21 + $0x99] sm:$0xff] }
  0x6d   : > { %v2810_v13 = vadd.f32 %v2705_v29, %v2590_v27  ;;  %v2811_v31 = vadd.f32 %v2706_v5, %v2591_v37  ;;  %v2812_v25 = vadd.f32 %v2707_v45, %v2592_v0  ;;  %v2813_v2 = vadd.f32 %v2708_v30, %v2593_v17  ;;  %v569_v38 = vld [vmem:[%s9331_s21 + $0xb9] sm:$0xff]  ;;  %v570_v37 = vld [vmem:[%s9331_s21 + $0xc1] sm:$0xff]  ;;  %v571_v0 = vld [vmem:[%s9331_s21 + $0xc9] sm:$0xff] }
  0x6e   : > { %8526 = vmatprep.mubr.msk.bf16.mxu0 %vm3123_vm0, %v4364_v33  ;;  %v2814_v26 = vadd.f32 %v2709_v48, %v2594_v4  ;;  %v2815_v9 = vadd.f32 %v2710_v54, %v2595_v23  ;;  %v460_v34 = vmul.f32 %v13720_v58, %v9868_v20  ;;  %v2921_v3 = vadd.f32 %v9707_v50, %v2809_v61  ;;  %v572_v23 = vld [vmem:[%s9331_s21 + $0xd1] sm:$0xff]  ;;  %v885_v30 = vld [vmem:[%s9331_s21 + $0x9a] sm:$0xff] }
  0x6f   : > { %v2922_v36 = vadd.f32 %v9707_v50, %v2810_v13  ;;  %v2923_v21 = vadd.f32 %v9707_v50, %v2811_v31  ;;  %v2924_v6 = vadd.f32 %v9707_v50, %v2812_v25  ;;  %v2925_v53 = vadd.f32 %v9707_v50, %v2813_v2  ;;  %v886_v31 = vld [vmem:[%s9331_s21 + $0xa2] sm:$0xff]  ;;  %v887_v25 = vld [vmem:[%s9331_s21 + $0xaa] sm:$0xff]  ;;  %v888_v2 = vld [vmem:[%s9331_s21 + $0xb2] sm:$0xff] }
  0x70   : > { %v2926_v58 = vadd.f32 %v9707_v50, %v2814_v26  ;;  %v2927_v18 = vadd.f32 %v9707_v50, %v2815_v9  ;;  %v461_v59 = vmul.f32 %v9910_v8, %v9877_v63  ;;  %v3026_v47 = vmax.f32 %v2921_v3, 0.0 }
  0x71   : > { %v3027_v41 = vmax.f32 %v2922_v36, 0.0  ;;  %v3028_v44 = vmax.f32 %v2923_v21, 0.0  ;;  %v3029_v51 = vmax.f32 %v2924_v6, 0.0  ;;  %v3030_v11 = vmax.f32 %v2925_v53, 0.0  ;;  %v889_v21 = vld [vmem:[%s9331_s21 + $0xba] sm:$0xff]  ;;  %v890_v6 = vld [vmem:[%s9331_s21 + $0xc2] sm:$0xff] }
  0x72   : > { %v3031_v35 = vmax.f32 %v2926_v58, 0.0  ;;  %v3032_v42 = vmax.f32 %v2927_v18, 0.0  ;;  %v462_v27 = vmul.f32 %v9910_v8, %v9881_v62  ;;  %3132 = vst.msk [vmem:[#allocation2 + $0x40] sm:$0xff] %vm3123_vm0, %v3026_v47  ;;  %v463_v17 = vmul.f32 %v9910_v8, %v9884_v32  ;;  %v891_v53 = vld [vmem:[%s9331_s21 + $0xca] sm:$0xff]  ;;  %v892_v47 = vld [vmem:[%s9331_s21 + $0xd2] sm:$0xff] }
  0x73   : > { %3133 = vst.msk [vmem:[#allocation2 + $0x48] sm:$0xff] %vm3123_vm0, %v3027_v41  ;;  %3134 = vst.msk [vmem:[#allocation2 + $0x50] sm:$0xff] %vm3123_vm0, %v3028_v44  ;;  %v464_v4 = vmul.f32 %v9910_v8, %v9893_v15  ;;  %v465_v1 = vmul.f32 %v9910_v8, %v9896_v7  ;;  %v466_v39 = vmul.f32 %v9910_v8, %v9899_v28 }
  0x74   : > { %3135 = vst.msk [vmem:[#allocation2 + $0x58] sm:$0xff] %vm3123_vm0, %v3029_v51  ;;  %3136 = vst.msk [vmem:[#allocation2 + $0x60] sm:$0xff] %vm3123_vm0, %v3030_v11  ;;  %v467_v29 = vmul.f32 %v9910_v8, %v9905_v49  ;;  %v675_v5 = vmul.f32 %v13721_v60, %v565_v46  ;;  %v676_v45 = vmul.f32 %v13721_v60, %v566_v19  ;;  %v9964_v51 = vld [vmem:[%s9331_s21 + $0xbe] sm:$0xff] }
  0x75   : > { %3137 = vst.msk [vmem:[#allocation2 + $0x68] sm:$0xff] %vm3123_vm0, %v3031_v35  ;;  %3138 = vst.msk [vmem:[#allocation2 + $0x70] sm:$0xff] %vm3123_vm0, %v3032_v42  ;;  %v677_v33 = vmul.f32 %v13721_v60, %v567_v52  ;;  %v678_v48 = vmul.f32 %v13721_v60, %v568_v57  ;;  %v679_v54 = vmul.f32 %v13721_v60, %v569_v38  ;;  %v9971_v42 = vld [vmem:[%s9331_s21 + $0xc6] sm:$0xff]  ;;  %v9977_v38 = vld [vmem:[%s9331_s21 + $0xd6] sm:$0xff] }
  0x76   : > { %v680_v61 = vmul.f32 %v13721_v60, %v570_v37  ;;  %v681_v13 = vmul.f32 %v13721_v60, %v571_v0  ;;  %v682_v26 = vmul.f32 %v13721_v60, %v572_v23  ;;  %v780_v9 = vadd.f32 %v675_v5, %v460_v34  ;;  %v9981_v23 = vld [vmem:[%s9331_s21 + $0xde] sm:$0xff] }
  0x77   : > { %v781_v3 = vadd.f32 %v676_v45, %v461_v59  ;;  %v782_v36 = vadd.f32 %v677_v33, %v462_v27  ;;  %v783_v58 = vadd.f32 %v678_v48, %v463_v17  ;;  %v784_v18 = vadd.f32 %v679_v54, %v464_v4  ;;  %v9961_v59 = vld [vmem:[%s9331_s21 + $0xb6] sm:$0xff]  ;;  %v9974_v27 = vld [vmem:[%s9331_s21 + $0xce] sm:$0xff]  ;;  %v9984_v54 = vld [vmem:[%s9331_s21 + $0xe6] sm:$0xff] }
  0x78   : > { %v785_v46 = vadd.f32 %v680_v61, %v465_v1  ;;  %v786_v19 = vadd.f32 %v681_v13, %v466_v39  ;;  %v787_v41 = vadd.f32 %v682_v26, %v467_v29  ;;  %v995_v44 = vmul.f32 %v13722_v22, %v885_v30 }
  0x79   : > { %v996_v60 = vmul.f32 %v13722_v22, %v886_v31  ;;  %v997_v34 = vmul.f32 %v13722_v22, %v887_v25  ;;  %v998_v52 = vmul.f32 %v13722_v22, %v888_v2  ;;  %v999_v57 = vmul.f32 %v13722_v22, %v889_v21  ;;  %v9987_v2 = vld [vmem:[%s9331_s21 + $0xee] sm:$0xff] }
  0x7a   : > { %v1000_v11 = vmul.f32 %v13722_v22, %v890_v6  ;;  %v1001_v35 = vmul.f32 %v13722_v22, %v891_v53  ;;  %v3286_v37 = vld [vmem:[#allocation2 + $0x3c] ss:$2 sm:$0xff]  ;;  %v3288_v0 = vld [vmem:[#allocation2 + $0x4c] ss:$2 sm:$0x3f]  ;;  %v1002_v17 = vmul.f32 %v13722_v22, %v892_v47  ;;  %v1100_v4 = vadd.f32 %v995_v44, %v780_v9 }
  0x7b   : > { %v1101_v1 = vadd.f32 %v996_v60, %v781_v3  ;;  %v1102_v39 = vadd.f32 %v997_v34, %v782_v36  ;;  %v3290_v29 = vld [vmem:[#allocation2 + $0x3d] ss:$2 sm:$0xff]  ;;  %v3292_v5 = vld [vmem:[#allocation2 + $0x4d] ss:$2 sm:$0x3f]  ;;  %v1103_v45 = vadd.f32 %v998_v52, %v783_v58  ;;  %v1104_v33 = vadd.f32 %v999_v57, %v784_v18 }
  0x7c   : > { %v1105_v30 = vadd.f32 %v1000_v11, %v785_v46  ;;  %v1106_v48 = vadd.f32 %v1001_v35, %v786_v19  ;;  %v3294_v61 = vld [vmem:[#allocation2 + $0x5a] ss:$2 sm:$0xff]  ;;  %v3296_v13 = vld [vmem:[#allocation2 + $0x6a] ss:$2 sm:$0x3f]  ;;  %v3301_v31 = vmax.f32 %v3286_v37, %v3290_v29  ;;  %v3302_v22 = vmax.f32 %v3288_v0, %v3292_v5 }
  0x7d   : > { %v1107_v25 = vadd.f32 %v1002_v17, %v787_v41  ;;  %v1315_v26 = vmul.f32 %v13727_v55, %v9961_v59  ;;  %v3298_v9 = vld [vmem:[#allocation2 + $0x5b] ss:$2 sm:$0xff]  ;;  %v3300_v3 = vld [vmem:[#allocation2 + $0x6b] ss:$2 sm:$0x3f]  ;;  %v1316_v36 = vmul.f32 %v13727_v55, %v9964_v51  ;;  %v1317_v21 = vmul.f32 %v13727_v55, %v9971_v42 }
  0x7e   : > { %v1318_v6 = vmul.f32 %v13727_v55, %v9974_v27  ;;  %v1319_v53 = vmul.f32 %v13727_v55, %v9977_v38  ;;  %v3303_v58 = vmax.f32 %v3294_v61, %v3298_v9  ;;  %v3304_v18 = vmax.f32 %v3296_v13, %v3300_v3  ;;  %v1521_v47 = vld [vmem:[%s9331_s21 + $0x97] sm:$0xff]  ;;  %v1522_v41 = vld [vmem:[%s9331_s21 + $0x9f] sm:$0xff]  ;;  %v1523_v44 = vld [vmem:[%s9331_s21 + $0xa7] sm:$0xff] }
  0x7f   : > { %v1320_v46 = vmul.f32 %v13727_v55, %v9981_v23  ;;  %v1321_v19 = vmul.f32 %v13727_v55, %v9984_v54  ;;  %v1322_v60 = vmul.f32 %v13727_v55, %v9987_v2  ;;  %v1420_v34 = vadd.f32 %v1315_v26, %v1100_v4  ;;  %v1524_v11 = vld [vmem:[%s9331_s21 + $0xaf] sm:$0xff]  ;;  %v1525_v35 = vld [vmem:[%s9331_s21 + $0xb7] sm:$0xff]  ;;  %v1526_v37 = vld [vmem:[%s9331_s21 + $0xbf] sm:$0xff] }
  0x80   : > { %v1421_v52 = vadd.f32 %v1316_v36, %v1101_v1  ;;  %v1422_v57 = vadd.f32 %v1317_v21, %v1102_v39  ;;  %v3305_v0 = vmax.f32 %v3301_v31, %v3303_v58  ;;  %v3306_v17 = vmax.f32 %v3302_v22, %v3304_v18  ;;  %v1527_v61 = vld [vmem:[%s9331_s21 + $0xc7] sm:$0xff]  ;;  %v1528_v13 = vld [vmem:[%s9331_s21 + $0xcf] sm:$0xff] }
  0x81   : > { %v1423_v29 = vadd.f32 %v1318_v6, %v1103_v45  ;;  %v10011_v5 = vadd.f32 %v1319_v53, %v1104_v33  ;;  %v1532_v9 = vld [vmem:[%s9331_s21 + $0xef] sm:$0xff]  ;;  %v10016_v3 = vadd.f32 %v1320_v46, %v1105_v30  ;;  %v10018_v8 = vadd.f32 %v1321_v19, %v1106_v48 }
  0x82   : > { %v1427_v50 = vadd.f32 %v1322_v60, %v1107_v25  ;;  %v1631_v55 = vmul.f32 %v9589_v43, %v1521_v47  ;;  %3307 = vst.msk [vmem:[#allocation3 + $0x21] sm:$0xff] %vm3123_vm0, %v3305_v0  ;;  %v1632_v4 = vmul.f32 %v9589_v43, %v1522_v41  ;;  %v1633_v1 = vmul.f32 %v9589_v43, %v1523_v44  ;;  %v2062_v47 = vld [vmem:[%s9331_s21 + $0xbc] sm:$0xff]  ;;  %v2064_v41 = vld [vmem:[%s9331_s21 + $0xcc] sm:$0xff] }
  0x83   : > { %3308 = vst.msk [vmem:[#allocation3 + $0x29] sm:$0x3f] %vm3228_vm1, %v3306_v17  ;;  %v1634_v39 = vmul.f32 %v9589_v43, %v1524_v11  ;;  %v1635_v45 = vmul.f32 %v9589_v43, %v1525_v35  ;;  %v1636_v33 = vmul.f32 %v9589_v43, %v1526_v37  ;;  %v1637_v30 = vmul.f32 %v9589_v43, %v1527_v61  ;;  %v2068_v0 = vld [vmem:[%s9331_s21 + $0xec] sm:$0xff] }
  0x84   : > { %v1638_v48 = vmul.f32 %v9589_v43, %v1528_v13  ;;  %v1642_v31 = vmul.f32 %v9589_v43, %v1532_v9  ;;  %v1736_v22 = vadd.f32 %v1631_v55, %v9810_v56  ;;  %v1737_v25 = vadd.f32 %v1632_v4, %v9812_v10  ;;  %v10040_v43 = vld [vmem:[%s13667_s1 + $0x5] ss:$0 sm:$0xff] }
  0x85   : > { %v1738_v26 = vadd.f32 %v1633_v1, %v9814_v12  ;;  %v1739_v36 = vadd.f32 %v1634_v39, %v9816_v16  ;;  %v1740_v21 = vadd.f32 %v1635_v45, %v1420_v34  ;;  %v1741_v6 = vadd.f32 %v1636_v33, %v1421_v52  ;;  %v2061_v16 = vld [vmem:[%s9331_s21 + $0xb4] sm:$0xff]  ;;  %v2066_v52 = vld [vmem:[%s9331_s21 + $0xdc] sm:$0xff]  ;;  %v2383_v45 = vld [vmem:[%s9331_s21 + $0xc5] sm:$0xff] }
  0x86   : > { %v1742_v53 = vadd.f32 %v1637_v30, %v1422_v57  ;;  %v1743_v58 = vadd.f32 %v1638_v48, %v1423_v29  ;;  %v10035_v18 = vadd.f32 %v1642_v31, %v1427_v50  ;;  %v1851_v56 = vmul.f32 %v10040_v43, %v9868_v20  ;;  %v2067_v57 = vld [vmem:[%s9331_s21 + $0xe4] sm:$0xff]  ;;  %v2381_v1 = vld [vmem:[%s9331_s21 + $0xb5] sm:$0xff] }
  0x87   : > { %v1852_v10 = vmul.f32 %v10040_v43, %v9877_v63  ;;  %v1853_v12 = vmul.f32 %v10040_v43, %v9881_v62  ;;  %v1854_v50 = vmul.f32 %v10040_v43, %v9884_v32  ;;  %v1855_v46 = vmul.f32 %v10040_v43, %v9893_v15  ;;  %v2063_v63 = vld [vmem:[%s9331_s21 + $0xc4] sm:$0xff]  ;;  %v2065_v32 = vld [vmem:[%s9331_s21 + $0xd4] sm:$0xff] }
  0x88   : > { %v1856_v19 = vmul.f32 %v10040_v43, %v9896_v7  ;;  %v1857_v20 = vmul.f32 %v10040_v43, %v9899_v28  ;;  %v1858_v62 = vmul.f32 %v10040_v43, %v9905_v49  ;;  %v1956_v44 = vadd.f32 %v1851_v56, %v1736_v22  ;;  %v2382_v39 = vld [vmem:[%s9331_s21 + $0xbd] sm:$0xff]  ;;  %v2384_v22 = vld [vmem:[%s9331_s21 + $0xcd] sm:$0xff]  ;;  %v2387_v56 = vld [vmem:[%s9331_s21 + $0xe5] sm:$0xff] }
  0x89   : > { %v1957_v60 = vadd.f32 %v1852_v10, %v1737_v25  ;;  %v1958_v34 = vadd.f32 %v1853_v12, %v1738_v26  ;;  %v4338_v15 = vld [vmem:[#allocation3 + $0x20] sm:$0xff]  ;;  %v1959_v11 = vadd.f32 %v1854_v50, %v1739_v36  ;;  %v1960_v28 = vadd.f32 %v1855_v46, %v1740_v21  ;;  %v2385_v25 = vld [vmem:[%s9331_s21 + $0xd5] sm:$0xff]  ;;  %v2386_v26 = vld [vmem:[%s9331_s21 + $0xdd] sm:$0xff] }
  0x8a   : > { %v4339_v7 = vld [vmem:[#allocation3 + $0x28] sm:$0xff]  ;;  %v1961_v35 = vadd.f32 %v1856_v19, %v1741_v6  ;;  %v1962_v37 = vadd.f32 %v1857_v20, %v1742_v53  ;;  %v1963_v29 = vadd.f32 %v1858_v62, %v1743_v58  ;;  %v2171_v49 = vmul.f32 %v9624_v14, %v2061_v16  ;;  %v9091_v36 = vld [vmem:[%s13669_s3 + $0x20] sm:$0xff]  }
  0x8b   : > { %v4365_v17 = vpack.c.bf16 %v4339_v7, %v4338_v15  ;;  %v2172_v61 = vmul.f32 %v9624_v14, %v2062_v47  ;;  %v2173_v13 = vmul.f32 %v9624_v14, %v2063_v63  ;;  %v2174_v9 = vmul.f32 %v9624_v14, %v2064_v41  ;;  %v2388_v10 = vld [vmem:[%s9331_s21 + $0xed] sm:$0xff] }
  0x8c   : > { %v2175_v55 = vmul.f32 %v9624_v14, %v2065_v32  ;;  %v2176_v4 = vmul.f32 %v9624_v14, %v2066_v52  ;;  %v2177_v33 = vmul.f32 %v9624_v14, %v2067_v57  ;;  %v2178_v30 = vmul.f32 %v9624_v14, %v2068_v0 }
  0x8d   : > { %8527 = vmatmul.mubr.msk.bf16.vlgmr.msra.gmra.mrb[0].mxu0 %vm3123_vm0, %v4365_v17  ;;  %v2276_v48 = vadd.f32 %v2171_v49, %v1956_v44  ;;  %v2277_v31 = vadd.f32 %v2172_v61, %v1957_v60  ;;  %v2278_v21 = vadd.f32 %v2173_v13, %v1958_v34  ;;  %v2279_v6 = vadd.f32 %v2174_v9, %v1959_v11  ;;  %v13729_v13 = vld [vmem:[#allocation17_spill] sm:$0xff] }
  0x8e   : > { %8555 = vmatpush3.bf16.msra.mxu0 %v9091_v36  ;;  %v2280_v53 = vadd.f32 %v2175_v55, %v1960_v28  ;;  %v2281_v58 = vadd.f32 %v2176_v4, %v1961_v35  ;;  %v2282_v12 = vadd.f32 %v2177_v33, %v1962_v37  ;;  %v2283_v16 = vadd.f32 %v2178_v30, %v1963_v29  ;;  %v10129_v33 = vld [vmem:[%s9331_s21 + $0xf8] sm:$0xff]  ;;  %v10132_v30 = vld [vmem:[%s9331_s21 + $0x100] sm:$0xff] }
  0x8f   : > { %v2491_v14 = vmul.f32 %v9662_v40, %v2381_v1  ;;  %v2492_v50 = vmul.f32 %v9662_v40, %v2382_v39  ;;  %v2493_v46 = vmul.f32 %v9662_v40, %v2383_v45  ;;  %v2494_v19 = vmul.f32 %v9662_v40, %v2384_v22  ;;  %v10126_v45 = vld [vmem:[%s9331_s21 + $0xf0] sm:$0xff]  ;;  %v573_v36 = vld [vmem:[%s9331_s21 + $0xd9] sm:$0xff] }
  0x90   : > { %v2495_v20 = vmul.f32 %v9662_v40, %v2385_v25  ;;  %v2496_v47 = vmul.f32 %v9662_v40, %v2386_v26  ;;  %v2497_v63 = vmul.f32 %v9662_v40, %v2387_v56  ;;  %v2498_v41 = vmul.f32 %v9662_v40, %v2388_v10  ;;  %v10137_v26 = vld [vmem:[%s9331_s21 + $0x108] sm:$0xff] }
  0x91   : > { %v2596_v62 = vadd.f32 %v2491_v14, %v2276_v48  ;;  %v2597_v44 = vadd.f32 %v2492_v50, %v2277_v31  ;;  %v2598_v60 = vadd.f32 %v2493_v46, %v2278_v21  ;;  %v2599_v34 = vadd.f32 %v2494_v19, %v2279_v6  ;;  %v574_v21 = vld [vmem:[%s9331_s21 + $0xe1] sm:$0xff]  ;;  %v575_v10 = vld [vmem:[%s9331_s21 + $0xe9] sm:$0xff] }
  0x92   : > { %v2600_v32 = vadd.f32 %v2495_v20, %v2280_v53  ;;  %v2601_v52 = vadd.f32 %v2496_v47, %v2281_v58  ;;  %v2602_v57 = vadd.f32 %v2497_v63, %v2282_v12  ;;  %v2603_v15 = vadd.f32 %v2498_v41, %v2283_v16  ;;  %v576_v12 = vld [vmem:[%s9331_s21 + $0xf1] sm:$0xff]  ;;  %v13730_v50 = vld [vmem:[#allocation18_spill] sm:$0xff]  ;;  %v579_v63 = vld [vmem:[%s9331_s21 + $0x109] sm:$0xff] }
  0x93   : > { %v2711_v7 = vmul.f32 %v9687_v24, %v9961_v59  ;;  %v2712_v11 = vmul.f32 %v9687_v24, %v9964_v51  ;;  %v2713_v28 = vmul.f32 %v9687_v24, %v9971_v42  ;;  %v2714_v40 = vmul.f32 %v9687_v24, %v9974_v27  ;;  %v577_v20 = vld [vmem:[%s9331_s21 + $0xf9] sm:$0xff]  ;;  %v578_v47 = vld [vmem:[%s9331_s21 + $0x101] sm:$0xff] }
  0x94   : > { %v2715_v35 = vmul.f32 %v9687_v24, %v9977_v38  ;;  %v2716_v37 = vmul.f32 %v9687_v24, %v9981_v23  ;;  %v2717_v59 = vmul.f32 %v9687_v24, %v9984_v54  ;;  %v2718_v51 = vmul.f32 %v9687_v24, %v9987_v2  ;;  %v10113_v54 = vld [vmem:[%s9331_s21 + $0xd8] sm:$0xff]  ;;  %v10116_v24 = vld [vmem:[%s9331_s21 + $0xe0] sm:$0xff]  ;;  %v10119_v2 = vld [vmem:[%s9331_s21 + $0xe8] sm:$0xff] }
  0x95   : > { %v2816_v0 = vadd.f32 %v2711_v7, %v2596_v62  ;;  %v2817_v42 = vadd.f32 %v2712_v11, %v2597_v44  ;;  %v2818_v17 = vadd.f32 %v2713_v28, %v2598_v60  ;;  %v2819_v27 = vadd.f32 %v2714_v40, %v2599_v34  ;;  %v893_v34 = vld [vmem:[%s9331_s21 + $0xda] sm:$0xff]  ;;  %v894_v11 = vld [vmem:[%s9331_s21 + $0xe2] sm:$0xff] }
  0x96   : > { %v2820_v29 = vadd.f32 %v2715_v35, %v2600_v32  ;;  %v2821_v49 = vadd.f32 %v2716_v37, %v2601_v52  ;;  %v2822_v38 = vadd.f32 %v2717_v59, %v2602_v57  ;;  %v2823_v61 = vadd.f32 %v2718_v51, %v2603_v15  ;;  %v10172_v52 = vld [vmem:[%s13667_s1 + $0x1] ss:$0 sm:$0xff]  ;;  %v895_v59 = vld [vmem:[%s9331_s21 + $0xea] sm:$0xff]  ;;  %v896_v51 = vld [vmem:[%s9331_s21 + $0xf2] sm:$0xff] }
  0x97   : > { %v2928_v9 = vadd.f32 %v13729_v13, %v2816_v0  ;;  %v2929_v23 = vadd.f32 %v13729_v13, %v2817_v42  ;;  %v2930_v55 = vadd.f32 %v13729_v13, %v2818_v17  ;;  %v2931_v4 = vadd.f32 %v13729_v13, %v2819_v27  ;;  %v897_v0 = vld [vmem:[%s9331_s21 + $0xfa] sm:$0xff] }
  0x98   : > { %v2932_v1 = vadd.f32 %v13729_v13, %v2820_v29  ;;  %v2933_v39 = vadd.f32 %v13729_v13, %v2821_v49  ;;  %v2934_v48 = vadd.f32 %v13729_v13, %v2822_v38  ;;  %v2935_v31 = vadd.f32 %v13729_v13, %v2823_v61  ;;  %v898_v29 = vld [vmem:[%s9331_s21 + $0x102] sm:$0xff]  ;;  %v899_v49 = vld [vmem:[%s9331_s21 + $0x10a] sm:$0xff]  ;;  %v10194_v13 = vld [vmem:[%s9331_s21 + $0xf6] sm:$0xff] }
  0x99   : > { %v3033_v22 = vmax.f32 %v2928_v9, 0.0  ;;  %v3034_v25 = vmax.f32 %v2929_v23, 0.0  ;;  %v3035_v6 = vmax.f32 %v2930_v55, 0.0  ;;  %v3036_v53 = vmax.f32 %v2931_v4, 0.0  ;;  %v10190_v38 = vld [vmem:[%s13667_s1 + $0x2] ss:$0 sm:$0xff] }
  0x9a   : > { %v3037_v58 = vmax.f32 %v2932_v1, 0.0  ;;  %v3038_v56 = vmax.f32 %v2933_v39, 0.0  ;;  %v3039_v16 = vmax.f32 %v2934_v48, 0.0  ;;  %v3040_v14 = vmax.f32 %v2935_v31, 0.0  ;;  %13731 = vst [vmem:[#allocation9_spill] sm:$0xff] %v10190_v38  ;;  %v10197_v1 = vld [vmem:[%s9331_s21 + $0xfe] sm:$0xff] }
  0x9b   : > { %3139 = vst.msk [vmem:[#allocation2 + $0x78] sm:$0xff] %vm3123_vm0, %v3033_v22  ;;  %3140 = vst.msk [vmem:[#allocation2 + $0x80] sm:$0xff] %vm3123_vm0, %v3034_v25  ;;  %v468_v46 = vmul.f32 %v13730_v50, %v10113_v54  ;;  %v469_v19 = vmul.f32 %v13730_v50, %v10116_v24  ;;  %v470_v41 = vmul.f32 %v13730_v50, %v10119_v2  ;;  %v10200_v39 = vld [vmem:[%s9331_s21 + $0x106] sm:$0xff] }
  0x9c   : > { %3141 = vst.msk [vmem:[#allocation2 + $0x88] sm:$0xff] %vm3123_vm0, %v3035_v6  ;;  %3142 = vst.msk [vmem:[#allocation2 + $0x90] sm:$0xff] %vm3123_vm0, %v3036_v53  ;;  %v471_v62 = vmul.f32 %v13730_v50, %v10126_v45  ;;  %v472_v44 = vmul.f32 %v13730_v50, %v10129_v33  ;;  %v473_v60 = vmul.f32 %v13730_v50, %v10132_v30  ;;  %v10213_v6 = vld [vmem:[%s9331_s21 + $0x11e] sm:$0xff] }
  0x9d   : > { %3143 = vst.msk [vmem:[#allocation2 + $0x98] sm:$0xff] %vm3123_vm0, %v3037_v58  ;;  %3144 = vst.msk [vmem:[#allocation2 + $0xa0] sm:$0xff] %vm3123_vm0, %v3038_v56  ;;  %v474_v32 = vmul.f32 %v13730_v50, %v10137_v26  ;;  %v683_v57 = vmul.f32 %v10172_v52, %v573_v36  ;;  %v684_v15 = vmul.f32 %v10172_v52, %v574_v21  ;;  %v10207_v36 = vld [vmem:[%s9331_s21 + $0x10e] sm:$0xff]  ;;  %v10210_v21 = vld [vmem:[%s9331_s21 + $0x116] sm:$0xff] }
  0x9e   : > { %3145 = vst.msk [vmem:[#allocation2 + $0xa8] sm:$0xff] %vm3123_vm0, %v3039_v16  ;;  %3146 = vst.msk [vmem:[#allocation2 + $0xb0] sm:$0xff] %vm3123_vm0, %v3040_v14  ;;  %v685_v7 = vmul.f32 %v10172_v52, %v575_v10  ;;  %v686_v28 = vmul.f32 %v10172_v52, %v576_v12  ;;  %v687_v40 = vmul.f32 %v10172_v52, %v577_v20  ;;  %v10218_v16 = vld [vmem:[%s9331_s21 + $0x126] sm:$0xff]  ;;  %v10223_v14 = vld [vmem:[%s13667_s1 + $0x3] ss:$0 sm:$0xff] }
  0x9f   : > { %v688_v35 = vmul.f32 %v10172_v52, %v578_v47  ;;  %v689_v37 = vmul.f32 %v10172_v52, %v579_v63  ;;  %v788_v42 = vadd.f32 %v683_v57, %v468_v46  ;;  %v789_v17 = vadd.f32 %v684_v15, %v469_v19 }
  0xa0   : > { %v790_v27 = vadd.f32 %v685_v7, %v470_v41  ;;  %v1003_v61 = vmul.f32 %v10190_v38, %v893_v34  ;;  %v791_v9 = vadd.f32 %v686_v28, %v471_v62  ;;  %v792_v23 = vadd.f32 %v687_v40, %v472_v44 }
  0xa1   : > { %v793_v55 = vadd.f32 %v688_v35, %v473_v60  ;;  %v794_v4 = vadd.f32 %v689_v37, %v474_v32  ;;  %v1004_v48 = vmul.f32 %v10190_v38, %v894_v11  ;;  %v1005_v31 = vmul.f32 %v10190_v38, %v895_v59 }
  0xa2   : > { %v1006_v22 = vmul.f32 %v10190_v38, %v896_v51  ;;  %v1007_v25 = vmul.f32 %v10190_v38, %v897_v0  ;;  %v3310_v53 = vld [vmem:[#allocation2 + $0x78] ss:$2 sm:$0xff]  ;;  %v3314_v58 = vld [vmem:[#allocation2 + $0x79] ss:$2 sm:$0xff]  ;;  %v1008_v56 = vmul.f32 %v10190_v38, %v898_v29  ;;  %v1009_v10 = vmul.f32 %v10190_v38, %v899_v49 }
  0xa3   : > { %v1108_v12 = vadd.f32 %v1003_v61, %v788_v42  ;;  %v1323_v46 = vmul.f32 %v10223_v14, %v10194_v13  ;;  %v3312_v19 = vld [vmem:[#allocation2 + $0x88] ss:$2 sm:$0x3f]  ;;  %v3316_v20 = vld [vmem:[#allocation2 + $0x89] ss:$2 sm:$0x3f]  ;;  %v3325_v47 = vmax.f32 %v3310_v53, %v3314_v58  ;;  %v1109_v63 = vadd.f32 %v1004_v48, %v789_v17 }
  0xa4   : > { %v1110_v41 = vadd.f32 %v1005_v31, %v790_v27  ;;  %v1111_v62 = vadd.f32 %v1006_v22, %v791_v9  ;;  %v3318_v44 = vld [vmem:[#allocation2 + $0x96] ss:$2 sm:$0xff]  ;;  %v3326_v34 = vmax.f32 %v3312_v19, %v3316_v20  ;;  %v1112_v32 = vadd.f32 %v1007_v25, %v792_v23  ;;  %v3322_v7 = vld [vmem:[#allocation2 + $0x97] ss:$2 sm:$0xff]  ;;  %v1531_v29 = vld [vmem:[%s9331_s21 + $0xe7] sm:$0xff] }
  0xa5   : > { %v3320_v60 = vld [vmem:[#allocation2 + $0xa6] ss:$2 sm:$0x3f]  ;;  %v1113_v57 = vadd.f32 %v1008_v56, %v793_v55  ;;  %v1114_v15 = vadd.f32 %v1009_v10, %v794_v4  ;;  %v3324_v11 = vld [vmem:[#allocation2 + $0xa7] ss:$2 sm:$0x3f]  ;;  %v1324_v28 = vmul.f32 %v10223_v14, %v10197_v1  ;;  %v1325_v40 = vmul.f32 %v10223_v14, %v10200_v39 }
  0xa6   : > { %v1326_v35 = vmul.f32 %v10223_v14, %v10207_v36  ;;  %v1327_v37 = vmul.f32 %v10223_v14, %v10210_v21  ;;  %v3327_v59 = vmax.f32 %v3318_v44, %v3322_v7  ;;  %v3328_v51 = vmax.f32 %v3320_v60, %v3324_v11  ;;  %v1529_v17 = vld [vmem:[%s9331_s21 + $0xd7] sm:$0xff]  ;;  %v1530_v27 = vld [vmem:[%s9331_s21 + $0xdf] sm:$0xff]  ;;  %v1535_v48 = vld [vmem:[%s9331_s21 + $0x107] sm:$0xff] }
  0xa7   : > { %v1328_v0 = vmul.f32 %v10223_v14, %v10213_v6  ;;  %v1329_v42 = vmul.f32 %v10223_v14, %v10218_v16  ;;  %v1428_v49 = vadd.f32 %v1323_v46, %v1108_v12  ;;  %v1429_v61 = vadd.f32 %v1324_v28, %v1109_v63  ;;  %v1533_v55 = vld [vmem:[%s9331_s21 + $0xf7] sm:$0xff]  ;;  %v1534_v4 = vld [vmem:[%s9331_s21 + $0xff] sm:$0xff]  ;;  %v2072_v28 = vld [vmem:[%s9331_s21 + $0x10c] sm:$0xff] }
  0xa8   : > { %v1430_v9 = vadd.f32 %v1325_v40, %v1110_v41  ;;  %v10242_v23 = vadd.f32 %v1326_v35, %v1111_v62  ;;  %v3329_v31 = vmax.f32 %v3325_v47, %v3327_v59  ;;  %v3330_v22 = vmax.f32 %v3326_v34, %v3328_v51  ;;  %v10256_v56 = vld [vmem:[%s13667_s1 + $0x4] ss:$0 sm:$0xff]  ;;  %v2069_v34 = vld [vmem:[%s9331_s21 + $0xf4] sm:$0xff]  ;;  %v2070_v7 = vld [vmem:[%s9331_s21 + $0xfc] sm:$0xff] }
  0xa9   : > { %v10247_v25 = vadd.f32 %v1327_v37, %v1112_v32  ;;  %v10249_v53 = vadd.f32 %v1328_v0, %v1113_v57  ;;  %v10251_v58 = vadd.f32 %v1329_v42, %v1114_v15  ;;  %v1639_v10 = vmul.f32 %v10256_v56, %v1529_v17  ;;  %v2071_v11 = vld [vmem:[%s9331_s21 + $0x104] sm:$0xff]  ;;  %v2073_v40 = vld [vmem:[%s9331_s21 + $0x114] sm:$0xff]  ;;  %v2074_v59 = vld [vmem:[%s9331_s21 + $0x11c] sm:$0xff] }
  0xaa   : > { %v1640_v12 = vmul.f32 %v10256_v56, %v1530_v27  ;;  %v1641_v46 = vmul.f32 %v10256_v56, %v1531_v29  ;;  %3331 = vst.msk [vmem:[#allocation3 + $0x31] sm:$0xff] %vm3123_vm0, %v3329_v31  ;;  %v1643_v19 = vmul.f32 %v10256_v56, %v1533_v55  ;;  %v1644_v20 = vmul.f32 %v10256_v56, %v1534_v4  ;;  %v2390_v27 = vld [vmem:[%s9331_s21 + $0xfd] sm:$0xff]  ;;  %v2391_v55 = vld [vmem:[%s9331_s21 + $0x105] sm:$0xff]  ;;  %v2392_v4 = vld [vmem:[%s9331_s21 + $0x10d] sm:$0xff] }
  0xab   : > { %3332 = vst.msk [vmem:[#allocation3 + $0x39] sm:$0x3f] %vm3228_vm1, %v3330_v22  ;;  %v1645_v47 = vmul.f32 %v10256_v56, %v1535_v48  ;;  %v1859_v63 = vmul.f32 %v10040_v43, %v10113_v54  ;;  %v1744_v41 = vadd.f32 %v1639_v10, %v10011_v5  ;;  %v1860_v60 = vmul.f32 %v10040_v43, %v10116_v24  ;;  %v2393_v48 = vld [vmem:[%s9331_s21 + $0x115] sm:$0xff] }
  0xac   : > { %v1745_v62 = vadd.f32 %v1640_v12, %v10016_v3  ;;  %v1746_v44 = vadd.f32 %v1641_v46, %v10018_v8  ;;  %v1748_v32 = vadd.f32 %v1643_v19, %v1428_v49  ;;  %v1749_v57 = vadd.f32 %v1644_v20, %v1429_v61  ;;  %v2394_v46 = vld [vmem:[%s9331_s21 + $0x11d] sm:$0xff]  ;;  %v10312_v19 = vld [vmem:[%s13667_s1 + $0x7] ss:$0 sm:$0xff] }
  0xad   : > { %v1750_v15 = vadd.f32 %v1645_v47, %v1430_v9  ;;  %v1861_v54 = vmul.f32 %v10040_v43, %v10119_v2  ;;  %v1862_v5 = vmul.f32 %v10040_v43, %v10126_v45  ;;  %v1863_v8 = vmul.f32 %v10040_v43, %v10129_v33  ;;  %v2075_v45 = vld [vmem:[%s9331_s21 + $0x124] sm:$0xff] }
  0xae   : > { %v1864_v3 = vmul.f32 %v10040_v43, %v10132_v30  ;;  %v1865_v24 = vmul.f32 %v10040_v43, %v10137_v26  ;;  %v1964_v35 = vadd.f32 %v1859_v63, %v1744_v41  ;;  %v1965_v2 = vadd.f32 %v1860_v60, %v1745_v62  ;;  %v10293_v33 = vld [vmem:[%s13667_s1 + $0x6] ss:$0 sm:$0xff]  ;;  %v2389_v26 = vld [vmem:[%s9331_s21 + $0xf5] sm:$0xff] }
  0xaf   : > { %v1966_v37 = vadd.f32 %v1861_v54, %v1746_v44  ;;  %v2179_v30 = vmul.f32 %v10293_v33, %v2069_v34  ;;  %v1967_v51 = vadd.f32 %v1862_v5, %v10035_v18  ;;  %v1968_v0 = vadd.f32 %v1863_v8, %v1748_v32  ;;  %v2395_v44 = vld [vmem:[%s9331_s21 + $0x125] sm:$0xff]  ;;  %v10323_v8 = vld [vmem:[%s9331_s21 + $0x110] sm:$0xff] }
  0xb0   : > { %v1969_v42 = vadd.f32 %v1864_v3, %v1749_v57  ;;  %v1970_v17 = vadd.f32 %v1865_v24, %v1750_v15  ;;  %v2180_v29 = vmul.f32 %v10293_v33, %v2070_v7  ;;  %v2181_v49 = vmul.f32 %v10293_v33, %v2071_v11 }
  0xb1   : > { %v2182_v61 = vmul.f32 %v10293_v33, %v2072_v28  ;;  %v2183_v9 = vmul.f32 %v10293_v33, %v2073_v40  ;;  %v4340_v31 = vld [vmem:[#allocation3 + $0x30] sm:$0xff]  ;;  %v2184_v18 = vmul.f32 %v10293_v33, %v2074_v59  ;;  %v2185_v10 = vmul.f32 %v10293_v33, %v2075_v45  ;;  %v10329_v28 = vld [vmem:[%s13667_s1 + $0x8] ss:$0 sm:$0xff] }
  0xb2   : > { %v4341_v22 = vld [vmem:[#allocation3 + $0x38] sm:$0xff]  ;;  %v2284_v12 = vadd.f32 %v2179_v30, %v1964_v35  ;;  %v2499_v20 = vmul.f32 %v10312_v19, %v2389_v26  ;;  %v2285_v63 = vadd.f32 %v2180_v29, %v1965_v2  ;;  %v2286_v41 = vadd.f32 %v2181_v49, %v1966_v37  ;;  %v10352_v49 = vld [vmem:[%s9331_s21 + $0x128] sm:$0xff] }
  0xb3   : > { %v4366_v47 = vpack.c.bf16 %v4341_v22, %v4340_v31  ;;  %v2287_v62 = vadd.f32 %v2182_v61, %v1967_v51  ;;  %v2288_v60 = vadd.f32 %v2183_v9, %v1968_v0  ;;  %v2289_v34 = vadd.f32 %v2184_v18, %v1969_v42  ;;  %v10359_v9 = vld [vmem:[%s13668_s2] ss:$0 sm:$0xff]  ;;  %v10366_v22 = vld [vmem:[%s9331_s21 + $0x130] sm:$0xff]  ;;  %v10369_v18 = vld [vmem:[%s9331_s21 + $0x138] sm:$0xff] }
  0xb4   : > { %v2290_v32 = vadd.f32 %v2185_v10, %v1970_v17  ;;  %v2500_v57 = vmul.f32 %v10312_v19, %v2390_v27  ;;  %v2501_v15 = vmul.f32 %v10312_v19, %v2391_v55  ;;  %v2502_v54 = vmul.f32 %v10312_v19, %v2392_v4  ;;  %v10346_v27 = vld [vmem:[%s9331_s21 + $0x118] sm:$0xff]  ;;  %13732 = vst [vmem:[#allocation10_spill] sm:$0xff] %v10359_v9  ;;  %v10372_v10 = vld [vmem:[%s9331_s21 + $0x140] sm:$0xff] }
  0xb5   : > { %8530 = vmatprep.mubr.msk.bf16.mxu0 %vm3123_vm0, %v4366_v47  ;;  %v2503_v7 = vmul.f32 %v10312_v19, %v2393_v48  ;;  %v2504_v5 = vmul.f32 %v10312_v19, %v2394_v46  ;;  %v2505_v3 = vmul.f32 %v10312_v19, %v2395_v44  ;;  %v2604_v24 = vadd.f32 %v2499_v20, %v2284_v12  ;;  %v581_v44 = vld [vmem:[%s9331_s21 + $0x119] sm:$0xff] }
  0xb6   : > { %v2605_v11 = vadd.f32 %v2500_v57, %v2285_v63  ;;  %v2719_v40 = vmul.f32 %v10329_v28, %v10194_v13  ;;  %v2606_v35 = vadd.f32 %v2501_v15, %v2286_v41  ;;  %v2607_v2 = vadd.f32 %v2502_v54, %v2287_v62  ;;  %v10380_v41 = vld [vmem:[%s9331_s21 + $0x148] sm:$0xff]  ;;  %v580_v62 = vld [vmem:[%s9331_s21 + $0x111] sm:$0xff] }
  0xb7   : > { %v2608_v37 = vadd.f32 %v2503_v7, %v2288_v60  ;;  %v2609_v59 = vadd.f32 %v2504_v5, %v2289_v34  ;;  %v2610_v45 = vadd.f32 %v2505_v3, %v2290_v32  ;;  %v2720_v30 = vmul.f32 %v10329_v28, %v10197_v1  ;;  %v10349_v1 = vld [vmem:[%s9331_s21 + $0x120] sm:$0xff]  ;;  %v583_v54 = vld [vmem:[%s9331_s21 + $0x129] sm:$0xff]  ;;  %v584_v7 = vld [vmem:[%s9331_s21 + $0x131] sm:$0xff] }
  0xb8   : > { %v2721_v26 = vmul.f32 %v10329_v28, %v10200_v39  ;;  %v2722_v51 = vmul.f32 %v10329_v28, %v10207_v36  ;;  %v2723_v0 = vmul.f32 %v10329_v28, %v10210_v21  ;;  %v2724_v13 = vmul.f32 %v10329_v28, %v10213_v6  ;;  %v582_v15 = vld [vmem:[%s9331_s21 + $0x121] sm:$0xff] }
  0xb9   : > { %v2725_v42 = vmul.f32 %v10329_v28, %v10218_v16  ;;  %v2824_v17 = vadd.f32 %v2719_v40, %v2604_v24  ;;  %v2825_v39 = vadd.f32 %v2720_v30, %v2605_v11  ;;  %v475_v21 = vmul.f32 %v13730_v50, %v10323_v8  ;;  %v585_v40 = vld [vmem:[%s9331_s21 + $0x139] sm:$0xff] }
  0xba   : > { %v2826_v29 = vadd.f32 %v2721_v26, %v2606_v35  ;;  %v2827_v36 = vadd.f32 %v2722_v51, %v2607_v2  ;;  %v2828_v6 = vadd.f32 %v2723_v0, %v2608_v37  ;;  %v2829_v61 = vadd.f32 %v2724_v13, %v2609_v59  ;;  %v586_v35 = vld [vmem:[%s9331_s21 + $0x141] sm:$0xff]  ;;  %v587_v2 = vld [vmem:[%s9331_s21 + $0x149] sm:$0xff]  ;;  %v900_v26 = vld [vmem:[%s9331_s21 + $0x112] sm:$0xff] }
  0xbb   : > { %v2830_v16 = vadd.f32 %v2725_v42, %v2610_v45  ;;  %v2936_v55 = vadd.f32 %v10359_v9, %v2824_v17  ;;  %v2937_v4 = vadd.f32 %v10359_v9, %v2825_v39  ;;  %v476_v12 = vmul.f32 %v13730_v50, %v10346_v27  ;;  %v901_v51 = vld [vmem:[%s9331_s21 + $0x11a] sm:$0xff]  ;;  %v902_v0 = vld [vmem:[%s9331_s21 + $0x122] sm:$0xff]  ;;  %v903_v13 = vld [vmem:[%s9331_s21 + $0x12a] sm:$0xff] }
  0xbc   : > { %v2938_v48 = vadd.f32 %v10359_v9, %v2826_v29  ;;  %v2939_v31 = vadd.f32 %v10359_v9, %v2827_v36  ;;  %v2940_v46 = vadd.f32 %v10359_v9, %v2828_v6  ;;  %v2941_v20 = vadd.f32 %v10359_v9, %v2829_v61  ;;  %v904_v36 = vld [vmem:[%s9331_s21 + $0x132] sm:$0xff]  ;;  %v906_v6 = vld [vmem:[%s9331_s21 + $0x142] sm:$0xff]  ;;  %v907_v61 = vld [vmem:[%s9331_s21 + $0x14a] sm:$0xff] }
  0xbd   : > { %v2942_v47 = vadd.f32 %v10359_v9, %v2830_v16  ;;  %v3041_v63 = vmax.f32 %v2936_v55, 0.0  ;;  %v3042_v60 = vmax.f32 %v2937_v4, 0.0  ;;  %v477_v57 = vmul.f32 %v13730_v50, %v10349_v1 }
  0xbe   : > { %v3043_v34 = vmax.f32 %v2938_v48, 0.0  ;;  %v3044_v32 = vmax.f32 %v2939_v31, 0.0  ;;  %v3045_v5 = vmax.f32 %v2940_v46, 0.0  ;;  %v3046_v3 = vmax.f32 %v2941_v20, 0.0 }
  0xbf   : > { %v3047_v24 = vmax.f32 %v2942_v47, 0.0  ;;  %3147 = vst.msk [vmem:[#allocation2 + $0xb8] sm:$0xff] %vm3123_vm0, %v3041_v63  ;;  %v478_v11 = vmul.f32 %v13730_v50, %v10352_v49  ;;  %3148 = vst.msk [vmem:[#allocation2 + $0xc0] sm:$0xff] %vm3123_vm0, %v3042_v60  ;;  %v479_v37 = vmul.f32 %v13730_v50, %v10366_v22  ;;  %v480_v59 = vmul.f32 %v13730_v50, %v10369_v18 }
  0xc0   : > { %3149 = vst.msk [vmem:[#allocation2 + $0xc8] sm:$0xff] %vm3123_vm0, %v3043_v34  ;;  %3150 = vst.msk [vmem:[#allocation2 + $0xd0] sm:$0xff] %vm3123_vm0, %v3044_v32  ;;  %v481_v45 = vmul.f32 %v13730_v50, %v10372_v10  ;;  %v482_v30 = vmul.f32 %v13730_v50, %v10380_v41  ;;  %v690_v42 = vmul.f32 %v10172_v52, %v580_v62  ;;  %v905_v50 = vld [vmem:[%s9331_s21 + $0x13a] sm:$0xff] }
  0xc1   : > { %3151 = vst.msk [vmem:[#allocation2 + $0xd8] sm:$0xff] %vm3123_vm0, %v3045_v5  ;;  %3152 = vst.msk [vmem:[#allocation2 + $0xe0] sm:$0xff] %vm3123_vm0, %v3046_v3  ;;  %v691_v17 = vmul.f32 %v10172_v52, %v581_v44  ;;  %v692_v39 = vmul.f32 %v10172_v52, %v582_v15  ;;  %v693_v29 = vmul.f32 %v10172_v52, %v583_v54 }
  0xc2   : > { %3153 = vst.msk [vmem:[#allocation2 + $0xe8] sm:$0xff] %vm3123_vm0, %v3047_v24  ;;  %v694_v16 = vmul.f32 %v10172_v52, %v584_v7  ;;  %v695_v55 = vmul.f32 %v10172_v52, %v585_v40  ;;  %v696_v4 = vmul.f32 %v10172_v52, %v586_v35  ;;  %v697_v48 = vmul.f32 %v10172_v52, %v587_v2  ;;  %v10430_v52 = vld [vmem:[%s9331_s21 + $0x12e] sm:$0xff]  ;;  %v10443_v24 = vld [vmem:[%s9331_s21 + $0x146] sm:$0xff]  ;;  %v10449_v40 = vld [vmem:[%s9331_s21 + $0x156] sm:$0xff] }
  0xc3   : > { %v795_v31 = vadd.f32 %v690_v42, %v475_v21  ;;  %v796_v46 = vadd.f32 %v691_v17, %v476_v12  ;;  %v797_v20 = vadd.f32 %v692_v39, %v477_v57  ;;  %v798_v47 = vadd.f32 %v693_v29, %v478_v11  ;;  %v10433_v21 = vld [vmem:[%s9331_s21 + $0x136] sm:$0xff]  ;;  %v10436_v12 = vld [vmem:[%s9331_s21 + $0x13e] sm:$0xff]  ;;  %v10446_v11 = vld [vmem:[%s9331_s21 + $0x14e] sm:$0xff] }
  0xc4   : > { %v799_v63 = vadd.f32 %v694_v16, %v479_v37  ;;  %v800_v62 = vadd.f32 %v695_v55, %v480_v59  ;;  %v801_v44 = vadd.f32 %v696_v4, %v481_v45  ;;  %v802_v60 = vadd.f32 %v697_v48, %v482_v30  ;;  %v10455_v29 = vld [vmem:[%s9331_s21 + $0x166] sm:$0xff] }
  0xc5   : > { %v1010_v34 = vmul.f32 %v10190_v38, %v900_v26  ;;  %v1011_v32 = vmul.f32 %v10190_v38, %v901_v51  ;;  %v1012_v15 = vmul.f32 %v10190_v38, %v902_v0  ;;  %v1013_v54 = vmul.f32 %v10190_v38, %v903_v13  ;;  %v10452_v26 = vld [vmem:[%s9331_s21 + $0x15e] sm:$0xff] }
  0xc6   : > { %v1014_v57 = vmul.f32 %v10190_v38, %v904_v36  ;;  %v1015_v7 = vmul.f32 %v10190_v38, %v905_v50  ;;  %v1016_v5 = vmul.f32 %v10190_v38, %v906_v6  ;;  %v1017_v3 = vmul.f32 %v10190_v38, %v907_v61  ;;  %v3334_v35 = vld [vmem:[#allocation2 + $0xb4] ss:$2 sm:$0xff]  ;;  %v3338_v51 = vld [vmem:[#allocation2 + $0xb5] ss:$2 sm:$0xff] }
  0xc7   : > { %v3336_v2 = vld [vmem:[#allocation2 + $0xc4] ss:$2 sm:$0x3f]  ;;  %v1115_v37 = vadd.f32 %v1010_v34, %v795_v31  ;;  %v1116_v59 = vadd.f32 %v1011_v32, %v796_v46  ;;  %v1117_v45 = vadd.f32 %v1012_v15, %v797_v20  ;;  %v1118_v30 = vadd.f32 %v1013_v54, %v798_v47  ;;  %v3340_v0 = vld [vmem:[#allocation2 + $0xc5] ss:$2 sm:$0x3f] }
  0xc8   : > { %v1119_v13 = vadd.f32 %v1014_v57, %v799_v63  ;;  %v1120_v42 = vadd.f32 %v1015_v7, %v800_v62  ;;  %v1121_v17 = vadd.f32 %v1016_v5, %v801_v44  ;;  %v1122_v39 = vadd.f32 %v1017_v3, %v802_v60  ;;  %v3342_v36 = vld [vmem:[#allocation2 + $0xd2] ss:$2 sm:$0xff]  ;;  %v3346_v4 = vld [vmem:[#allocation2 + $0xd3] ss:$2 sm:$0xff]  ;;  %v1539_v3 = vld [vmem:[%s9331_s21 + $0x127] sm:$0xff] }
  0xc9   : > { %v3344_v50 = vld [vmem:[#allocation2 + $0xe2] ss:$2 sm:$0x3f]  ;;  %v3349_v6 = vmax.f32 %v3334_v35, %v3338_v51  ;;  %v3350_v61 = vmax.f32 %v3336_v2, %v3340_v0  ;;  %v1330_v16 = vmul.f32 %v10223_v14, %v10430_v52  ;;  %v1331_v55 = vmul.f32 %v10223_v14, %v10433_v21  ;;  %v3348_v48 = vld [vmem:[#allocation2 + $0xe3] ss:$2 sm:$0x3f] }
  0xca   : > { %v1332_v31 = vmul.f32 %v10223_v14, %v10436_v12  ;;  %v1333_v46 = vmul.f32 %v10223_v14, %v10443_v24  ;;  %v1334_v20 = vmul.f32 %v10223_v14, %v10446_v11  ;;  %v1335_v47 = vmul.f32 %v10223_v14, %v10449_v40  ;;  %v1536_v34 = vld [vmem:[%s9331_s21 + $0x10f] sm:$0xff]  ;;  %v1537_v32 = vld [vmem:[%s9331_s21 + $0x117] sm:$0xff]  ;;  %v1538_v15 = vld [vmem:[%s9331_s21 + $0x11f] sm:$0xff] }
  0xcb   : > { %v3351_v63 = vmax.f32 %v3342_v36, %v3346_v4  ;;  %v3352_v62 = vmax.f32 %v3344_v50, %v3348_v48  ;;  %v1336_v44 = vmul.f32 %v10223_v14, %v10452_v26  ;;  %v1337_v60 = vmul.f32 %v10223_v14, %v10455_v29  ;;  %v1540_v35 = vld [vmem:[%s9331_s21 + $0x12f] sm:$0xff]  ;;  %v1541_v2 = vld [vmem:[%s9331_s21 + $0x137] sm:$0xff]  ;;  %v1542_v4 = vld [vmem:[%s9331_s21 + $0x13f] sm:$0xff] }
  0xcc   : > { %v1435_v54 = vadd.f32 %v1330_v16, %v1115_v37  ;;  %v1436_v57 = vadd.f32 %v1331_v55, %v1116_v59  ;;  %v1437_v7 = vadd.f32 %v1332_v31, %v1117_v45  ;;  %v1438_v5 = vadd.f32 %v1333_v46, %v1118_v30  ;;  %v1543_v14 = vld [vmem:[%s9331_s21 + $0x147] sm:$0xff] }
  0xcd   : > { %v3353_v51 = vmax.f32 %v3349_v6, %v3351_v63  ;;  %v3354_v0 = vmax.f32 %v3350_v61, %v3352_v62  ;;  %v10479_v36 = vadd.f32 %v1334_v20, %v1119_v13  ;;  %v10481_v50 = vadd.f32 %v1335_v47, %v1120_v42  ;;  %v1547_v48 = vld [vmem:[%s9331_s21 + $0x167] sm:$0xff] }
  0xce   : > { %v10486_v38 = vadd.f32 %v1336_v44, %v1121_v17  ;;  %v1442_v9 = vadd.f32 %v1337_v60, %v1122_v39  ;;  %v1646_v37 = vmul.f32 %v10256_v56, %v1536_v34  ;;  %v1647_v59 = vmul.f32 %v10256_v56, %v1537_v32  ;;  %v2076_v44 = vld [vmem:[%s9331_s21 + $0x12c] sm:$0xff]  ;;  %v2078_v34 = vld [vmem:[%s9331_s21 + $0x13c] sm:$0xff]  ;;  %v2079_v32 = vld [vmem:[%s9331_s21 + $0x144] sm:$0xff] }
  0xcf   : > { %3355 = vst.msk [vmem:[#allocation3 + $0x41] sm:$0xff] %vm3123_vm0, %v3353_v51  ;;  %v1648_v45 = vmul.f32 %v10256_v56, %v1538_v15  ;;  %v1649_v30 = vmul.f32 %v10256_v56, %v1539_v3  ;;  %v1650_v13 = vmul.f32 %v10256_v56, %v1540_v35  ;;  %v1651_v42 = vmul.f32 %v10256_v56, %v1541_v2  ;;  %v2083_v35 = vld [vmem:[%s9331_s21 + $0x164] sm:$0xff] }
  0xd0   : > { %3356 = vst.msk [vmem:[#allocation3 + $0x49] sm:$0x3f] %vm3228_vm1, %v3354_v0  ;;  %v1652_v17 = vmul.f32 %v10256_v56, %v1542_v4  ;;  %v1653_v39 = vmul.f32 %v10256_v56, %v1543_v14  ;;  %v1657_v6 = vmul.f32 %v10256_v56, %v1547_v48  ;;  %v1751_v61 = vadd.f32 %v1646_v37, %v10242_v23  ;;  %v2396_v14 = vld [vmem:[%s9331_s21 + $0x12d] sm:$0xff] }
  0xd1   : > { %v1752_v16 = vadd.f32 %v1647_v59, %v10247_v25  ;;  %v1753_v55 = vadd.f32 %v1648_v45, %v10249_v53  ;;  %v1754_v31 = vadd.f32 %v1649_v30, %v10251_v58  ;;  %v1755_v46 = vadd.f32 %v1650_v13, %v1435_v54  ;;  %v2397_v30 = vld [vmem:[%s9331_s21 + $0x135] sm:$0xff]  ;;  %v2398_v13 = vld [vmem:[%s9331_s21 + $0x13d] sm:$0xff] }
  0xd2   : > { %v1756_v20 = vadd.f32 %v1651_v42, %v1436_v57  ;;  %v1757_v47 = vadd.f32 %v1652_v17, %v1437_v7  ;;  %v1758_v63 = vadd.f32 %v1653_v39, %v1438_v5  ;;  %v10503_v62 = vadd.f32 %v1657_v6, %v1442_v9  ;;  %v2080_v57 = vld [vmem:[%s9331_s21 + $0x14c] sm:$0xff]  ;;  %v2082_v7 = vld [vmem:[%s9331_s21 + $0x15c] sm:$0xff] }
  0xd3   : > { %v1866_v23 = vmul.f32 %v10040_v43, %v10323_v8  ;;  %v1867_v25 = vmul.f32 %v10040_v43, %v10346_v27  ;;  %v1868_v53 = vmul.f32 %v10040_v43, %v10349_v1  ;;  %v1869_v58 = vmul.f32 %v10040_v43, %v10352_v49  ;;  %v2077_v27 = vld [vmem:[%s9331_s21 + $0x134] sm:$0xff]  ;;  %v2399_v42 = vld [vmem:[%s9331_s21 + $0x145] sm:$0xff] }
  0xd4   : > { %v1870_v56 = vmul.f32 %v10040_v43, %v10366_v22  ;;  %v1871_v9 = vmul.f32 %v10040_v43, %v10369_v18  ;;  %v1872_v8 = vmul.f32 %v10040_v43, %v10372_v10  ;;  %v1873_v60 = vmul.f32 %v10040_v43, %v10380_v41  ;;  %v2081_v22 = vld [vmem:[%s9331_s21 + $0x154] sm:$0xff] }
  0xd5   : > { %v1971_v1 = vadd.f32 %v1866_v23, %v1751_v61  ;;  %v1972_v15 = vadd.f32 %v1867_v25, %v1752_v16  ;;  %v1973_v54 = vadd.f32 %v1868_v53, %v1753_v55  ;;  %v1974_v49 = vadd.f32 %v1869_v58, %v1754_v31  ;;  %v2400_v16 = vld [vmem:[%s9331_s21 + $0x14d] sm:$0xff]  ;;  %v2401_v55 = vld [vmem:[%s9331_s21 + $0x155] sm:$0xff]  ;;  %v2402_v31 = vld [vmem:[%s9331_s21 + $0x15d] sm:$0xff] }
  0xd6   : > { %v4342_v5 = vld [vmem:[#allocation3 + $0x40] sm:$0xff]  ;;  %v1975_v10 = vadd.f32 %v1870_v56, %v1755_v46  ;;  %v1976_v3 = vadd.f32 %v1871_v9, %v1756_v20  ;;  %v1977_v43 = vadd.f32 %v1872_v8, %v1757_v47  ;;  %v1978_v41 = vadd.f32 %v1873_v60, %v1758_v63 }
  0xd7   : > { %v4343_v18 = vld [vmem:[#allocation3 + $0x48] sm:$0xff]  ;;  %v2186_v51 = vmul.f32 %v10293_v33, %v2076_v44  ;;  %v2187_v0 = vmul.f32 %v10293_v33, %v2077_v27  ;;  %v2188_v4 = vmul.f32 %v10293_v33, %v2078_v34  ;;  %v2189_v48 = vmul.f32 %v10293_v33, %v2079_v32  ;;  %v2403_v44 = vld [vmem:[%s9331_s21 + $0x165] sm:$0xff] }
  0xd8   : > { %v4367_v2 = vpack.c.bf16 %v4343_v18, %v4342_v5  ;;  %v2190_v37 = vmul.f32 %v10293_v33, %v2080_v57  ;;  %v2191_v59 = vmul.f32 %v10293_v33, %v2081_v22  ;;  %v2192_v45 = vmul.f32 %v10293_v33, %v2082_v7 }
  0xd9   : > { %v2193_v17 = vmul.f32 %v10293_v33, %v2083_v35  ;;  %v2291_v39 = vadd.f32 %v2186_v51, %v1971_v1  ;;  %v2292_v6 = vadd.f32 %v2187_v0, %v1972_v15  ;;  %v2293_v61 = vadd.f32 %v2188_v4, %v1973_v54 }
  0xda   : > { %8531 = vmatmul.mubr.msk.bf16.gmra.mrb[4].mxu0 %vm3123_vm0, %v4367_v2  ;;  %v2294_v46 = vadd.f32 %v2189_v48, %v1974_v49  ;;  %v2295_v20 = vadd.f32 %v2190_v37, %v1975_v10  ;;  %v2296_v47 = vadd.f32 %v2191_v59, %v1976_v3  ;;  %v2297_v63 = vadd.f32 %v2192_v45, %v1977_v43  ;;  %v10571_v2 = vld [vmem:[%s9331_s21 + $0x150] sm:$0xff]  ;;  %v10589_v37 = vld [vmem:[%s9331_s21 + $0x178] sm:$0xff]  ;;  %v10592_v59 = vld [vmem:[%s9331_s21 + $0x180] sm:$0xff] }
  0xdb   : > { %v2298_v23 = vadd.f32 %v2193_v17, %v1978_v41  ;;  %v2506_v25 = vmul.f32 %v10312_v19, %v2396_v14  ;;  %v2507_v53 = vmul.f32 %v10312_v19, %v2397_v30  ;;  %v2508_v58 = vmul.f32 %v10312_v19, %v2398_v13  ;;  %v10583_v14 = vld [vmem:[%s9331_s21 + $0x168] sm:$0xff]  ;;  %v10586_v48 = vld [vmem:[%s9331_s21 + $0x170] sm:$0xff] }
  0xdc   : > { %v2509_v33 = vmul.f32 %v10312_v19, %v2399_v42  ;;  %v2510_v56 = vmul.f32 %v10312_v19, %v2400_v16  ;;  %v2511_v9 = vmul.f32 %v10312_v19, %v2401_v55  ;;  %v2512_v8 = vmul.f32 %v10312_v19, %v2402_v31  ;;  %v588_v17 = vld [vmem:[%s9331_s21 + $0x151] sm:$0xff] }
  0xdd   : > { %v2513_v60 = vmul.f32 %v10312_v19, %v2403_v44  ;;  %v2611_v27 = vadd.f32 %v2506_v25, %v2291_v39  ;;  %v2612_v34 = vadd.f32 %v2507_v53, %v2292_v6  ;;  %v2613_v32 = vadd.f32 %v2508_v58, %v2293_v61  ;;  %v589_v39 = vld [vmem:[%s9331_s21 + $0x159] sm:$0xff]  ;;  %v590_v6 = vld [vmem:[%s9331_s21 + $0x161] sm:$0xff]  ;;  %v591_v61 = vld [vmem:[%s9331_s21 + $0x169] sm:$0xff] }
  0xde   : > { %v2614_v1 = vadd.f32 %v2509_v33, %v2294_v46  ;;  %v2615_v15 = vadd.f32 %v2510_v56, %v2295_v20  ;;  %v2616_v54 = vadd.f32 %v2511_v9, %v2296_v47  ;;  %v2617_v49 = vadd.f32 %v2512_v8, %v2297_v63  ;;  %v592_v20 = vld [vmem:[%s9331_s21 + $0x171] sm:$0xff]  ;;  %v593_v47 = vld [vmem:[%s9331_s21 + $0x179] sm:$0xff]  ;;  %v594_v63 = vld [vmem:[%s9331_s21 + $0x181] sm:$0xff] }
  0xdf   : > { %v2618_v57 = vadd.f32 %v2513_v60, %v2298_v23  ;;  %v2726_v22 = vmul.f32 %v10329_v28, %v10430_v52  ;;  %v2727_v7 = vmul.f32 %v10329_v28, %v10433_v21  ;;  %v2728_v19 = vmul.f32 %v10329_v28, %v10436_v12  ;;  %v908_v44 = vld [vmem:[%s9331_s21 + $0x152] sm:$0xff]  ;;  %v10613_v56 = vld [vmem:[%s13667_s1] ss:$0 sm:$0xff] }
  0xe0   : > { %v2729_v5 = vmul.f32 %v10329_v28, %v10443_v24  ;;  %v2730_v18 = vmul.f32 %v10329_v28, %v10446_v11  ;;  %v2731_v10 = vmul.f32 %v10329_v28, %v10449_v40  ;;  %v2732_v52 = vmul.f32 %v10329_v28, %v10452_v26  ;;  %v10574_v40 = vld [vmem:[%s9331_s21 + $0x158] sm:$0xff]  ;;  %v10577_v26 = vld [vmem:[%s9331_s21 + $0x160] sm:$0xff] }
  0xe1   : > { %v2733_v21 = vmul.f32 %v10329_v28, %v10455_v29  ;;  %v2831_v3 = vadd.f32 %v2726_v22, %v2611_v27  ;;  %v2832_v12 = vadd.f32 %v2727_v7, %v2612_v34  ;;  %v2833_v43 = vadd.f32 %v2728_v19, %v2613_v32  ;;  %v13733_v29 = vld [vmem:[#allocation10_spill] sm:$0xff] }
  0xe2   : > { %v2834_v24 = vadd.f32 %v2729_v5, %v2614_v1  ;;  %v2835_v41 = vadd.f32 %v2730_v18, %v2615_v15  ;;  %v2836_v35 = vadd.f32 %v2731_v10, %v2616_v54  ;;  %v2837_v11 = vadd.f32 %v2732_v52, %v2617_v49  ;;  %v909_v27 = vld [vmem:[%s9331_s21 + $0x15a] sm:$0xff]  ;;  %v910_v54 = vld [vmem:[%s9331_s21 + $0x162] sm:$0xff]  ;;  %v911_v52 = vld [vmem:[%s9331_s21 + $0x16a] sm:$0xff] }
  0xe3   : > { %v2838_v28 = vadd.f32 %v2733_v21, %v2618_v57  ;;  %v2943_v51 = vadd.f32 %v13733_v29, %v2831_v3  ;;  %v2944_v0 = vadd.f32 %v13733_v29, %v2832_v12  ;;  %v2945_v4 = vadd.f32 %v13733_v29, %v2833_v43  ;;  %v10639_v49 = vld [vmem:[%s13667_s1 + $0x1] ss:$0 sm:$0xff]  ;;  %v912_v21 = vld [vmem:[%s9331_s21 + $0x172] sm:$0xff] }
  0xe4   : > { %v2946_v45 = vadd.f32 %v13733_v29, %v2834_v24  ;;  %v2947_v30 = vadd.f32 %v13733_v29, %v2835_v41  ;;  %v2948_v13 = vadd.f32 %v13733_v29, %v2836_v35  ;;  %v2949_v42 = vadd.f32 %v13733_v29, %v2837_v11  ;;  %v913_v3 = vld [vmem:[%s9331_s21 + $0x17a] sm:$0xff] }
  0xe5   : > { %v2950_v16 = vadd.f32 %v13733_v29, %v2838_v28  ;;  %v3048_v55 = vmax.f32 %v2943_v51, 0.0  ;;  %v3049_v31 = vmax.f32 %v2944_v0, 0.0  ;;  %v3050_v46 = vmax.f32 %v2945_v4, 0.0  ;;  %v13734_v12 = vld [vmem:[#allocation9_spill] sm:$0xff]  ;;  %v914_v28 = vld [vmem:[%s9331_s21 + $0x182] sm:$0xff]  ;;  %v10654_v29 = vld [vmem:[%s9331_s21 + $0x16e] sm:$0xff] }
  0xe6   : > { %v3051_v23 = vmax.f32 %v2946_v45, 0.0  ;;  %v3052_v25 = vmax.f32 %v2947_v30, 0.0  ;;  %v3053_v53 = vmax.f32 %v2948_v13, 0.0  ;;  %v3054_v58 = vmax.f32 %v2949_v42, 0.0  ;;  %v10657_v51 = vld [vmem:[%s9331_s21 + $0x176] sm:$0xff]  ;;  %v10666_v42 = vld [vmem:[%s9331_s21 + $0x17e] sm:$0xff] }
  0xe7   : > { %v3055_v33 = vmax.f32 %v2950_v16, 0.0  ;;  %3154 = vst.msk [vmem:[#allocation2 + $0xf0] sm:$0xff] %vm3123_vm0, %v3048_v55  ;;  %3155 = vst.msk [vmem:[#allocation2 + $0xf8] sm:$0xff] %vm3123_vm0, %v3049_v31  ;;  %v483_v9 = vmul.f32 %v10613_v56, %v10571_v2  ;;  %v484_v8 = vmul.f32 %v10613_v56, %v10574_v40  ;;  %v485_v60 = vmul.f32 %v10613_v56, %v10577_v26  ;;  %v10662_v30 = vld [vmem:[%s13667_s1 + $0x2] ss:$0 sm:$0xff]  ;;  %v10679_v31 = vld [vmem:[%s9331_s21 + $0x196] sm:$0xff] }
  0xe8   : > { %3156 = vst.msk [vmem:[#allocation2 + $0x100] sm:$0xff] %vm3123_vm0, %v3050_v46  ;;  %3157 = vst.msk [vmem:[#allocation2 + $0x108] sm:$0xff] %vm3123_vm0, %v3051_v23  ;;  %v486_v34 = vmul.f32 %v10613_v56, %v10583_v14  ;;  %v487_v32 = vmul.f32 %v10613_v56, %v10586_v48  ;;  %v488_v1 = vmul.f32 %v10613_v56, %v10589_v37  ;;  %v10682_v46 = vld [vmem:[%s9331_s21 + $0x19e] sm:$0xff] }
  0xe9   : > { %3158 = vst.msk [vmem:[#allocation2 + $0x110] sm:$0xff] %vm3123_vm0, %v3052_v25  ;;  %3159 = vst.msk [vmem:[#allocation2 + $0x118] sm:$0xff] %vm3123_vm0, %v3053_v53  ;;  %v489_v15 = vmul.f32 %v10613_v56, %v10592_v59  ;;  %v698_v57 = vmul.f32 %v10639_v49, %v588_v17  ;;  %v699_v22 = vmul.f32 %v10639_v49, %v589_v39  ;;  %v10669_v17 = vld [vmem:[%s9331_s21 + $0x186] sm:$0xff]  ;;  %v10672_v39 = vld [vmem:[%s9331_s21 + $0x18e] sm:$0xff] }
  0xea   : > { %3160 = vst.msk [vmem:[#allocation2 + $0x120] sm:$0xff] %vm3123_vm0, %v3054_v58  ;;  %3161 = vst.msk [vmem:[#allocation2 + $0x128] sm:$0xff] %vm3123_vm0, %v3055_v33  ;;  %v700_v7 = vmul.f32 %v10639_v49, %v590_v6  ;;  %v701_v19 = vmul.f32 %v10639_v49, %v591_v61  ;;  %v702_v5 = vmul.f32 %v10639_v49, %v592_v20  ;;  %v10688_v25 = vld [vmem:[%s13667_s1 + $0x3] ss:$0 sm:$0xff] }
  0xeb   : > { %v703_v18 = vmul.f32 %v10639_v49, %v593_v47  ;;  %v704_v10 = vmul.f32 %v10639_v49, %v594_v63  ;;  %v1018_v43 = vmul.f32 %v13734_v12, %v908_v44  ;;  %v803_v24 = vadd.f32 %v698_v57, %v483_v9 }
  0xec   : > { %v804_v41 = vadd.f32 %v699_v22, %v484_v8  ;;  %v805_v35 = vadd.f32 %v700_v7, %v485_v60  ;;  %v806_v11 = vadd.f32 %v701_v19, %v486_v34  ;;  %v807_v0 = vadd.f32 %v702_v5, %v487_v32 }
  0xed   : > { %v808_v4 = vadd.f32 %v703_v18, %v488_v1  ;;  %v809_v45 = vadd.f32 %v704_v10, %v489_v15  ;;  %v1019_v13 = vmul.f32 %v10662_v30, %v909_v27  ;;  %v1020_v6 = vmul.f32 %v10662_v30, %v910_v54 }
  0xee   : > { %v1021_v61 = vmul.f32 %v10662_v30, %v911_v52  ;;  %v1022_v16 = vmul.f32 %v10662_v30, %v912_v21  ;;  %v1023_v55 = vmul.f32 %v10662_v30, %v913_v3  ;;  %v3358_v20 = vld [vmem:[#allocation2 + $0xf0] ss:$2 sm:$0xff]  ;;  %v3362_v47 = vld [vmem:[#allocation2 + $0xf1] ss:$2 sm:$0xff]  ;;  %v1024_v63 = vmul.f32 %v10662_v30, %v914_v28 }
  0xef   : > { %v1123_v44 = vadd.f32 %v1018_v43, %v803_v24  ;;  %v1124_v23 = vadd.f32 %v1019_v13, %v804_v41  ;;  %v1338_v53 = vmul.f32 %v10688_v25, %v10654_v29  ;;  %v3360_v58 = vld [vmem:[#allocation2 + $0x100] ss:$2 sm:$0x3f]  ;;  %v3364_v33 = vld [vmem:[#allocation2 + $0x101] ss:$2 sm:$0x3f]  ;;  %v3373_v9 = vmax.f32 %v3358_v20, %v3362_v47 }
  0xf0   : > { %v1125_v8 = vadd.f32 %v1020_v6, %v805_v35  ;;  %v1126_v60 = vadd.f32 %v1021_v61, %v806_v11  ;;  %v1127_v27 = vadd.f32 %v1022_v16, %v807_v0  ;;  %v3366_v34 = vld [vmem:[#allocation2 + $0x10e] ss:$2 sm:$0xff]  ;;  %v3374_v1 = vmax.f32 %v3360_v58, %v3364_v33  ;;  %v3370_v22 = vld [vmem:[#allocation2 + $0x10f] ss:$2 sm:$0xff]  ;;  %v1546_v41 = vld [vmem:[%s9331_s21 + $0x15f] sm:$0xff] }
  0xf1   : > { %v3368_v32 = vld [vmem:[#allocation2 + $0x11e] ss:$2 sm:$0x3f]  ;;  %v1128_v15 = vadd.f32 %v1023_v55, %v808_v4  ;;  %v1129_v54 = vadd.f32 %v1024_v63, %v809_v45  ;;  %v1339_v57 = vmul.f32 %v10688_v25, %v10657_v51  ;;  %v3372_v7 = vld [vmem:[#allocation2 + $0x11f] ss:$2 sm:$0x3f]  ;;  %v1340_v19 = vmul.f32 %v10688_v25, %v10666_v42 }
  0xf2   : > { %v1341_v5 = vmul.f32 %v10688_v25, %v10669_v17  ;;  %v1342_v18 = vmul.f32 %v10688_v25, %v10672_v39  ;;  %v1343_v10 = vmul.f32 %v10688_v25, %v10679_v31  ;;  %v1544_v52 = vld [vmem:[%s9331_s21 + $0x14f] sm:$0xff]  ;;  %v3375_v21 = vmax.f32 %v3366_v34, %v3370_v22  ;;  %v1545_v24 = vld [vmem:[%s9331_s21 + $0x157] sm:$0xff]  ;;  %v1550_v13 = vld [vmem:[%s9331_s21 + $0x17f] sm:$0xff] }
  0xf3   : > { %v3376_v3 = vmax.f32 %v3368_v32, %v3372_v7  ;;  %v1344_v12 = vmul.f32 %v10688_v25, %v10682_v46  ;;  %v1443_v43 = vadd.f32 %v1338_v53, %v1123_v44  ;;  %v1548_v35 = vld [vmem:[%s9331_s21 + $0x16f] sm:$0xff]  ;;  %v1444_v11 = vadd.f32 %v1339_v57, %v1124_v23  ;;  %v1549_v45 = vld [vmem:[%s9331_s21 + $0x177] sm:$0xff]  ;;  %v10721_v20 = vld [vmem:[%s13667_s1 + $0x4] ss:$0 sm:$0xff] }
  0xf4   : > { %v1445_v28 = vadd.f32 %v1340_v19, %v1125_v8  ;;  %v10708_v0 = vadd.f32 %v1341_v5, %v1126_v60  ;;  %v10710_v4 = vadd.f32 %v1342_v18, %v1127_v27  ;;  %v3377_v6 = vmax.f32 %v3373_v9, %v3375_v21  ;;  %v2084_v53 = vld [vmem:[%s9331_s21 + $0x16c] sm:$0xff]  ;;  %v10735_v9 = vld [vmem:[%s13667_s1 + $0x5] ss:$0 sm:$0xff]  ;;  %v2085_v27 = vld [vmem:[%s9331_s21 + $0x174] sm:$0xff] }
  0xf5   : > { %v3378_v61 = vmax.f32 %v3374_v1, %v3376_v3  ;;  %v10714_v16 = vadd.f32 %v1343_v10, %v1128_v15  ;;  %v10716_v55 = vadd.f32 %v1344_v12, %v1129_v54  ;;  %v1654_v47 = vmul.f32 %v10721_v20, %v1544_v52  ;;  %v2086_v54 = vld [vmem:[%s9331_s21 + $0x17c] sm:$0xff]  ;;  %v2087_v57 = vld [vmem:[%s9331_s21 + $0x184] sm:$0xff]  ;;  %v2088_v22 = vld [vmem:[%s9331_s21 + $0x18c] sm:$0xff] }
  0xf6   : > { %v1655_v63 = vmul.f32 %v10721_v20, %v1545_v24  ;;  %v1656_v44 = vmul.f32 %v10721_v20, %v1546_v41  ;;  %v1658_v23 = vmul.f32 %v10721_v20, %v1548_v35  ;;  %3379 = vst.msk [vmem:[#allocation3 + $0x51] sm:$0xff] %vm3123_vm0, %v3377_v6  ;;  %v1659_v58 = vmul.f32 %v10721_v20, %v1549_v45  ;;  %v2089_v7 = vld [vmem:[%s9331_s21 + $0x194] sm:$0xff]  ;;  %v2407_v35 = vld [vmem:[%s9331_s21 + $0x185] sm:$0xff] }
  0xf7   : > { %3380 = vst.msk [vmem:[#allocation3 + $0x59] sm:$0x3f] %vm3228_vm1, %v3378_v61  ;;  %v1660_v33 = vmul.f32 %v10721_v20, %v1550_v13  ;;  %v1874_v8 = vmul.f32 %v10735_v9, %v10571_v2  ;;  %v1875_v60 = vmul.f32 %v10735_v9, %v10574_v40  ;;  %v1759_v34 = vadd.f32 %v1654_v47, %v10479_v36  ;;  %v2090_v36 = vld [vmem:[%s9331_s21 + $0x19c] sm:$0xff]  ;;  %v2404_v18 = vld [vmem:[%s9331_s21 + $0x16d] sm:$0xff] }
  0xf8   : > { %v1760_v32 = vadd.f32 %v1655_v63, %v10481_v50  ;;  %v1761_v1 = vadd.f32 %v1656_v44, %v10486_v38  ;;  %v1763_v15 = vadd.f32 %v1658_v23, %v1443_v43  ;;  %v1764_v19 = vadd.f32 %v1659_v58, %v1444_v11  ;;  %v2405_v12 = vld [vmem:[%s9331_s21 + $0x175] sm:$0xff]  ;;  %v2408_v13 = vld [vmem:[%s9331_s21 + $0x18d] sm:$0xff]  ;;  %v2410_v61 = vld [vmem:[%s9331_s21 + $0x19d] sm:$0xff] }
  0xf9   : > { %v1765_v2 = vadd.f32 %v1660_v33, %v1445_v28  ;;  %v1876_v5 = vmul.f32 %v10735_v9, %v10577_v26  ;;  %v1877_v40 = vmul.f32 %v10735_v9, %v10583_v14  ;;  %v1878_v38 = vmul.f32 %v10735_v9, %v10586_v48  ;;  %v10765_v14 = vld [vmem:[%s13667_s1 + $0x6] ss:$0 sm:$0xff]  ;;  %v2409_v6 = vld [vmem:[%s9331_s21 + $0x195] sm:$0xff]  ;;  %v10783_v58 = vld [vmem:[%s13667_s1 + $0x7] ss:$0 sm:$0xff] }
  0xfa   : > { %v1879_v50 = vmul.f32 %v10735_v9, %v10589_v37  ;;  %v1880_v10 = vmul.f32 %v10735_v9, %v10592_v59  ;;  %v1979_v52 = vadd.f32 %v1874_v8, %v1759_v34  ;;  %v1980_v21 = vadd.f32 %v1875_v60, %v1760_v32  ;;  %v2406_v37 = vld [vmem:[%s9331_s21 + $0x17d] sm:$0xff] }
  0xfb   : > { %v1981_v3 = vadd.f32 %v1876_v5, %v1761_v1  ;;  %v1982_v26 = vadd.f32 %v1877_v40, %v10503_v62  ;;  %v2194_v48 = vmul.f32 %v10765_v14, %v2084_v53  ;;  %v1983_v43 = vadd.f32 %v1878_v38, %v1763_v15 }
  0xfc   : > { %v1984_v24 = vadd.f32 %v1879_v50, %v1764_v19  ;;  %v1985_v59 = vadd.f32 %v1880_v10, %v1765_v2  ;;  %v2195_v41 = vmul.f32 %v10765_v14, %v2085_v27  ;;  %v2196_v11 = vmul.f32 %v10765_v14, %v2086_v54  ;;  %v10794_v2 = vld [vmem:[%s9331_s21 + $0x188] sm:$0xff] }
  0xfd   : > { %v2197_v62 = vmul.f32 %v10765_v14, %v2087_v57  ;;  %v2198_v28 = vmul.f32 %v10765_v14, %v2088_v22  ;;  %v2199_v45 = vmul.f32 %v10765_v14, %v2089_v7  ;;  %v4344_v47 = vld [vmem:[#allocation3 + $0x50] sm:$0xff]  ;;  %v2200_v44 = vmul.f32 %v10765_v14, %v2090_v36 }
  0xfe   : > { %v4345_v63 = vld [vmem:[#allocation3 + $0x58] sm:$0xff]  ;;  %v2299_v23 = vadd.f32 %v2194_v48, %v1979_v52  ;;  %v2300_v53 = vadd.f32 %v2195_v41, %v1980_v21  ;;  %v2514_v33 = vmul.f32 %v10783_v58, %v2404_v18  ;;  %v2301_v60 = vadd.f32 %v2196_v11, %v1981_v3  ;;  %v10799_v18 = vld [vmem:[%s13667_s1 + $0x8] ss:$0 sm:$0xff] }
  0xff   : > { %v4368_v8 = vpack.c.bf16 %v4345_v63, %v4344_v47  ;;  %v2302_v27 = vadd.f32 %v2197_v62, %v1982_v26  ;;  %v2303_v34 = vadd.f32 %v2198_v28, %v1983_v43  ;;  %v2304_v32 = vadd.f32 %v2199_v45, %v1984_v24  ;;  %v10834_v62 = vld [vmem:[%s13668_s2] ss:$0 sm:$0xff]  ;;  %v10838_v45 = vld [vmem:[%s9331_s21 + $0x1b0] sm:$0xff] }
 0x100   : > { %v2305_v1 = vadd.f32 %v2200_v44, %v1985_v59  ;;  %v2515_v15 = vmul.f32 %v10783_v58, %v2405_v12  ;;  %v2516_v54 = vmul.f32 %v10783_v58, %v2406_v37  ;;  %v2517_v57 = vmul.f32 %v10783_v58, %v2407_v35  ;;  %v10812_v37 = vld [vmem:[%s9331_s21 + $0x190] sm:$0xff]  ;;  %v10826_v35 = vld [vmem:[%s9331_s21 + $0x1a0] sm:$0xff]  ;;  %v10847_v44 = vld [vmem:[%s9331_s21 + $0x1b8] sm:$0xff] }
 0x101   : > { %8534 = vmatprep.mubr.msk.bf16.mxu0 %vm3123_vm0, %v4368_v8  ;;  %v2518_v22 = vmul.f32 %v10783_v58, %v2408_v13  ;;  %v2519_v7 = vmul.f32 %v10783_v58, %v2409_v6  ;;  %v2520_v19 = vmul.f32 %v10783_v58, %v2410_v61  ;;  %v2619_v5 = vadd.f32 %v2514_v33, %v2299_v23  ;;  %v10850_v23 = vld [vmem:[%s9331_s21 + $0x1c0] sm:$0xff] }
 0x102   : > { %v2620_v40 = vadd.f32 %v2515_v15, %v2300_v53  ;;  %v2621_v36 = vadd.f32 %v2516_v54, %v2301_v60  ;;  %v2734_v38 = vmul.f32 %v10799_v18, %v10654_v29  ;;  %v2622_v50 = vadd.f32 %v2517_v57, %v2302_v27  ;;  %v595_v53 = vld [vmem:[%s9331_s21 + $0x189] sm:$0xff] }
 0x103   : > { %v2623_v10 = vadd.f32 %v2518_v22, %v2303_v34  ;;  %v2624_v52 = vadd.f32 %v2519_v7, %v2304_v32  ;;  %v2625_v21 = vadd.f32 %v2520_v19, %v2305_v1  ;;  %v2735_v3 = vmul.f32 %v10799_v18, %v10657_v51  ;;  %v10819_v51 = vld [vmem:[%s9331_s21 + $0x198] sm:$0xff]  ;;  %v598_v1 = vld [vmem:[%s9331_s21 + $0x1a1] sm:$0xff]  ;;  %v599_v7 = vld [vmem:[%s9331_s21 + $0x1a9] sm:$0xff] }
 0x104   : > { %v2736_v26 = vmul.f32 %v10799_v18, %v10666_v42  ;;  %v2737_v48 = vmul.f32 %v10799_v18, %v10669_v17  ;;  %v2738_v12 = vmul.f32 %v10799_v18, %v10672_v39  ;;  %v2739_v29 = vmul.f32 %v10799_v18, %v10679_v31  ;;  %v10829_v31 = vld [vmem:[%s9331_s21 + $0x1a8] sm:$0xff]  ;;  %v596_v34 = vld [vmem:[%s9331_s21 + $0x191] sm:$0xff]  ;;  %v597_v32 = vld [vmem:[%s9331_s21 + $0x199] sm:$0xff] }
 0x105   : > { %v2740_v43 = vmul.f32 %v10799_v18, %v10682_v46  ;;  %v2839_v24 = vadd.f32 %v2734_v38, %v2619_v5  ;;  %v10823_v42 = vmul.f32 %v10613_v56, %v10794_v2  ;;  %v2840_v17 = vadd.f32 %v2735_v3, %v2620_v40  ;;  %v600_v19 = vld [vmem:[%s9331_s21 + $0x1b1] sm:$0xff] }
 0x106   : > { %v2841_v59 = vadd.f32 %v2736_v26, %v2621_v36  ;;  %v2842_v39 = vadd.f32 %v2737_v48, %v2622_v50  ;;  %v2843_v41 = vadd.f32 %v2738_v12, %v2623_v10  ;;  %v2844_v11 = vadd.f32 %v2739_v29, %v2624_v52  ;;  %v601_v50 = vld [vmem:[%s9331_s21 + $0x1b9] sm:$0xff]  ;;  %v602_v10 = vld [vmem:[%s9331_s21 + $0x1c1] sm:$0xff]  ;;  %v915_v52 = vld [vmem:[%s9331_s21 + $0x18a] sm:$0xff] }
 0x107   : > { %v2845_v46 = vadd.f32 %v2740_v43, %v2625_v21  ;;  %v2951_v28 = vadd.f32 %v10834_v62, %v2839_v24  ;;  %v491_v13 = vmul.f32 %v10613_v56, %v10812_v37  ;;  %v2952_v6 = vadd.f32 %v10834_v62, %v2840_v17  ;;  %v916_v12 = vld [vmem:[%s9331_s21 + $0x192] sm:$0xff]  ;;  %v917_v29 = vld [vmem:[%s9331_s21 + $0x19a] sm:$0xff]  ;;  %v918_v43 = vld [vmem:[%s9331_s21 + $0x1a2] sm:$0xff] }
 0x108   : > { %v2953_v61 = vadd.f32 %v10834_v62, %v2841_v59  ;;  %v2954_v47 = vadd.f32 %v10834_v62, %v2842_v39  ;;  %v2955_v63 = vadd.f32 %v10834_v62, %v2843_v41  ;;  %v2956_v33 = vadd.f32 %v10834_v62, %v2844_v11  ;;  %v919_v24 = vld [vmem:[%s9331_s21 + $0x1aa] sm:$0xff]  ;;  %v920_v11 = vld [vmem:[%s9331_s21 + $0x1b2] sm:$0xff] }
 0x109   : > { %v2957_v8 = vadd.f32 %v10834_v62, %v2845_v46  ;;  %v3056_v60 = vmax.f32 %v2951_v28, 0.0  ;;  %v492_v27 = vmul.f32 %v10613_v56, %v10819_v51  ;;  %v3057_v15 = vmax.f32 %v2952_v6, 0.0  ;;  %v922_v46 = vld [vmem:[%s9331_s21 + $0x1c2] sm:$0xff] }
 0x10a   : > { %v3058_v54 = vmax.f32 %v2953_v61, 0.0  ;;  %v3059_v57 = vmax.f32 %v2954_v47, 0.0  ;;  %v3060_v22 = vmax.f32 %v2955_v63, 0.0  ;;  %v3061_v5 = vmax.f32 %v2956_v33, 0.0 }
 0x10b   : > { %v3062_v40 = vmax.f32 %v2957_v8, 0.0  ;;  %3162 = vst.msk [vmem:[#allocation2 + $0x130] sm:$0xff] %vm3123_vm0, %v3056_v60  ;;  %v493_v36 = vmul.f32 %v10613_v56, %v10826_v35  ;;  %v494_v38 = vmul.f32 %v10613_v56, %v10829_v31  ;;  %3163 = vst.msk [vmem:[#allocation2 + $0x138] sm:$0xff] %vm3123_vm0, %v3057_v15  ;;  %v495_v21 = vmul.f32 %v10613_v56, %v10838_v45 }
 0x10c   : > { %3164 = vst.msk [vmem:[#allocation2 + $0x140] sm:$0xff] %vm3123_vm0, %v3058_v54  ;;  %3165 = vst.msk [vmem:[#allocation2 + $0x148] sm:$0xff] %vm3123_vm0, %v3059_v57  ;;  %v496_v3 = vmul.f32 %v10613_v56, %v10847_v44  ;;  %v497_v26 = vmul.f32 %v10613_v56, %v10850_v23  ;;  %v705_v48 = vmul.f32 %v10639_v49, %v595_v53  ;;  %v921_v56 = vld [vmem:[%s9331_s21 + $0x1ba] sm:$0xff] }
 0x10d   : > { %3166 = vst.msk [vmem:[#allocation2 + $0x150] sm:$0xff] %vm3123_vm0, %v3060_v22  ;;  %3167 = vst.msk [vmem:[#allocation2 + $0x158] sm:$0xff] %vm3123_vm0, %v3061_v5  ;;  %v706_v17 = vmul.f32 %v10639_v49, %v596_v34  ;;  %v707_v59 = vmul.f32 %v10639_v49, %v597_v32  ;;  %v708_v39 = vmul.f32 %v10639_v49, %v598_v1  ;;  %v10910_v57 = vld [vmem:[%s9331_s21 + $0x1b6] sm:$0xff] }
 0x10e   : > { %3168 = vst.msk [vmem:[#allocation2 + $0x160] sm:$0xff] %vm3123_vm0, %v3062_v40  ;;  %v709_v41 = vmul.f32 %v10639_v49, %v599_v7  ;;  %v710_v28 = vmul.f32 %v10639_v49, %v600_v19  ;;  %v711_v6 = vmul.f32 %v10639_v49, %v601_v50  ;;  %v712_v61 = vmul.f32 %v10639_v49, %v602_v10  ;;  %v10916_v40 = vld [vmem:[%s9331_s21 + $0x1be] sm:$0xff] }
 0x10f   : > { %v810_v47 = vadd.f32 %v705_v48, %v10823_v42  ;;  %v811_v63 = vadd.f32 %v706_v17, %v491_v13  ;;  %v812_v53 = vadd.f32 %v707_v59, %v492_v27  ;;  %v813_v33 = vadd.f32 %v708_v39, %v493_v36  ;;  %v10904_v13 = vld [vmem:[%s9331_s21 + $0x1a6] sm:$0xff]  ;;  %v10907_v27 = vld [vmem:[%s9331_s21 + $0x1ae] sm:$0xff]  ;;  %v10925_v48 = vld [vmem:[%s9331_s21 + $0x1d6] sm:$0xff] }
 0x110   : > { %v814_v8 = vadd.f32 %v709_v41, %v494_v38  ;;  %v815_v60 = vadd.f32 %v710_v28, %v495_v21  ;;  %v816_v34 = vadd.f32 %v711_v6, %v496_v3  ;;  %v817_v32 = vadd.f32 %v712_v61, %v497_v26  ;;  %v10919_v36 = vld [vmem:[%s9331_s21 + $0x1c6] sm:$0xff]  ;;  %v10922_v38 = vld [vmem:[%s9331_s21 + $0x1ce] sm:$0xff]  ;;  %v10928_v17 = vld [vmem:[%s9331_s21 + $0x1de] sm:$0xff] }
 0x111   : > { %v1025_v1 = vmul.f32 %v10662_v30, %v915_v52  ;;  %v1026_v15 = vmul.f32 %v10662_v30, %v916_v12  ;;  %v1027_v54 = vmul.f32 %v10662_v30, %v917_v29  ;;  %v1028_v49 = vmul.f32 %v10662_v30, %v918_v43 }
 0x112   : > { %v1029_v42 = vmul.f32 %v10662_v30, %v919_v24  ;;  %v1030_v22 = vmul.f32 %v10662_v30, %v920_v11  ;;  %v1031_v7 = vmul.f32 %v10662_v30, %v921_v56  ;;  %v1032_v19 = vmul.f32 %v10662_v30, %v922_v46  ;;  %v3382_v50 = vld [vmem:[#allocation2 + $0x12c] ss:$2 sm:$0xff]  ;;  %v3386_v12 = vld [vmem:[#allocation2 + $0x12d] ss:$2 sm:$0xff] }
 0x113   : > { %v1130_v5 = vadd.f32 %v1025_v1, %v810_v47  ;;  %v3384_v10 = vld [vmem:[#allocation2 + $0x13c] ss:$2 sm:$0x3f]  ;;  %v1131_v52 = vadd.f32 %v1026_v15, %v811_v63  ;;  %v1132_v21 = vadd.f32 %v1027_v54, %v812_v53  ;;  %v1133_v3 = vadd.f32 %v1028_v49, %v813_v33  ;;  %v3388_v29 = vld [vmem:[#allocation2 + $0x13d] ss:$2 sm:$0x3f] }
 0x114   : > { %v1134_v26 = vadd.f32 %v1029_v42, %v814_v8  ;;  %v1135_v43 = vadd.f32 %v1030_v22, %v815_v60  ;;  %v1136_v30 = vadd.f32 %v1031_v7, %v816_v34  ;;  %v1137_v24 = vadd.f32 %v1032_v19, %v817_v32  ;;  %v3390_v39 = vld [vmem:[#allocation2 + $0x14a] ss:$2 sm:$0xff]  ;;  %v3394_v6 = vld [vmem:[#allocation2 + $0x14b] ss:$2 sm:$0xff]  ;;  %v1554_v49 = vld [vmem:[%s9331_s21 + $0x19f] sm:$0xff] }
 0x115   : > { %v1345_v59 = vmul.f32 %v10688_v25, %v10904_v13  ;;  %v3392_v41 = vld [vmem:[#allocation2 + $0x15a] ss:$2 sm:$0x3f]  ;;  %v3397_v11 = vmax.f32 %v3382_v50, %v3386_v12  ;;  %v3398_v56 = vmax.f32 %v3384_v10, %v3388_v29  ;;  %v1346_v46 = vmul.f32 %v10688_v25, %v10907_v27  ;;  %v3396_v61 = vld [vmem:[#allocation2 + $0x15b] ss:$2 sm:$0x3f] }
 0x116   : > { %v1347_v28 = vmul.f32 %v10688_v25, %v10910_v57  ;;  %v1348_v47 = vmul.f32 %v10688_v25, %v10916_v40  ;;  %v1349_v63 = vmul.f32 %v10688_v25, %v10919_v36  ;;  %v1350_v53 = vmul.f32 %v10688_v25, %v10922_v38  ;;  %v1551_v8 = vld [vmem:[%s9331_s21 + $0x187] sm:$0xff]  ;;  %v1552_v15 = vld [vmem:[%s9331_s21 + $0x18f] sm:$0xff]  ;;  %v1553_v54 = vld [vmem:[%s9331_s21 + $0x197] sm:$0xff] }
 0x117   : > { %v1351_v33 = vmul.f32 %v10688_v25, %v10925_v48  ;;  %v3399_v60 = vmax.f32 %v3390_v39, %v3394_v6  ;;  %v3400_v34 = vmax.f32 %v3392_v41, %v3396_v61  ;;  %v1352_v32 = vmul.f32 %v10688_v25, %v10928_v17  ;;  %v1555_v50 = vld [vmem:[%s9331_s21 + $0x1a7] sm:$0xff]  ;;  %v1556_v10 = vld [vmem:[%s9331_s21 + $0x1af] sm:$0xff]  ;;  %v1557_v12 = vld [vmem:[%s9331_s21 + $0x1b7] sm:$0xff] }
 0x118   : > { %v1450_v1 = vadd.f32 %v1345_v59, %v1130_v5  ;;  %v1451_v42 = vadd.f32 %v1346_v46, %v1131_v52  ;;  %v1452_v22 = vadd.f32 %v1347_v28, %v1132_v21  ;;  %v1453_v7 = vadd.f32 %v1348_v47, %v1133_v3  ;;  %v1558_v25 = vld [vmem:[%s9331_s21 + $0x1bf] sm:$0xff] }
 0x119   : > { %v10950_v19 = vadd.f32 %v1349_v63, %v1134_v26  ;;  %v3401_v29 = vmax.f32 %v3397_v11, %v3399_v60  ;;  %v3402_v39 = vmax.f32 %v3398_v56, %v3400_v34  ;;  %v10955_v41 = vadd.f32 %v1350_v53, %v1135_v43  ;;  %v1562_v5 = vld [vmem:[%s9331_s21 + $0x1df] sm:$0xff] }
 0x11a   : > { %v10957_v6 = vadd.f32 %v1351_v33, %v1136_v30  ;;  %v1457_v59 = vadd.f32 %v1352_v32, %v1137_v24  ;;  %v1661_v61 = vmul.f32 %v10721_v20, %v1551_v8  ;;  %v1662_v52 = vmul.f32 %v10721_v20, %v1552_v15  ;;  %v2091_v33 = vld [vmem:[%s9331_s21 + $0x1a4] sm:$0xff] }
 0x11b   : > { %v1663_v21 = vmul.f32 %v10721_v20, %v1553_v54  ;;  %3403 = vst.msk [vmem:[#allocation3 + $0x61] sm:$0xff] %vm3123_vm0, %v3401_v29  ;;  %v1664_v3 = vmul.f32 %v10721_v20, %v1554_v49  ;;  %v1665_v26 = vmul.f32 %v10721_v20, %v1555_v50  ;;  %v1666_v43 = vmul.f32 %v10721_v20, %v1556_v10  ;;  %v2093_v54 = vld [vmem:[%s9331_s21 + $0x1b4] sm:$0xff]  ;;  %v2095_v49 = vld [vmem:[%s9331_s21 + $0x1c4] sm:$0xff]  ;;  %v2098_v10 = vld [vmem:[%s9331_s21 + $0x1dc] sm:$0xff] }
 0x11c   : > { %3404 = vst.msk [vmem:[#allocation3 + $0x69] sm:$0x3f] %vm3228_vm1, %v3402_v39  ;;  %v1667_v30 = vmul.f32 %v10721_v20, %v1557_v12  ;;  %v1668_v24 = vmul.f32 %v10721_v20, %v1558_v25  ;;  %v1672_v11 = vmul.f32 %v10721_v20, %v1562_v5  ;;  %v1766_v56 = vadd.f32 %v1661_v61, %v10708_v0  ;;  %v2092_v0 = vld [vmem:[%s9331_s21 + $0x1ac] sm:$0xff]  ;;  %v2097_v50 = vld [vmem:[%s9331_s21 + $0x1d4] sm:$0xff] }
 0x11d   : > { %v1767_v46 = vadd.f32 %v1662_v52, %v10710_v4  ;;  %v1768_v28 = vadd.f32 %v1663_v21, %v10714_v16  ;;  %v1769_v47 = vadd.f32 %v1664_v3, %v10716_v55  ;;  %v1770_v63 = vadd.f32 %v1665_v26, %v1450_v1  ;;  %v2411_v39 = vld [vmem:[%s9331_s21 + $0x1a5] sm:$0xff]  ;;  %v2412_v52 = vld [vmem:[%s9331_s21 + $0x1ad] sm:$0xff] }
 0x11e   : > { %v1771_v53 = vadd.f32 %v1666_v43, %v1451_v42  ;;  %v1772_v8 = vadd.f32 %v1667_v30, %v1452_v22  ;;  %v1773_v60 = vadd.f32 %v1668_v24, %v1453_v7  ;;  %v10977_v34 = vadd.f32 %v1672_v11, %v1457_v59  ;;  %v2413_v30 = vld [vmem:[%s9331_s21 + $0x1b5] sm:$0xff]  ;;  %v2414_v24 = vld [vmem:[%s9331_s21 + $0x1bd] sm:$0xff]  ;;  %v2415_v11 = vld [vmem:[%s9331_s21 + $0x1c5] sm:$0xff] }
 0x11f   : > { %v1881_v20 = vmul.f32 %v10735_v9, %v10794_v2  ;;  %v1882_v4 = vmul.f32 %v10735_v9, %v10812_v37  ;;  %v1883_v16 = vmul.f32 %v10735_v9, %v10819_v51  ;;  %v1884_v55 = vmul.f32 %v10735_v9, %v10826_v35  ;;  %v2094_v51 = vld [vmem:[%s9331_s21 + $0x1bc] sm:$0xff] }
 0x120   : > { %v1885_v32 = vmul.f32 %v10735_v9, %v10829_v31  ;;  %v1886_v1 = vmul.f32 %v10735_v9, %v10838_v45  ;;  %v1887_v2 = vmul.f32 %v10735_v9, %v10847_v44  ;;  %v1888_v37 = vmul.f32 %v10735_v9, %v10850_v23  ;;  %v2096_v31 = vld [vmem:[%s9331_s21 + $0x1cc] sm:$0xff] }
 0x121   : > { %v1986_v15 = vadd.f32 %v1881_v20, %v1766_v56  ;;  %v1987_v42 = vadd.f32 %v1882_v4, %v1767_v46  ;;  %v1988_v22 = vadd.f32 %v1883_v16, %v1768_v28  ;;  %v1989_v35 = vadd.f32 %v1884_v55, %v1769_v47 }
 0x122   : > { %v1990_v7 = vadd.f32 %v1885_v32, %v1770_v63  ;;  %v4346_v45 = vld [vmem:[#allocation3 + $0x60] sm:$0xff]  ;;  %v1991_v44 = vadd.f32 %v1886_v1, %v1771_v53  ;;  %v1992_v9 = vadd.f32 %v1887_v2, %v1772_v8  ;;  %v1993_v23 = vadd.f32 %v1888_v37, %v1773_v60  ;;  %v2417_v53 = vld [vmem:[%s9331_s21 + $0x1d5] sm:$0xff] }
 0x123   : > { %v4347_v12 = vld [vmem:[#allocation3 + $0x68] sm:$0xff]  ;;  %v2201_v29 = vmul.f32 %v10765_v14, %v2091_v33  ;;  %v2202_v5 = vmul.f32 %v10765_v14, %v2092_v0  ;;  %v2203_v59 = vmul.f32 %v10765_v14, %v2093_v54  ;;  %v2204_v61 = vmul.f32 %v10765_v14, %v2094_v51  ;;  %v2418_v33 = vld [vmem:[%s9331_s21 + $0x1dd] sm:$0xff] }
 0x124   : > { %v4369_v25 = vpack.c.bf16 %v4347_v12, %v4346_v45  ;;  %v2205_v21 = vmul.f32 %v10765_v14, %v2095_v49  ;;  %v2206_v3 = vmul.f32 %v10765_v14, %v2096_v31  ;;  %v2207_v26 = vmul.f32 %v10765_v14, %v2097_v50  ;;  %v2416_v63 = vld [vmem:[%s9331_s21 + $0x1cd] sm:$0xff] }
 0x125   : > { %v2208_v43 = vmul.f32 %v10765_v14, %v2098_v10  ;;  %v2306_v56 = vadd.f32 %v2201_v29, %v1986_v15  ;;  %v2307_v46 = vadd.f32 %v2202_v5, %v1987_v42  ;;  %v2308_v28 = vadd.f32 %v2203_v59, %v1988_v22 }
 0x126   : > { %8535 = vmatmul.mubr.msk.bf16.gmra.mrb[8].mxu0 %vm3123_vm0, %v4369_v25  ;;  %v2309_v47 = vadd.f32 %v2204_v61, %v1989_v35  ;;  %v2310_v8 = vadd.f32 %v2205_v21, %v1990_v7  ;;  %v2311_v60 = vadd.f32 %v2206_v3, %v1991_v44  ;;  %v2312_v20 = vadd.f32 %v2207_v26, %v1992_v9  ;;  %v11044_v25 = vld [vmem:[%s9331_s21 + $0x1c8] sm:$0xff]  ;;  %v11063_v21 = vld [vmem:[%s9331_s21 + $0x1f0] sm:$0xff]  ;;  %v11066_v3 = vld [vmem:[%s9331_s21 + $0x1f8] sm:$0xff] }
 0x127   : > { %v2313_v0 = vadd.f32 %v2208_v43, %v1993_v23  ;;  %v2521_v4 = vmul.f32 %v10783_v58, %v2411_v39  ;;  %v2522_v14 = vmul.f32 %v10783_v58, %v2412_v52  ;;  %v2523_v16 = vmul.f32 %v10783_v58, %v2413_v30  ;;  %v11060_v52 = vld [vmem:[%s9331_s21 + $0x1e8] sm:$0xff] }
 0x128   : > { %v2524_v55 = vmul.f32 %v10783_v58, %v2414_v24  ;;  %v2525_v32 = vmul.f32 %v10783_v58, %v2415_v11  ;;  %v2526_v1 = vmul.f32 %v10783_v58, %v2416_v63  ;;  %v2527_v2 = vmul.f32 %v10783_v58, %v2417_v53  ;;  %v603_v26 = vld [vmem:[%s9331_s21 + $0x1c9] sm:$0xff] }
 0x129   : > { %v2528_v37 = vmul.f32 %v10783_v58, %v2418_v33  ;;  %v2626_v15 = vadd.f32 %v2521_v4, %v2306_v56  ;;  %v2627_v54 = vadd.f32 %v2522_v14, %v2307_v46  ;;  %v2628_v51 = vadd.f32 %v2523_v16, %v2308_v28  ;;  %v604_v56 = vld [vmem:[%s9331_s21 + $0x1d1] sm:$0xff]  ;;  %v605_v46 = vld [vmem:[%s9331_s21 + $0x1d9] sm:$0xff]  ;;  %v606_v28 = vld [vmem:[%s9331_s21 + $0x1e1] sm:$0xff] }
 0x12a   : > { %v2629_v49 = vadd.f32 %v2524_v55, %v2309_v47  ;;  %v2630_v42 = vadd.f32 %v2525_v32, %v2310_v8  ;;  %v2631_v22 = vadd.f32 %v2526_v1, %v2311_v60  ;;  %v2632_v35 = vadd.f32 %v2527_v2, %v2312_v20  ;;  %v607_v47 = vld [vmem:[%s9331_s21 + $0x1e9] sm:$0xff]  ;;  %v608_v60 = vld [vmem:[%s9331_s21 + $0x1f1] sm:$0xff]  ;;  %v609_v20 = vld [vmem:[%s9331_s21 + $0x1f9] sm:$0xff] }
 0x12b   : > { %v2633_v7 = vadd.f32 %v2528_v37, %v2313_v0  ;;  %v2741_v31 = vmul.f32 %v10799_v18, %v10904_v13  ;;  %v2742_v50 = vmul.f32 %v10799_v18, %v10907_v27  ;;  %v2743_v10 = vmul.f32 %v10799_v18, %v10910_v57  ;;  %v923_v0 = vld [vmem:[%s9331_s21 + $0x1ca] sm:$0xff] }
 0x12c   : > { %v2744_v58 = vmul.f32 %v10799_v18, %v10916_v40  ;;  %v2745_v45 = vmul.f32 %v10799_v18, %v10919_v36  ;;  %v2746_v12 = vmul.f32 %v10799_v18, %v10922_v38  ;;  %v2747_v13 = vmul.f32 %v10799_v18, %v10925_v48  ;;  %v11047_v38 = vld [vmem:[%s9331_s21 + $0x1d0] sm:$0xff]  ;;  %v11050_v48 = vld [vmem:[%s9331_s21 + $0x1d8] sm:$0xff] }
 0x12d   : > { %v2748_v27 = vmul.f32 %v10799_v18, %v10928_v17  ;;  %v2846_v44 = vadd.f32 %v2741_v31, %v2626_v15  ;;  %v2847_v57 = vadd.f32 %v2742_v50, %v2627_v54  ;;  %v2848_v9 = vadd.f32 %v2743_v10, %v2628_v51  ;;  %v11053_v18 = vld [vmem:[%s9331_s21 + $0x1e0] sm:$0xff]  ;;  %v924_v15 = vld [vmem:[%s9331_s21 + $0x1d2] sm:$0xff] }
 0x12e   : > { %v2849_v40 = vadd.f32 %v2744_v58, %v2629_v49  ;;  %v2850_v23 = vadd.f32 %v2745_v45, %v2630_v42  ;;  %v2851_v29 = vadd.f32 %v2746_v12, %v2631_v22  ;;  %v2852_v36 = vadd.f32 %v2747_v13, %v2632_v35  ;;  %v925_v54 = vld [vmem:[%s9331_s21 + $0x1da] sm:$0xff]  ;;  %v927_v45 = vld [vmem:[%s9331_s21 + $0x1ea] sm:$0xff]  ;;  %v928_v12 = vld [vmem:[%s9331_s21 + $0x1f2] sm:$0xff] }
 0x12f   : > { %v2853_v39 = vadd.f32 %v2748_v27, %v2633_v7  ;;  %v2958_v17 = vadd.f32 %v10834_v62, %v2846_v44  ;;  %v2959_v5 = vadd.f32 %v10834_v62, %v2847_v57  ;;  %v2960_v59 = vadd.f32 %v10834_v62, %v2848_v9  ;;  %v11112_v22 = vld [vmem:[%s13667_s1 + $0x1] ss:$0 sm:$0xff]  ;;  %v926_v7 = vld [vmem:[%s9331_s21 + $0x1e2] sm:$0xff] }
 0x130   : > { %v2961_v61 = vadd.f32 %v10834_v62, %v2849_v40  ;;  %v2962_v43 = vadd.f32 %v10834_v62, %v2850_v23  ;;  %v2963_v30 = vadd.f32 %v10834_v62, %v2851_v29  ;;  %v2964_v24 = vadd.f32 %v10834_v62, %v2852_v36  ;;  %13736 = vst [vmem:[#allocation11_spill] sm:$0xff] %v11112_v22  ;;  %v929_v13 = vld [vmem:[%s9331_s21 + $0x1fa] sm:$0xff]  ;;  %v11128_v9 = vld [vmem:[%s13667_s1 + $0x2] ss:$0 sm:$0xff] }
 0x131   : > { %v2965_v11 = vadd.f32 %v10834_v62, %v2853_v39  ;;  %v3063_v63 = vmax.f32 %v2958_v17, 0.0  ;;  %v3064_v53 = vmax.f32 %v2959_v5, 0.0  ;;  %v3065_v33 = vmax.f32 %v2960_v59, 0.0  ;;  %v11087_v62 = vld [vmem:[%s13667_s1] ss:$0 sm:$0xff]  ;;  %13737 = vst [vmem:[#allocation12_spill] sm:$0xff] %v11128_v9 }
 0x132   : > { %v3066_v8 = vmax.f32 %v2961_v61, 0.0  ;;  %v3067_v4 = vmax.f32 %v2962_v43, 0.0  ;;  %v3068_v14 = vmax.f32 %v2963_v30, 0.0  ;;  %v3069_v16 = vmax.f32 %v2964_v24, 0.0  ;;  %13735 = vst [vmem:[#allocation14_spill] sm:$0xff] %v11087_v62  ;;  %v11132_v17 = vld [vmem:[%s9331_s21 + $0x1e6] sm:$0xff] }
 0x133   : > { %v3070_v55 = vmax.f32 %v2965_v11, 0.0  ;;  %3169 = vst.msk [vmem:[#allocation2 + $0x168] sm:$0xff] %vm3123_vm0, %v3063_v63  ;;  %3170 = vst.msk [vmem:[#allocation2 + $0x170] sm:$0xff] %vm3123_vm0, %v3064_v53  ;;  %v498_v32 = vmul.f32 %v11087_v62, %v11044_v25  ;;  %v499_v1 = vmul.f32 %v11087_v62, %v11047_v38  ;;  %v500_v2 = vmul.f32 %v11087_v62, %v11050_v48  ;;  %v11137_v43 = vld [vmem:[%s9331_s21 + $0x1ee] sm:$0xff]  ;;  %v11140_v30 = vld [vmem:[%s9331_s21 + $0x1f6] sm:$0xff] }
 0x134   : > { %3171 = vst.msk [vmem:[#allocation2 + $0x178] sm:$0xff] %vm3123_vm0, %v3065_v33  ;;  %3172 = vst.msk [vmem:[#allocation2 + $0x180] sm:$0xff] %vm3123_vm0, %v3066_v8  ;;  %v501_v37 = vmul.f32 %v11087_v62, %v11053_v18  ;;  %v502_v51 = vmul.f32 %v11087_v62, %v11060_v52  ;;  %v503_v49 = vmul.f32 %v11087_v62, %v11063_v21  ;;  %v11143_v24 = vld [vmem:[%s9331_s21 + $0x1fe] sm:$0xff]  ;;  %v11153_v63 = vld [vmem:[%s9331_s21 + $0x20e] sm:$0xff] }
 0x135   : > { %3173 = vst.msk [vmem:[#allocation2 + $0x188] sm:$0xff] %vm3123_vm0, %v3067_v4  ;;  %3174 = vst.msk [vmem:[#allocation2 + $0x190] sm:$0xff] %vm3123_vm0, %v3068_v14  ;;  %v504_v42 = vmul.f32 %v11087_v62, %v11066_v3  ;;  %v713_v35 = vmul.f32 %v11112_v22, %v603_v26  ;;  %v714_v31 = vmul.f32 %v11112_v22, %v604_v56  ;;  %v11161_v4 = vld [vmem:[%s13667_s1 + $0x3] ss:$0 sm:$0xff] }
 0x136   : > { %3175 = vst.msk [vmem:[#allocation2 + $0x198] sm:$0xff] %vm3123_vm0, %v3069_v16  ;;  %3176 = vst.msk [vmem:[#allocation2 + $0x1a0] sm:$0xff] %vm3123_vm0, %v3070_v55  ;;  %v715_v50 = vmul.f32 %v11112_v22, %v605_v46  ;;  %v716_v10 = vmul.f32 %v11112_v22, %v606_v28  ;;  %v717_v58 = vmul.f32 %v11112_v22, %v607_v47  ;;  %v11150_v47 = vld [vmem:[%s9331_s21 + $0x206] sm:$0xff] }
 0x137   : > { %v718_v27 = vmul.f32 %v11112_v22, %v608_v60  ;;  %v719_v44 = vmul.f32 %v11112_v22, %v609_v20  ;;  %v818_v57 = vadd.f32 %v713_v35, %v498_v32  ;;  %v1033_v40 = vmul.f32 %v11128_v9, %v923_v0  ;;  %v11156_v0 = vld [vmem:[%s9331_s21 + $0x216] sm:$0xff]  ;;  %13738 = vst [vmem:[#allocation13_spill] sm:$0xff] %v11161_v4 }
 0x138   : > { %v819_v23 = vadd.f32 %v714_v31, %v499_v1  ;;  %v820_v29 = vadd.f32 %v715_v50, %v500_v2  ;;  %v821_v36 = vadd.f32 %v716_v10, %v501_v37  ;;  %v822_v39 = vadd.f32 %v717_v58, %v502_v51 }
 0x139   : > { %v823_v5 = vadd.f32 %v718_v27, %v503_v49  ;;  %v824_v59 = vadd.f32 %v719_v44, %v504_v42  ;;  %v1034_v61 = vmul.f32 %v11128_v9, %v924_v15  ;;  %v1035_v26 = vmul.f32 %v11128_v9, %v925_v54 }
 0x13a   : > { %v1036_v11 = vmul.f32 %v11128_v9, %v926_v7  ;;  %v1037_v56 = vmul.f32 %v11128_v9, %v927_v45  ;;  %v1038_v46 = vmul.f32 %v11128_v9, %v928_v12  ;;  %v1039_v28 = vmul.f32 %v11128_v9, %v929_v13  ;;  %v3406_v53 = vld [vmem:[#allocation2 + $0x168] ss:$2 sm:$0xff]  ;;  %v3410_v16 = vld [vmem:[#allocation2 + $0x169] ss:$2 sm:$0xff] }
 0x13b   : > { %v3408_v33 = vld [vmem:[#allocation2 + $0x178] ss:$2 sm:$0x3f]  ;;  %v1138_v8 = vadd.f32 %v1033_v40, %v818_v57  ;;  %v1139_v60 = vadd.f32 %v1034_v61, %v819_v23  ;;  %v1140_v20 = vadd.f32 %v1035_v26, %v820_v29  ;;  %v1353_v14 = vmul.f32 %v11161_v4, %v11132_v17  ;;  %v3412_v55 = vld [vmem:[#allocation2 + $0x179] ss:$2 sm:$0x3f] }
 0x13c   : > { %v1141_v32 = vadd.f32 %v1036_v11, %v821_v36  ;;  %v1142_v1 = vadd.f32 %v1037_v56, %v822_v39  ;;  %v1143_v2 = vadd.f32 %v1038_v46, %v823_v5  ;;  %v1144_v37 = vadd.f32 %v1039_v28, %v824_v59  ;;  %v3414_v15 = vld [vmem:[#allocation2 + $0x186] ss:$2 sm:$0xff]  ;;  %v3418_v31 = vld [vmem:[#allocation2 + $0x187] ss:$2 sm:$0xff]  ;;  %v1561_v23 = vld [vmem:[%s9331_s21 + $0x1d7] sm:$0xff] }
 0x13d   : > { %v3416_v54 = vld [vmem:[#allocation2 + $0x196] ss:$2 sm:$0x3f]  ;;  %v3421_v51 = vmax.f32 %v3406_v53, %v3410_v16  ;;  %v3422_v49 = vmax.f32 %v3408_v33, %v3412_v55  ;;  %v1354_v42 = vmul.f32 %v11161_v4, %v11137_v43  ;;  %v1355_v35 = vmul.f32 %v11161_v4, %v11140_v30  ;;  %v1559_v7 = vld [vmem:[%s9331_s21 + $0x1c7] sm:$0xff]  ;;  %v11194_v28 = vld [vmem:[%s13667_s1 + $0x4] ss:$0 sm:$0xff] }
 0x13e   : > { %v3420_v50 = vld [vmem:[#allocation2 + $0x197] ss:$2 sm:$0x3f]  ;;  %v1356_v10 = vmul.f32 %v11161_v4, %v11143_v24  ;;  %v1357_v58 = vmul.f32 %v11161_v4, %v11150_v47  ;;  %v1358_v45 = vmul.f32 %v11161_v4, %v11153_v63  ;;  %v1359_v12 = vmul.f32 %v11161_v4, %v11156_v0  ;;  %v1560_v13 = vld [vmem:[%s9331_s21 + $0x1cf] sm:$0xff]  ;;  %v1563_v29 = vld [vmem:[%s9331_s21 + $0x1e7] sm:$0xff] }
 0x13f   : > { %v3423_v27 = vmax.f32 %v3414_v15, %v3418_v31  ;;  %v3424_v44 = vmax.f32 %v3416_v54, %v3420_v50  ;;  %v1458_v57 = vadd.f32 %v1353_v14, %v1138_v8  ;;  %v1459_v40 = vadd.f32 %v1354_v42, %v1139_v60  ;;  %v1564_v36 = vld [vmem:[%s9331_s21 + $0x1ef] sm:$0xff]  ;;  %v1565_v26 = vld [vmem:[%s9331_s21 + $0x1f7] sm:$0xff]  ;;  %v2099_v14 = vld [vmem:[%s9331_s21 + $0x1e4] sm:$0xff] }
 0x140   : > { %v1460_v39 = vadd.f32 %v1355_v35, %v1140_v20  ;;  %v11182_v5 = vadd.f32 %v1356_v10, %v1141_v32  ;;  %v11184_v59 = vadd.f32 %v1357_v58, %v1142_v1  ;;  %v11186_v61 = vadd.f32 %v1358_v45, %v1143_v2  ;;  %v11209_v32 = vld [vmem:[%s13667_s1 + $0x5] ss:$0 sm:$0xff]  ;;  %v2101_v15 = vld [vmem:[%s9331_s21 + $0x1f4] sm:$0xff]  ;;  %v2102_v42 = vld [vmem:[%s9331_s21 + $0x1fc] sm:$0xff] }
 0x141   : > { %v3425_v11 = vmax.f32 %v3421_v51, %v3423_v27  ;;  %v3426_v56 = vmax.f32 %v3422_v49, %v3424_v44  ;;  %v11189_v46 = vadd.f32 %v1359_v12, %v1144_v37  ;;  %v1669_v53 = vmul.f32 %v11194_v28, %v1559_v7  ;;  %v2100_v37 = vld [vmem:[%s9331_s21 + $0x1ec] sm:$0xff]  ;;  %v2103_v35 = vld [vmem:[%s9331_s21 + $0x204] sm:$0xff]  ;;  %v2105_v31 = vld [vmem:[%s9331_s21 + $0x214] sm:$0xff] }
 0x142   : > { %v1670_v33 = vmul.f32 %v11194_v28, %v1560_v13  ;;  %v1671_v8 = vmul.f32 %v11194_v28, %v1561_v23  ;;  %v1673_v60 = vmul.f32 %v11194_v28, %v1563_v29  ;;  %v1674_v20 = vmul.f32 %v11194_v28, %v1564_v36  ;;  %v2104_v7 = vld [vmem:[%s9331_s21 + $0x20c] sm:$0xff]  ;;  %v2421_v44 = vld [vmem:[%s9331_s21 + $0x1f5] sm:$0xff] }
 0x143   : > { %3427 = vst.msk [vmem:[#allocation3 + $0x71] sm:$0xff] %vm3123_vm0, %v3425_v11  ;;  %v1675_v16 = vmul.f32 %v11194_v28, %v1565_v26  ;;  %v1774_v55 = vadd.f32 %v1669_v53, %v10950_v19  ;;  %v1889_v1 = vmul.f32 %v11209_v32, %v11044_v25  ;;  %v1890_v2 = vmul.f32 %v11209_v32, %v11047_v38  ;;  %v2423_v11 = vld [vmem:[%s9331_s21 + $0x205] sm:$0xff]  ;;  %v2425_v53 = vld [vmem:[%s9331_s21 + $0x215] sm:$0xff] }
 0x144   : > { %3428 = vst.msk [vmem:[#allocation3 + $0x79] sm:$0x3f] %vm3228_vm1, %v3426_v56  ;;  %v1775_v54 = vadd.f32 %v1670_v33, %v10955_v41  ;;  %v1776_v51 = vadd.f32 %v1671_v8, %v10957_v6  ;;  %v1778_v49 = vadd.f32 %v1673_v60, %v1458_v57  ;;  %v1779_v19 = vadd.f32 %v1674_v20, %v1459_v40  ;;  %v2419_v6 = vld [vmem:[%s9331_s21 + $0x1e5] sm:$0xff]  ;;  %v2422_v57 = vld [vmem:[%s9331_s21 + $0x1fd] sm:$0xff]  ;;  %v2424_v56 = vld [vmem:[%s9331_s21 + $0x20d] sm:$0xff] }
 0x145   : > { %v1780_v50 = vadd.f32 %v1675_v16, %v1460_v39  ;;  %v1891_v25 = vmul.f32 %v11209_v32, %v11050_v48  ;;  %v1892_v38 = vmul.f32 %v11209_v32, %v11053_v18  ;;  %v1893_v41 = vmul.f32 %v11209_v32, %v11060_v52  ;;  %v11238_v18 = vld [vmem:[%s13667_s1 + $0x6] ss:$0 sm:$0xff]  ;;  %v11256_v16 = vld [vmem:[%s13667_s1 + $0x7] ss:$0 sm:$0xff] }
 0x146   : > { %v1894_v10 = vmul.f32 %v11209_v32, %v11063_v21  ;;  %v1895_v58 = vmul.f32 %v11209_v32, %v11066_v3  ;;  %v1994_v45 = vadd.f32 %v1889_v1, %v1774_v55  ;;  %v1995_v12 = vadd.f32 %v1890_v2, %v1775_v54  ;;  %v2420_v21 = vld [vmem:[%s9331_s21 + $0x1ed] sm:$0xff] }
 0x147   : > { %v1996_v13 = vadd.f32 %v1891_v25, %v1776_v51  ;;  %v1997_v27 = vadd.f32 %v1892_v38, %v10977_v34  ;;  %v1998_v48 = vadd.f32 %v1893_v41, %v1778_v49  ;;  %v2209_v52 = vmul.f32 %v11238_v18, %v2099_v14 }
 0x148   : > { %v1999_v3 = vadd.f32 %v1894_v10, %v1779_v19  ;;  %v2000_v40 = vadd.f32 %v1895_v58, %v1780_v50  ;;  %v2210_v23 = vmul.f32 %v11238_v18, %v2100_v37  ;;  %v2211_v29 = vmul.f32 %v11238_v18, %v2101_v15 }
 0x149   : > { %v2212_v34 = vmul.f32 %v11238_v18, %v2102_v42  ;;  %v2213_v36 = vmul.f32 %v11238_v18, %v2103_v35  ;;  %v2214_v39 = vmul.f32 %v11238_v18, %v2104_v7  ;;  %v2215_v26 = vmul.f32 %v11238_v18, %v2105_v31  ;;  %v11263_v42 = vld [vmem:[%s9331_s21 + $0x200] sm:$0xff] }
 0x14a   : > { %v4348_v33 = vld [vmem:[#allocation3 + $0x70] sm:$0xff]  ;;  %v2314_v60 = vadd.f32 %v2209_v52, %v1994_v45  ;;  %v2315_v20 = vadd.f32 %v2210_v23, %v1995_v12  ;;  %v2316_v14 = vadd.f32 %v2211_v29, %v1996_v13  ;;  %v2529_v55 = vmul.f32 %v11256_v16, %v2419_v6  ;;  %v11272_v6 = vld [vmem:[%s13667_s1 + $0x8] ss:$0 sm:$0xff] }
 0x14b   : > { %v4349_v8 = vld [vmem:[#allocation3 + $0x78] sm:$0xff]  ;;  %v2317_v2 = vadd.f32 %v2212_v34, %v1997_v27  ;;  %v2318_v37 = vadd.f32 %v2213_v36, %v1998_v48  ;;  %v2319_v15 = vadd.f32 %v2214_v39, %v1999_v3  ;;  %v2320_v54 = vadd.f32 %v2215_v26, %v2000_v40  ;;  %v11297_v23 = vld [vmem:[%s9331_s21 + $0x218] sm:$0xff]  ;;  %v11310_v26 = vld [vmem:[%s9331_s21 + $0x228] sm:$0xff] }
 0x14c   : > { %v4370_v1 = vpack.c.bf16 %v4349_v8, %v4348_v33  ;;  %v2530_v51 = vmul.f32 %v11256_v16, %v2420_v21  ;;  %v2531_v49 = vmul.f32 %v11256_v16, %v2421_v44  ;;  %v2532_v19 = vmul.f32 %v11256_v16, %v2422_v57  ;;  %v11307_v39 = vld [vmem:[%s9331_s21 + $0x220] sm:$0xff] }
 0x14d   : > { %v2533_v35 = vmul.f32 %v11256_v16, %v2423_v11  ;;  %v2534_v7 = vmul.f32 %v11256_v16, %v2424_v56  ;;  %v2535_v31 = vmul.f32 %v11256_v16, %v2425_v53  ;;  %v2634_v50 = vadd.f32 %v2529_v55, %v2314_v60  ;;  %v11313_v11 = vld [vmem:[%s9331_s21 + $0x230] sm:$0xff] }
 0x14e   : > { %8538 = vmatprep.mubr.msk.bf16.mxu0 %vm3123_vm0, %v4370_v1  ;;  %v2635_v25 = vadd.f32 %v2530_v51, %v2315_v20  ;;  %v2636_v38 = vadd.f32 %v2531_v49, %v2316_v14  ;;  %v2637_v41 = vadd.f32 %v2532_v19, %v2317_v2  ;;  %v2749_v10 = vmul.f32 %v11272_v6, %v11132_v17  ;;  %v11287_v17 = vld [vmem:[%s9331_s21 + $0x208] sm:$0xff]  ;;  %v11322_v20 = vld [vmem:[%s9331_s21 + $0x238] sm:$0xff] }
 0x14f   : > { %v2638_v58 = vadd.f32 %v2533_v35, %v2318_v37  ;;  %v2639_v45 = vadd.f32 %v2534_v7, %v2319_v15  ;;  %v2640_v12 = vadd.f32 %v2535_v31, %v2320_v54  ;;  %v2750_v13 = vmul.f32 %v11272_v6, %v11137_v43  ;;  %v610_v14 = vld [vmem:[%s9331_s21 + $0x201] sm:$0xff]  ;;  %v611_v55 = vld [vmem:[%s9331_s21 + $0x209] sm:$0xff]  ;;  %v612_v54 = vld [vmem:[%s9331_s21 + $0x211] sm:$0xff] }
 0x150   : > { %v2751_v27 = vmul.f32 %v11272_v6, %v11140_v30  ;;  %v2752_v48 = vmul.f32 %v11272_v6, %v11143_v24  ;;  %v2753_v52 = vmul.f32 %v11272_v6, %v11150_v47  ;;  %v2754_v21 = vmul.f32 %v11272_v6, %v11153_v63  ;;  %v11292_v30 = vld [vmem:[%s9331_s21 + $0x210] sm:$0xff]  ;;  %v613_v51 = vld [vmem:[%s9331_s21 + $0x219] sm:$0xff]  ;;  %v614_v49 = vld [vmem:[%s9331_s21 + $0x221] sm:$0xff] }
 0x151   : > { %v2755_v44 = vmul.f32 %v11272_v6, %v11156_v0  ;;  %v2854_v43 = vadd.f32 %v2749_v10, %v2634_v50  ;;  %v2855_v57 = vadd.f32 %v2750_v13, %v2635_v25  ;;  %v505_v24 = vmul.f32 %v11087_v62, %v11263_v42  ;;  %v11302_v0 = vld [vmem:[%s13668_s2] ss:$0 sm:$0xff]  ;;  %v615_v50 = vld [vmem:[%s9331_s21 + $0x229] sm:$0xff]  ;;  %v616_v25 = vld [vmem:[%s9331_s21 + $0x231] sm:$0xff] }
 0x152   : > { %v2856_v3 = vadd.f32 %v2751_v27, %v2636_v38  ;;  %v2857_v47 = vadd.f32 %v2752_v48, %v2637_v41  ;;  %v2858_v40 = vadd.f32 %v2753_v52, %v2638_v58  ;;  %v2859_v63 = vadd.f32 %v2754_v21, %v2639_v45  ;;  %v617_v45 = vld [vmem:[%s9331_s21 + $0x239] sm:$0xff]  ;;  %v931_v13 = vld [vmem:[%s9331_s21 + $0x20a] sm:$0xff] }
 0x153   : > { %v2860_v29 = vadd.f32 %v2755_v44, %v2640_v12  ;;  %v2966_v34 = vadd.f32 %v11302_v0, %v2854_v43  ;;  %v2967_v36 = vadd.f32 %v11302_v0, %v2855_v57  ;;  %v506_v56 = vmul.f32 %v11087_v62, %v11287_v17  ;;  %v930_v12 = vld [vmem:[%s9331_s21 + $0x202] sm:$0xff]  ;;  %v932_v44 = vld [vmem:[%s9331_s21 + $0x212] sm:$0xff]  ;;  %v933_v43 = vld [vmem:[%s9331_s21 + $0x21a] sm:$0xff] }
 0x154   : > { %v2968_v53 = vadd.f32 %v11302_v0, %v2856_v3  ;;  %v2969_v33 = vadd.f32 %v11302_v0, %v2857_v47  ;;  %v2970_v8 = vadd.f32 %v11302_v0, %v2858_v40  ;;  %v2971_v60 = vadd.f32 %v11302_v0, %v2859_v63 }
 0x155   : > { %v2972_v1 = vadd.f32 %v11302_v0, %v2860_v29  ;;  %v3071_v2 = vmax.f32 %v2966_v34, 0.0  ;;  %v3072_v37 = vmax.f32 %v2967_v36, 0.0  ;;  %v507_v15 = vmul.f32 %v11087_v62, %v11292_v30 }
 0x156   : > { %v3073_v19 = vmax.f32 %v2968_v53, 0.0  ;;  %v3074_v35 = vmax.f32 %v2969_v33, 0.0  ;;  %v3075_v7 = vmax.f32 %v2970_v8, 0.0  ;;  %v3076_v31 = vmax.f32 %v2971_v60, 0.0  ;;  %v934_v53 = vld [vmem:[%s9331_s21 + $0x222] sm:$0xff]  ;;  %v935_v33 = vld [vmem:[%s9331_s21 + $0x22a] sm:$0xff] }
 0x157   : > { %v3077_v38 = vmax.f32 %v2972_v1, 0.0  ;;  %3177 = vst.msk [vmem:[#allocation2 + $0x1a8] sm:$0xff] %vm3123_vm0, %v3071_v2  ;;  %3178 = vst.msk [vmem:[#allocation2 + $0x1b0] sm:$0xff] %vm3123_vm0, %v3072_v37  ;;  %v508_v41 = vmul.f32 %v11087_v62, %v11297_v23  ;;  %v509_v10 = vmul.f32 %v11087_v62, %v11307_v39  ;;  %v510_v58 = vmul.f32 %v11087_v62, %v11310_v26  ;;  %v936_v1 = vld [vmem:[%s9331_s21 + $0x232] sm:$0xff]  ;;  %v937_v2 = vld [vmem:[%s9331_s21 + $0x23a] sm:$0xff] }
 0x158   : > { %3179 = vst.msk [vmem:[#allocation2 + $0x1b8] sm:$0xff] %vm3123_vm0, %v3073_v19  ;;  %3180 = vst.msk [vmem:[#allocation2 + $0x1c0] sm:$0xff] %vm3123_vm0, %v3074_v35  ;;  %v511_v27 = vmul.f32 %v11087_v62, %v11313_v11  ;;  %v512_v48 = vmul.f32 %v11087_v62, %v11322_v20  ;;  %v720_v52 = vmul.f32 %v11112_v22, %v610_v14 }
 0x159   : > { %3181 = vst.msk [vmem:[#allocation2 + $0x1c8] sm:$0xff] %vm3123_vm0, %v3075_v7  ;;  %3182 = vst.msk [vmem:[#allocation2 + $0x1d0] sm:$0xff] %vm3123_vm0, %v3076_v31  ;;  %v721_v21 = vmul.f32 %v11112_v22, %v611_v55  ;;  %v722_v57 = vmul.f32 %v11112_v22, %v612_v54  ;;  %v723_v3 = vmul.f32 %v11112_v22, %v613_v51 }
 0x15a   : > { %3183 = vst.msk [vmem:[#allocation2 + $0x1d8] sm:$0xff] %vm3123_vm0, %v3077_v38  ;;  %v724_v47 = vmul.f32 %v11112_v22, %v614_v49  ;;  %v725_v40 = vmul.f32 %v11112_v22, %v615_v50  ;;  %v726_v63 = vmul.f32 %v11112_v22, %v616_v25  ;;  %v727_v29 = vmul.f32 %v11112_v22, %v617_v45  ;;  %v11384_v50 = vld [vmem:[%s9331_s21 + $0x236] sm:$0xff]  ;;  %v11387_v25 = vld [vmem:[%s9331_s21 + $0x23e] sm:$0xff]  ;;  %v11390_v38 = vld [vmem:[%s9331_s21 + $0x246] sm:$0xff] }
 0x15b   : > { %v825_v34 = vadd.f32 %v720_v52, %v505_v24  ;;  %v826_v36 = vadd.f32 %v721_v21, %v506_v56  ;;  %v827_v8 = vadd.f32 %v722_v57, %v507_v15  ;;  %v828_v60 = vadd.f32 %v723_v3, %v508_v41  ;;  %v11371_v24 = vld [vmem:[%s9331_s21 + $0x21e] sm:$0xff]  ;;  %v11374_v56 = vld [vmem:[%s9331_s21 + $0x226] sm:$0xff]  ;;  %v11377_v15 = vld [vmem:[%s9331_s21 + $0x22e] sm:$0xff] }
 0x15c   : > { %v829_v14 = vadd.f32 %v724_v47, %v509_v10  ;;  %v830_v55 = vadd.f32 %v725_v40, %v510_v58  ;;  %v831_v37 = vadd.f32 %v726_v63, %v511_v27  ;;  %v832_v54 = vadd.f32 %v727_v29, %v512_v48  ;;  %v11395_v27 = vld [vmem:[%s9331_s21 + $0x24e] sm:$0xff] }
 0x15d   : > { %v1040_v51 = vmul.f32 %v11128_v9, %v930_v12  ;;  %v1041_v49 = vmul.f32 %v11128_v9, %v931_v13  ;;  %v1042_v19 = vmul.f32 %v11128_v9, %v932_v44  ;;  %v1043_v35 = vmul.f32 %v11128_v9, %v933_v43 }
 0x15e   : > { %v1044_v7 = vmul.f32 %v11128_v9, %v934_v53  ;;  %v1045_v31 = vmul.f32 %v11128_v9, %v935_v33  ;;  %v3430_v41 = vld [vmem:[#allocation2 + $0x1a4] ss:$2 sm:$0xff]  ;;  %v3434_v10 = vld [vmem:[#allocation2 + $0x1a5] ss:$2 sm:$0xff]  ;;  %v1046_v58 = vmul.f32 %v11128_v9, %v936_v1  ;;  %v1047_v45 = vmul.f32 %v11128_v9, %v937_v2  ;;  %v11398_v33 = vld [vmem:[%s9331_s21 + $0x256] sm:$0xff] }
 0x15f   : > { %v1145_v12 = vadd.f32 %v1040_v51, %v825_v34  ;;  %v1146_v13 = vadd.f32 %v1041_v49, %v826_v36  ;;  %v3432_v48 = vld [vmem:[#allocation2 + $0x1b4] ss:$2 sm:$0x3f]  ;;  %v3436_v52 = vld [vmem:[#allocation2 + $0x1b5] ss:$2 sm:$0x3f]  ;;  %v3445_v21 = vmax.f32 %v3430_v41, %v3434_v10  ;;  %v1147_v44 = vadd.f32 %v1042_v19, %v827_v8 }
 0x160   : > { %v1148_v43 = vadd.f32 %v1043_v35, %v828_v60  ;;  %v1149_v57 = vadd.f32 %v1044_v7, %v829_v14  ;;  %v3438_v3 = vld [vmem:[#allocation2 + $0x1c2] ss:$2 sm:$0xff]  ;;  %v3446_v40 = vmax.f32 %v3432_v48, %v3436_v52  ;;  %v1150_v63 = vadd.f32 %v1045_v31, %v830_v55  ;;  %v3442_v34 = vld [vmem:[#allocation2 + $0x1c3] ss:$2 sm:$0xff]  ;;  %v1569_v10 = vld [vmem:[%s9331_s21 + $0x217] sm:$0xff] }
 0x161   : > { %v3440_v47 = vld [vmem:[#allocation2 + $0x1d2] ss:$2 sm:$0x3f]  ;;  %v1151_v29 = vadd.f32 %v1046_v58, %v831_v37  ;;  %v1152_v53 = vadd.f32 %v1047_v45, %v832_v54  ;;  %v3444_v36 = vld [vmem:[#allocation2 + $0x1d3] ss:$2 sm:$0x3f]  ;;  %v1360_v1 = vmul.f32 %v11161_v4, %v11371_v24  ;;  %v1361_v8 = vmul.f32 %v11161_v4, %v11374_v56 }
 0x162   : > { %v1362_v60 = vmul.f32 %v11161_v4, %v11377_v15  ;;  %v1363_v14 = vmul.f32 %v11161_v4, %v11384_v50  ;;  %v3447_v55 = vmax.f32 %v3438_v3, %v3442_v34  ;;  %v3448_v2 = vmax.f32 %v3440_v47, %v3444_v36  ;;  %v1566_v51 = vld [vmem:[%s9331_s21 + $0x1ff] sm:$0xff]  ;;  %v1567_v49 = vld [vmem:[%s9331_s21 + $0x207] sm:$0xff]  ;;  %v1568_v41 = vld [vmem:[%s9331_s21 + $0x20f] sm:$0xff] }
 0x163   : > { %v1364_v37 = vmul.f32 %v11161_v4, %v11387_v25  ;;  %v1365_v54 = vmul.f32 %v11161_v4, %v11390_v38  ;;  %v1366_v19 = vmul.f32 %v11161_v4, %v11395_v27  ;;  %v1367_v35 = vmul.f32 %v11161_v4, %v11398_v33  ;;  %v1570_v58 = vld [vmem:[%s9331_s21 + $0x21f] sm:$0xff]  ;;  %v1571_v47 = vld [vmem:[%s9331_s21 + $0x227] sm:$0xff]  ;;  %v1572_v34 = vld [vmem:[%s9331_s21 + $0x22f] sm:$0xff] }
 0x164   : > { %v1465_v7 = vadd.f32 %v1360_v1, %v1145_v12  ;;  %v1466_v31 = vadd.f32 %v1361_v8, %v1146_v13  ;;  %v3449_v45 = vmax.f32 %v3445_v21, %v3447_v55  ;;  %v3450_v48 = vmax.f32 %v3446_v40, %v3448_v2  ;;  %v1573_v36 = vld [vmem:[%s9331_s21 + $0x237] sm:$0xff] }
 0x165   : > { %v1467_v52 = vadd.f32 %v1362_v60, %v1147_v44  ;;  %v1468_v3 = vadd.f32 %v1363_v14, %v1148_v43  ;;  %v11424_v9 = vadd.f32 %v1364_v37, %v1149_v57  ;;  %v11426_v22 = vadd.f32 %v1365_v54, %v1150_v63  ;;  %v1577_v12 = vld [vmem:[%s9331_s21 + $0x257] sm:$0xff] }
 0x166   : > { %v11428_v62 = vadd.f32 %v1366_v19, %v1151_v29  ;;  %v1472_v4 = vadd.f32 %v1367_v35, %v1152_v53  ;;  %3451 = vst.msk [vmem:[#allocation3 + $0x81] sm:$0xff] %vm3123_vm0, %v3449_v45  ;;  %v1676_v13 = vmul.f32 %v11194_v28, %v1566_v51  ;;  %v1677_v21 = vmul.f32 %v11194_v28, %v1567_v49  ;;  %v2106_v49 = vld [vmem:[%s9331_s21 + $0x21c] sm:$0xff]  ;;  %v2107_v35 = vld [vmem:[%s9331_s21 + $0x224] sm:$0xff] }
 0x167   : > { %3452 = vst.msk [vmem:[#allocation3 + $0x89] sm:$0x3f] %vm3228_vm1, %v3450_v48  ;;  %v1678_v44 = vmul.f32 %v11194_v28, %v1568_v41  ;;  %v1679_v43 = vmul.f32 %v11194_v28, %v1569_v10  ;;  %v1680_v57 = vmul.f32 %v11194_v28, %v1570_v58  ;;  %v1681_v40 = vmul.f32 %v11194_v28, %v1571_v47  ;;  %v2110_v10 = vld [vmem:[%s9331_s21 + $0x23c] sm:$0xff]  ;;  %v2112_v58 = vld [vmem:[%s9331_s21 + $0x24c] sm:$0xff]  ;;  %v2113_v47 = vld [vmem:[%s9331_s21 + $0x254] sm:$0xff] }
 0x168   : > { %v1682_v63 = vmul.f32 %v11194_v28, %v1572_v34  ;;  %v1683_v29 = vmul.f32 %v11194_v28, %v1573_v36  ;;  %v1687_v53 = vmul.f32 %v11194_v28, %v1577_v12  ;;  %v1781_v1 = vadd.f32 %v1676_v13, %v11182_v5 }
 0x169   : > { %v1782_v8 = vadd.f32 %v1677_v21, %v11184_v59  ;;  %v1783_v60 = vadd.f32 %v1678_v44, %v11186_v61  ;;  %v1784_v14 = vadd.f32 %v1679_v43, %v11189_v46  ;;  %v1785_v55 = vadd.f32 %v1680_v57, %v1465_v7  ;;  %v2109_v7 = vld [vmem:[%s9331_s21 + $0x234] sm:$0xff]  ;;  %v2426_v43 = vld [vmem:[%s9331_s21 + $0x21d] sm:$0xff]  ;;  %v2427_v57 = vld [vmem:[%s9331_s21 + $0x225] sm:$0xff] }
 0x16a   : > { %v1786_v2 = vadd.f32 %v1681_v40, %v1466_v31  ;;  %v1787_v37 = vadd.f32 %v1682_v63, %v1467_v52  ;;  %v1788_v54 = vadd.f32 %v1683_v29, %v1468_v3  ;;  %v11446_v51 = vadd.f32 %v1687_v53, %v1472_v4 }
 0x16b   : > { %v1896_v5 = vmul.f32 %v11209_v32, %v11263_v42  ;;  %v1897_v59 = vmul.f32 %v11209_v32, %v11287_v17  ;;  %v1898_v61 = vmul.f32 %v11209_v32, %v11292_v30  ;;  %v1899_v46 = vmul.f32 %v11209_v32, %v11297_v23  ;;  %v2108_v42 = vld [vmem:[%s9331_s21 + $0x22c] sm:$0xff]  ;;  %v2111_v23 = vld [vmem:[%s9331_s21 + $0x244] sm:$0xff] }
 0x16c   : > { %v1900_v19 = vmul.f32 %v11209_v32, %v11307_v39  ;;  %v1901_v4 = vmul.f32 %v11209_v32, %v11310_v26  ;;  %v1902_v17 = vmul.f32 %v11209_v32, %v11313_v11  ;;  %v1903_v31 = vmul.f32 %v11209_v32, %v11322_v20 }
 0x16d   : > { %v2001_v30 = vadd.f32 %v1896_v5, %v1781_v1  ;;  %v2002_v41 = vadd.f32 %v1897_v59, %v1782_v8  ;;  %v4350_v39 = vld [vmem:[#allocation3 + $0x80] sm:$0xff]  ;;  %v2003_v26 = vadd.f32 %v1898_v61, %v1783_v60  ;;  %v2004_v48 = vadd.f32 %v1899_v46, %v1784_v14  ;;  %v2429_v8 = vld [vmem:[%s9331_s21 + $0x235] sm:$0xff]  ;;  %v2430_v60 = vld [vmem:[%s9331_s21 + $0x23d] sm:$0xff] }
 0x16e   : > { %v4351_v45 = vld [vmem:[#allocation3 + $0x88] sm:$0xff]  ;;  %v2005_v52 = vadd.f32 %v1900_v19, %v1785_v55  ;;  %v2006_v3 = vadd.f32 %v1901_v4, %v1786_v2  ;;  %v2007_v11 = vadd.f32 %v1902_v17, %v1787_v37  ;;  %v2008_v20 = vadd.f32 %v1903_v31, %v1788_v54  ;;  %v2431_v54 = vld [vmem:[%s9331_s21 + $0x245] sm:$0xff] }
 0x16f   : > { %v4371_v34 = vpack.c.bf16 %v4351_v45, %v4350_v39  ;;  %v2216_v36 = vmul.f32 %v11238_v18, %v2106_v49  ;;  %v2217_v12 = vmul.f32 %v11238_v18, %v2107_v35  ;;  %v2218_v13 = vmul.f32 %v11238_v18, %v2108_v42  ;;  %v2428_v1 = vld [vmem:[%s9331_s21 + $0x22d] sm:$0xff]  ;;  %v2433_v59 = vld [vmem:[%s9331_s21 + $0x255] sm:$0xff] }
 0x170   : > { %v2219_v21 = vmul.f32 %v11238_v18, %v2109_v7  ;;  %v2220_v44 = vmul.f32 %v11238_v18, %v2110_v10  ;;  %v2221_v40 = vmul.f32 %v11238_v18, %v2111_v23  ;;  %v2222_v63 = vmul.f32 %v11238_v18, %v2112_v58  ;;  %v2432_v5 = vld [vmem:[%s9331_s21 + $0x24d] sm:$0xff] }
 0x171   : > { %8539 = vmatmul.mubr.msk.bf16.gmra.mrb[12].mxu0 %vm3123_vm0, %v4371_v34  ;;  %v2223_v29 = vmul.f32 %v11238_v18, %v2113_v47  ;;  %v2321_v53 = vadd.f32 %v2216_v36, %v2001_v30  ;;  %v2322_v14 = vadd.f32 %v2217_v12, %v2002_v41  ;;  %v2323_v55 = vadd.f32 %v2218_v13, %v2003_v26 }
 0x172   : > { %v2324_v2 = vadd.f32 %v2219_v21, %v2004_v48  ;;  %v2325_v37 = vadd.f32 %v2220_v44, %v2005_v52  ;;  %v2326_v49 = vadd.f32 %v2221_v40, %v2006_v3  ;;  %v2327_v61 = vadd.f32 %v2222_v63, %v2007_v11 }
 0x173   : > { %v2328_v46 = vadd.f32 %v2223_v29, %v2008_v20  ;;  %v2536_v19 = vmul.f32 %v11256_v16, %v2426_v43  ;;  %v2537_v4 = vmul.f32 %v11256_v16, %v2427_v57  ;;  %v2538_v35 = vmul.f32 %v11256_v16, %v2428_v1  ;;  %v11518_v43 = vld [vmem:[%s9331_s21 + $0x248] sm:$0xff]  ;;  %v11525_v29 = vld [vmem:[%s9331_s21 + $0x250] sm:$0xff]  ;;  %v11531_v1 = vld [vmem:[%s9331_s21 + $0x260] sm:$0xff] }
 0x174   : > { %v2539_v42 = vmul.f32 %v11256_v16, %v2429_v8  ;;  %v2540_v7 = vmul.f32 %v11256_v16, %v2430_v60  ;;  %v2541_v17 = vmul.f32 %v11256_v16, %v2431_v54  ;;  %v2542_v31 = vmul.f32 %v11256_v16, %v2432_v5  ;;  %v618_v54 = vld [vmem:[%s9331_s21 + $0x241] sm:$0xff] }
 0x175   : > { %v2543_v30 = vmul.f32 %v11256_v16, %v2433_v59  ;;  %v2641_v41 = vadd.f32 %v2536_v19, %v2321_v53  ;;  %v2642_v10 = vadd.f32 %v2537_v4, %v2322_v14  ;;  %v2643_v23 = vadd.f32 %v2538_v35, %v2323_v55  ;;  %v11528_v53 = vld [vmem:[%s9331_s21 + $0x258] sm:$0xff] }
 0x176   : > { %v2644_v58 = vadd.f32 %v2539_v42, %v2324_v2  ;;  %v2645_v39 = vadd.f32 %v2540_v7, %v2325_v37  ;;  %v2646_v45 = vadd.f32 %v2541_v17, %v2326_v49  ;;  %v2647_v26 = vadd.f32 %v2542_v31, %v2327_v61  ;;  %v11537_v2 = vld [vmem:[%s9331_s21 + $0x268] sm:$0xff]  ;;  %v11540_v37 = vld [vmem:[%s9331_s21 + $0x270] sm:$0xff]  ;;  %v13739_v7 = vld [vmem:[#allocation14_spill] sm:$0xff] }
 0x177   : > { %v2648_v48 = vadd.f32 %v2543_v30, %v2328_v46  ;;  %v2756_v52 = vmul.f32 %v11272_v6, %v11371_v24  ;;  %v2757_v3 = vmul.f32 %v11272_v6, %v11374_v56  ;;  %v2758_v47 = vmul.f32 %v11272_v6, %v11377_v15  ;;  %v619_v46 = vld [vmem:[%s9331_s21 + $0x249] sm:$0xff]  ;;  %v620_v19 = vld [vmem:[%s9331_s21 + $0x251] sm:$0xff]  ;;  %v621_v31 = vld [vmem:[%s9331_s21 + $0x259] sm:$0xff] }
 0x178   : > { %v2759_v34 = vmul.f32 %v11272_v6, %v11384_v50  ;;  %v2760_v11 = vmul.f32 %v11272_v6, %v11387_v25  ;;  %v2761_v20 = vmul.f32 %v11272_v6, %v11390_v38  ;;  %v2762_v24 = vmul.f32 %v11272_v6, %v11395_v27  ;;  %v11515_v27 = vld [vmem:[%s9331_s21 + $0x240] sm:$0xff] }
 0x179   : > { %v2763_v56 = vmul.f32 %v11272_v6, %v11398_v33  ;;  %v2861_v36 = vadd.f32 %v2756_v52, %v2641_v41  ;;  %v2862_v15 = vadd.f32 %v2757_v3, %v2642_v10  ;;  %v2863_v12 = vadd.f32 %v2758_v47, %v2643_v23  ;;  %v622_v30 = vld [vmem:[%s9331_s21 + $0x261] sm:$0xff]  ;;  %v623_v41 = vld [vmem:[%s9331_s21 + $0x269] sm:$0xff] }
 0x17a   : > { %v2864_v13 = vadd.f32 %v2759_v34, %v2644_v58  ;;  %v2865_v50 = vadd.f32 %v2760_v11, %v2645_v39  ;;  %v2866_v21 = vadd.f32 %v2761_v20, %v2646_v45  ;;  %v2867_v44 = vadd.f32 %v2762_v24, %v2647_v26  ;;  %v624_v45 = vld [vmem:[%s9331_s21 + $0x271] sm:$0xff]  ;;  %v938_v26 = vld [vmem:[%s9331_s21 + $0x242] sm:$0xff] }
 0x17b   : > { %v2868_v25 = vadd.f32 %v2763_v56, %v2648_v48  ;;  %v2973_v38 = vadd.f32 %v11302_v0, %v2861_v36  ;;  %v2974_v33 = vadd.f32 %v11302_v0, %v2862_v15  ;;  %v2975_v57 = vadd.f32 %v11302_v0, %v2863_v12  ;;  %v13740_v3 = vld [vmem:[#allocation11_spill] sm:$0xff]  ;;  %v940_v15 = vld [vmem:[%s9331_s21 + $0x252] sm:$0xff]  ;;  %v941_v12 = vld [vmem:[%s9331_s21 + $0x25a] sm:$0xff] }
 0x17c   : > { %v2976_v40 = vadd.f32 %v11302_v0, %v2864_v13  ;;  %v2977_v63 = vadd.f32 %v11302_v0, %v2865_v50  ;;  %v2978_v8 = vadd.f32 %v11302_v0, %v2866_v21  ;;  %v2979_v60 = vadd.f32 %v11302_v0, %v2867_v44  ;;  %v939_v36 = vld [vmem:[%s9331_s21 + $0x24a] sm:$0xff]  ;;  %v942_v44 = vld [vmem:[%s9331_s21 + $0x262] sm:$0xff] }
 0x17d   : > { %v2980_v14 = vadd.f32 %v11302_v0, %v2868_v25  ;;  %v3078_v55 = vmax.f32 %v2973_v38, 0.0  ;;  %v3079_v5 = vmax.f32 %v2974_v33, 0.0  ;;  %v3080_v59 = vmax.f32 %v2975_v57, 0.0  ;;  %v943_v25 = vld [vmem:[%s9331_s21 + $0x26a] sm:$0xff]  ;;  %v944_v38 = vld [vmem:[%s9331_s21 + $0x272] sm:$0xff] }
 0x17e   : > { %v3081_v49 = vmax.f32 %v2976_v40, 0.0  ;;  %v3082_v61 = vmax.f32 %v2977_v63, 0.0  ;;  %v3083_v4 = vmax.f32 %v2978_v8, 0.0  ;;  %v3084_v35 = vmax.f32 %v2979_v60, 0.0  ;;  %v13741_v33 = vld [vmem:[#allocation12_spill] sm:$0xff] }
 0x17f   : > { %v3085_v42 = vmax.f32 %v2980_v14, 0.0  ;;  %3184 = vst.msk [vmem:[#allocation2 + $0x1e0] sm:$0xff] %vm3123_vm0, %v3078_v55  ;;  %v513_v17 = vmul.f32 %v13739_v7, %v11515_v27  ;;  %3185 = vst.msk [vmem:[#allocation2 + $0x1e8] sm:$0xff] %vm3123_vm0, %v3079_v5  ;;  %v514_v10 = vmul.f32 %v13739_v7, %v11518_v43  ;;  %v515_v23 = vmul.f32 %v13739_v7, %v11525_v29  ;;  %v11587_v14 = vld [vmem:[%s9331_s21 + $0x25e] sm:$0xff] }
 0x180   : > { %3186 = vst.msk [vmem:[#allocation2 + $0x1f0] sm:$0xff] %vm3123_vm0, %v3080_v59  ;;  %3187 = vst.msk [vmem:[#allocation2 + $0x1f8] sm:$0xff] %vm3123_vm0, %v3081_v49  ;;  %v516_v58 = vmul.f32 %v13739_v7, %v11528_v53  ;;  %v517_v39 = vmul.f32 %v13739_v7, %v11531_v1  ;;  %v518_v48 = vmul.f32 %v13739_v7, %v11537_v2  ;;  %v11593_v49 = vld [vmem:[%s9331_s21 + $0x266] sm:$0xff] }
 0x181   : > { %3188 = vst.msk [vmem:[#allocation2 + $0x200] sm:$0xff] %vm3123_vm0, %v3082_v61  ;;  %3189 = vst.msk [vmem:[#allocation2 + $0x208] sm:$0xff] %vm3123_vm0, %v3083_v4  ;;  %v519_v52 = vmul.f32 %v13739_v7, %v11540_v37  ;;  %v728_v47 = vmul.f32 %v13740_v3, %v618_v54  ;;  %v729_v34 = vmul.f32 %v13740_v3, %v619_v46  ;;  %v11596_v61 = vld [vmem:[%s9331_s21 + $0x26e] sm:$0xff]  ;;  %v11605_v7 = vld [vmem:[%s9331_s21 + $0x27e] sm:$0xff] }
 0x182   : > { %3190 = vst.msk [vmem:[#allocation2 + $0x210] sm:$0xff] %vm3123_vm0, %v3084_v35  ;;  %3191 = vst.msk [vmem:[#allocation2 + $0x218] sm:$0xff] %vm3123_vm0, %v3085_v42  ;;  %v730_v11 = vmul.f32 %v13740_v3, %v620_v19  ;;  %v731_v20 = vmul.f32 %v13740_v3, %v621_v31  ;;  %v732_v24 = vmul.f32 %v13740_v3, %v622_v30  ;;  %v11602_v42 = vld [vmem:[%s9331_s21 + $0x276] sm:$0xff] }
 0x183   : > { %v733_v56 = vmul.f32 %v13740_v3, %v623_v41  ;;  %v734_v13 = vmul.f32 %v13740_v3, %v624_v45  ;;  %v833_v50 = vadd.f32 %v728_v47, %v513_v17  ;;  %v834_v21 = vadd.f32 %v729_v34, %v514_v10  ;;  %v11608_v17 = vld [vmem:[%s9331_s21 + $0x286] sm:$0xff] }
 0x184   : > { %v1048_v57 = vmul.f32 %v13741_v33, %v938_v26  ;;  %v835_v40 = vadd.f32 %v730_v11, %v515_v23  ;;  %v836_v63 = vadd.f32 %v731_v20, %v516_v58  ;;  %v837_v8 = vadd.f32 %v732_v24, %v517_v39  ;;  %v11611_v58 = vld [vmem:[%s9331_s21 + $0x28e] sm:$0xff]  ;;  %v13742_v39 = vld [vmem:[#allocation13_spill] sm:$0xff]  ;;  %v1574_v11 = vld [vmem:[%s9331_s21 + $0x23f] sm:$0xff] }
 0x185   : > { %v838_v60 = vadd.f32 %v733_v56, %v518_v48  ;;  %v839_v55 = vadd.f32 %v734_v13, %v519_v52  ;;  %v1049_v54 = vmul.f32 %v13741_v33, %v939_v36  ;;  %v1050_v5 = vmul.f32 %v13741_v33, %v940_v15  ;;  %v1575_v13 = vld [vmem:[%s9331_s21 + $0x247] sm:$0xff] }
 0x186   : > { %v1051_v59 = vmul.f32 %v13741_v33, %v941_v12  ;;  %v1052_v46 = vmul.f32 %v13741_v33, %v942_v44  ;;  %v1053_v19 = vmul.f32 %v13741_v33, %v943_v25  ;;  %v1054_v4 = vmul.f32 %v13741_v33, %v944_v38  ;;  %v3454_v31 = vld [vmem:[#allocation2 + $0x1e0] ss:$2 sm:$0xff]  ;;  %v3458_v26 = vld [vmem:[#allocation2 + $0x1e1] ss:$2 sm:$0xff] }
 0x187   : > { %v1153_v35 = vadd.f32 %v1048_v57, %v833_v50  ;;  %v3456_v30 = vld [vmem:[#allocation2 + $0x1f0] ss:$2 sm:$0x3f]  ;;  %v1154_v41 = vadd.f32 %v1049_v54, %v834_v21  ;;  %v1155_v10 = vadd.f32 %v1050_v5, %v835_v40  ;;  %v1368_v45 = vmul.f32 %v13742_v39, %v11587_v14  ;;  %v3460_v48 = vld [vmem:[#allocation2 + $0x1f1] ss:$2 sm:$0x3f] }
 0x188   : > { %v1156_v23 = vadd.f32 %v1051_v59, %v836_v63  ;;  %v1157_v52 = vadd.f32 %v1052_v46, %v837_v8  ;;  %v1158_v3 = vadd.f32 %v1053_v19, %v838_v60  ;;  %v1159_v47 = vadd.f32 %v1054_v4, %v839_v55  ;;  %v3462_v20 = vld [vmem:[#allocation2 + $0x1fe] ss:$2 sm:$0xff]  ;;  %v3466_v50 = vld [vmem:[#allocation2 + $0x1ff] ss:$2 sm:$0xff]  ;;  %v1576_v57 = vld [vmem:[%s9331_s21 + $0x24f] sm:$0xff] }
 0x189   : > { %v1369_v34 = vmul.f32 %v13742_v39, %v11593_v49  ;;  %v3464_v24 = vld [vmem:[#allocation2 + $0x20e] ss:$2 sm:$0x3f]  ;;  %v3469_v56 = vmax.f32 %v3454_v31, %v3458_v26  ;;  %v3470_v36 = vmax.f32 %v3456_v30, %v3460_v48  ;;  %v1370_v15 = vmul.f32 %v13742_v39, %v11596_v61  ;;  %v3468_v21 = vld [vmem:[#allocation2 + $0x20f] ss:$2 sm:$0x3f] }
 0x18a   : > { %v1371_v12 = vmul.f32 %v13742_v39, %v11602_v42  ;;  %v1372_v44 = vmul.f32 %v13742_v39, %v11605_v7  ;;  %v1373_v25 = vmul.f32 %v13742_v39, %v11608_v17  ;;  %v1374_v38 = vmul.f32 %v13742_v39, %v11611_v58  ;;  %v1578_v55 = vld [vmem:[%s9331_s21 + $0x25f] sm:$0xff]  ;;  %v1579_v54 = vld [vmem:[%s9331_s21 + $0x267] sm:$0xff]  ;;  %v1580_v5 = vld [vmem:[%s9331_s21 + $0x26f] sm:$0xff] }
 0x18b   : > { %v1473_v33 = vadd.f32 %v1368_v45, %v1153_v35  ;;  %v3471_v40 = vmax.f32 %v3462_v20, %v3466_v50  ;;  %v3472_v63 = vmax.f32 %v3464_v24, %v3468_v21  ;;  %v1474_v8 = vadd.f32 %v1369_v34, %v1154_v41  ;;  %v2115_v24 = vld [vmem:[%s9331_s21 + $0x264] sm:$0xff] }
 0x18c   : > { %v1475_v60 = vadd.f32 %v1370_v15, %v1155_v10  ;;  %v11633_v59 = vadd.f32 %v1371_v12, %v1156_v23  ;;  %v11635_v46 = vadd.f32 %v1372_v44, %v1157_v52  ;;  %v11637_v19 = vadd.f32 %v1373_v25, %v1158_v3  ;;  %v2118_v12 = vld [vmem:[%s9331_s21 + $0x27c] sm:$0xff] }
 0x18d   : > { %v11639_v4 = vadd.f32 %v1374_v38, %v1159_v47  ;;  %v3473_v31 = vmax.f32 %v3469_v56, %v3471_v40  ;;  %v3474_v30 = vmax.f32 %v3470_v36, %v3472_v63  ;;  %v1684_v35 = vmul.f32 %v11194_v28, %v1574_v11  ;;  %v2114_v47 = vld [vmem:[%s9331_s21 + $0x25c] sm:$0xff]  ;;  %v2116_v56 = vld [vmem:[%s9331_s21 + $0x26c] sm:$0xff] }
 0x18e   : > { %v1685_v39 = vmul.f32 %v11194_v28, %v1575_v13  ;;  %v1686_v41 = vmul.f32 %v11194_v28, %v1576_v57  ;;  %v1688_v10 = vmul.f32 %v11194_v28, %v1578_v55  ;;  %v1689_v23 = vmul.f32 %v11194_v28, %v1579_v54  ;;  %v2119_v13 = vld [vmem:[%s9331_s21 + $0x284] sm:$0xff]  ;;  %v2436_v40 = vld [vmem:[%s9331_s21 + $0x26d] sm:$0xff]  ;;  %v2437_v55 = vld [vmem:[%s9331_s21 + $0x275] sm:$0xff] }
 0x18f   : > { %v1690_v45 = vmul.f32 %v11194_v28, %v1580_v5  ;;  %3475 = vst.msk [vmem:[#allocation3 + $0x91] sm:$0xff] %vm3123_vm0, %v3473_v31  ;;  %v1789_v26 = vadd.f32 %v1684_v35, %v11424_v9  ;;  %v1904_v52 = vmul.f32 %v11209_v32, %v11515_v27  ;;  %v1905_v3 = vmul.f32 %v11209_v32, %v11518_v43  ;;  %v2434_v25 = vld [vmem:[%s9331_s21 + $0x25d] sm:$0xff]  ;;  %v2435_v57 = vld [vmem:[%s9331_s21 + $0x265] sm:$0xff] }
 0x190   : > { %3476 = vst.msk [vmem:[#allocation3 + $0x99] sm:$0x3f] %vm3228_vm1, %v3474_v30  ;;  %v1790_v48 = vadd.f32 %v1685_v39, %v11426_v22  ;;  %v1791_v28 = vadd.f32 %v1686_v41, %v11428_v62  ;;  %v1793_v34 = vadd.f32 %v1688_v10, %v1473_v33  ;;  %v1794_v11 = vadd.f32 %v1689_v23, %v1474_v8  ;;  %v2117_v62 = vld [vmem:[%s9331_s21 + $0x274] sm:$0xff]  ;;  %v2438_v54 = vld [vmem:[%s9331_s21 + $0x27d] sm:$0xff]  ;;  %v2439_v5 = vld [vmem:[%s9331_s21 + $0x285] sm:$0xff] }
 0x191   : > { %v1795_v20 = vadd.f32 %v1690_v45, %v1475_v60  ;;  %v1906_v9 = vmul.f32 %v11209_v32, %v11525_v29  ;;  %v1907_v22 = vmul.f32 %v11209_v32, %v11528_v53  ;;  %v1908_v27 = vmul.f32 %v11209_v32, %v11531_v1  ;;  %v2120_v53 = vld [vmem:[%s9331_s21 + $0x28c] sm:$0xff] }
 0x192   : > { %v1909_v43 = vmul.f32 %v11209_v32, %v11537_v2  ;;  %v1910_v36 = vmul.f32 %v11209_v32, %v11540_v37  ;;  %v2009_v15 = vadd.f32 %v1904_v52, %v1789_v26  ;;  %v2010_v29 = vadd.f32 %v1905_v3, %v1790_v48  ;;  %v2440_v10 = vld [vmem:[%s9331_s21 + $0x28d] sm:$0xff] }
 0x193   : > { %v2224_v50 = vmul.f32 %v11238_v18, %v2114_v47  ;;  %v2011_v1 = vadd.f32 %v1906_v9, %v1791_v28  ;;  %v2012_v2 = vadd.f32 %v1907_v22, %v11446_v51  ;;  %v2013_v21 = vadd.f32 %v1908_v27, %v1793_v34 }
 0x194   : > { %v2014_v44 = vadd.f32 %v1909_v43, %v1794_v11  ;;  %v2015_v38 = vadd.f32 %v1910_v36, %v1795_v20  ;;  %v2225_v32 = vmul.f32 %v11238_v18, %v2115_v24  ;;  %v2226_v37 = vmul.f32 %v11238_v18, %v2116_v56  ;;  %v11699_v56 = vld [vmem:[%s9331_s21 + $0x278] sm:$0xff] }
 0x195   : > { %v2227_v33 = vmul.f32 %v11238_v18, %v2117_v62  ;;  %v2228_v63 = vmul.f32 %v11238_v18, %v2118_v12  ;;  %v2229_v8 = vmul.f32 %v11238_v18, %v2119_v13  ;;  %v2230_v51 = vmul.f32 %v11238_v18, %v2120_v53  ;;  %v11714_v53 = vld [vmem:[%s9331_s21 + $0x280] sm:$0xff] }
 0x196   : > { %v2329_v60 = vadd.f32 %v2224_v50, %v2009_v15  ;;  %v4352_v31 = vld [vmem:[#allocation3 + $0x90] sm:$0xff]  ;;  %v2330_v35 = vadd.f32 %v2225_v32, %v2010_v29  ;;  %v2331_v39 = vadd.f32 %v2226_v37, %v2011_v1  ;;  %v2544_v23 = vmul.f32 %v11256_v16, %v2434_v25  ;;  %v11736_v37 = vld [vmem:[%s9331_s21 + $0x2a0] sm:$0xff] }
 0x197   : > { %v4353_v30 = vld [vmem:[#allocation3 + $0x98] sm:$0xff]  ;;  %v2332_v41 = vadd.f32 %v2227_v33, %v2012_v2  ;;  %v2333_v26 = vadd.f32 %v2228_v63, %v2013_v21  ;;  %v2334_v48 = vadd.f32 %v2229_v8, %v2014_v44  ;;  %v2335_v52 = vadd.f32 %v2230_v51, %v2015_v38  ;;  %v11724_v2 = vld [vmem:[%s9331_s21 + $0x288] sm:$0xff]  ;;  %v11727_v21 = vld [vmem:[%s9331_s21 + $0x290] sm:$0xff] }
 0x198   : > { %v4372_v45 = vpack.c.bf16 %v4353_v30, %v4352_v31  ;;  %v2545_v3 = vmul.f32 %v11256_v16, %v2435_v57  ;;  %v2546_v18 = vmul.f32 %v11256_v16, %v2436_v40  ;;  %v2547_v47 = vmul.f32 %v11256_v16, %v2437_v55  ;;  %v11733_v32 = vld [vmem:[%s9331_s21 + $0x298] sm:$0xff]  ;;  %v11739_v33 = vld [vmem:[%s9331_s21 + $0x2a8] sm:$0xff] }
 0x199   : > { %v2548_v28 = vmul.f32 %v11256_v16, %v2438_v54  ;;  %v2549_v34 = vmul.f32 %v11256_v16, %v2439_v5  ;;  %v2550_v11 = vmul.f32 %v11256_v16, %v2440_v10  ;;  %v2649_v20 = vadd.f32 %v2544_v23, %v2329_v60  ;;  %v11748_v60 = vld [vmem:[%s9331_s21 + $0x2b0] sm:$0xff]  ;;  %v625_v55 = vld [vmem:[%s9331_s21 + $0x279] sm:$0xff]  ;;  %v626_v54 = vld [vmem:[%s9331_s21 + $0x281] sm:$0xff] }
 0x19a   : > { %8542 = vmatprep.mubr.msk.bf16.mxu0 %vm3123_vm0, %v4372_v45  ;;  %v2764_v9 = vmul.f32 %v11272_v6, %v11587_v14  ;;  %v2650_v22 = vadd.f32 %v2545_v3, %v2330_v35  ;;  %v2651_v27 = vadd.f32 %v2546_v18, %v2331_v39  ;;  %v2652_v43 = vadd.f32 %v2547_v47, %v2332_v41  ;;  %v627_v39 = vld [vmem:[%s9331_s21 + $0x289] sm:$0xff]  ;;  %v628_v41 = vld [vmem:[%s9331_s21 + $0x291] sm:$0xff]  ;;  %v629_v10 = vld [vmem:[%s9331_s21 + $0x299] sm:$0xff] }
 0x19b   : > { %v2653_v24 = vadd.f32 %v2548_v28, %v2333_v26  ;;  %v2654_v62 = vadd.f32 %v2549_v34, %v2334_v48  ;;  %v2655_v36 = vadd.f32 %v2550_v11, %v2335_v52  ;;  %v2765_v15 = vmul.f32 %v11272_v6, %v11593_v49  ;;  %v631_v52 = vld [vmem:[%s9331_s21 + $0x2a9] sm:$0xff]  ;;  %v632_v34 = vld [vmem:[%s9331_s21 + $0x2b1] sm:$0xff] }
 0x19c   : > { %v2766_v16 = vmul.f32 %v11272_v6, %v11596_v61  ;;  %v2767_v29 = vmul.f32 %v11272_v6, %v11602_v42  ;;  %v2768_v14 = vmul.f32 %v11272_v6, %v11605_v7  ;;  %v2769_v12 = vmul.f32 %v11272_v6, %v11608_v17  ;;  %v11719_v42 = vld [vmem:[%s13667_s1] ss:$0 sm:$0xff] }
 0x19d   : > { %v2770_v13 = vmul.f32 %v11272_v6, %v11611_v58  ;;  %v2869_v49 = vadd.f32 %v2764_v9, %v2649_v20  ;;  %v2870_v61 = vadd.f32 %v2765_v15, %v2650_v22  ;;  %v520_v7 = vmul.f32 %v11719_v42, %v11699_v56  ;;  %v11780_v20 = vld [vmem:[%s13667_s1 + $0x1] ss:$0 sm:$0xff] }
 0x19e   : > { %v2871_v50 = vadd.f32 %v2766_v16, %v2651_v27  ;;  %v2872_v17 = vadd.f32 %v2767_v29, %v2652_v43  ;;  %v2873_v1 = vadd.f32 %v2768_v14, %v2653_v24  ;;  %v2874_v6 = vadd.f32 %v2769_v12, %v2654_v62  ;;  %v945_v43 = vld [vmem:[%s9331_s21 + $0x27a] sm:$0xff]  ;;  %v946_v16 = vld [vmem:[%s9331_s21 + $0x282] sm:$0xff]  ;;  %v947_v29 = vld [vmem:[%s9331_s21 + $0x28a] sm:$0xff] }
 0x19f   : > { %v2875_v58 = vadd.f32 %v2770_v13, %v2655_v36  ;;  %v2981_v44 = vadd.f32 %v11302_v0, %v2869_v49  ;;  %v2982_v25 = vadd.f32 %v11302_v0, %v2870_v61  ;;  %v521_v57 = vmul.f32 %v11719_v42, %v11714_v53  ;;  %v948_v14 = vld [vmem:[%s9331_s21 + $0x292] sm:$0xff] }
 0x1a0   : > { %v2983_v38 = vadd.f32 %v11302_v0, %v2871_v50  ;;  %v2984_v40 = vadd.f32 %v11302_v0, %v2872_v17  ;;  %v2985_v63 = vadd.f32 %v11302_v0, %v2873_v1  ;;  %v2986_v8 = vadd.f32 %v11302_v0, %v2874_v6  ;;  %v949_v50 = vld [vmem:[%s9331_s21 + $0x29a] sm:$0xff]  ;;  %v950_v17 = vld [vmem:[%s9331_s21 + $0x2a2] sm:$0xff]  ;;  %v951_v1 = vld [vmem:[%s9331_s21 + $0x2aa] sm:$0xff] }
 0x1a1   : > { %v2987_v51 = vadd.f32 %v11302_v0, %v2875_v58  ;;  %v3086_v5 = vmax.f32 %v2981_v44, 0.0  ;;  %v3087_v31 = vmax.f32 %v2982_v25, 0.0  ;;  %v522_v35 = vmul.f32 %v11719_v42, %v11724_v2  ;;  %v630_v0 = vld [vmem:[%s9331_s21 + $0x2a1] sm:$0xff] }
 0x1a2   : > { %v3088_v30 = vmax.f32 %v2983_v38, 0.0  ;;  %v3089_v23 = vmax.f32 %v2984_v40, 0.0  ;;  %v3090_v45 = vmax.f32 %v2985_v63, 0.0  ;;  %v3091_v26 = vmax.f32 %v2986_v8, 0.0  ;;  %v952_v38 = vld [vmem:[%s9331_s21 + $0x2b2] sm:$0xff] }
 0x1a3   : > { %v3092_v48 = vmax.f32 %v2987_v51, 0.0  ;;  %3192 = vst.msk [vmem:[#allocation2 + $0x220] sm:$0xff] %vm3123_vm0, %v3086_v5  ;;  %3193 = vst.msk [vmem:[#allocation2 + $0x228] sm:$0xff] %vm3123_vm0, %v3087_v31  ;;  %v523_v3 = vmul.f32 %v11719_v42, %v11727_v21  ;;  %v524_v18 = vmul.f32 %v11719_v42, %v11733_v32  ;;  %v525_v47 = vmul.f32 %v11719_v42, %v11736_v37  ;;  %v11807_v51 = vld [vmem:[%s9331_s21 + $0x296] sm:$0xff] }
 0x1a4   : > { %3194 = vst.msk [vmem:[#allocation2 + $0x230] sm:$0xff] %vm3123_vm0, %v3088_v30  ;;  %v526_v28 = vmul.f32 %v11719_v42, %v11739_v33  ;;  %3195 = vst.msk [vmem:[#allocation2 + $0x238] sm:$0xff] %vm3123_vm0, %v3089_v23  ;;  %v527_v11 = vmul.f32 %v11719_v42, %v11748_v60  ;;  %v735_v9 = vmul.f32 %v11780_v20, %v625_v55  ;;  %v11810_v55 = vld [vmem:[%s9331_s21 + $0x29e] sm:$0xff] }
 0x1a5   : > { %3196 = vst.msk [vmem:[#allocation2 + $0x240] sm:$0xff] %vm3123_vm0, %v3090_v45  ;;  %3197 = vst.msk [vmem:[#allocation2 + $0x248] sm:$0xff] %vm3123_vm0, %v3091_v26  ;;  %v736_v22 = vmul.f32 %v11780_v20, %v626_v54  ;;  %v737_v27 = vmul.f32 %v11780_v20, %v627_v39  ;;  %v738_v24 = vmul.f32 %v11780_v20, %v628_v41  ;;  %v11820_v39 = vld [vmem:[%s9331_s21 + $0x2ae] sm:$0xff]  ;;  %v11823_v41 = vld [vmem:[%s9331_s21 + $0x2b6] sm:$0xff] }
 0x1a6   : > { %3198 = vst.msk [vmem:[#allocation2 + $0x250] sm:$0xff] %vm3123_vm0, %v3092_v48  ;;  %v739_v62 = vmul.f32 %v11780_v20, %v629_v10  ;;  %v740_v36 = vmul.f32 %v11780_v20, %v630_v0  ;;  %v741_v15 = vmul.f32 %v11780_v20, %v631_v52  ;;  %v742_v12 = vmul.f32 %v11780_v20, %v632_v34  ;;  %v11827_v52 = vld [vmem:[%s9331_s21 + $0x2be] sm:$0xff] }
 0x1a7   : > { %v840_v13 = vadd.f32 %v735_v9, %v520_v7  ;;  %v841_v49 = vadd.f32 %v736_v22, %v521_v57  ;;  %v842_v61 = vadd.f32 %v737_v27, %v522_v35  ;;  %v843_v6 = vadd.f32 %v738_v24, %v523_v3  ;;  %v11801_v7 = vld [vmem:[%s13667_s1 + $0x2] ss:$0 sm:$0xff]  ;;  %v11817_v35 = vld [vmem:[%s9331_s21 + $0x2a6] sm:$0xff] }
 0x1a8   : > { %v844_v58 = vadd.f32 %v739_v62, %v524_v18  ;;  %v845_v44 = vadd.f32 %v740_v36, %v525_v47  ;;  %v846_v25 = vadd.f32 %v741_v15, %v526_v28  ;;  %v847_v40 = vadd.f32 %v742_v12, %v527_v11  ;;  %v11830_v9 = vld [vmem:[%s9331_s21 + $0x2c6] sm:$0xff]  ;;  %v11833_v36 = vld [vmem:[%s9331_s21 + $0x2ce] sm:$0xff]  ;;  %v11838_v15 = vld [vmem:[%s13667_s1 + $0x3] ss:$0 sm:$0xff] }
 0x1a9   : > { %v1055_v57 = vmul.f32 %v11801_v7, %v945_v43  ;;  %v1056_v63 = vmul.f32 %v11801_v7, %v946_v16  ;;  %v1057_v8 = vmul.f32 %v11801_v7, %v947_v29  ;;  %v1058_v54 = vmul.f32 %v11801_v7, %v948_v14 }
 0x1aa   : > { %v1059_v5 = vmul.f32 %v11801_v7, %v949_v50  ;;  %v1060_v31 = vmul.f32 %v11801_v7, %v950_v17  ;;  %v1061_v30 = vmul.f32 %v11801_v7, %v951_v1  ;;  %v3478_v10 = vld [vmem:[#allocation2 + $0x21c] ss:$2 sm:$0xff]  ;;  %v1062_v45 = vmul.f32 %v11801_v7, %v952_v38  ;;  %v3482_v3 = vld [vmem:[#allocation2 + $0x21d] ss:$2 sm:$0xff] }
 0x1ab   : > { %v3480_v23 = vld [vmem:[#allocation2 + $0x22c] ss:$2 sm:$0x3f]  ;;  %v1160_v26 = vadd.f32 %v1055_v57, %v840_v13  ;;  %v1161_v48 = vadd.f32 %v1056_v63, %v841_v49  ;;  %v1162_v0 = vadd.f32 %v1057_v8, %v842_v61  ;;  %v3484_v18 = vld [vmem:[#allocation2 + $0x22d] ss:$2 sm:$0x3f]  ;;  %v1163_v47 = vadd.f32 %v1058_v54, %v843_v6 }
 0x1ac   : > { %v1164_v28 = vadd.f32 %v1059_v5, %v844_v58  ;;  %v1165_v34 = vadd.f32 %v1060_v31, %v845_v44  ;;  %v1166_v11 = vadd.f32 %v1061_v30, %v846_v25  ;;  %v3486_v22 = vld [vmem:[#allocation2 + $0x23a] ss:$2 sm:$0xff]  ;;  %v3493_v43 = vmax.f32 %v3478_v10, %v3482_v3  ;;  %v3490_v29 = vld [vmem:[#allocation2 + $0x23b] ss:$2 sm:$0xff]  ;;  %v1584_v8 = vld [vmem:[%s9331_s21 + $0x28f] sm:$0xff] }
 0x1ad   : > { %v3488_v27 = vld [vmem:[#allocation2 + $0x24a] ss:$2 sm:$0x3f]  ;;  %v3494_v24 = vmax.f32 %v3480_v23, %v3484_v18  ;;  %v1167_v62 = vadd.f32 %v1062_v45, %v847_v40  ;;  %v1375_v16 = vmul.f32 %v11838_v15, %v11807_v51  ;;  %v3492_v14 = vld [vmem:[#allocation2 + $0x24b] ss:$2 sm:$0x3f]  ;;  %v1376_v12 = vmul.f32 %v11838_v15, %v11810_v55 }
 0x1ae   : > { %v1377_v13 = vmul.f32 %v11838_v15, %v11817_v35  ;;  %v1378_v49 = vmul.f32 %v11838_v15, %v11820_v39  ;;  %v1379_v61 = vmul.f32 %v11838_v15, %v11823_v41  ;;  %v3495_v50 = vmax.f32 %v3486_v22, %v3490_v29  ;;  %v1581_v58 = vld [vmem:[%s9331_s21 + $0x277] sm:$0xff]  ;;  %v1582_v44 = vld [vmem:[%s9331_s21 + $0x27f] sm:$0xff]  ;;  %v1583_v25 = vld [vmem:[%s9331_s21 + $0x287] sm:$0xff] }
 0x1af   : > { %v3496_v17 = vmax.f32 %v3488_v27, %v3492_v14  ;;  %v1380_v1 = vmul.f32 %v11838_v15, %v11827_v52  ;;  %v1381_v6 = vmul.f32 %v11838_v15, %v11830_v9  ;;  %v1382_v38 = vmul.f32 %v11838_v15, %v11833_v36  ;;  %v1585_v54 = vld [vmem:[%s9331_s21 + $0x297] sm:$0xff]  ;;  %v1586_v5 = vld [vmem:[%s9331_s21 + $0x29f] sm:$0xff]  ;;  %v1587_v45 = vld [vmem:[%s9331_s21 + $0x2a7] sm:$0xff] }
 0x1b0   : > { %v1480_v40 = vadd.f32 %v1375_v16, %v1160_v26  ;;  %v1481_v57 = vadd.f32 %v1376_v12, %v1161_v48  ;;  %v1482_v63 = vadd.f32 %v1377_v13, %v1162_v0  ;;  %v3497_v31 = vmax.f32 %v3493_v43, %v3495_v50  ;;  %v1588_v3 = vld [vmem:[%s9331_s21 + $0x2af] sm:$0xff]  ;;  %v11874_v26 = vld [vmem:[%s13667_s1 + $0x4] ss:$0 sm:$0xff] }
 0x1b1   : > { %v3498_v30 = vmax.f32 %v3494_v24, %v3496_v17  ;;  %v1483_v10 = vadd.f32 %v1378_v49, %v1163_v47  ;;  %v11862_v23 = vadd.f32 %v1379_v61, %v1164_v28  ;;  %v1592_v18 = vld [vmem:[%s9331_s21 + $0x2cf] sm:$0xff]  ;;  %v11867_v22 = vadd.f32 %v1380_v1, %v1165_v34 }
 0x1b2   : > { %v11869_v27 = vadd.f32 %v1381_v6, %v1166_v11  ;;  %v1487_v29 = vadd.f32 %v1382_v38, %v1167_v62  ;;  %v1691_v48 = vmul.f32 %v11874_v26, %v1581_v58  ;;  %3499 = vst.msk [vmem:[#allocation3 + $0xa1] sm:$0xff] %vm3123_vm0, %v3497_v31  ;;  %v1692_v0 = vmul.f32 %v11874_v26, %v1582_v44  ;;  %v11896_v6 = vld [vmem:[%s13667_s1 + $0x5] ss:$0 sm:$0xff]  ;;  %v2122_v38 = vld [vmem:[%s9331_s21 + $0x29c] sm:$0xff] }
 0x1b3   : > { %3500 = vst.msk [vmem:[#allocation3 + $0xa9] sm:$0x3f] %vm3228_vm1, %v3498_v30  ;;  %v1693_v47 = vmul.f32 %v11874_v26, %v1583_v25  ;;  %v1694_v28 = vmul.f32 %v11874_v26, %v1584_v8  ;;  %v1695_v34 = vmul.f32 %v11874_v26, %v1585_v54  ;;  %v1696_v11 = vmul.f32 %v11874_v26, %v1586_v5  ;;  %v2126_v54 = vld [vmem:[%s9331_s21 + $0x2bc] sm:$0xff]  ;;  %v2127_v5 = vld [vmem:[%s9331_s21 + $0x2c4] sm:$0xff] }
 0x1b4   : > { %v1697_v43 = vmul.f32 %v11874_v26, %v1587_v45  ;;  %v1698_v24 = vmul.f32 %v11874_v26, %v1588_v3  ;;  %v1702_v62 = vmul.f32 %v11874_v26, %v1592_v18  ;;  %v1796_v16 = vadd.f32 %v1691_v48, %v11633_v59  ;;  %v2128_v45 = vld [vmem:[%s9331_s21 + $0x2cc] sm:$0xff] }
 0x1b5   : > { %v1797_v14 = vadd.f32 %v1692_v0, %v11635_v46  ;;  %v1798_v12 = vadd.f32 %v1693_v47, %v11637_v19  ;;  %v1799_v13 = vadd.f32 %v1694_v28, %v11639_v4  ;;  %v1800_v49 = vadd.f32 %v1695_v34, %v1480_v40  ;;  %v2121_v4 = vld [vmem:[%s9331_s21 + $0x294] sm:$0xff]  ;;  %v2124_v40 = vld [vmem:[%s9331_s21 + $0x2ac] sm:$0xff] }
 0x1b6   : > { %v1801_v61 = vadd.f32 %v1696_v11, %v1481_v57  ;;  %v1802_v50 = vadd.f32 %v1697_v43, %v1482_v63  ;;  %v1803_v17 = vadd.f32 %v1698_v24, %v1483_v10  ;;  %v11891_v1 = vadd.f32 %v1702_v62, %v1487_v29  ;;  %v2441_v11 = vld [vmem:[%s9331_s21 + $0x295] sm:$0xff]  ;;  %v2442_v43 = vld [vmem:[%s9331_s21 + $0x29d] sm:$0xff]  ;;  %v2443_v24 = vld [vmem:[%s9331_s21 + $0x2a5] sm:$0xff] }
 0x1b7   : > { %v1911_v59 = vmul.f32 %v11896_v6, %v11699_v56  ;;  %v1912_v46 = vmul.f32 %v11896_v6, %v11714_v53  ;;  %v1913_v19 = vmul.f32 %v11896_v6, %v11724_v2  ;;  %v1914_v58 = vmul.f32 %v11896_v6, %v11727_v21  ;;  %v2123_v53 = vld [vmem:[%s9331_s21 + $0x2a4] sm:$0xff]  ;;  %v2125_v21 = vld [vmem:[%s9331_s21 + $0x2b4] sm:$0xff] }
 0x1b8   : > { %v1915_v44 = vmul.f32 %v11896_v6, %v11733_v32  ;;  %v1916_v25 = vmul.f32 %v11896_v6, %v11736_v37  ;;  %v1917_v56 = vmul.f32 %v11896_v6, %v11739_v33  ;;  %v1918_v2 = vmul.f32 %v11896_v6, %v11748_v60  ;;  %v11925_v60 = vld [vmem:[%s13667_s1 + $0x6] ss:$0 sm:$0xff] }
 0x1b9   : > { %v2016_v57 = vadd.f32 %v1911_v59, %v1796_v16  ;;  %v2017_v63 = vadd.f32 %v1912_v46, %v1797_v14  ;;  %v2018_v8 = vadd.f32 %v1913_v19, %v1798_v12  ;;  %v4354_v32 = vld [vmem:[#allocation3 + $0xa0] sm:$0xff]  ;;  %v2019_v37 = vadd.f32 %v1914_v58, %v1799_v13 }
 0x1ba   : > { %v4355_v31 = vld [vmem:[#allocation3 + $0xa8] sm:$0xff]  ;;  %v2020_v33 = vadd.f32 %v1915_v44, %v1800_v49  ;;  %v2021_v30 = vadd.f32 %v1916_v25, %v1801_v61  ;;  %v2022_v10 = vadd.f32 %v1917_v56, %v1802_v50  ;;  %v2023_v18 = vadd.f32 %v1918_v2, %v1803_v17  ;;  %v2446_v61 = vld [vmem:[%s9331_s21 + $0x2bd] sm:$0xff]  ;;  %v2447_v19 = vld [vmem:[%s9331_s21 + $0x2c5] sm:$0xff] }
 0x1bb   : > { %v4373_v3 = vpack.c.bf16 %v4355_v31, %v4354_v32  ;;  %v2231_v29 = vmul.f32 %v11925_v60, %v2121_v4  ;;  %v2232_v48 = vmul.f32 %v11925_v60, %v2122_v38  ;;  %v2233_v0 = vmul.f32 %v11925_v60, %v2123_v53  ;;  %v2444_v13 = vld [vmem:[%s9331_s21 + $0x2ad] sm:$0xff]  ;;  %v2445_v49 = vld [vmem:[%s9331_s21 + $0x2b5] sm:$0xff]  ;;  %v11947_v25 = vld [vmem:[%s13667_s1 + $0x7] ss:$0 sm:$0xff] }
 0x1bc   : > { %v2234_v47 = vmul.f32 %v11925_v60, %v2124_v40  ;;  %v2235_v28 = vmul.f32 %v11925_v60, %v2125_v21  ;;  %v2236_v34 = vmul.f32 %v11925_v60, %v2126_v54  ;;  %v2237_v62 = vmul.f32 %v11925_v60, %v2127_v5  ;;  %v2448_v4 = vld [vmem:[%s9331_s21 + $0x2cd] sm:$0xff] }
 0x1bd   : > { %8543 = vmatmul.mubr.msk.bf16.gmra.mrb[16].mxu0 %vm3123_vm0, %v4373_v3  ;;  %v2238_v16 = vmul.f32 %v11925_v60, %v2128_v45  ;;  %v2336_v14 = vadd.f32 %v2231_v29, %v2016_v57  ;;  %v2337_v12 = vadd.f32 %v2232_v48, %v2017_v63  ;;  %v2338_v50 = vadd.f32 %v2233_v0, %v2018_v8 }
 0x1be   : > { %v2339_v17 = vadd.f32 %v2234_v47, %v2019_v37  ;;  %v2340_v59 = vadd.f32 %v2235_v28, %v2020_v33  ;;  %v2341_v46 = vadd.f32 %v2236_v34, %v2021_v30  ;;  %v2342_v58 = vadd.f32 %v2237_v62, %v2022_v10  ;;  %v11960_v10 = vld [vmem:[%s13667_s1 + $0x8] ss:$0 sm:$0xff]  ;;  %v11989_v62 = vld [vmem:[%s9331_s21 + $0x2c0] sm:$0xff] }
 0x1bf   : > { %v2343_v44 = vadd.f32 %v2238_v16, %v2023_v18  ;;  %v2551_v56 = vmul.f32 %v11947_v25, %v2441_v11  ;;  %v2552_v38 = vmul.f32 %v11947_v25, %v2442_v43  ;;  %v2553_v53 = vmul.f32 %v11947_v25, %v2443_v24  ;;  %v11979_v11 = vld [vmem:[%s9331_s21 + $0x2b8] sm:$0xff]  ;;  %v11992_v16 = vld [vmem:[%s9331_s21 + $0x2c8] sm:$0xff] }
 0x1c0   : > { %v2554_v40 = vmul.f32 %v11947_v25, %v2444_v13  ;;  %v2555_v2 = vmul.f32 %v11947_v25, %v2445_v49  ;;  %v2556_v57 = vmul.f32 %v11947_v25, %v2446_v61  ;;  %v2557_v63 = vmul.f32 %v11947_v25, %v2447_v19 }
 0x1c1   : > { %v2558_v8 = vmul.f32 %v11947_v25, %v2448_v4  ;;  %v2656_v21 = vadd.f32 %v2551_v56, %v2336_v14  ;;  %v2657_v54 = vadd.f32 %v2552_v38, %v2337_v12  ;;  %v2658_v5 = vadd.f32 %v2553_v53, %v2338_v50  ;;  %v11995_v14 = vld [vmem:[%s9331_s21 + $0x2d0] sm:$0xff]  ;;  %v12002_v50 = vld [vmem:[%s9331_s21 + $0x2d8] sm:$0xff]  ;;  %v634_v56 = vld [vmem:[%s9331_s21 + $0x2c1] sm:$0xff] }
 0x1c2   : > { %v2659_v32 = vadd.f32 %v2554_v40, %v2339_v17  ;;  %v2660_v31 = vadd.f32 %v2555_v2, %v2340_v59  ;;  %v2661_v37 = vadd.f32 %v2556_v57, %v2341_v46  ;;  %v2662_v33 = vadd.f32 %v2557_v63, %v2342_v58  ;;  %v12005_v17 = vld [vmem:[%s9331_s21 + $0x2e0] sm:$0xff]  ;;  %v12008_v59 = vld [vmem:[%s9331_s21 + $0x2e8] sm:$0xff]  ;;  %v636_v63 = vld [vmem:[%s9331_s21 + $0x2d1] sm:$0xff] }
 0x1c3   : > { %v2663_v30 = vadd.f32 %v2558_v8, %v2343_v44  ;;  %v2771_v45 = vmul.f32 %v11960_v10, %v11807_v51  ;;  %v2772_v3 = vmul.f32 %v11960_v10, %v11810_v55  ;;  %v2773_v18 = vmul.f32 %v11960_v10, %v11817_v35  ;;  %v633_v44 = vld [vmem:[%s9331_s21 + $0x2b9] sm:$0xff]  ;;  %v635_v38 = vld [vmem:[%s9331_s21 + $0x2c9] sm:$0xff] }
 0x1c4   : > { %v2774_v29 = vmul.f32 %v11960_v10, %v11820_v39  ;;  %v2775_v48 = vmul.f32 %v11960_v10, %v11823_v41  ;;  %v2776_v0 = vmul.f32 %v11960_v10, %v11827_v52  ;;  %v2777_v51 = vmul.f32 %v11960_v10, %v11830_v9  ;;  %v11984_v9 = vld [vmem:[%s13668_s2] ss:$0 sm:$0xff]  ;;  %v8984_v8 = vld [vmem:[%s13669_s3 + $0x8] sm:$0xff]  }
 0x1c5   : > { %v2778_v55 = vmul.f32 %v11960_v10, %v11833_v36  ;;  %v2876_v47 = vadd.f32 %v2771_v45, %v2656_v21  ;;  %v2877_v35 = vadd.f32 %v2772_v3, %v2657_v54  ;;  %v2878_v28 = vadd.f32 %v2773_v18, %v2658_v5  ;;  %13743 = vst [vmem:[#allocation15_spill] sm:$0xff] %v11984_v9 }
 0x1c6   : > { %v2879_v34 = vadd.f32 %v2774_v29, %v2659_v32  ;;  %v2880_v39 = vadd.f32 %v2775_v48, %v2660_v31  ;;  %v2881_v41 = vadd.f32 %v2776_v0, %v2661_v37  ;;  %v2882_v52 = vadd.f32 %v2777_v51, %v2662_v33  ;;  %v637_v31 = vld [vmem:[%s9331_s21 + $0x2d9] sm:$0xff]  ;;  %v638_v37 = vld [vmem:[%s9331_s21 + $0x2e1] sm:$0xff]  ;;  %v639_v33 = vld [vmem:[%s9331_s21 + $0x2e9] sm:$0xff]  ;;  %8434 = vmatprep.subr.bf16.mxu1 %v8984_v8 }
 0x1c7   : > { %v2883_v43 = vadd.f32 %v2778_v55, %v2663_v30  ;;  %v2988_v36 = vadd.f32 %v11984_v9, %v2876_v47  ;;  %v2989_v24 = vadd.f32 %v11984_v9, %v2877_v35  ;;  %v2990_v12 = vadd.f32 %v11984_v9, %v2878_v28  ;;  %v953_v29 = vld [vmem:[%s9331_s21 + $0x2ba] sm:$0xff]  ;;  %v954_v47 = vld [vmem:[%s9331_s21 + $0x2c2] sm:$0xff]  ;;  %8435 = vmatpush3.bf16.msra.mxu1 %v8984_v8 }
 0x1c8   : > { %v2991_v13 = vadd.f32 %v11984_v9, %v2879_v34  ;;  %v2992_v49 = vadd.f32 %v11984_v9, %v2880_v39  ;;  %v2993_v61 = vadd.f32 %v11984_v9, %v2881_v41  ;;  %v2994_v46 = vadd.f32 %v11984_v9, %v2882_v52  ;;  %v955_v41 = vld [vmem:[%s9331_s21 + $0x2ca] sm:$0xff]  ;;  %v956_v52 = vld [vmem:[%s9331_s21 + $0x2d2] sm:$0xff] }
 0x1c9   : > { %v2995_v19 = vadd.f32 %v11984_v9, %v2883_v43  ;;  %v3093_v4 = vmax.f32 %v2988_v36, 0.0  ;;  %v3094_v58 = vmax.f32 %v2989_v24, 0.0  ;;  %v3095_v53 = vmax.f32 %v2990_v12, 0.0  ;;  %v957_v43 = vld [vmem:[%s9331_s21 + $0x2da] sm:$0xff] }
 0x1ca   : > { %v3096_v40 = vmax.f32 %v2991_v13, 0.0  ;;  %v3097_v2 = vmax.f32 %v2992_v49, 0.0  ;;  %v3098_v57 = vmax.f32 %v2993_v61, 0.0  ;;  %v3099_v21 = vmax.f32 %v2994_v46, 0.0  ;;  %v958_v13 = vld [vmem:[%s9331_s21 + $0x2e2] sm:$0xff]  ;;  %v959_v49 = vld [vmem:[%s9331_s21 + $0x2ea] sm:$0xff] }
 0x1cb   : > { %v3100_v54 = vmax.f32 %v2995_v19, 0.0  ;;  %3199 = vst.msk [vmem:[#allocation2 + $0x258] sm:$0xff] %vm3123_vm0, %v3093_v4  ;;  %3200 = vst.msk [vmem:[#allocation2 + $0x260] sm:$0xff] %vm3123_vm0, %v3094_v58  ;;  %v528_v5 = vmul.f32 %v11719_v42, %v11979_v11  ;;  %v529_v32 = vmul.f32 %v11719_v42, %v11989_v62  ;;  %v530_v30 = vmul.f32 %v11719_v42, %v11992_v16  ;;  %v12060_v46 = vld [vmem:[%s9331_s21 + $0x2d6] sm:$0xff] }
 0x1cc   : > { %3201 = vst.msk [vmem:[#allocation2 + $0x268] sm:$0xff] %vm3123_vm0, %v3095_v53  ;;  %3202 = vst.msk [vmem:[#allocation2 + $0x270] sm:$0xff] %vm3123_vm0, %v3096_v40  ;;  %v531_v45 = vmul.f32 %v11719_v42, %v11995_v14  ;;  %v532_v3 = vmul.f32 %v11719_v42, %v12002_v50  ;;  %v533_v18 = vmul.f32 %v11719_v42, %v12005_v17  ;;  %v12076_v8 = vld [vmem:[%s9331_s21 + $0x2f6] sm:$0xff] }
 0x1cd   : > { %3203 = vst.msk [vmem:[#allocation2 + $0x278] sm:$0xff] %vm3123_vm0, %v3097_v2  ;;  %3204 = vst.msk [vmem:[#allocation2 + $0x280] sm:$0xff] %vm3123_vm0, %v3098_v57  ;;  %v534_v48 = vmul.f32 %v11719_v42, %v12008_v59  ;;  %v743_v0 = vmul.f32 %v11780_v20, %v633_v44  ;;  %v744_v51 = vmul.f32 %v11780_v20, %v634_v56  ;;  %v12063_v56 = vld [vmem:[%s9331_s21 + $0x2de] sm:$0xff] }
 0x1ce   : > { %3205 = vst.msk [vmem:[#allocation2 + $0x288] sm:$0xff] %vm3123_vm0, %v3099_v21  ;;  %3206 = vst.msk [vmem:[#allocation2 + $0x290] sm:$0xff] %vm3123_vm0, %v3100_v54  ;;  %v745_v55 = vmul.f32 %v11780_v20, %v635_v38  ;;  %v746_v35 = vmul.f32 %v11780_v20, %v636_v63  ;;  %v747_v28 = vmul.f32 %v11780_v20, %v637_v31  ;;  %v12066_v38 = vld [vmem:[%s9331_s21 + $0x2e6] sm:$0xff]  ;;  %v12073_v63 = vld [vmem:[%s9331_s21 + $0x2ee] sm:$0xff] }
 0x1cf   : > { %v748_v34 = vmul.f32 %v11780_v20, %v638_v37  ;;  %v749_v39 = vmul.f32 %v11780_v20, %v639_v33  ;;  %v848_v36 = vadd.f32 %v743_v0, %v528_v5  ;;  %v849_v24 = vadd.f32 %v744_v51, %v529_v32  ;;  %v12079_v21 = vld [vmem:[%s9331_s21 + $0x2fe] sm:$0xff]  ;;  %v12084_v33 = vld [vmem:[%s9331_s21 + $0x306] sm:$0xff] }
 0x1d0   : > { %v850_v12 = vadd.f32 %v745_v55, %v530_v30  ;;  %v1063_v61 = vmul.f32 %v11801_v7, %v953_v29  ;;  %v851_v19 = vadd.f32 %v746_v35, %v531_v45  ;;  %v852_v4 = vadd.f32 %v747_v28, %v532_v3 }
 0x1d1   : > { %v853_v58 = vadd.f32 %v748_v34, %v533_v18  ;;  %v854_v44 = vadd.f32 %v749_v39, %v534_v48  ;;  %v1064_v53 = vmul.f32 %v11801_v7, %v954_v47  ;;  %v1065_v40 = vmul.f32 %v11801_v7, %v955_v41  ;;  %v8985_v39 = vld [vmem:[%s13669_s3 + $0x28] sm:$0xff]  }
 0x1d2   : > { %v1066_v2 = vmul.f32 %v11801_v7, %v956_v52  ;;  %v1067_v57 = vmul.f32 %v11801_v7, %v957_v43  ;;  %v3502_v54 = vld [vmem:[#allocation2 + $0x258] ss:$2 sm:$0xff]  ;;  %v3506_v5 = vld [vmem:[#allocation2 + $0x259] ss:$2 sm:$0xff]  ;;  %v1068_v32 = vmul.f32 %v11801_v7, %v958_v13  ;;  %v1069_v31 = vmul.f32 %v11801_v7, %v959_v49  ;;  %8584 = vmatprep.subr.bf16.mxu0 %v8985_v39 }
 0x1d3   : > { %v1168_v37 = vadd.f32 %v1063_v61, %v848_v36  ;;  %v1383_v30 = vmul.f32 %v11838_v15, %v12060_v46  ;;  %v3504_v45 = vld [vmem:[#allocation2 + $0x268] ss:$2 sm:$0x3f]  ;;  %v3508_v3 = vld [vmem:[#allocation2 + $0x269] ss:$2 sm:$0x3f]  ;;  %v3517_v18 = vmax.f32 %v3502_v54, %v3506_v5  ;;  %v1169_v29 = vadd.f32 %v1064_v53, %v849_v24 }
 0x1d4   : > { %v1170_v48 = vadd.f32 %v1065_v40, %v850_v12  ;;  %v1171_v0 = vadd.f32 %v1066_v2, %v851_v19  ;;  %v3510_v51 = vld [vmem:[#allocation2 + $0x276] ss:$2 sm:$0xff]  ;;  %v3518_v47 = vmax.f32 %v3504_v45, %v3508_v3  ;;  %v1172_v35 = vadd.f32 %v1067_v57, %v852_v4  ;;  %v3514_v41 = vld [vmem:[#allocation2 + $0x277] ss:$2 sm:$0xff] }
 0x1d5   : > { %v3512_v55 = vld [vmem:[#allocation2 + $0x286] ss:$2 sm:$0x3f]  ;;  %v1173_v28 = vadd.f32 %v1068_v32, %v853_v58  ;;  %v1174_v34 = vadd.f32 %v1069_v31, %v854_v44  ;;  %v3516_v52 = vld [vmem:[#allocation2 + $0x287] ss:$2 sm:$0x3f]  ;;  %v1384_v43 = vmul.f32 %v11838_v15, %v12063_v56  ;;  %v1385_v36 = vmul.f32 %v11838_v15, %v12066_v38 }
 0x1d6   : > { %v1386_v24 = vmul.f32 %v11838_v15, %v12073_v63  ;;  %v1387_v12 = vmul.f32 %v11838_v15, %v12076_v8  ;;  %v3519_v13 = vmax.f32 %v3510_v51, %v3514_v41  ;;  %v3520_v49 = vmax.f32 %v3512_v55, %v3516_v52  ;;  %v1589_v4 = vld [vmem:[%s9331_s21 + $0x2b7] sm:$0xff]  ;;  %v1590_v58 = vld [vmem:[%s9331_s21 + $0x2bf] sm:$0xff]  ;;  %v1591_v44 = vld [vmem:[%s9331_s21 + $0x2c7] sm:$0xff] }
 0x1d7   : > { %v1388_v61 = vmul.f32 %v11838_v15, %v12079_v21  ;;  %v1389_v19 = vmul.f32 %v11838_v15, %v12084_v33  ;;  %v1488_v53 = vadd.f32 %v1383_v30, %v1168_v37  ;;  %v1489_v40 = vadd.f32 %v1384_v43, %v1169_v29  ;;  %v1593_v54 = vld [vmem:[%s9331_s21 + $0x2d7] sm:$0xff]  ;;  %v1594_v5 = vld [vmem:[%s9331_s21 + $0x2df] sm:$0xff]  ;;  %v1595_v32 = vld [vmem:[%s9331_s21 + $0x2e7] sm:$0xff] }
 0x1d8   : > { %v1490_v2 = vadd.f32 %v1385_v36, %v1170_v48  ;;  %v12106_v57 = vadd.f32 %v1386_v24, %v1171_v0  ;;  %v3521_v31 = vmax.f32 %v3517_v18, %v3519_v13  ;;  %v3522_v45 = vmax.f32 %v3518_v47, %v3520_v49  ;;  %v2129_v39 = vld [vmem:[%s9331_s21 + $0x2d4] sm:$0xff]  ;;  %v2130_v24 = vld [vmem:[%s9331_s21 + $0x2dc] sm:$0xff]  ;;  %v2132_v13 = vld [vmem:[%s9331_s21 + $0x2ec] sm:$0xff] }
 0x1d9   : > { %v12111_v3 = vadd.f32 %v1387_v12, %v1172_v35  ;;  %v12113_v51 = vadd.f32 %v1388_v61, %v1173_v28  ;;  %v12115_v55 = vadd.f32 %v1389_v19, %v1174_v34  ;;  %v1699_v41 = vmul.f32 %v11874_v26, %v1589_v4  ;;  %v2131_v12 = vld [vmem:[%s9331_s21 + $0x2e4] sm:$0xff]  ;;  %v2133_v49 = vld [vmem:[%s9331_s21 + $0x2f4] sm:$0xff] }
 0x1da   : > { %v1700_v37 = vmul.f32 %v11874_v26, %v1590_v58  ;;  %v1701_v30 = vmul.f32 %v11874_v26, %v1591_v44  ;;  %3523 = vst.msk [vmem:[#allocation3 + $0xb1] sm:$0xff] %vm3123_vm0, %v3521_v31  ;;  %v1703_v18 = vmul.f32 %v11874_v26, %v1593_v54  ;;  %v1704_v29 = vmul.f32 %v11874_v26, %v1594_v5  ;;  %v2135_v4 = vld [vmem:[%s9331_s21 + $0x304] sm:$0xff]  ;;  %v2449_v58 = vld [vmem:[%s9331_s21 + $0x2d5] sm:$0xff] }
 0x1db   : > { %3524 = vst.msk [vmem:[#allocation3 + $0xb9] sm:$0x3f] %vm3228_vm1, %v3522_v45  ;;  %v1705_v48 = vmul.f32 %v11874_v26, %v1595_v32  ;;  %v1919_v0 = vmul.f32 %v11896_v6, %v11979_v11  ;;  %v1804_v47 = vadd.f32 %v1699_v41, %v11862_v23  ;;  %v1920_v34 = vmul.f32 %v11896_v6, %v11989_v62  ;;  %v2451_v31 = vld [vmem:[%s9331_s21 + $0x2e5] sm:$0xff]  ;;  %v2452_v45 = vld [vmem:[%s9331_s21 + $0x2ed] sm:$0xff]  ;;  %v2453_v41 = vld [vmem:[%s9331_s21 + $0x2f5] sm:$0xff] }
 0x1dc   : > { %v1805_v35 = vadd.f32 %v1700_v37, %v11867_v22  ;;  %v1806_v28 = vadd.f32 %v1701_v30, %v11869_v27  ;;  %v1808_v52 = vadd.f32 %v1703_v18, %v1488_v53  ;;  %v1809_v43 = vadd.f32 %v1704_v29, %v1489_v40  ;;  %v2450_v40 = vld [vmem:[%s9331_s21 + $0x2dd] sm:$0xff] }
 0x1dd   : > { %v1810_v36 = vadd.f32 %v1705_v48, %v1490_v2  ;;  %v1921_v11 = vmul.f32 %v11896_v6, %v11992_v16  ;;  %v1922_v23 = vmul.f32 %v11896_v6, %v11995_v14  ;;  %v1923_v22 = vmul.f32 %v11896_v6, %v12002_v50  ;;  %v2134_v14 = vld [vmem:[%s9331_s21 + $0x2fc] sm:$0xff] }
 0x1de   : > { %v1924_v27 = vmul.f32 %v11896_v6, %v12005_v17  ;;  %v1925_v62 = vmul.f32 %v11896_v6, %v12008_v59  ;;  %v2024_v61 = vadd.f32 %v1919_v0, %v1804_v47  ;;  %v2025_v16 = vadd.f32 %v1920_v34, %v1805_v35  ;;  %v2454_v48 = vld [vmem:[%s9331_s21 + $0x2fd] sm:$0xff] }
 0x1df   : > { %v2026_v19 = vadd.f32 %v1921_v11, %v1806_v28  ;;  %v2239_v50 = vmul.f32 %v11925_v60, %v2129_v39  ;;  %v2027_v17 = vadd.f32 %v1922_v23, %v11891_v1  ;;  %v2028_v44 = vadd.f32 %v1923_v22, %v1808_v52  ;;  %v2455_v39 = vld [vmem:[%s9331_s21 + $0x305] sm:$0xff] }
 0x1e0   : > { %v2029_v53 = vadd.f32 %v1924_v27, %v1809_v43  ;;  %v2030_v59 = vadd.f32 %v1925_v62, %v1810_v36  ;;  %v2240_v2 = vmul.f32 %v11925_v60, %v2130_v24  ;;  %v2241_v54 = vmul.f32 %v11925_v60, %v2131_v12 }
 0x1e1   : > { %v2242_v5 = vmul.f32 %v11925_v60, %v2132_v13  ;;  %v2243_v32 = vmul.f32 %v11925_v60, %v2133_v49  ;;  %v4356_v37 = vld [vmem:[#allocation3 + $0xb0] sm:$0xff]  ;;  %v2244_v1 = vmul.f32 %v11925_v60, %v2134_v14  ;;  %v2245_v18 = vmul.f32 %v11925_v60, %v2135_v4  ;;  %v12175_v4 = vld [vmem:[%s9331_s21 + $0x2f0] sm:$0xff] }
 0x1e2   : > { %v4357_v30 = vld [vmem:[#allocation3 + $0xb8] sm:$0xff]  ;;  %v2344_v29 = vadd.f32 %v2239_v50, %v2024_v61  ;;  %v2559_v0 = vmul.f32 %v11947_v25, %v2449_v58  ;;  %v2345_v35 = vadd.f32 %v2240_v2, %v2025_v16  ;;  %v2346_v28 = vadd.f32 %v2241_v54, %v2026_v19 }
 0x1e3   : > { %v4374_v47 = vpack.c.bf16 %v4357_v30, %v4356_v37  ;;  %v2347_v34 = vadd.f32 %v2242_v5, %v2027_v17  ;;  %v2348_v52 = vadd.f32 %v2243_v32, %v2028_v44  ;;  %v2349_v43 = vadd.f32 %v2244_v1, %v2029_v53  ;;  %v12205_v30 = vld [vmem:[%s9331_s21 + $0x310] sm:$0xff]  ;;  %v12208_v1 = vld [vmem:[%s9331_s21 + $0x318] sm:$0xff] }
 0x1e4   : > { %v2350_v36 = vadd.f32 %v2245_v18, %v2030_v59  ;;  %v2560_v11 = vmul.f32 %v11947_v25, %v2450_v40  ;;  %v2561_v24 = vmul.f32 %v11947_v25, %v2451_v31  ;;  %v2562_v23 = vmul.f32 %v11947_v25, %v2452_v45  ;;  %v12199_v31 = vld [vmem:[%s9331_s21 + $0x308] sm:$0xff]  ;;  %v12211_v18 = vld [vmem:[%s9331_s21 + $0x320] sm:$0xff] }
 0x1e5   : > { %8546 = vmatprep.mubr.msk.bf16.mxu0 %vm3123_vm0, %v4374_v47  ;;  %v2563_v22 = vmul.f32 %v11947_v25, %v2453_v41  ;;  %v2564_v27 = vmul.f32 %v11947_v25, %v2454_v48  ;;  %v2565_v62 = vmul.f32 %v11947_v25, %v2455_v39  ;;  %v2664_v12 = vadd.f32 %v2559_v0, %v2344_v29  ;;  %v641_v39 = vld [vmem:[%s9331_s21 + $0x2f9] sm:$0xff] }
 0x1e6   : > { %v2665_v13 = vadd.f32 %v2560_v11, %v2345_v35  ;;  %v2779_v49 = vmul.f32 %v11960_v10, %v12060_v46  ;;  %v2666_v61 = vadd.f32 %v2561_v24, %v2346_v28  ;;  %v2667_v16 = vadd.f32 %v2562_v23, %v2347_v34  ;;  %v12219_v28 = vld [vmem:[%s9331_s21 + $0x328] sm:$0xff]  ;;  %v640_v34 = vld [vmem:[%s9331_s21 + $0x2f1] sm:$0xff] }
 0x1e7   : > { %v2668_v19 = vadd.f32 %v2563_v22, %v2348_v52  ;;  %v2669_v14 = vadd.f32 %v2564_v27, %v2349_v43  ;;  %v2670_v50 = vadd.f32 %v2565_v62, %v2350_v36  ;;  %v2780_v58 = vmul.f32 %v11960_v10, %v12063_v56  ;;  %v12190_v56 = vld [vmem:[%s9331_s21 + $0x2f8] sm:$0xff]  ;;  %v642_v24 = vld [vmem:[%s9331_s21 + $0x301] sm:$0xff]  ;;  %v643_v23 = vld [vmem:[%s9331_s21 + $0x309] sm:$0xff] }
 0x1e8   : > { %v2781_v17 = vmul.f32 %v11960_v10, %v12066_v38  ;;  %v2782_v44 = vmul.f32 %v11960_v10, %v12073_v63  ;;  %v2783_v46 = vmul.f32 %v11960_v10, %v12076_v8  ;;  %v2784_v53 = vmul.f32 %v11960_v10, %v12079_v21  ;;  %v644_v22 = vld [vmem:[%s9331_s21 + $0x311] sm:$0xff] }
 0x1e9   : > { %v2785_v59 = vmul.f32 %v11960_v10, %v12084_v33  ;;  %v2884_v40 = vadd.f32 %v2779_v49, %v2664_v12  ;;  %v2885_v38 = vadd.f32 %v2780_v58, %v2665_v13  ;;  %v535_v63 = vmul.f32 %v11719_v42, %v12175_v4  ;;  %v12196_v33 = vld [vmem:[%s9331_s21 + $0x300] sm:$0xff] }
 0x1ea   : > { %v2886_v2 = vadd.f32 %v2781_v17, %v2666_v61  ;;  %v2887_v54 = vadd.f32 %v2782_v44, %v2667_v16  ;;  %v2888_v5 = vadd.f32 %v2783_v46, %v2668_v19  ;;  %v2889_v8 = vadd.f32 %v2784_v53, %v2669_v14  ;;  %v645_v49 = vld [vmem:[%s9331_s21 + $0x319] sm:$0xff]  ;;  %v646_v61 = vld [vmem:[%s9331_s21 + $0x321] sm:$0xff]  ;;  %v647_v16 = vld [vmem:[%s9331_s21 + $0x329] sm:$0xff] }
 0x1eb   : > { %v2890_v32 = vadd.f32 %v2785_v59, %v2670_v50  ;;  %v2996_v21 = vadd.f32 %v11984_v9, %v2884_v40  ;;  %v2997_v45 = vadd.f32 %v11984_v9, %v2885_v38  ;;  %v536_v29 = vmul.f32 %v11719_v42, %v12190_v56  ;;  %v960_v59 = vld [vmem:[%s9331_s21 + $0x2f2] sm:$0xff] }
 0x1ec   : > { %v2998_v41 = vadd.f32 %v11984_v9, %v2886_v2  ;;  %v2999_v37 = vadd.f32 %v11984_v9, %v2887_v54  ;;  %v3000_v48 = vadd.f32 %v11984_v9, %v2888_v5  ;;  %v3001_v0 = vadd.f32 %v11984_v9, %v2889_v8  ;;  %v962_v5 = vld [vmem:[%s9331_s21 + $0x302] sm:$0xff]  ;;  %v963_v8 = vld [vmem:[%s9331_s21 + $0x30a] sm:$0xff] }
 0x1ed   : > { %v3002_v47 = vadd.f32 %v11984_v9, %v2890_v32  ;;  %v3101_v35 = vmax.f32 %v2996_v21, 0.0  ;;  %v3102_v52 = vmax.f32 %v2997_v45, 0.0  ;;  %v537_v11 = vmul.f32 %v11719_v42, %v12196_v33  ;;  %v964_v32 = vld [vmem:[%s9331_s21 + $0x312] sm:$0xff] }
 0x1ee   : > { %v3103_v43 = vmax.f32 %v2998_v41, 0.0  ;;  %v3104_v36 = vmax.f32 %v2999_v37, 0.0  ;;  %v3105_v27 = vmax.f32 %v3000_v48, 0.0  ;;  %v3106_v62 = vmax.f32 %v3001_v0, 0.0  ;;  %v965_v48 = vld [vmem:[%s9331_s21 + $0x31a] sm:$0xff]  ;;  %v966_v0 = vld [vmem:[%s9331_s21 + $0x322] sm:$0xff] }
 0x1ef   : > { %v3107_v12 = vmax.f32 %v3002_v47, 0.0  ;;  %3207 = vst.msk [vmem:[#allocation2 + $0x298] sm:$0xff] %vm3123_vm0, %v3101_v35  ;;  %v538_v13 = vmul.f32 %v11719_v42, %v12199_v31  ;;  %3208 = vst.msk [vmem:[#allocation2 + $0x2a0] sm:$0xff] %vm3123_vm0, %v3102_v52  ;;  %v539_v19 = vmul.f32 %v11719_v42, %v12205_v30  ;;  %v540_v14 = vmul.f32 %v11719_v42, %v12208_v1  ;;  %v967_v47 = vld [vmem:[%s9331_s21 + $0x32a] sm:$0xff] }
 0x1f0   : > { %3209 = vst.msk [vmem:[#allocation2 + $0x2a8] sm:$0xff] %vm3123_vm0, %v3103_v43  ;;  %3210 = vst.msk [vmem:[#allocation2 + $0x2b0] sm:$0xff] %vm3123_vm0, %v3104_v36  ;;  %v541_v50 = vmul.f32 %v11719_v42, %v12211_v18  ;;  %v542_v58 = vmul.f32 %v11719_v42, %v12219_v28  ;;  %v750_v17 = vmul.f32 %v11780_v20, %v640_v34  ;;  %v961_v42 = vld [vmem:[%s9331_s21 + $0x2fa] sm:$0xff]  ;;  %v12269_v36 = vld [vmem:[%s9331_s21 + $0x30e] sm:$0xff] }
 0x1f1   : > { %3211 = vst.msk [vmem:[#allocation2 + $0x2b8] sm:$0xff] %vm3123_vm0, %v3105_v27  ;;  %3212 = vst.msk [vmem:[#allocation2 + $0x2c0] sm:$0xff] %vm3123_vm0, %v3106_v62  ;;  %v751_v44 = vmul.f32 %v11780_v20, %v641_v39  ;;  %v752_v46 = vmul.f32 %v11780_v20, %v642_v24  ;;  %v753_v53 = vmul.f32 %v11780_v20, %v643_v23  ;;  %v12275_v24 = vld [vmem:[%s9331_s21 + $0x31e] sm:$0xff] }
 0x1f2   : > { %3213 = vst.msk [vmem:[#allocation2 + $0x2c8] sm:$0xff] %vm3123_vm0, %v3107_v12  ;;  %v754_v40 = vmul.f32 %v11780_v20, %v644_v22  ;;  %v755_v38 = vmul.f32 %v11780_v20, %v645_v49  ;;  %v756_v2 = vmul.f32 %v11780_v20, %v646_v61  ;;  %v757_v54 = vmul.f32 %v11780_v20, %v647_v16  ;;  %v12282_v12 = vld [vmem:[%s9331_s21 + $0x326] sm:$0xff]  ;;  %v12288_v49 = vld [vmem:[%s9331_s21 + $0x336] sm:$0xff] }
 0x1f3   : > { %v855_v21 = vadd.f32 %v750_v17, %v535_v63  ;;  %v856_v45 = vadd.f32 %v751_v44, %v536_v29  ;;  %v857_v41 = vadd.f32 %v752_v46, %v537_v11  ;;  %v858_v37 = vadd.f32 %v753_v53, %v538_v13  ;;  %v12272_v11 = vld [vmem:[%s9331_s21 + $0x316] sm:$0xff]  ;;  %v12285_v13 = vld [vmem:[%s9331_s21 + $0x32e] sm:$0xff]  ;;  %v12291_v17 = vld [vmem:[%s9331_s21 + $0x33e] sm:$0xff] }
 0x1f4   : > { %v859_v35 = vadd.f32 %v754_v40, %v539_v19  ;;  %v860_v34 = vadd.f32 %v755_v38, %v540_v14  ;;  %v861_v39 = vadd.f32 %v756_v2, %v541_v50  ;;  %v862_v20 = vadd.f32 %v757_v54, %v542_v58  ;;  %v12294_v40 = vld [vmem:[%s9331_s21 + $0x346] sm:$0xff] }
 0x1f5   : > { %v1070_v52 = vmul.f32 %v11801_v7, %v960_v59  ;;  %v1071_v43 = vmul.f32 %v11801_v7, %v961_v42  ;;  %v1072_v63 = vmul.f32 %v11801_v7, %v962_v5  ;;  %v1073_v29 = vmul.f32 %v11801_v7, %v963_v8 }
 0x1f6   : > { %v1074_v23 = vmul.f32 %v11801_v7, %v964_v32  ;;  %v1075_v22 = vmul.f32 %v11801_v7, %v965_v48  ;;  %v1076_v27 = vmul.f32 %v11801_v7, %v966_v0  ;;  %v1077_v62 = vmul.f32 %v11801_v7, %v967_v47  ;;  %v3526_v61 = vld [vmem:[#allocation2 + $0x294] ss:$2 sm:$0xff]  ;;  %v3530_v44 = vld [vmem:[#allocation2 + $0x295] ss:$2 sm:$0xff] }
 0x1f7   : > { %v3528_v16 = vld [vmem:[#allocation2 + $0x2a4] ss:$2 sm:$0x3f]  ;;  %v1175_v19 = vadd.f32 %v1070_v52, %v855_v21  ;;  %v1176_v14 = vadd.f32 %v1071_v43, %v856_v45  ;;  %v1177_v50 = vadd.f32 %v1072_v63, %v857_v41  ;;  %v1178_v58 = vadd.f32 %v1073_v29, %v858_v37  ;;  %v3532_v46 = vld [vmem:[#allocation2 + $0x2a5] ss:$2 sm:$0x3f] }
 0x1f8   : > { %v1179_v53 = vadd.f32 %v1074_v23, %v859_v35  ;;  %v1180_v59 = vadd.f32 %v1075_v22, %v860_v34  ;;  %v1181_v7 = vadd.f32 %v1076_v27, %v861_v39  ;;  %v1182_v42 = vadd.f32 %v1077_v62, %v862_v20  ;;  %v3534_v38 = vld [vmem:[#allocation2 + $0x2b2] ss:$2 sm:$0xff]  ;;  %v3538_v21 = vld [vmem:[#allocation2 + $0x2b3] ss:$2 sm:$0xff]  ;;  %v1599_v27 = vld [vmem:[%s9331_s21 + $0x307] sm:$0xff] }
 0x1f9   : > { %v3536_v2 = vld [vmem:[#allocation2 + $0x2c2] ss:$2 sm:$0x3f]  ;;  %v3541_v54 = vmax.f32 %v3526_v61, %v3530_v44  ;;  %v3542_v5 = vmax.f32 %v3528_v16, %v3532_v46  ;;  %v1390_v8 = vmul.f32 %v11838_v15, %v12269_v36  ;;  %v1391_v32 = vmul.f32 %v11838_v15, %v12272_v11  ;;  %v3540_v45 = vld [vmem:[#allocation2 + $0x2c3] ss:$2 sm:$0x3f] }
 0x1fa   : > { %v1392_v41 = vmul.f32 %v11838_v15, %v12275_v24  ;;  %v1393_v37 = vmul.f32 %v11838_v15, %v12282_v12  ;;  %v1394_v48 = vmul.f32 %v11838_v15, %v12285_v13  ;;  %v1395_v0 = vmul.f32 %v11838_v15, %v12288_v49  ;;  %v1596_v20 = vld [vmem:[%s9331_s21 + $0x2ef] sm:$0xff]  ;;  %v1597_v52 = vld [vmem:[%s9331_s21 + $0x2f7] sm:$0xff]  ;;  %v1598_v43 = vld [vmem:[%s9331_s21 + $0x2ff] sm:$0xff] }
 0x1fb   : > { %v3543_v47 = vmax.f32 %v3534_v38, %v3538_v21  ;;  %v3544_v35 = vmax.f32 %v3536_v2, %v3540_v45  ;;  %v1396_v34 = vmul.f32 %v11838_v15, %v12291_v17  ;;  %v1397_v39 = vmul.f32 %v11838_v15, %v12294_v40  ;;  %v1600_v62 = vld [vmem:[%s9331_s21 + $0x30f] sm:$0xff]  ;;  %v1601_v61 = vld [vmem:[%s9331_s21 + $0x317] sm:$0xff]  ;;  %v1602_v2 = vld [vmem:[%s9331_s21 + $0x31f] sm:$0xff] }
 0x1fc   : > { %v1495_v63 = vadd.f32 %v1390_v8, %v1175_v19  ;;  %v1496_v29 = vadd.f32 %v1391_v32, %v1176_v14  ;;  %v1497_v23 = vadd.f32 %v1392_v41, %v1177_v50  ;;  %v1498_v22 = vadd.f32 %v1393_v37, %v1178_v58  ;;  %v1603_v15 = vld [vmem:[%s9331_s21 + $0x327] sm:$0xff] }
 0x1fd   : > { %v3545_v16 = vmax.f32 %v3541_v54, %v3543_v47  ;;  %v3546_v44 = vmax.f32 %v3542_v5, %v3544_v35  ;;  %v12318_v46 = vadd.f32 %v1394_v48, %v1179_v53  ;;  %v12320_v38 = vadd.f32 %v1395_v0, %v1180_v59  ;;  %v1607_v21 = vld [vmem:[%s9331_s21 + $0x347] sm:$0xff] }
 0x1fe   : > { %v12325_v45 = vadd.f32 %v1396_v34, %v1181_v7  ;;  %v1502_v9 = vadd.f32 %v1397_v39, %v1182_v42  ;;  %v1706_v19 = vmul.f32 %v11874_v26, %v1596_v20  ;;  %v1707_v14 = vmul.f32 %v11874_v26, %v1597_v52  ;;  %v2138_v39 = vld [vmem:[%s9331_s21 + $0x31c] sm:$0xff]  ;;  %v2139_v20 = vld [vmem:[%s9331_s21 + $0x324] sm:$0xff] }
 0x1ff   : > { %3547 = vst.msk [vmem:[#allocation3 + $0xc1] sm:$0xff] %vm3123_vm0, %v3545_v16  ;;  %v1708_v50 = vmul.f32 %v11874_v26, %v1598_v43  ;;  %v1709_v58 = vmul.f32 %v11874_v26, %v1599_v27  ;;  %v1710_v53 = vmul.f32 %v11874_v26, %v1600_v62  ;;  %v1711_v59 = vmul.f32 %v11874_v26, %v1601_v61  ;;  %v2143_v61 = vld [vmem:[%s9331_s21 + $0x344] sm:$0xff] }
 0x200   : > { %3548 = vst.msk [vmem:[#allocation3 + $0xc9] sm:$0x3f] %vm3228_vm1, %v3546_v44  ;;  %v1712_v7 = vmul.f32 %v11874_v26, %v1602_v2  ;;  %v1713_v42 = vmul.f32 %v11874_v26, %v1603_v15  ;;  %v1717_v54 = vmul.f32 %v11874_v26, %v1607_v21  ;;  %v1811_v5 = vadd.f32 %v1706_v19, %v12106_v57  ;;  %v2456_v21 = vld [vmem:[%s9331_s21 + $0x30d] sm:$0xff] }
 0x201   : > { %v1812_v8 = vadd.f32 %v1707_v14, %v12111_v3  ;;  %v1813_v32 = vadd.f32 %v1708_v50, %v12113_v51  ;;  %v1814_v41 = vadd.f32 %v1709_v58, %v12115_v55  ;;  %v1815_v37 = vadd.f32 %v1710_v53, %v1495_v63  ;;  %v2136_v55 = vld [vmem:[%s9331_s21 + $0x30c] sm:$0xff]  ;;  %v2457_v53 = vld [vmem:[%s9331_s21 + $0x315] sm:$0xff] }
 0x202   : > { %v1816_v48 = vadd.f32 %v1711_v59, %v1496_v29  ;;  %v1817_v0 = vadd.f32 %v1712_v7, %v1497_v23  ;;  %v1818_v47 = vadd.f32 %v1713_v42, %v1498_v22  ;;  %v12342_v35 = vadd.f32 %v1717_v54, %v1502_v9  ;;  %v12356_v9 = vld [vmem:[%s13669_s3] sm:$0xff]   ;;  %v2140_v23 = vld [vmem:[%s9331_s21 + $0x32c] sm:$0xff] }
 0x203   : > { %v1926_v26 = vmul.f32 %v11896_v6, %v12175_v4  ;;  %v1927_v57 = vmul.f32 %v11896_v6, %v12190_v56  ;;  %v1928_v3 = vmul.f32 %v11896_v6, %v12196_v33  ;;  %v1929_v51 = vmul.f32 %v11896_v6, %v12199_v31  ;;  %v2137_v31 = vld [vmem:[%s9331_s21 + $0x314] sm:$0xff]  ;;  %v2142_v22 = vld [vmem:[%s9331_s21 + $0x33c] sm:$0xff]  ;;  %8464 = vmatprep.subr.bf16.mxu1 %v12356_v9  ;;  %v2459_v7 = vld [vmem:[%s9331_s21 + $0x325] sm:$0xff] }
 0x204   : > { %v1930_v4 = vmul.f32 %v11896_v6, %v12205_v30  ;;  %v1931_v56 = vmul.f32 %v11896_v6, %v12208_v1  ;;  %v1932_v33 = vmul.f32 %v11896_v6, %v12211_v18  ;;  %v1933_v34 = vmul.f32 %v11896_v6, %v12219_v28  ;;  %v2141_v30 = vld [vmem:[%s9331_s21 + $0x334] sm:$0xff]  ;;  %v2458_v59 = vld [vmem:[%s9331_s21 + $0x31d] sm:$0xff] }
 0x205   : > { %v2031_v52 = vadd.f32 %v1926_v26, %v1811_v5  ;;  %v2032_v43 = vadd.f32 %v1927_v57, %v1812_v8  ;;  %v2033_v63 = vadd.f32 %v1928_v3, %v1813_v32  ;;  %v2034_v29 = vadd.f32 %v1929_v51, %v1814_v41  ;;  %v2460_v32 = vld [vmem:[%s9331_s21 + $0x32d] sm:$0xff]  ;;  %v2461_v41 = vld [vmem:[%s9331_s21 + $0x335] sm:$0xff]  ;;  %v2463_v57 = vld [vmem:[%s9331_s21 + $0x345] sm:$0xff] }
 0x206   : > { %v4358_v1 = vld [vmem:[#allocation3 + $0xc0] sm:$0xff]  ;;  %v2035_v27 = vadd.f32 %v1930_v4, %v1815_v37  ;;  %v2036_v6 = vadd.f32 %v1931_v56, %v1816_v48  ;;  %v2037_v28 = vadd.f32 %v1932_v33, %v1817_v0  ;;  %v2038_v62 = vadd.f32 %v1933_v34, %v1818_v47  ;;  %v2462_v37 = vld [vmem:[%s9331_s21 + $0x33d] sm:$0xff] }
 0x207   : > { %v4359_v18 = vld [vmem:[#allocation3 + $0xc8] sm:$0xff]  ;;  %v2246_v44 = vmul.f32 %v11925_v60, %v2136_v55  ;;  %v2247_v2 = vmul.f32 %v11925_v60, %v2137_v31  ;;  %v2248_v15 = vmul.f32 %v11925_v60, %v2138_v39  ;;  %v2249_v19 = vmul.f32 %v11925_v60, %v2139_v20 }
 0x208   : > { %v4375_v16 = vpack.c.bf16 %v4359_v18, %v4358_v1  ;;  %v2250_v14 = vmul.f32 %v11925_v60, %v2140_v23  ;;  %v2251_v50 = vmul.f32 %v11925_v60, %v2141_v30  ;;  %v2252_v58 = vmul.f32 %v11925_v60, %v2142_v22 }
 0x209   : > { %v2253_v42 = vmul.f32 %v11925_v60, %v2143_v61  ;;  %v2351_v54 = vadd.f32 %v2246_v44, %v2031_v52  ;;  %v2352_v5 = vadd.f32 %v2247_v2, %v2032_v43  ;;  %v2353_v8 = vadd.f32 %v2248_v15, %v2033_v63  ;;  %v12416_v44 = vld [vmem:[%s9331_s21 + $0x330] sm:$0xff]  ;;  %v13744_v2 = vld [vmem:[#allocation15_spill] sm:$0xff] }
 0x20a   : > { %8547 = vmatmul.mubr.msk.bf16.gmra.mrb[20].mxu0 %vm3123_vm0, %v4375_v16  ;;  %v2354_v48 = vadd.f32 %v2249_v19, %v2034_v29  ;;  %v2355_v0 = vadd.f32 %v2250_v14, %v2035_v27  ;;  %v2356_v47 = vadd.f32 %v2251_v50, %v2036_v6  ;;  %v2357_v26 = vadd.f32 %v2252_v58, %v2037_v28  ;;  %v648_v19 = vld [vmem:[%s9331_s21 + $0x331] sm:$0xff] }
 0x20b   : > { %v2358_v3 = vadd.f32 %v2253_v42, %v2038_v62  ;;  %v2566_v51 = vmul.f32 %v11947_v25, %v2456_v21  ;;  %v2567_v55 = vmul.f32 %v11947_v25, %v2457_v53  ;;  %v2568_v4 = vmul.f32 %v11947_v25, %v2458_v59  ;;  %v435_v21 = vld [vmem:[%s9331_s21 + $0x340] sm:$0x3f]  ;;  %v968_v42 = vld [vmem:[%s9331_s21 + $0x332] sm:$0xff] }
 0x20c   : > { %v2569_v60 = vmul.f32 %v11947_v25, %v2459_v7  ;;  %v2570_v56 = vmul.f32 %v11947_v25, %v2460_v32  ;;  %v2571_v33 = vmul.f32 %v11947_v25, %v2461_v41  ;;  %v2572_v34 = vmul.f32 %v11947_v25, %v2462_v37  ;;  %v649_v59 = vld [vmem:[%s9331_s21 + $0x339] sm:$0xff]  ;;  %v650_v7 = vld [vmem:[%s9331_s21 + $0x341] sm:$0x3f] }
 0x20d   : > { %v2573_v31 = vmul.f32 %v11947_v25, %v2463_v57  ;;  %v2671_v39 = vadd.f32 %v2566_v51, %v2351_v54  ;;  %v2672_v20 = vadd.f32 %v2567_v55, %v2352_v5  ;;  %v2673_v52 = vadd.f32 %v2568_v4, %v2353_v8  ;;  %v969_v41 = vld [vmem:[%s9331_s21 + $0x33a] sm:$0xff]  ;;  %v970_v37 = vld [vmem:[%s9331_s21 + $0x342] sm:$0x3f]  ;;  %v12437_v57 = vld [vmem:[%s9331_s21 + $0x34e] sm:$0xff] }
 0x20e   : > { %v2674_v43 = vadd.f32 %v2569_v60, %v2354_v48  ;;  %v2675_v63 = vadd.f32 %v2570_v56, %v2355_v0  ;;  %v2676_v29 = vadd.f32 %v2571_v33, %v2356_v47  ;;  %v2677_v23 = vadd.f32 %v2572_v34, %v2357_v26  ;;  %v9130_v55 = vld [vmem:[%s13667_s1] ss:$0 sm:$0xff]  ;;  %v1604_v34 = vld [vmem:[%s9331_s21 + $0x32f] sm:$0xff] }
 0x20f   : > { %v2678_v30 = vadd.f32 %v2573_v31, %v2358_v3  ;;  %v2786_v22 = vmul.f32 %v11960_v10, %v12269_v36  ;;  %v2787_v1 = vmul.f32 %v11960_v10, %v12272_v11  ;;  %v2788_v18 = vmul.f32 %v11960_v10, %v12275_v24  ;;  %v12440_v3 = vld [vmem:[%s9331_s21 + $0x356] sm:$0xff]  ;;  %v1290_v33 = vld [vmem:[%s9331_s21 + $0x35e] sm:$0x3f] }
 0x210   : > { %v2789_v25 = vmul.f32 %v11960_v10, %v12282_v12  ;;  %v2790_v27 = vmul.f32 %v11960_v10, %v12285_v13  ;;  %v2791_v6 = vmul.f32 %v11960_v10, %v12288_v49  ;;  %v2792_v36 = vmul.f32 %v11960_v10, %v12291_v17  ;;  %v9131_v31 = vld [vmem:[%s13667_s1 + $0x1] ss:$0 sm:$0xff] }
 0x211   : > { %v2793_v11 = vmul.f32 %v11960_v10, %v12294_v40  ;;  %v2891_v28 = vadd.f32 %v2786_v22, %v2671_v39  ;;  %v2892_v24 = vadd.f32 %v2787_v1, %v2672_v20  ;;  %v2893_v62 = vadd.f32 %v2788_v18, %v2673_v52  ;;  %v12422_v40 = vld [vmem:[%s9331_s21 + $0x338] sm:$0xff]  ;;  %v9133_v18 = vld [vmem:[%s13667_s1 + $0x3] ss:$0 sm:$0xff] }
 0x212   : > { %v2894_v61 = vadd.f32 %v2789_v25, %v2674_v43  ;;  %v2895_v12 = vadd.f32 %v2790_v27, %v2675_v63  ;;  %v2896_v13 = vadd.f32 %v2791_v6, %v2676_v29  ;;  %v2897_v16 = vadd.f32 %v2792_v36, %v2677_v23  ;;  %v9132_v43 = vld [vmem:[%s13667_s1 + $0x2] ss:$0 sm:$0xff]  ;;  %v1605_v29 = vld [vmem:[%s9331_s21 + $0x337] sm:$0xff] }
 0x213   : > { %v2898_v49 = vadd.f32 %v2793_v11, %v2678_v30  ;;  %v3003_v15 = vadd.f32 %v13744_v2, %v2891_v28  ;;  %v3004_v17 = vadd.f32 %v13744_v2, %v2892_v24  ;;  %v3005_v10 = vadd.f32 %v13744_v2, %v2893_v62  ;;  %v1606_v23 = vld [vmem:[%s9331_s21 + $0x33f] sm:$0xff]  ;;  %v1608_v30 = vld [vmem:[%s9331_s21 + $0x34f] sm:$0xff]  ;;  %v1609_v6 = vld [vmem:[%s9331_s21 + $0x357] sm:$0xff] }
 0x214   : > { %v3006_v14 = vadd.f32 %v13744_v2, %v2894_v61  ;;  %v3007_v50 = vadd.f32 %v13744_v2, %v2895_v12  ;;  %v3008_v58 = vadd.f32 %v13744_v2, %v2896_v13  ;;  %v3009_v53 = vadd.f32 %v13744_v2, %v2897_v16  ;;  %v1610_v62 = vld [vmem:[%s9331_s21 + $0x35f] sm:$0x3f] }
 0x215   : > { %v3010_v54 = vadd.f32 %v13744_v2, %v2898_v49  ;;  %v3108_v5 = vmax.f32 %v3003_v15, 0.0  ;;  %v3109_v8 = vmax.f32 %v3004_v17, 0.0  ;;  %v3110_v32 = vmax.f32 %v3005_v10, 0.0  ;;  %v9134_v61 = vld [vmem:[%s13667_s1 + $0x4] ss:$0 sm:$0xff] }
 0x216   : > { %v3111_v48 = vmax.f32 %v3006_v14, 0.0  ;;  %v3112_v0 = vmax.f32 %v3007_v50, 0.0  ;;  %v3113_v47 = vmax.f32 %v3008_v58, 0.0  ;;  %v3114_v26 = vmax.f32 %v3009_v53, 0.0 }
 0x217   : > { %v3115_v51 = vmax.f32 %v3010_v54, 0.0  ;;  %3214 = vst.msk [vmem:[#allocation2 + $0x2d0] sm:$0xff] %vm3123_vm0, %v3108_v5  ;;  %3215 = vst.msk [vmem:[#allocation2 + $0x2d8] sm:$0xff] %vm3123_vm0, %v3109_v8  ;;  %v543_v4 = vmul.f32 %v9130_v55, %v12416_v44  ;;  %v544_v60 = vmul.f32 %v9130_v55, %v12422_v40  ;;  %v545_v56 = vmul.f32 %v9130_v55, %v435_v21  ;;  %v1826_v21 = vld [vmem:[%s9331_s21 + $0x340] sm:$0xff] }
 0x218   : > { %3216 = vst.msk [vmem:[#allocation2 + $0x2e0] sm:$0xff] %vm3123_vm0, %v3110_v32  ;;  %3217 = vst.msk [vmem:[#allocation2 + $0x2e8] sm:$0xff] %vm3123_vm0, %v3111_v48  ;;  %v758_v39 = vmul.f32 %v9131_v31, %v648_v19  ;;  %v759_v20 = vmul.f32 %v9131_v31, %v649_v59  ;;  %v760_v52 = vmul.f32 %v9131_v31, %v650_v7  ;;  %v1827_v19 = vld [vmem:[%s9331_s21 + $0x348] sm:$0xff]  ;;  %v1828_v59 = vld [vmem:[%s9331_s21 + $0x350] sm:$0xff] }
 0x219   : > { %3218 = vst.msk [vmem:[#allocation2 + $0x2f0] sm:$0xff] %vm3123_vm0, %v3112_v0  ;;  %3219 = vst.msk [vmem:[#allocation2 + $0x2f8] sm:$0xff] %vm3123_vm0, %v3113_v47  ;;  %v1078_v63 = vmul.f32 %v9132_v43, %v968_v42  ;;  %v1079_v22 = vmul.f32 %v9132_v43, %v969_v41  ;;  %v1080_v1 = vmul.f32 %v9132_v43, %v970_v37  ;;  %v1829_v7 = vld [vmem:[%s9331_s21 + $0x358] sm:$0xff]  ;;  %v1830_v41 = vld [vmem:[%s9331_s21 + $0x360] sm:$0x3f] }
 0x21a   : > { %3220 = vst.msk [vmem:[#allocation2 + $0x300] sm:$0xff] %vm3123_vm0, %v3114_v26  ;;  %3221 = vst.msk [vmem:[#allocation2 + $0x308] sm:$0xff] %vm3123_vm0, %v3115_v51  ;;  %v1398_v25 = vmul.f32 %v9133_v18, %v12437_v57  ;;  %v1399_v27 = vmul.f32 %v9133_v18, %v12440_v3  ;;  %v863_v36 = vadd.f32 %v758_v39, %v543_v4  ;;  %v9135_v37 = vld [vmem:[%s13667_s1 + $0x5] ss:$0 sm:$0xff]  ;;  %v2144_v51 = vld [vmem:[%s9331_s21 + $0x34c] sm:$0xff] }
 0x21b   : > { %v864_v11 = vadd.f32 %v759_v20, %v544_v60  ;;  %v865_v28 = vadd.f32 %v760_v52, %v545_v56  ;;  %v1400_v24 = vmul.f32 %v9133_v18, %v1290_v33  ;;  %v1714_v12 = vmul.f32 %v9134_v61, %v1604_v34  ;;  %v2145_v31 = vld [vmem:[%s9331_s21 + $0x354] sm:$0xff]  ;;  %v2148_v18 = vld [vmem:[%s9331_s21 + $0x36c] sm:$0xff] }
 0x21c   : > { %v1715_v13 = vmul.f32 %v9134_v61, %v1605_v29  ;;  %v1716_v16 = vmul.f32 %v9134_v61, %v1606_v23  ;;  %v1718_v49 = vmul.f32 %v9134_v61, %v1608_v30  ;;  %v1183_v2 = vadd.f32 %v1078_v63, %v863_v36  ;;  %v2146_v63 = vld [vmem:[%s9331_s21 + $0x35c] sm:$0xff] }
 0x21d   : > { %v1184_v15 = vadd.f32 %v1079_v22, %v864_v11  ;;  %v1185_v17 = vadd.f32 %v1080_v1, %v865_v28  ;;  %v1719_v10 = vmul.f32 %v9134_v61, %v1609_v6  ;;  %v1720_v14 = vmul.f32 %v9134_v61, %v1610_v62  ;;  %v2147_v1 = vld [vmem:[%s9331_s21 + $0x364] sm:$0xff]  ;;  %v2150_v28 = vld [vmem:[%s9331_s21 + $0x37c] sm:$0x3f] }
 0x21e   : > { %v1819_v50 = vadd.f32 %v1714_v12, %v12318_v46  ;;  %v1820_v58 = vadd.f32 %v1715_v13, %v12320_v38  ;;  %v1821_v53 = vadd.f32 %v1716_v16, %v12325_v45  ;;  %v3550_v42 = vld [vmem:[#allocation2 + $0x2d0] ss:$2 sm:$0xff]  ;;  %v3554_v54 = vld [vmem:[#allocation2 + $0x2d1] ss:$2 sm:$0xff]  ;;  %v1503_v5 = vadd.f32 %v1398_v25, %v1183_v2  ;;  %v9136_v12 = vld [vmem:[%s13667_s1 + $0x6] ss:$0 sm:$0xff] }
 0x21f   : > { %v1504_v8 = vadd.f32 %v1399_v27, %v1184_v15  ;;  %v1505_v32 = vadd.f32 %v1400_v24, %v1185_v17  ;;  %v1934_v46 = vmul.f32 %v9135_v37, %v12416_v44  ;;  %v3552_v48 = vld [vmem:[#allocation2 + $0x2e0] ss:$2 sm:$0x3f]  ;;  %v3556_v38 = vld [vmem:[#allocation2 + $0x2e1] ss:$2 sm:$0x3f]  ;;  %v3565_v0 = vmax.f32 %v3550_v42, %v3554_v54 }
 0x220   : > { %v1935_v45 = vmul.f32 %v9135_v37, %v12422_v40  ;;  %v1936_v47 = vmul.f32 %v9135_v37, %v1826_v21  ;;  %v1937_v26 = vmul.f32 %v9135_v37, %v1827_v19  ;;  %v3558_v55 = vld [vmem:[#allocation2 + $0x2ee] ss:$2 sm:$0xff]  ;;  %v3566_v60 = vmax.f32 %v3552_v48, %v3556_v38  ;;  %v3562_v44 = vld [vmem:[#allocation2 + $0x2ef] ss:$2 sm:$0xff]  ;;  %v2467_v21 = vld [vmem:[%s9331_s21 + $0x365] sm:$0xff] }
 0x221   : > { %v3560_v4 = vld [vmem:[#allocation2 + $0x2fe] ss:$2 sm:$0x3f]  ;;  %v1823_v56 = vadd.f32 %v1718_v49, %v1503_v5  ;;  %v1824_v33 = vadd.f32 %v1719_v10, %v1504_v8  ;;  %v1825_v34 = vadd.f32 %v1720_v14, %v1505_v32  ;;  %v3564_v39 = vld [vmem:[#allocation2 + $0x2ff] ss:$2 sm:$0x3f]  ;;  %v1938_v20 = vmul.f32 %v9135_v37, %v1828_v59 }
 0x222   : > { %v1939_v52 = vmul.f32 %v9135_v37, %v1829_v7  ;;  %v1940_v40 = vmul.f32 %v9135_v37, %v1830_v41  ;;  %v2039_v43 = vadd.f32 %v1934_v46, %v1819_v50  ;;  %v3567_v29 = vmax.f32 %v3558_v55, %v3562_v44  ;;  %v2149_v25 = vld [vmem:[%s9331_s21 + $0x374] sm:$0xff]  ;;  %v2466_v10 = vld [vmem:[%s9331_s21 + $0x35d] sm:$0xff]  ;;  %v9137_v7 = vld [vmem:[%s13667_s1 + $0x7] ss:$0 sm:$0xff] }
 0x223   : > { %v3568_v23 = vmax.f32 %v3560_v4, %v3564_v39  ;;  %v2040_v30 = vadd.f32 %v1935_v45, %v1820_v58  ;;  %v2041_v22 = vadd.f32 %v1936_v47, %v1821_v53  ;;  %v2042_v27 = vadd.f32 %v1937_v26, %v12342_v35  ;;  %v2464_v24 = vld [vmem:[%s9331_s21 + $0x34d] sm:$0xff]  ;;  %v2465_v17 = vld [vmem:[%s9331_s21 + $0x355] sm:$0xff]  ;;  %v2470_v59 = vld [vmem:[%s9331_s21 + $0x37d] sm:$0x3f] }
 0x224   : > { %v2043_v6 = vadd.f32 %v1938_v20, %v1823_v56  ;;  %v2044_v36 = vadd.f32 %v1939_v52, %v1824_v33  ;;  %v2045_v11 = vadd.f32 %v1940_v40, %v1825_v34  ;;  %v3569_v62 = vmax.f32 %v3565_v0, %v3567_v29  ;;  %v2468_v58 = vld [vmem:[%s9331_s21 + $0x36d] sm:$0xff]  ;;  %v2469_v53 = vld [vmem:[%s9331_s21 + $0x375] sm:$0xff]  ;;  %v2686_v38 = vld [vmem:[%s9331_s21 + $0x35e] sm:$0xff] }
 0x225   : > { %v3570_v61 = vmax.f32 %v3566_v60, %v3568_v23  ;;  %v2254_v13 = vmul.f32 %v9136_v12, %v2144_v51  ;;  %v2255_v16 = vmul.f32 %v9136_v12, %v2145_v31  ;;  %v2256_v49 = vmul.f32 %v9136_v12, %v2146_v63  ;;  %v2687_v51 = vld [vmem:[%s9331_s21 + $0x366] sm:$0xff]  ;;  %v2688_v55 = vld [vmem:[%s9331_s21 + $0x36e] sm:$0xff]  ;;  %v2689_v4 = vld [vmem:[%s9331_s21 + $0x376] sm:$0xff] }
 0x226   : > { %v2257_v35 = vmul.f32 %v9136_v12, %v2147_v1  ;;  %v2258_v2 = vmul.f32 %v9136_v12, %v2148_v18  ;;  %v2259_v15 = vmul.f32 %v9136_v12, %v2149_v25  ;;  %3571 = vst.msk [vmem:[#allocation3 + $0xd1] sm:$0xff] %vm3123_vm0, %v3569_v62  ;;  %v2260_v19 = vmul.f32 %v9136_v12, %v2150_v28  ;;  %v2690_v34 = vld [vmem:[%s9331_s21 + $0x37e] sm:$0x3f]  ;;  %v9138_v31 = vld [vmem:[%s13667_s1 + $0x8] ss:$0 sm:$0xff]  ;;  %v3641_v39 = vld [vmem:[#allocation3 + $0x1] sm:$0xff] }
 0x227   : > { %3572 = vst.msk [vmem:[#allocation3 + $0xd9] sm:$0x3f] %vm3228_vm1, %v3570_v61  ;;  %v2359_v14 = vadd.f32 %v2254_v13, %v2039_v43  ;;  %v2360_v50 = vadd.f32 %v2255_v16, %v2040_v30  ;;  %v2574_v42 = vmul.f32 %v9137_v7, %v2464_v24  ;;  %v2361_v54 = vadd.f32 %v2256_v49, %v2041_v22  ;;  %v3642_v20 = vld [vmem:[#allocation3 + $0x9] sm:$0xff]  ;;  %v3643_v1 = vld [vmem:[#allocation3 + $0x11] sm:$0xff]  ;;  %s7854_s21 = sshll.u32 %s324_s22, 4  ;;  %s13626_s21 = int_to_ptr.vmem [resolvable:$true] %s7854_s21 }
 0x228   : > { %v2362_v5 = vadd.f32 %v2257_v35, %v2042_v27  ;;  %v2363_v8 = vadd.f32 %v2258_v2, %v2043_v6  ;;  %v2364_v32 = vadd.f32 %v2259_v15, %v2044_v36  ;;  %v2365_v41 = vadd.f32 %v2260_v19, %v2045_v11  ;;  %v9139_v13 = vld [vmem:[%s13668_s2] ss:$0 sm:$0xff]  ;;  %v4603_v35 = vld [vmem:[#allocation3 + $0x21] sm:$0xff]  ;;  %v4604_v2 = vld [vmem:[#allocation3 + $0x29] sm:$0xff]  ;;  %s9141_s23 = scalar_lea.vmem %s13626_s21, 16  ;;  %p9148_p0 = scmp.lt.s32.totalorder %s13626_s21, %s9146_s27 }
 0x229   : > { %v2575_v37 = vmul.f32 %v9137_v7, %v2465_v17  ;;  %v2576_v46 = vmul.f32 %v9137_v7, %v2466_v10  ;;  %v2577_v48 = vmul.f32 %v9137_v7, %v2467_v21  ;;  %v2578_v0 = vmul.f32 %v9137_v7, %v2468_v58  ;;  %p9142_p11 = scmp.ne.s32.totalorder %s13626_s21, %s9141_s23  ;;  %p9149_p1 = scmp.lt.s32.totalorder %s9147_s28, %s9141_s23 }
 0x22a   : > { %v2579_v45 = vmul.f32 %v9137_v7, %v2469_v53  ;;  %v2580_v47 = vmul.f32 %v9137_v7, %v2470_v59  ;;  %v2679_v26 = vadd.f32 %v2574_v42, %v2359_v14  ;;  %v2794_v44 = vmul.f32 %v9138_v31, %v12437_v57  ;;  %v3644_v57 = vld [vmem:[#allocation3 + $0x19] sm:$0xff] }
 0x22b   : > { %v2680_v60 = vadd.f32 %v2575_v37, %v2360_v50  ;;  %v2681_v56 = vadd.f32 %v2576_v46, %v2361_v54  ;;  %v2682_v33 = vadd.f32 %v2577_v48, %v2362_v5  ;;  %v2683_v52 = vadd.f32 %v2578_v0, %v2363_v8  ;;  %v3647_v8 = vld [vmem:[#allocation3 + $0x31] sm:$0xff]  ;;  %v4607_v37 = vld [vmem:[#allocation3 + $0x41] sm:$0xff]  ;;  %v4608_v46 = vld [vmem:[#allocation3 + $0x49] sm:$0xff]  ;;  %p9143_p12 = pnand %p9142_p11, %p9300_p5  ;;  %p9150_p2 = por %p9149_p1, %p9148_p0 }
 0x22c   : > { %v2684_v40 = vadd.f32 %v2579_v45, %v2364_v32  ;;  %v2685_v43 = vadd.f32 %v2580_v47, %v2365_v41  ;;  %v2795_v63 = vmul.f32 %v9138_v31, %v12440_v3  ;;  %v2796_v29 = vmul.f32 %v9138_v31, %v2686_v38  ;;  %v3648_v32 = vld [vmem:[#allocation3 + $0x39] sm:$0xff] }
 0x22d   : > { %v2797_v23 = vmul.f32 %v9138_v31, %v2687_v51  ;;  %v2798_v30 = vmul.f32 %v9138_v31, %v2688_v55  ;;  %v2799_v22 = vmul.f32 %v9138_v31, %v2689_v4  ;;  %v12522_v18 = vld [vmem:[#allocation3 + $0xd0] sm:$0xff]  ;;  %v2800_v27 = vmul.f32 %v9138_v31, %v2690_v34  ;;  %v3652_v45 = vld [vmem:[#allocation3 + $0x59] sm:$0xff]  ;;  %p9144_p13 = pneg %p9143_p12 }
 0x22e   : > { %v4361_v25 = vld [vmem:[#allocation3 + $0xd8] sm:$0xff]  ;;  %v2899_v6 = vadd.f32 %v2794_v44, %v2679_v26  ;;  %v2900_v36 = vadd.f32 %v2795_v63, %v2680_v60  ;;  %v3669_v11 = vpack.c.bf16 %v3642_v20, %v3641_v39  ;;  %v2901_v24 = vadd.f32 %v2796_v29, %v2681_v56  ;;  %v12557_v56 = vld [vmem:[%s13669_s3 + $0x10] sm:$0xff]  }
 0x22f   : > { %v4376_v28 = vpack.c.bf16 %v4361_v25, %v12522_v18  ;;  %v2902_v62 = vadd.f32 %v2797_v23, %v2682_v33  ;;  %v2903_v61 = vadd.f32 %v2798_v30, %v2683_v52  ;;  %v2904_v12 = vadd.f32 %v2799_v22, %v2684_v40  ;;  %v4611_v20 = vld [vmem:[#allocation3 + $0x61] sm:$0xff]  ;;  %v4612_v52 = vld [vmem:[#allocation3 + $0x69] sm:$0xff]  ;;  %v3655_v29 = vld [vmem:[#allocation3 + $0x71] sm:$0xff]  ;;  %p9151_p3 = pnand %p9150_p2, %p9144_p13 }
 0x230   : > { %v2905_v3 = vadd.f32 %v2800_v27, %v2685_v43  ;;  %v3011_v16 = vadd.f32 %v9139_v13, %v2899_v6  ;;  %v3012_v49 = vadd.f32 %v9139_v13, %v2900_v36  ;;  %8436 = vmatprep.mubr.msk.bf16.mxu1 %vm3123_vm0, %v3669_v11  ;;  %v3013_v15 = vadd.f32 %v9139_v13, %v2901_v24  ;;  %v3656_v23 = vld [vmem:[#allocation3 + $0x79] sm:$0xff]  ;;  %v4615_v22 = vld [vmem:[#allocation3 + $0x81] sm:$0xff]  ;;  %v3659_v11 = vld [vmem:[#allocation3 + $0x91] sm:$0xff] }
 0x231   : > { %8550 = vmatprep.mubr.msk.bf16.mxu0 %vm3123_vm0, %v4376_v28  ;;  %v3014_v17 = vadd.f32 %v9139_v13, %v2902_v62  ;;  %v3015_v10 = vadd.f32 %v9139_v13, %v2903_v61  ;;  %v12530_v21 = vpack.c.bf16 %v3644_v57, %v3643_v1  ;;  %v3016_v19 = vadd.f32 %v9139_v13, %v2904_v12  ;;  %v4616_v1 = vld [vmem:[#allocation3 + $0x89] sm:$0xff]  ;;  %v3660_v57 = vld [vmem:[#allocation3 + $0x99] sm:$0xff]  ;;  %v4619_v24 = vld [vmem:[#allocation3 + $0xa1] sm:$0xff] }
 0x232   : > { %v3017_v14 = vadd.f32 %v9139_v13, %v2905_v3  ;;  %v3116_v50 = vmax.f32 %v3011_v16, 0.0  ;;  %v3117_v58 = vmax.f32 %v3012_v49, 0.0  ;;  %v3118_v53 = vmax.f32 %v3013_v15, 0.0  ;;  %v4620_v62 = vld [vmem:[#allocation3 + $0xa9] sm:$0xff]  ;;  %v3663_v3 = vld [vmem:[#allocation3 + $0xb1] sm:$0xff]  ;;  %v3664_v13 = vld [vmem:[#allocation3 + $0xb9] sm:$0xff] }
 0x233   : > { %v3119_v59 = vmax.f32 %v3014_v17, 0.0  ;;  %v3120_v7 = vmax.f32 %v3015_v10, 0.0  ;;  %8437 = vmatmul.mubr.msk.bf16.vlgmr.msra.gmra.mrb[0].mxu1 %vm3123_vm0, %v12530_v21  ;;  %v12534_v42 = vpack.c.bf16 %v4604_v2, %v4603_v35  ;;  %v3121_v54 = vmax.f32 %v3016_v19, 0.0  ;;  %v12593_v12 = vld [vmem:[%s13669_s3 + $0x30] sm:$0xff]   ;;  %v9140_v16 = vld [vmem:[%s13669_s3 + $0x28] sm:$0xff]   ;;  %v3667_v17 = vld [vmem:[#allocation3 + $0xd1] sm:$0xff] }
 0x234   : > { %v3122_v5 = vmax.f32 %v3017_v14, 0.0  ;;  %3222 = vst.msk [vmem:[#allocation2 + $0x310] sm:$0xff] %vm3123_vm0, %v3116_v50  ;;  %3223 = vst.msk [vmem:[#allocation2 + $0x318] sm:$0xff] %vm3123_vm0, %v3117_v58  ;;  %8465 = vmatpush3.bf16.msra.mxu1 %v12356_v9  ;;  %v12546_v41 = vpack.c.bf16 %v3648_v32, %v3647_v8  ;;  %v12548_v48 = vpack.c.bf16 %v4608_v46, %v4607_v37  ;;  %v3651_v9 = vld [vmem:[#allocation3 + $0x51] sm:$0xff]  ;;  %v4623_v35 = vld [vmem:[#allocation3 + $0xc1] sm:$0xff] }
 0x235   : > { %3224 = vst.msk [vmem:[#allocation2 + $0x320] sm:$0xff] %vm3123_vm0, %v3118_v53  ;;  %3225 = vst.msk [vmem:[#allocation2 + $0x328] sm:$0xff] %vm3123_vm0, %v3119_v59  ;;  %8440 = vmatprep.mubr.msk.bf16.mxu1 %vm3123_vm0, %v12534_v42  ;;  %v12559_v39 = vpack.c.bf16 %v3652_v45, %v3651_v9  ;;  %8494 = vmatprep.subr.bf16.mxu1 %v12557_v56  ;;  %v12562_v63 = vpack.c.bf16 %v4612_v52, %v4611_v20  ;;  %v4624_v2 = vld [vmem:[#allocation3 + $0xc9] sm:$0xff]  ;;  %v3668_v10 = vld [vmem:[#allocation3 + $0xd9] sm:$0x3f] }
 0x236   : > { %3226 = vst.msk [vmem:[#allocation2 + $0x330] sm:$0xff] %vm3123_vm0, %v3120_v7  ;;  %3227 = vst.msk [vmem:[#allocation2 + $0x338] sm:$0xff] %vm3123_vm0, %v3121_v54  ;;  %v12570_v30 = vpack.c.bf16 %v3656_v23, %v3655_v29  ;;  %v12574_v6 = vpack.c.bf16 %v4616_v1, %v4615_v22  ;;  %v12584_v28 = vpack.c.bf16 %v3660_v57, %v3659_v11  ;;  %v3598_v19 = vld [vmem:[#allocation3 + $0x8] sm:$0xff]  ;;  %v3599_v58 = vld [vmem:[#allocation3 + $0x10] sm:$0xff] }
 0x237   : > { %3229 = vst.msk [vmem:[#allocation2 + $0x340] sm:$0x3f] %vm3228_vm1, %v3122_v5  ;;  %v12586_v61 = vpack.c.bf16 %v4620_v62, %v4619_v24  ;;  %v12604_v49 = vpack.c.bf16 %v3664_v13, %v3663_v3  ;;  %v12607_v15 = vpack.c.bf16 %v4624_v2, %v4623_v35  ;;  %v3682_v14 = vpack.c.bf16 %v3668_v10, %v3667_v17  ;;  %v3600_v53 = vld [vmem:[#allocation3 + $0x18] sm:$0xff]  ;;  %v3601_v59 = vld [vmem:[#allocation3 + $0x20] sm:$0xff]  ;;  %v3602_v7 = vld [vmem:[#allocation3 + $0x28] sm:$0xff] }
 0x238   : > { %v3626_v54 = vpack.c.bf16 %v3600_v53, %v3599_v58  ;;  %v12623_v5 = vpack.c.bf16 %v3602_v7, %v3601_v59  ;;  %v3603_v8 = vld [vmem:[#allocation3 + $0x30] sm:$0xff]  ;;  %v3604_v32 = vld [vmem:[#allocation3 + $0x38] sm:$0xff]  ;;  %v3605_v37 = vld [vmem:[#allocation3 + $0x40] sm:$0xff] }
 0x239   : > { %v3606_v46 = vld [vmem:[#allocation3 + $0x48] sm:$0xff]  ;;  %v12633_v9 = vpack.c.bf16 %v3604_v32, %v3603_v8  ;;  %v3608_v45 = vld [vmem:[#allocation3 + $0x58] sm:$0xff]  ;;  %v3615_v1 = vld [vmem:[#allocation3 + $0x90] sm:$0xff] }
 0x23a   : > { %v4866_v52 = vld [vmem:[#allocation3 + $0x12] sm:$0xff]  ;;  %v3618_v11 = vld [vmem:[#allocation3 + $0xa8] sm:$0xff]  ;;  %v4871_v3 = vld [vmem:[#allocation3 + $0x3a] sm:$0xff] }
 0x23b   : > { %v3574_v38 = vld [vmem:[#allocation2 + $0x30c] ss:$2 sm:$0xff]  ;;  %v3578_v0 = vld [vmem:[#allocation2 + $0x30d] ss:$2 sm:$0xff]  ;;  %8441 = vmatmul.mubr.msk.bf16.gmra.mrb[4].mxu1 %vm3123_vm0, %v12546_v41  ;;  %v4875_v59 = vld [vmem:[#allocation3 + $0x5a] sm:$0xff] }
 0x23c   : > { %v3576_v47 = vld [vmem:[#allocation2 + $0x31c] ss:$2 sm:$0x3f]  ;;  %v3580_v26 = vld [vmem:[#allocation2 + $0x31d] ss:$2 sm:$0x3f]  ;;  %8444 = vmatprep.mubr.msk.bf16.mxu1 %vm3123_vm0, %v12548_v48  ;;  %v3589_v4 = vmax.f32 %v3574_v38, %v3578_v0  ;;  %v12635_v38 = vpack.c.bf16 %v3606_v46, %v3605_v37 }
 0x23d   : > { %v3582_v51 = vld [vmem:[#allocation2 + $0x32a] ss:$2 sm:$0xff]  ;;  %v3590_v60 = vmax.f32 %v3576_v47, %v3580_v26  ;;  %v3586_v33 = vld [vmem:[#allocation2 + $0x32b] ss:$2 sm:$0xff]  ;;  %v4870_v62 = vld [vmem:[#allocation3 + $0x32] sm:$0xff] }
 0x23e   : > { %v3584_v55 = vld [vmem:[#allocation2 + $0x33a] ss:$2 sm:$0x3f]  ;;  %v3588_v34 = vld [vmem:[#allocation2 + $0x33b] ss:$2 sm:$0x3f]  ;;  %v3591_v31 = vmax.f32 %v3582_v51, %v3586_v33  ;;  %v12678_v2 = vpack.c.bf16 %v4871_v3, %v4870_v62 }
 0x23f   : > { %v3592_v44 = vmax.f32 %v3584_v55, %v3588_v34  ;;  %v3607_v0 = vld [vmem:[#allocation3 + $0x50] sm:$0xff]  ;;  %v3609_v47 = vld [vmem:[#allocation3 + $0x60] sm:$0xff]  ;;  %v3610_v26 = vld [vmem:[#allocation3 + $0x68] sm:$0xff] }
 0x240   : > { %v3593_v40 = vmax.f32 %v3589_v4, %v3591_v31  ;;  %v4626_v51 = vld [vmem:[#allocation3 + $0xd9] sm:$0xff]  ;;  %v12645_v55 = vpack.c.bf16 %v3608_v45, %v3607_v0  ;;  %v12647_v4 = vpack.c.bf16 %v3610_v26, %v3609_v47  ;;  %v3614_v31 = vld [vmem:[#allocation3 + $0x88] sm:$0xff]  ;;  %v3619_v10 = vld [vmem:[#allocation3 + $0xb0] sm:$0xff] }
 0x241   : > { %v3594_v43 = vmax.f32 %v3590_v60, %v3592_v44  ;;  %v12649_v60 = vpack.c.bf16 %v4626_v51, %v3667_v17  ;;  %v3612_v33 = vld [vmem:[#allocation3 + $0x78] sm:$0xff]  ;;  %v3613_v34 = vld [vmem:[#allocation3 + $0x80] sm:$0xff]  ;;  %v4869_v24 = vld [vmem:[#allocation3 + $0x2a] sm:$0xff] }
 0x242   : > { %3595 = vst.msk [vmem:[#allocation3 + $0xe1] sm:$0xff] %vm3123_vm0, %v3593_v40  ;;  %v4867_v40 = vld [vmem:[#allocation3 + $0x1a] sm:$0xff]  ;;  %v12663_v29 = vpack.c.bf16 %v3614_v31, %v3613_v34  ;;  %v4868_v57 = vld [vmem:[#allocation3 + $0x22] sm:$0xff]  ;;  %v12685_v17 = vld [vmem:[%s13669_s3 + $0x38] sm:$0xff]  }
 0x243   : > { %3596 = vst.msk [vmem:[#allocation3 + $0xe9] sm:$0x3f] %vm3228_vm1, %v3594_v43  ;;  %8445 = vmatmul.mubr.msk.bf16.gmra.mrb[8].mxu1 %vm3123_vm0, %v12559_v39  ;;  %v4894_v22 = vpack.c.bf16 %v4867_v40, %v4866_v52  ;;  %v12676_v35 = vpack.c.bf16 %v4869_v24, %v4868_v57  ;;  %v4873_v58 = vld [vmem:[#allocation3 + $0x4a] sm:$0xff]  ;;  %v4874_v53 = vld [vmem:[#allocation3 + $0x52] sm:$0xff]  ;;  %v4071_v37 = vld [vmem:[#allocation3 + $0x2] sm:$0xff] }
 0x244   : > { %8448 = vmatprep.mubr.msk.bf16.mxu1 %vm3123_vm0, %v12562_v63  ;;  %v12701_v32 = vpack.c.bf16 %v4875_v59, %v4874_v53  ;;  %v4072_v46 = vld [vmem:[#allocation3 + $0xa] sm:$0xff]  ;;  %v4876_v0 = vld [vmem:[#allocation3 + $0x62] sm:$0xff]  ;;  %v4878_v47 = vld [vmem:[#allocation3 + $0x72] sm:$0xff] }
 0x245   : > { %v4877_v45 = vld [vmem:[#allocation3 + $0x6a] sm:$0xff]  ;;  %v4879_v26 = vld [vmem:[#allocation3 + $0x7a] sm:$0xff]  ;;  %v4880_v31 = vld [vmem:[#allocation3 + $0x82] sm:$0xff] }
 0x246   : > { %v12714_v34 = vpack.c.bf16 %v4879_v26, %v4878_v47  ;;  %v4882_v52 = vld [vmem:[#allocation3 + $0x92] sm:$0xff]  ;;  %v4883_v40 = vld [vmem:[#allocation3 + $0x9a] sm:$0xff]  ;;  %v4889_v62 = vld [vmem:[#allocation3 + $0xca] sm:$0xff] }
 0x247   : > { %v4890_v3 = vld [vmem:[#allocation3 + $0xd2] sm:$0xff] }
 0x248   : > { %v8990_v53 = vld [vmem:[%s13669_s3 + $0x40] sm:$0xff]  }
 0x249   : > { %v12572_v25 = vld [vmem:[#allocation3 + $0xe0] sm:$0xff] }
 0x24a   : > { %v4363_v27 = vld [vmem:[#allocation3 + $0xe8] sm:$0x3f] }
 0x24b   : > { %v4377_v36 = vpack.c.bf16 %v4363_v27, %v12572_v25  ;;  %8449 = vmatmul.mubr.msk.bf16.gmra.mrb[12].mxu1 %vm3123_vm0, %v12570_v30  ;;  %v12659_v44 = vld [vmem:[#allocation3 + $0xe1] sm:$0xff]  ;;  %v4628_v20 = vld [vmem:[#allocation3 + $0xe9] sm:$0x3f]  ;;  %v3616_v27 = vld [vmem:[#allocation3 + $0x98] sm:$0xff] }
 0x24c   : > { %8452 = vmatprep.mubr.msk.bf16.mxu1 %vm3123_vm0, %v12574_v6  ;;  %v4642_v23 = vpack.c.bf16 %v4628_v20, %v12659_v44  ;;  %v12672_v13 = vpack.c.bf16 %v3616_v27, %v3615_v1  ;;  %v4881_v20 = vld [vmem:[#allocation3 + $0x8a] sm:$0xff]  ;;  %v4884_v1 = vld [vmem:[#allocation3 + $0xa2] sm:$0xff] }
 0x24d   : > { %8551 = vmatmul.mubr.msk.bf16.gmra.mrb[24].mxu0 %vm3123_vm0, %v4377_v36  ;;  %v3617_v36 = vld [vmem:[#allocation3 + $0xa0] sm:$0xff]  ;;  %v4885_v27 = vld [vmem:[#allocation3 + $0xaa] sm:$0xff] }
 0x24e   : > { %8556 = vmatprep.mubr.msk.bf16.mxu0 %vm3123_vm0, %v12530_v21  ;;  %v3597_v21 = vld [vmem:[#allocation3] sm:$0xff]  ;;  %v12733_v57 = vpack.c.bf16 %v4885_v27, %v4884_v1  ;;  %v12901_v27 = vld [vmem:[%s13670_s4] ss:$0 sm:$0xff] }
 0x24f   : > { %v3625_v50 = vpack.c.bf16 %v3598_v19, %v3597_v21  ;;  %v3620_v21 = vld [vmem:[#allocation3 + $0xb8] sm:$0xff]  ;;  %v3621_v19 = vld [vmem:[#allocation3 + $0xc0] sm:$0xff] }
 0x250   : > { %v12694_v7 = vpack.c.bf16 %v3620_v21, %v3619_v10  ;;  %v4891_v10 = vld [vmem:[#allocation3 + $0xda] sm:$0xff] }
 0x253   : > { %8453 = vmatmul.mubr.msk.bf16.gmra.mrb[16].mxu1 %vm3123_vm0, %v12584_v28 }
 0x254   : > { %8456 = vmatprep.mubr.msk.bf16.mxu1 %vm3123_vm0, %v12586_v61 }
 0x255   : > { %8557 = vmatmul.mubr.msk.bf16.vlgmr.msra.gmra.mrb[0].mxu0 %vm3123_vm0, %v12534_v42 }
 0x256   : > { %8585 = vmatpush3.bf16.msra.mxu0 %v9140_v16  ;;  %8560 = vmatprep.mubr.msk.bf16.mxu0 %vm3123_vm0, %v12546_v41  ;;  %v12674_v16 = vpack.c.bf16 %v3618_v11, %v3617_v36  ;;  %v4886_v36 = vld [vmem:[#allocation3 + $0xb2] sm:$0xff]  ;;  %v4887_v11 = vld [vmem:[#allocation3 + $0xba] sm:$0xff] }
 0x257   : > { %8614 = vmatprep.subr.bf16.mxu0 %v12593_v12  ;;  %v12735_v24 = vpack.c.bf16 %v4887_v11, %v4886_v36 }
 0x25b   : > { %8457 = vmatmul.mubr.msk.bf16.gmra.mrb[20].mxu1 %vm3123_vm0, %v12604_v49 }
 0x25c   : > { %8460 = vmatprep.mubr.msk.bf16.mxu1 %vm3123_vm0, %v12607_v15 }
 0x25d   : > { %8561 = vmatmul.mubr.msk.bf16.gmra.mrb[4].mxu0 %vm3123_vm0, %v12548_v48 }
 0x25e   : > { %8564 = vmatprep.mubr.msk.bf16.mxu0 %vm3123_vm0, %v12559_v39 }
 0x263   : > { %8461 = vmatmul.mubr.msk.bf16.gmra.mrb[24].mxu1 %vm3123_vm0, %v3682_v14  ;;  %v3622_v14 = vld [vmem:[#allocation3 + $0xc8] sm:$0xff] }
 0x264   : > { %8466 = vmatprep.mubr.msk.bf16.mxu1 %vm3123_vm0, %v3625_v50  ;;  %v4872_v50 = vld [vmem:[#allocation3 + $0x42] sm:$0xff] }
 0x265   : > { %8565 = vmatmul.mubr.msk.bf16.gmra.mrb[8].mxu0 %vm3123_vm0, %v12562_v63  ;;  %v12699_v8 = vpack.c.bf16 %v4873_v58, %v4872_v50  ;;  %v4893_v50 = vld [vmem:[#allocation3 + $0xea] sm:$0x3f] }
 0x266   : > { %8568 = vmatprep.mubr.msk.bf16.mxu0 %vm3123_vm0, %v12570_v30 }
 0x26b   : > { %8467 = vmatmul.mubr.msk.bf16.vlgmr.msra.gmra.mrb[0].mxu1 %vm3123_vm0, %v3626_v54  ;;  %v12697_v54 = vpack.c.bf16 %v3622_v14, %v3621_v19  ;;  %v12747_v19 = vpack.c.bf16 %v4891_v10, %v4890_v3  ;;  %v12757_v14 = vld [vmem:[#allocation3 + $0xe2] sm:$0xff]  ;;  %v12907_v10 = vld [vmem:[%s13671_s5] ss:$0 sm:$0xff] }
 0x26c   : > { %8470 = vmatprep.mubr.msk.bf16.mxu1 %vm3123_vm0, %v12623_v5  ;;  %8495 = vmatpush3.bf16.msra.mxu1 %v12557_v56  ;;  %v3611_v56 = vld [vmem:[#allocation3 + $0x70] sm:$0xff]  ;;  %v4907_v58 = vpack.c.bf16 %v4893_v50, %v12757_v14 }
 0x26d   : > { %8569 = vmatmul.mubr.msk.bf16.gmra.mrb[12].mxu0 %vm3123_vm0, %v12574_v6  ;;  %v12661_v43 = vpack.c.bf16 %v3612_v33, %v3611_v56  ;;  %v4099_v56 = vpack.c.bf16 %v4072_v46, %v4071_v37  ;;  %v12712_v33 = vpack.c.bf16 %v4877_v45, %v4876_v0 }
 0x26e   : > { %8572 = vmatprep.mubr.msk.bf16.mxu0 %vm3123_vm0, %v12584_v28 }
 0x273   : > { %8471 = vmatmul.mubr.msk.bf16.gmra.mrb[4].mxu1 %vm3123_vm0, %v12633_v9 }
 0x274   : > { %8474 = vmatprep.mubr.msk.bf16.mxu1 %vm3123_vm0, %v12635_v38 }
 0x275   : > { %8573 = vmatmul.mubr.msk.bf16.gmra.mrb[16].mxu0 %vm3123_vm0, %v12586_v61 }
 0x276   : > { %8576 = vmatprep.mubr.msk.bf16.mxu0 %vm3123_vm0, %v12604_v49 }
 0x27b   : > { %8475 = vmatmul.mubr.msk.bf16.gmra.mrb[8].mxu1 %vm3123_vm0, %v12645_v55 }
 0x27c   : > { %8478 = vmatprep.mubr.msk.bf16.mxu1 %vm3123_vm0, %v12647_v4 }
 0x27d   : > { %8577 = vmatmul.mubr.msk.bf16.gmra.mrb[20].mxu0 %vm3123_vm0, %v12607_v15 }
 0x27e   : > { %8580 = vmatprep.mubr.msk.bf16.mxu0 %vm3123_vm0, %v12649_v60 }
 0x283   : > { %8479 = vmatmul.mubr.msk.bf16.gmra.mrb[12].mxu1 %vm3123_vm0, %v12661_v43 }
 0x284   : > { %8482 = vmatprep.mubr.msk.bf16.mxu1 %vm3123_vm0, %v12663_v29 }
 0x285   : > { %8581 = vmatmul.mubr.msk.bf16.gmra.mrb[24].mxu0 %vm3123_vm0, %v4642_v23  ;;  %v12724_v23 = vpack.c.bf16 %v4883_v40, %v4882_v52 }
 0x286   : > { %8586 = vmatprep.mubr.msk.bf16.mxu0 %vm3123_vm0, %v4894_v22 }
 0x28b   : > { %8483 = vmatmul.mubr.msk.bf16.gmra.mrb[16].mxu1 %vm3123_vm0, %v12672_v13 }
 0x28c   : > { %8486 = vmatprep.mubr.msk.bf16.mxu1 %vm3123_vm0, %v12674_v16 }
 0x28d   : > { %8587 = vmatmul.mubr.msk.bf16.vlgmr.msra.gmra.mrb[0].mxu0 %vm3123_vm0, %v12676_v35 }
 0x28e   : > { %8615 = vmatpush3.bf16.msra.mxu0 %v12593_v12  ;;  %8590 = vmatprep.mubr.msk.bf16.mxu0 %vm3123_vm0, %v12678_v2  ;;  %v3624_v12 = vld [vmem:[#allocation3 + $0xd8] sm:$0x3f] }
 0x28f   : > { %8644 = vmatprep.subr.bf16.mxu0 %v12685_v17  ;;  %v3638_v51 = vpack.c.bf16 %v3624_v12, %v12522_v18  ;;  %v12722_v18 = vpack.c.bf16 %v4881_v20, %v4880_v31 }
 0x293   : > { %8487 = vmatmul.mubr.msk.bf16.gmra.mrb[20].mxu1 %vm3123_vm0, %v12694_v7 }
 0x294   : > { %8490 = vmatprep.mubr.msk.bf16.mxu1 %vm3123_vm0, %v12697_v54 }
 0x295   : > { %8591 = vmatmul.mubr.msk.bf16.gmra.mrb[4].mxu0 %vm3123_vm0, %v12699_v8 }
 0x296   : > { %8594 = vmatprep.mubr.msk.bf16.mxu0 %vm3123_vm0, %v12701_v32 }
 0x29b   : > { %8491 = vmatmul.mubr.msk.bf16.gmra.mrb[24].mxu1 %vm3123_vm0, %v3638_v51 }
 0x29c   : > { %8496 = vmatprep.mubr.msk.bf16.mxu1 %vm3123_vm0, %v4099_v56 }
 0x29d   : > { %8595 = vmatmul.mubr.msk.bf16.gmra.mrb[8].mxu0 %vm3123_vm0, %v12712_v33 }
 0x29e   : > { %8598 = vmatprep.mubr.msk.bf16.mxu0 %vm3123_vm0, %v12714_v34 }
 0x2a3   : > { %8497 = vmatmul.mubr.msk.bf16.vlgmr.msra.gmra.mrb[0].mxu1 %vm3123_vm0, %v4894_v22  ;;  %v4888_v22 = vld [vmem:[#allocation3 + $0xc2] sm:$0xff] }
 0x2a4   : > { %8500 = vmatprep.mubr.msk.bf16.mxu1 %vm3123_vm0, %v12676_v35  ;;  %v12745_v21 = vpack.c.bf16 %v4889_v62, %v4888_v22 }
 0x2a5   : > { %8599 = vmatmul.mubr.msk.bf16.gmra.mrb[12].mxu0 %vm3123_vm0, %v12722_v18 }
 0x2a6   : > { %8602 = vmatprep.mubr.msk.bf16.mxu0 %vm3123_vm0, %v12724_v23 }
 0x2ab   : > { %8501 = vmatmul.mubr.msk.bf16.gmra.mrb[4].mxu1 %vm3123_vm0, %v12678_v2 }
 0x2ac   : > { %8504 = vmatprep.mubr.msk.bf16.mxu1 %vm3123_vm0, %v12699_v8 }
 0x2ad   : > { %8603 = vmatmul.mubr.msk.bf16.gmra.mrb[16].mxu0 %vm3123_vm0, %v12733_v57 }
 0x2ae   : > { %8606 = vmatprep.mubr.msk.bf16.mxu0 %vm3123_vm0, %v12735_v24 }
 0x2b3   : > { %8505 = vmatmul.mubr.msk.bf16.gmra.mrb[8].mxu1 %vm3123_vm0, %v12701_v32 }
 0x2b4   : > { %8508 = vmatprep.mubr.msk.bf16.mxu1 %vm3123_vm0, %v12712_v33 }
 0x2b5   : > { %8607 = vmatmul.mubr.msk.bf16.gmra.mrb[20].mxu0 %vm3123_vm0, %v12745_v21 }
 0x2b6   : > { %8610 = vmatprep.mubr.msk.bf16.mxu0 %vm3123_vm0, %v12747_v19 }
 0x2bb   : > { %8509 = vmatmul.mubr.msk.bf16.gmra.mrb[12].mxu1 %vm3123_vm0, %v12714_v34 }
 0x2bc   : > { %8512 = vmatprep.mubr.msk.bf16.mxu1 %vm3123_vm0, %v12722_v18 }
 0x2bd   : > { %8611 = vmatmul.mubr.msk.bf16.gmra.mrb[24].mxu0 %vm3123_vm0, %v4907_v58  ;;  %v12914_v58 = vld [vmem:[%s13672_s6] ss:$0 sm:$0xff] }
 0x2be   : > { %8616 = vmatprep.mubr.msk.bf16.mxu0 %vm3123_vm0, %v12623_v5  ;;  %v4098_v5 = vld [vmem:[#allocation3 + $0xda] sm:$0x3f] }
 0x2c3   : > { %8513 = vmatmul.mubr.msk.bf16.gmra.mrb[16].mxu1 %vm3123_vm0, %v12724_v23 }
 0x2c4   : > { %8516 = vmatprep.mubr.msk.bf16.mxu1 %vm3123_vm0, %v12733_v57 }
 0x2c5   : > { %8617 = vmatmul.mubr.msk.bf16.vlgmr.msra.gmra.mrb[0].mxu0 %vm3123_vm0, %v12633_v9  ;;  %v4112_v9 = vpack.c.bf16 %v4098_v5, %v4890_v3 }
 0x2c6   : > { %8645 = vmatpush3.bf16.msra.mxu0 %v12685_v17  ;;  %8620 = vmatprep.mubr.msk.bf16.mxu0 %vm3123_vm0, %v12635_v38  ;;  %v5153_v38 = vld [vmem:[#allocation3 + $0xd0] sm:$0xff] }
 0x2c7   : > { %8674 = vmatprep.subr.bf16.mxu0 %v8990_v53 }
 0x2cb   : > { %8517 = vmatmul.mubr.msk.bf16.gmra.mrb[20].mxu1 %vm3123_vm0, %v12735_v24 }
 0x2cc   : > { %8520 = vmatprep.mubr.msk.bf16.mxu1 %vm3123_vm0, %v12745_v21 }
 0x2cd   : > { %8621 = vmatmul.mubr.msk.bf16.gmra.mrb[4].mxu0 %vm3123_vm0, %v12645_v55  ;;  %v5154_v55 = vld [vmem:[#allocation3 + $0xd8] sm:$0xff] }
 0x2ce   : > { %8624 = vmatprep.mubr.msk.bf16.mxu0 %vm3123_vm0, %v12647_v4  ;;  %v5156_v4 = vld [vmem:[#allocation3 + $0xe8] sm:$0xff]  ;;  %v5170_v17 = vpack.c.bf16 %v5154_v55, %v5153_v38 }
 0x2d3   : > { %8521 = vmatmul.mubr.msk.bf16.gmra.mrb[24].mxu1 %vm3123_vm0, %v4112_v9 }
 0x2d5   : > { %8625 = vmatmul.mubr.msk.bf16.gmra.mrb[8].mxu0 %vm3123_vm0, %v12661_v43  ;;  %v5171_v43 = vpack.c.bf16 %v5156_v4, %v12572_v25 }
 0x2d6   : > { %8628 = vmatprep.mubr.msk.bf16.mxu0 %vm3123_vm0, %v12663_v29  ;;  %v5157_v29 = vld [vmem:[#allocation3 + $0xf0] sm:$0xff] }
 0x2dd   : > { %8629 = vmatmul.mubr.msk.bf16.gmra.mrb[12].mxu0 %vm3123_vm0, %v12672_v13  ;;  %v5158_v13 = vld [vmem:[#allocation3 + $0xf8] sm:$0x3f] }
 0x2de   : > { %8632 = vmatprep.mubr.msk.bf16.mxu0 %vm3123_vm0, %v12674_v16  ;;  %v5172_v59 = vpack.c.bf16 %v5158_v13, %v5157_v29 }
 0x2e5   : > { %8633 = vmatmul.mubr.msk.bf16.gmra.mrb[16].mxu0 %vm3123_vm0, %v12694_v7 }
 0x2e6   : > { %8636 = vmatprep.mubr.msk.bf16.mxu0 %vm3123_vm0, %v12697_v54 }
 0x2ed   : > { %8637 = vmatmul.mubr.msk.bf16.gmra.mrb[20].mxu0 %vm3123_vm0, %v5170_v17 }
 0x2ee   : > { %8640 = vmatprep.mubr.msk.bf16.mxu0 %vm3123_vm0, %v5171_v43 }
 0x2f5   : > { %8641 = vmatmul.mubr.msk.bf16.gmra.mrb[24].mxu0 %vm3123_vm0, %v5172_v59 }
 0x2f6   : > { %8646 = vmatprep.mubr.msk.bf16.mxu0 %vm3123_vm0, %v12534_v42  ;;  %v5421_v42 = vld [vmem:[#allocation3 + $0xe9] sm:$0xff] }
 0x2fd   : > { %8647 = vmatmul.mubr.msk.bf16.vlgmr.msra.gmra.mrb[0].mxu0 %vm3123_vm0, %v12546_v41  ;;  %v5436_v41 = vpack.c.bf16 %v5421_v42, %v12659_v44 }
 0x2fe   : > { %8675 = vmatpush3.bf16.msra.mxu0 %v8990_v53  ;;  %8650 = vmatprep.mubr.msk.bf16.mxu0 %vm3123_vm0, %v12548_v48  ;;  %v5422_v48 = vld [vmem:[#allocation3 + $0xf1] sm:$0xff] }
 0x305   : > { %8651 = vmatmul.mubr.msk.bf16.gmra.mrb[4].mxu0 %vm3123_vm0, %v12559_v39  ;;  %v5423_v39 = vld [vmem:[#allocation3 + $0xf9] sm:$0x3f] }
 0x306   : > { %8654 = vmatprep.mubr.msk.bf16.mxu0 %vm3123_vm0, %v12562_v63  ;;  %v5437_v63 = vpack.c.bf16 %v5423_v39, %v5422_v48 }
 0x30d   : > { %8655 = vmatmul.mubr.msk.bf16.gmra.mrb[8].mxu0 %vm3123_vm0, %v12570_v30  ;;  %v5686_v30 = vld [vmem:[#allocation3 + $0xea] sm:$0xff] }
 0x30e   : > { %8658 = vmatprep.mubr.msk.bf16.mxu0 %vm3123_vm0, %v12574_v6  ;;  %v5701_v25 = vpack.c.bf16 %v5686_v30, %v12757_v14  ;;  %v5687_v6 = vld [vmem:[#allocation3 + $0xf2] sm:$0xff] }
 0x315   : > { %8659 = vmatmul.mubr.msk.bf16.gmra.mrb[12].mxu0 %vm3123_vm0, %v12584_v28  ;;  %v5688_v28 = vld [vmem:[#allocation3 + $0xfa] sm:$0x3f] }
 0x316   : > { %8662 = vmatprep.mubr.msk.bf16.mxu0 %vm3123_vm0, %v12586_v61  ;;  %v5702_v61 = vpack.c.bf16 %v5688_v28, %v5687_v6 }
 0x31d   : > { %8663 = vmatmul.mubr.msk.bf16.gmra.mrb[16].mxu0 %vm3123_vm0, %v12604_v49 }
 0x31e   : > { %8666 = vmatprep.mubr.msk.bf16.mxu0 %vm3123_vm0, %v12607_v15 }
 0x325   : > { %8667 = vmatmul.mubr.msk.bf16.gmra.mrb[20].mxu0 %vm3123_vm0, %v12649_v60 }
 0x326   : > { %8670 = vmatprep.mubr.msk.bf16.mxu0 %vm3123_vm0, %v5436_v41 }
 0x32d   : > { %8671 = vmatmul.mubr.msk.bf16.gmra.mrb[24].mxu0 %vm3123_vm0, %v5437_v63 }
 0x32e   : > { %8676 = vmatprep.mubr.msk.bf16.mxu0 %vm3123_vm0, %v12676_v35 }
 0x335   : > { %8677 = vmatmul.mubr.msk.bf16.vlgmr.msra.gmra.mrb[0].mxu0 %vm3123_vm0, %v12678_v2 }
 0x336   : > { %8680 = vmatprep.mubr.msk.bf16.mxu0 %vm3123_vm0, %v12699_v8 }
 0x33d   : > { %8681 = vmatmul.mubr.msk.bf16.gmra.mrb[4].mxu0 %vm3123_vm0, %v12701_v32 }
 0x33e   : > { %8684 = vmatprep.mubr.msk.bf16.mxu0 %vm3123_vm0, %v12712_v33 }
 0x345   : > { %8685 = vmatmul.mubr.msk.bf16.gmra.mrb[8].mxu0 %vm3123_vm0, %v12714_v34 }
 0x346   : > { %8688 = vmatprep.mubr.msk.bf16.mxu0 %vm3123_vm0, %v12722_v18 }
 0x34d   : > { %8689 = vmatmul.mubr.msk.bf16.gmra.mrb[12].mxu0 %vm3123_vm0, %v12724_v23 }
 0x34e   : > { %8692 = vmatprep.mubr.msk.bf16.mxu0 %vm3123_vm0, %v12733_v57 }
 0x355   : > { %8693 = vmatmul.mubr.msk.bf16.gmra.mrb[16].mxu0 %vm3123_vm0, %v12735_v24 }
 0x356   : > { %8696 = vmatprep.mubr.msk.bf16.mxu0 %vm3123_vm0, %v12745_v21 }
 0x35d   : > { %8697 = vmatmul.mubr.msk.bf16.gmra.mrb[20].mxu0 %vm3123_vm0, %v12747_v19 }
 0x35e   : > { %8700 = vmatprep.mubr.msk.bf16.mxu0 %vm3123_vm0, %v5701_v25 }
 0x365   : > { %8701 = vmatmul.mubr.msk.bf16.gmra.mrb[24].mxu0 %vm3123_vm0, %v5702_v61 }
 0x376   : > { %v8498_v49 = vpop.f32.mrb[0].mxu1 }
 0x377   : > { %v4197_v15 = vpop.f32.mrb[1].mxu1 }
 0x378   : > { %v8499_v60 = vpop.f32.mrb[2].mxu1 }
 0x379   : > { %v4200_v44 = vpop.f32.mrb[3].mxu1 }
 0x37e   : > { %v8502_v16 = vpop.f32.mrb[4].mxu1 }
 0x37f   : > { %v4213_v35 = vpop.f32.mrb[5].mxu1 }
 0x380   : > { %v8503_v2 = vpop.f32.mrb[6].mxu1 }
 0x381   : > { %v4216_v7 = vpop.f32.mrb[7].mxu1 }
 0x386   : > { %v12858_v54 = vpop.f32.mrb[8].mxu1 }
 0x387   : > { %v12860_v8 = vpop.f32.mrb[9].mxu1 }
 0x388   : > { %v12862_v32 = vpop.f32.mrb[10].mxu1 }
 0x389   : > { %v12864_v12 = vpop.f32.mrb[11].mxu1 }
 0x38e   : > { %v12866_v37 = vpop.f32.mrb[12].mxu1 }
 0x38f   : > { %v12868_v46 = vpop.f32.mrb[13].mxu1 }
 0x390   : > { %v12870_v0 = vpop.f32.mrb[14].mxu1 }
 0x391   : > { %v12872_v45 = vpop.f32.mrb[15].mxu1 }
 0x396   : > { %v12874_v47 = vpop.f32.mrb[16].mxu1 }
 0x397   : > { %v12876_v26 = vpop.f32.mrb[17].mxu1 }
 0x398   : > { %v12878_v51 = vpop.f32.mrb[18].mxu1 }
 0x399   : > { %v12880_v56 = vpop.f32.mrb[19].mxu1 }
 0x39e   : > { %v12882_v33 = vpop.f32.mrb[20].mxu1 }
 0x39f   : > { %v12884_v34 = vpop.f32.mrb[21].mxu1 }
 0x3a0   : > { %v12886_v31 = vpop.f32.mrb[22].mxu1 }
 0x3a1   : > { %v12888_v20 = vpop.f32.mrb[23].mxu1 }
 0x3a6   : > { %v12890_v52 = vpop.f32.mrb[24].mxu1 }
 0x3a7   : > { %v12892_v40 = vpop.f32.mrb[25].mxu1 }
 0x3a8   : > { %v12894_v18 = vpop.f32.mrb[26].mxu1 }
 0x3a9   : > { %v12896_v23 = vpop.f32.mrb[27].mxu1 }
 0x408   : > { %v8678_v1 = vpop.f32.mrb[0].mxu0 }
 0x409   : > { %v8712_v36 = vadd.f32 %v8678_v1, %v8498_v49  ;;  %v5787_v11 = vpop.f32.mrb[1].mxu0 }
 0x40a   : > { %v8713_v57 = vadd.f32 %v5787_v11, %v4197_v15  ;;  %v8679_v24 = vpop.f32.mrb[2].mxu0  ;;  %v6099_v11 = vlaneseq }
 0x40b   : > { %v5935_v22 = vadd.f32 %v8712_v36, %v12901_v27  ;;  %v8714_v62 = vadd.f32 %v8679_v24, %v8499_v60  ;;  %v5790_v3 = vpop.f32.mrb[3].mxu0 }
 0x40c   : > { %v5933_v21 = vadd.f32 %v8713_v57, %v12901_v27  ;;  %v8715_v19 = vadd.f32 %v5790_v3, %v4200_v44  ;;  %vm12965_vm3 = vcmp.lt.s32.totalorder %v6099_v11, 32  ;;  %vm6130_vm5 = vcmp.ge.s32.totalorder %v6099_v11, 32 }
 0x40d   : > { %v5963_v14 = vmax.f32 %v5935_v22, 0.0  ;;  %v5936_v50 = vadd.f32 %v8714_v62, %v12901_v27  ;;  %vm6131_vm6 = vcmp.lt.s32.totalorder %v6099_v11, 64  ;;  %vm6138_vm8 = vcmp.ge.s32.totalorder %v6099_v11, 64 }
 0x40e   : > { %v5961_v53 = vmax.f32 %v5933_v21, 0.0  ;;  %v5934_v5 = vadd.f32 %v8715_v19, %v12901_v27  ;;  %vm13236_vm7 = vmand %vm6130_vm5, %vm6131_vm6  ;;  %vm6139_vm9 = vcmp.lt.s32.totalorder %v6099_v11, 96  ;;  %vm6146_vm11 = vcmp.ge.s32.totalorder %v6099_v11, 96 }
 0x40f   : > { %v5998_v9 = vmul.f32 %v12907_v10, %v5963_v14  ;;  %v5964_v38 = vmax.f32 %v5936_v50, 0.0  ;;  %vm13244_vm10 = vmand %vm6138_vm8, %vm6139_vm9  ;;  %vm6147_vm12 = vcmp.lt.s32.totalorder %v6099_v11, 128 }
 0x410   : > { %v5996_v55 = vmul.f32 %v12907_v10, %v5961_v53  ;;  %v5962_v4 = vmax.f32 %v5934_v5, 0.0  ;;  %v8682_v17 = vpop.f32.mrb[4].mxu0  ;;  %vm13252_vm13 = vmand %vm6146_vm11, %vm6147_vm12 }
 0x411   : > { %v6033_v43 = vadd.f32 %v12914_v58, %v5998_v9  ;;  %v5999_v29 = vmul.f32 %v12907_v10, %v5964_v38  ;;  %v8716_v13 = vadd.f32 %v8682_v17, %v8502_v16  ;;  %v5803_v59 = vpop.f32.mrb[5].mxu0 }
 0x412   : > { %v6031_v42 = vadd.f32 %v12914_v58, %v5996_v55  ;;  %v5997_v41 = vmul.f32 %v12907_v10, %v5962_v4  ;;  %v8717_v48 = vadd.f32 %v5803_v59, %v4213_v35  ;;  %v8683_v39 = vpop.f32.mrb[6].mxu0  ;;  %v9206_v35 = vmov 1966171168  }
 0x413   : > { %6062 = vst.msk [vmem:[#allocation4 + $0x10] sm:$0xff] %vm6059_vm2, %v6033_v43  ;;  %v6034_v63 = vadd.f32 %v12914_v58, %v5999_v29  ;;  %v5939_v30 = vadd.f32 %v8716_v13, %v12901_v27  ;;  %v8718_v25 = vadd.f32 %v8683_v39, %v8503_v2  ;;  %v5806_v6 = vpop.f32.mrb[7].mxu0  ;;  %v6106_v2 = vunpack.c.l.s4 %v9206_v35 }
 0x414   : > { %6060 = vst.msk [vmem:[#allocation4] sm:$0xff] %vm6059_vm2, %v6031_v42  ;;  %v6032_v28 = vadd.f32 %v12914_v58, %v5997_v41  ;;  %v5937_v61 = vadd.f32 %v8717_v48, %v12901_v27  ;;  %v8719_v49 = vadd.f32 %v5806_v6, %v4216_v7 }
 0x415   : > { %6063 = vst.msk [vmem:[#allocation4 + $0x18] sm:$0xff] %vm6059_vm2, %v6034_v63  ;;  %v5967_v15 = vmax.f32 %v5939_v30, 0.0  ;;  %v5940_v60 = vadd.f32 %v8718_v25, %v12901_v27  ;;  %v6107_v5 = vunpack.c.0.s8 %v6106_v2  ;;  %v8991_v30 = vld [vmem:[%s13673_s7 + $0x40] sm:$0xff]  }
 0x416   : > { %6061 = vst.msk [vmem:[#allocation4 + $0x8] sm:$0xff] %vm6059_vm2, %v6032_v28  ;;  %v5965_v44 = vmax.f32 %v5937_v61, 0.0  ;;  %v5938_v16 = vadd.f32 %v8719_v49, %v12901_v27  ;;  %8299 = vmatprep.subr.bf16.mxu1 %v8991_v30 }
 0x417   : > { %v6002_v1 = vmul.f32 %v12907_v10, %v5967_v15  ;;  %v5968_v36 = vmax.f32 %v5940_v60, 0.0 }
 0x418   : > { %v6000_v57 = vmul.f32 %v12907_v10, %v5965_v44  ;;  %v5966_v24 = vmax.f32 %v5938_v16, 0.0  ;;  %v8686_v7 = vpop.f32.mrb[8].mxu0  ;;  %v8992_v44 = vld [vmem:[%s13673_s7] sm:$0xff]  }
 0x419   : > { %v6037_v22 = vadd.f32 %v12914_v58, %v6002_v1  ;;  %v6003_v62 = vmul.f32 %v12907_v10, %v5968_v36  ;;  %v8720_v3 = vadd.f32 %v8686_v7, %v12858_v54  ;;  %v5819_v21 = vpop.f32.mrb[9].mxu0  ;;  %v12946_v54 = vshrl.u32 %v6099_v11, 7  ;;  %8300 = vmatpush3.bf16.msra.mxu1 %v8992_v44 }
 0x41a   : > { %v6035_v19 = vadd.f32 %v12914_v58, %v6000_v57  ;;  %v6001_v14 = vmul.f32 %v12907_v10, %v5966_v24  ;;  %v8721_v50 = vadd.f32 %v5819_v21, %v12860_v8  ;;  %v8687_v53 = vpop.f32.mrb[10].mxu0 }
 0x41b   : > { %6066 = vst.msk [vmem:[#allocation4 + $0x30] sm:$0xff] %vm6059_vm2, %v6037_v22  ;;  %v6038_v9 = vadd.f32 %v12914_v58, %v6003_v62  ;;  %v5943_v38 = vadd.f32 %v8720_v3, %v12901_v27  ;;  %v8722_v55 = vadd.f32 %v8687_v53, %v12862_v32  ;;  %v5822_v4 = vpop.f32.mrb[11].mxu0  ;;  %v12961_v28 = vsub.s32 %v6107_v5, %v12946_v54 }
 0x41c   : > { %6064 = vst.msk [vmem:[#allocation4 + $0x20] sm:$0xff] %vm6059_vm2, %v6035_v19  ;;  %v6036_v17 = vadd.f32 %v12914_v58, %v6001_v14  ;;  %v5941_v8 = vadd.f32 %v8721_v50, %v12901_v27  ;;  %v8723_v43 = vadd.f32 %v5822_v4, %v12864_v12  ;;  %v6093_v29 = vld [vmem:[#allocation4 + $0x10] ss:$2 sm:$0x7f] }
 0x41d   : > { %v6095_v13 = vld [vmem:[#allocation4 + $0x11] ss:$2 sm:$0x7f]  ;;  %6067 = vst.msk [vmem:[#allocation4 + $0x38] sm:$0xff] %vm6059_vm2, %v6038_v9  ;;  %v5971_v59 = vmax.f32 %v5943_v38, 0.0  ;;  %v5944_v42 = vadd.f32 %v8722_v55, %v12901_v27 }
 0x41e   : > { %v6089_v32 = vld [vmem:[#allocation4] ss:$2 sm:$0x7f]  ;;  %v6097_v41 = vmax.f32 %v6093_v29, %v6095_v13  ;;  %6065 = vst.msk [vmem:[#allocation4 + $0x28] sm:$0xff] %vm6059_vm2, %v6036_v17  ;;  %v5969_v48 = vmax.f32 %v5941_v8, 0.0  ;;  %v5942_v39 = vadd.f32 %v8723_v43, %v12901_v27 }
 0x41f   : > { %v6091_v63 = vld [vmem:[#allocation4 + $0x1] ss:$2 sm:$0x7f]  ;;  %v6006_v12 = vmul.f32 %v12907_v10, %v5971_v59  ;;  %v5972_v25 = vmax.f32 %v5944_v42, 0.0 }
 0x420   : > { %v6096_v6 = vmax.f32 %v6089_v32, %v6091_v63  ;;  %v6004_v61 = vmul.f32 %v12907_v10, %v5969_v48  ;;  %v5970_v49 = vmax.f32 %v5942_v39, 0.0  ;;  %v8690_v15 = vpop.f32.mrb[12].mxu0 }
 0x421   : > { %v6041_v16 = vadd.f32 %v12914_v58, %v6006_v12  ;;  %v6007_v35 = vmul.f32 %v12907_v10, %v5972_v25  ;;  %v8724_v2 = vadd.f32 %v8690_v15, %v12866_v37  ;;  %v5835_v1 = vpop.f32.mrb[13].mxu0  ;;  %v8993_v25 = vld [vmem:[%s13673_s7 + $0x48] sm:$0xff]  }
 0x422   : > { %v6098_v36 = vmax.f32 %v6096_v6, %v6097_v41  ;;  %v6039_v57 = vadd.f32 %v12914_v58, %v6004_v61  ;;  %v6005_v24 = vmul.f32 %v12907_v10, %v5970_v49  ;;  %v8725_v7 = vadd.f32 %v5835_v1, %v12868_v46  ;;  %v8691_v22 = vpop.f32.mrb[14].mxu0  ;;  %v8994_v6 = vld [vmem:[%s13673_s7 + $0x8] sm:$0xff]   ;;  %8301 = vmatprep.subr.bf16.mxu1 %v8993_v25 }
 0x423   : > { %6070 = vst.msk [vmem:[#allocation4 + $0x50] sm:$0xff] %vm6059_vm2, %v6041_v16  ;;  %v6042_v62 = vadd.f32 %v12914_v58, %v6007_v35  ;;  %v5947_v3 = vadd.f32 %v8724_v2, %v12901_v27  ;;  %v8726_v21 = vadd.f32 %v8691_v22, %v12870_v0  ;;  %v5838_v19 = vpop.f32.mrb[15].mxu0  ;;  %8302 = vmatpush3.bf16.msra.mxu1 %v8994_v6 }
 0x424   : > { %v6111_v37 = vrot.slane %v6098_v36, %v12961_v28  ;;  %6103 = vst.msk [vmem:[#allocation5] sm:$0x1] %vm12965_vm3, %v6098_v36  ;;  %v6040_v46 = vadd.f32 %v12914_v58, %v6005_v24  ;;  %v5945_v14 = vadd.f32 %v8725_v7, %v12901_v27  ;;  %v8727_v50 = vadd.f32 %v5838_v19, %v12872_v45  ;;  %v6189_v5 = vld [vmem:[#allocation4 + $0x30] ss:$2 sm:$0x7f] }
 0x425   : > { %6068 = vst.msk [vmem:[#allocation4 + $0x40] sm:$0xff] %vm6059_vm2, %v6039_v57  ;;  %v6150_v53 = vcombine.high %v6098_v36, %v6098_v36  ;;  %v6191_v9 = vld [vmem:[#allocation4 + $0x31] ss:$2 sm:$0x7f]  ;;  %6071 = vst.msk [vmem:[#allocation4 + $0x58] sm:$0xff] %vm6059_vm2, %v6042_v62  ;;  %v5975_v0 = vmax.f32 %v5947_v3, 0.0  ;;  %v5948_v38 = vadd.f32 %v8726_v21, %v12901_v27 }
 0x426   : > { %v6112_v55 = vcombine.high %v6111_v37, %v6111_v37  ;;  %v6119_v4 = vrot.slane %v6111_v37, %v12961_v28  ;;  %v6185_v17 = vld [vmem:[#allocation4 + $0x20] ss:$2 sm:$0x7f]  ;;  %6069 = vst.msk [vmem:[#allocation4 + $0x48] sm:$0xff] %vm6059_vm2, %v6040_v46  ;;  %v5973_v8 = vmax.f32 %v5945_v14, 0.0  ;;  %v5946_v43 = vadd.f32 %v8727_v50, %v12901_v27 }
 0x427   : > { %v6157_v29 = vrot.slane %v6150_v53, %v12961_v28  ;;  %v6187_v45 = vld [vmem:[#allocation4 + $0x21] ss:$2 sm:$0x7f]  ;;  %v6193_v13 = vmax.f32 %v6189_v5, %v6191_v9  ;;  %v6010_v59 = vmul.f32 %v12907_v10, %v5975_v0  ;;  %v5976_v42 = vmax.f32 %v5948_v38, 0.0 }
 0x428   : > { %v12997_v32 = vrot.slane %v6112_v55, %v12961_v28  ;;  %v6134_v41 = vcombine.high %v6119_v4, %v6119_v4  ;;  %v6008_v48 = vmul.f32 %v12907_v10, %v5973_v8  ;;  %v5974_v39 = vmax.f32 %v5946_v43, 0.0  ;;  %v8694_v63 = vpop.f32.mrb[16].mxu0  ;;  %v8995_v9 = vld [vmem:[%s13673_s7 + $0x50] sm:$0xff]  }
 0x429   : > { %v6164_v30 = vrot.slane %v6157_v29, %v12961_v28  ;;  %v6192_v12 = vmax.f32 %v6185_v17, %v6187_v45  ;;  %v6045_v61 = vadd.f32 %v12914_v58, %v6010_v59  ;;  %v6011_v49 = vmul.f32 %v12907_v10, %v5976_v42  ;;  %v5851_v16 = vpop.f32.mrb[17].mxu0  ;;  %8303 = vmatprep.subr.bf16.mxu1 %v8995_v9 }
 0x42a   : > { %v8728_v15 = vadd.f32 %v8694_v63, %v12874_v47  ;;  %6127 = vrot.lane.b32.xlu0 %v12997_v32, %s9207_s24  ;;  %v6142_v44 = vcombine.high %v12997_v32, %v12997_v32  ;;  %v6043_v35 = vadd.f32 %v12914_v58, %v6008_v48  ;;  %v6009_v2 = vmul.f32 %v12907_v10, %v5974_v39  ;;  %v8695_v36 = vpop.f32.mrb[18].mxu0  ;;  %v8996_v48 = vld [vmem:[%s13673_s7 + $0x10] sm:$0xff]  }
 0x42b   : > { %v8729_v1 = vadd.f32 %v5851_v16, %v12876_v26  ;;  %v6179_v57 = vcombine.high %v6164_v30, %v6164_v30  ;;  %6166 = vst.msk [vmem:[#allocation5 + $0x1] sm:$0x1] %vm12965_vm3, %v6164_v30  ;;  %v6046_v47 = vadd.f32 %v12914_v58, %v6011_v49  ;;  %v8730_v7 = vadd.f32 %v8695_v36, %v12878_v51  ;;  %v5854_v22 = vpop.f32.mrb[19].mxu0 }
 0x42c   : > { %6074 = vst.msk [vmem:[#allocation4 + $0x70] sm:$0xff] %vm6059_vm2, %v6045_v61  ;;  %v5951_v24 = vadd.f32 %v8728_v15, %v12901_v27  ;;  %v6194_v62 = vmax.f32 %v6192_v12, %v6193_v13  ;;  %6072 = vst.msk [vmem:[#allocation4 + $0x60] sm:$0xff] %vm6059_vm2, %v6043_v35  ;;  %v6044_v26 = vadd.f32 %v12914_v58, %v6009_v2  ;;  %v6273_v37 = vld [vmem:[#allocation4 + $0x50] ss:$2 sm:$0x7f]  ;;  %8304 = vmatpush3.bf16.msra.mxu1 %v8996_v48 }
 0x42d   : > { %v5949_v3 = vadd.f32 %v8729_v1, %v12901_v27  ;;  %6180 = vrot.lane.b32.xlu1 %v6179_v57, %s9208_s25  ;;  %v8731_v21 = vadd.f32 %v5854_v22, %v12880_v56  ;;  %v6167_v19 = vcombine.high %v6157_v29, %v6157_v29  ;;  %v6275_v46 = vld [vmem:[#allocation4 + $0x51] ss:$2 sm:$0x7f]  ;;  %6075 = vst.msk [vmem:[#allocation4 + $0x78] sm:$0xff] %vm6059_vm2, %v6046_v47 }
 0x42e   : > { %v5979_v51 = vmax.f32 %v5951_v24, 0.0  ;;  %v5952_v14 = vadd.f32 %v8730_v7, %v12901_v27  ;;  %6135 = vrot.lane.b32.xlu0 %v6134_v41, %s9208_s25  ;;  %v6202_v50 = vrot.slane %v6194_v62, %v12961_v28  ;;  %v6234_v53 = vcombine.high %v6194_v62, %v6194_v62  ;;  %v6269_v5 = vld [vmem:[#allocation4 + $0x40] ss:$2 sm:$0x7f]  ;;  %6073 = vst.msk [vmem:[#allocation4 + $0x68] sm:$0xff] %vm6059_vm2, %v6044_v26  ;;  %v8998_v26 = vld [vmem:[%s13673_s7 + $0x18] sm:$0xff]  }
 0x42f   : > { %v5977_v56 = vmax.f32 %v5949_v3, 0.0  ;;  %v5950_v0 = vadd.f32 %v8731_v21, %v12901_v27  ;;  %v6174_v38 = vrot.slane %v6167_v19, %v12961_v28  ;;  %v6271_v55 = vld [vmem:[#allocation4 + $0x41] ss:$2 sm:$0x7f]  ;;  %v6277_v4 = vmax.f32 %v6273_v37, %v6275_v46 }
 0x430   : > { %v6014_v17 = vmul.f32 %v12907_v10, %v5979_v51  ;;  %v5980_v8 = vmax.f32 %v5952_v14, 0.0  ;;  %v6209_v43 = vrot.slane %v6202_v50, %v12961_v28  ;;  %v13041_v29 = vrot.slane %v6234_v53, %v12961_v28  ;;  %v8698_v59 = vpop.f32.mrb[20].mxu0 }
 0x431   : > { %v6012_v45 = vmul.f32 %v12907_v10, %v5977_v56  ;;  %v5978_v13 = vmax.f32 %v5950_v0, 0.0  ;;  %v6276_v42 = vmax.f32 %v6269_v5, %v6271_v55  ;;  %v6214_v41 = vcombine.high %v6202_v50, %v6202_v50  ;;  %v5867_v12 = vpop.f32.mrb[21].mxu0 }
 0x432   : > { %v6049_v39 = vadd.f32 %v12914_v58, %v6014_v17  ;;  %v6015_v63 = vmul.f32 %v12907_v10, %v5980_v8  ;;  %6210 = vrot.lane.b32.xlu1 %v6209_v43, %s9209_s14  ;;  %v8732_v30 = vadd.f32 %v8698_v59, %v12882_v33  ;;  %6175 = vrot.lane.b32.xlu0 %v6174_v38, %s9207_s24  ;;  %v8699_v49 = vpop.f32.mrb[22].mxu0 }
 0x433   : > { %v6047_v25 = vadd.f32 %v12914_v58, %v6012_v45  ;;  %v6013_v6 = vmul.f32 %v12907_v10, %v5978_v13  ;;  %v8733_v61 = vadd.f32 %v5867_v12, %v12884_v34  ;;  %v6224_v15 = vcombine.high %v6209_v43, %v6209_v43  ;;  %v5870_v2 = vpop.f32.mrb[23].mxu0 }
 0x434   : > { %6078 = vst.msk [vmem:[#allocation4 + $0x90] sm:$0xff] %vm6059_vm2, %v6049_v39  ;;  %v6050_v16 = vadd.f32 %v12914_v58, %v6015_v63  ;;  %v5955_v35 = vadd.f32 %v8732_v30, %v12901_v27  ;;  %v8734_v33 = vadd.f32 %v8699_v49, %v12886_v31  ;;  %v6248_v1 = vrot.slane %v13041_v29, %v12961_v28  ;;  %v6357_v0 = vld [vmem:[#allocation4 + $0x70] ss:$2 sm:$0x7f] }
 0x435   : > { %6076 = vst.msk [vmem:[#allocation4 + $0x80] sm:$0xff] %vm6059_vm2, %v6047_v25  ;;  %v6048_v36 = vadd.f32 %v12914_v58, %v6013_v6  ;;  %v5953_v34 = vadd.f32 %v8733_v61, %v12901_v27  ;;  %v8735_v57 = vadd.f32 %v5870_v2, %v12888_v20  ;;  %v6278_v47 = vmax.f32 %v6276_v42, %v6277_v4  ;;  %v6353_v62 = vld [vmem:[#allocation4 + $0x60] ss:$2 sm:$0x7f]  ;;  %v8997_v20 = vld [vmem:[%s13673_s7 + $0x58] sm:$0xff]  }
 0x436   : > { %6079 = vst.msk [vmem:[#allocation4 + $0x98] sm:$0xff] %vm6059_vm2, %v6050_v16  ;;  %v5983_v24 = vmax.f32 %v5955_v35, 0.0  ;;  %v5956_v7 = vadd.f32 %v8734_v33, %v12901_v27  ;;  %6225 = vrot.lane.b32.xlu1 %v6224_v15, %s9207_s24  ;;  %6143 = vrot.lane.b32.xlu0 %v6142_v44, %s9209_s14  ;;  %v6263_v31 = vcombine.high %v6248_v1, %v6248_v1  ;;  %v6355_v19 = vld [vmem:[#allocation4 + $0x61] ss:$2 sm:$0x7f]  ;;  %v8999_v16 = vld [vmem:[%s13673_s7 + $0x60] sm:$0xff]  }
 0x437   : > { %v6221_v22 = vrot.slane %v6214_v41, %v12961_v28  ;;  %6077 = vst.msk [vmem:[#allocation4 + $0x88] sm:$0xff] %vm6059_vm2, %v6048_v36  ;;  %v5981_v3 = vmax.f32 %v5953_v34, 0.0  ;;  %v5954_v21 = vadd.f32 %v8735_v57, %v12901_v27  ;;  %v6286_v32 = vrot.slane %v6278_v47, %v12961_v28  ;;  %8305 = vmatprep.subr.bf16.mxu1 %v8997_v20  ;;  %v6359_v8 = vld [vmem:[#allocation4 + $0x71] ss:$2 sm:$0x7f] }
 0x438   : > { %v6318_v44 = vcombine.high %v6278_v47, %v6278_v47  ;;  %v6018_v37 = vmul.f32 %v12907_v10, %v5983_v24  ;;  %v5984_v46 = vmax.f32 %v5956_v7, 0.0  ;;  %v6360_v14 = vmax.f32 %v6353_v62, %v6355_v19  ;;  %v8702_v5 = vpop.f32.mrb[24].mxu0  ;;  %8306 = vmatpush3.bf16.msra.mxu1 %v8998_v26 }
 0x439   : > { %v6229_v51 = vcombine.high %v6221_v22, %v6221_v22  ;;  %6223 = vst.msk [vmem:[#allocation5 + $0x2] sm:$0x1] %vm12965_vm3, %v6221_v22  ;;  %v6016_v50 = vmul.f32 %v12907_v10, %v5981_v3  ;;  %v5982_v53 = vmax.f32 %v5954_v21, 0.0  ;;  %v13087_v9 = vrot.slane %v6286_v32, %v12961_v28  ;;  %v5883_v17 = vpop.f32.mrb[25].mxu0  ;;  %8307 = vmatprep.subr.bf16.mxu1 %v8999_v16 }
 0x43a   : > { %v6298_v56 = vcombine.high %v6286_v32, %v6286_v32  ;;  %v6053_v38 = vadd.f32 %v12914_v58, %v6018_v37  ;;  %v6019_v55 = vmul.f32 %v12907_v10, %v5984_v46  ;;  %6264 = vrot.lane.b32.xlu1 %v6263_v31, %s9207_s24  ;;  %v8736_v4 = vadd.f32 %v8702_v5, %v12890_v52  ;;  %v8703_v59 = vpop.f32.mrb[26].mxu0 }
 0x43b   : > { %6249 = vrot.lane.b32.xlu0 %v6248_v1, %s9209_s14  ;;  %v6051_v43 = vadd.f32 %v12914_v58, %v6016_v50  ;;  %v6017_v45 = vmul.f32 %v12907_v10, %v5982_v53  ;;  %v8737_v13 = vadd.f32 %v5883_v17, %v12892_v40  ;;  %v8738_v52 = vadd.f32 %v8703_v59, %v12894_v18  ;;  %v5886_v39 = vpop.f32.mrb[27].mxu0  ;;  %v9002_v17 = vld [vmem:[%s13673_s7 + $0x28] sm:$0xff]  }
 0x43c   : > { %v6305_v42 = vrot.slane %v6298_v56, %v12961_v28  ;;  %6082 = vst.msk [vmem:[#allocation4 + $0xb0] sm:$0xff] %vm6059_vm2, %v6053_v38  ;;  %v6054_v41 = vadd.f32 %v12914_v58, %v6019_v55  ;;  %v5959_v48 = vadd.f32 %v8736_v4, %v12901_v27  ;;  %v13103_v63 = vrot.slane %v6318_v44, %v12961_v28  ;;  %v9001_v4 = vld [vmem:[%s13673_s7 + $0x68] sm:$0xff]  }
 0x43d   : > { %6080 = vst.msk [vmem:[#allocation4 + $0xa0] sm:$0xff] %vm6059_vm2, %v6051_v43  ;;  %v6052_v30 = vadd.f32 %v12914_v58, %v6017_v45  ;;  %v5957_v40 = vadd.f32 %v8737_v13, %v12901_v27  ;;  %v8739_v12 = vadd.f32 %v5886_v39, %v12896_v23  ;;  %v6361_v25 = vmax.f32 %v6357_v0, %v6359_v8  ;;  %v6443_v6 = vld [vmem:[#allocation4 + $0x90] ss:$2 sm:$0x7f] }
 0x43e   : > { %v6445_v61 = vld [vmem:[#allocation4 + $0x91] ss:$2 sm:$0x7f]  ;;  %6083 = vst.msk [vmem:[#allocation4 + $0xb8] sm:$0xff] %vm6059_vm2, %v6054_v41  ;;  %v5987_v49 = vmax.f32 %v5959_v48, 0.0  ;;  %v5960_v18 = vadd.f32 %v8738_v52, %v12901_v27  ;;  %6294 = vrot.lane.b32.xlu1 %v13087_v9, %s9208_s25  ;;  %v6332_v2 = vrot.slane %v13103_v63, %v12961_v28  ;;  %v6313_v62 = vcombine.high %v6305_v42, %v6305_v42  ;;  %v9003_v48 = vld [vmem:[%s13673_s7 + $0x70] sm:$0xff]  }
 0x43f   : > { %6230 = vrot.lane.b32.xlu0 %v6229_v51, %s9208_s25  ;;  %v6439_v15 = vld [vmem:[#allocation4 + $0x80] ss:$2 sm:$0x7f]  ;;  %v9000_v23 = vld [vmem:[%s13673_s7 + $0x20] sm:$0xff]   ;;  %6081 = vst.msk [vmem:[#allocation4 + $0xa8] sm:$0xff] %vm6059_vm2, %v6052_v30  ;;  %v5985_v35 = vmax.f32 %v5957_v40, 0.0  ;;  %v5958_v33 = vadd.f32 %v8739_v12, %v12901_v27  ;;  %v6362_v1 = vmax.f32 %v6360_v14, %v6361_v25  ;;  %v6447_v24 = vmax.f32 %v6443_v6, %v6445_v61 }
 0x440   : > { %v6441_v36 = vld [vmem:[#allocation4 + $0x81] ss:$2 sm:$0x7f]  ;;  %v6022_v34 = vmul.f32 %v12907_v10, %v5987_v49  ;;  %v5988_v57 = vmax.f32 %v5960_v18, 0.0  ;;  %8308 = vmatpush3.bf16.msra.mxu1 %v9000_v23  ;;  %v6337_v26 = vcombine.high %v13103_v63, %v13103_v63  ;;  %v6253_v51 = vcombine.high %v13041_v29, %v13041_v29 }
 0x441   : > { %v6446_v47 = vmax.f32 %v6439_v15, %v6441_v36  ;;  %v6020_v7 = vmul.f32 %v12907_v10, %v5985_v35  ;;  %v5986_v31 = vmax.f32 %v5958_v33, 0.0  ;;  %v6370_v22 = vrot.slane %v6362_v1, %v12961_v28  ;;  %8309 = vmatprep.subr.bf16.mxu1 %v9001_v4  ;;  %v9004_v35 = vld [vmem:[%s13673_s7 + $0x30] sm:$0xff]  }
 0x442   : > { %v6057_v27 = vadd.f32 %v12914_v58, %v6022_v34  ;;  %v6023_v20 = vmul.f32 %v12907_v10, %v5988_v57  ;;  %6306 = vrot.lane.b32.xlu1 %v6305_v42, %s9209_s14  ;;  %v6402_v44 = vcombine.high %v6362_v1, %v6362_v1  ;;  %v6349_v5 = vcombine.high %v6332_v2, %v6332_v2 }
 0x443   : > { %6333 = vrot.lane.b32.xlu0 %v6332_v2, %s9208_s25  ;;  %v6055_v3 = vadd.f32 %v12914_v58, %v6020_v7  ;;  %v6021_v21 = vmul.f32 %v12907_v10, %v5986_v31  ;;  %v6382_v32 = vcombine.high %v6370_v22, %v6370_v22  ;;  %v6377_v37 = vrot.slane %v6370_v22, %v12961_v28 }
 0x444   : > { %6086 = vst.msk [vmem:[#allocation4 + $0xd0] sm:$0xff] %vm6059_vm2, %v6057_v27  ;;  %v6058_v19 = vadd.f32 %v12914_v58, %v6023_v20  ;;  %v6448_v46 = vmax.f32 %v6446_v47, %v6447_v24  ;;  %v6260_v55 = vrot.slane %v6253_v51, %v12961_v28  ;;  %v6344_v8 = vrot.slane %v6337_v26, %v12961_v28  ;;  %v9005_v47 = vld [vmem:[%s13673_s7 + $0x78] sm:$0xff]   ;;  %v9007_v51 = vld [vmem:[%s13673_s7 + $0xc0] sm:$0xff]  }
 0x445   : > { %6084 = vst.msk [vmem:[#allocation4 + $0xc0] sm:$0xff] %vm6059_vm2, %v6055_v3  ;;  %v6056_v14 = vadd.f32 %v12914_v58, %v6021_v21  ;;  %v6389_v50 = vrot.slane %v6382_v32, %v12961_v28  ;;  %v6526_v53 = vld [vmem:[#allocation4 + $0xb0] ss:$2 sm:$0x7f]  ;;  %v6409_v43 = vrot.slane %v6402_v44, %v12961_v28  ;;  %v6310_v42 = vcombine.high %v13087_v9, %v13087_v9 }
 0x446   : > { %v6528_v10 = vld [vmem:[#allocation4 + $0xb1] ss:$2 sm:$0x7f]  ;;  %6088 = vst.msk [vmem:[#allocation4 + $0xd8] sm:$0x3f] %vm6087_vm4, %v6058_v19  ;;  %6378 = vrot.lane.b32.xlu1 %v6377_v37, %s9207_s24  ;;  %v6487_v29 = vcombine.high %v6448_v46, %v6448_v46  ;;  %v6457_v45 = vrot.slane %v6448_v46, %v12961_v28  ;;  %8310 = vmatpush3.bf16.msra.mxu1 %v9002_v17 }
 0x447   : > { %6314 = vrot.lane.b32.xlu0 %v6313_v62, %s9207_s24  ;;  %v6522_v56 = vld [vmem:[#allocation4 + $0xa0] ss:$2 sm:$0x7f]  ;;  %v6524_v0 = vld [vmem:[#allocation4 + $0xa1] ss:$2 sm:$0x7f]  ;;  %v6530_v38 = vmax.f32 %v6526_v53, %v6528_v10  ;;  %v6399_v41 = vcombine.high %v6389_v50, %v6389_v50  ;;  %v6394_v9 = vcombine.high %v6377_v37, %v6377_v37  ;;  %v6416_v30 = vrot.slane %v6409_v43, %v12961_v28 }
 0x448   : > { %6449 = vst.msk [vmem:[#allocation5 + $0x7] sm:$0x1] %vm12965_vm3, %v6448_v46  ;;  %v6529_v58 = vmax.f32 %v6522_v56, %v6524_v0  ;;  %6351 = vst.msk [vmem:[#allocation5 + $0x5] sm:$0x1] %vm12965_vm3, %v6349_v5  ;;  %v6494_v13 = vrot.slane %v6487_v29, %v12961_v28  ;;  %v6458_v40 = vcombine.high %v6457_v45, %v6457_v45  ;;  %8311 = vmatprep.subr.bf16.mxu1 %v9003_v48  ;;  %v9006_v24 = vld [vmem:[%s13673_s7 + $0x38] sm:$0xff]  }
 0x449   : > { %6085 = vst.msk [vmem:[#allocation4 + $0xc8] sm:$0xff] %vm6059_vm2, %v6056_v14  ;;  %v6421_v12 = vcombine.high %v6409_v43, %v6409_v43  ;;  %v6465_v36 = vrot.slane %v6457_v45, %v12961_v28  ;;  %v6433_v27 = vcombine.high %v6416_v30, %v6416_v30 }
 0x44a   : > { %v6531_v59 = vmax.f32 %v6529_v58, %v6530_v38  ;;  %6262 = vst.msk [vmem:[#allocation5 + $0x3] sm:$0x1] %vm12965_vm3, %v6260_v55  ;;  %6390 = vrot.lane.b32.xlu1 %v6389_v50, %s9208_s25  ;;  %v6501_v39 = vrot.slane %v6494_v13, %v12961_v28  ;;  %6312 = vst.msk [vmem:[#allocation5 + $0x4] sm:$0x1] %vm12965_vm3, %v6310_v42  ;;  %v6472_v2 = vrot.slane %v6458_v40, %v12961_v28 }
 0x44b   : > { %6345 = vrot.lane.b32.xlu0 %v6344_v8, %s9209_s14  ;;  %6401 = vst.msk [vmem:[#allocation5 + $0x6] sm:$0x1] %vm12965_vm3, %v6399_v41  ;;  %v6428_v1 = vrot.slane %v6421_v12, %v12961_v28  ;;  %8312 = vmatpush3.bf16.msra.mxu1 %v9004_v35  ;;  %v6477_v62 = vcombine.high %v6465_v36, %v6465_v36 }
 0x44c   : > { %v6539_v52 = vrot.slane %v6531_v59, %v12961_v28  ;;  %v6571_v63 = vcombine.high %v6531_v59, %v6531_v59  ;;  %6503 = vst.msk [vmem:[#allocation5 + $0x8] sm:$0x1] %vm12965_vm3, %v6501_v39  ;;  %8313 = vmatprep.subr.bf16.mxu1 %v9005_v47  ;;  %v6504_v20 = vcombine.high %v6494_v13, %v6494_v13 }
 0x44d   : > { %v6610_v6 = vld [vmem:[#allocation4 + $0xd0] ss:$2 sm:$0x7f]  ;;  %v6612_v61 = vld [vmem:[#allocation4 + $0xd1] ss:$2 sm:$0x7f]  ;;  %v6482_v44 = vcombine.high %v6472_v2, %v6472_v2  ;;  %v6516_v50 = vcombine.high %v6501_v39, %v6501_v39 }
 0x44e   : > { %v6578_v25 = vrot.slane %v6571_v63, %v12961_v28  ;;  %6395 = vrot.lane.b32.xlu1 %v6394_v9, %s9209_s14  ;;  %v6551_v49 = vcombine.high %v6539_v52, %v6539_v52  ;;  %v6614_v16 = vmax.f32 %v6610_v6, %v6612_v61  ;;  %v6511_v19 = vrot.slane %v6504_v20, %v12961_v28 }
 0x44f   : > { %6417 = vrot.lane.b32.xlu0 %v6416_v30, %s9207_s24  ;;  %8314 = vmatpush3.bf16.msra.mxu1 %v9006_v24  ;;  %v6546_v37 = vrot.slane %v6539_v52, %v12961_v28 }
 0x450   : > { %v6606_v18 = vld [vmem:[#allocation4 + $0xc0] ss:$2 sm:$0x7f]  ;;  %v6608_v15 = vld [vmem:[#allocation4 + $0xc1] ss:$2 sm:$0x7f]  ;;  %v6590_v33 = vcombine.high %v6578_v25, %v6578_v25  ;;  %v6558_v34 = vrot.slane %v6551_v49, %v12961_v28  ;;  %8321 = vmatprep.subr.bf16.mxu1 %v9007_v51  ;;  %v6585_v53 = vrot.slane %v6578_v25, %v12961_v28 }
 0x451   : > { %v6613_v23 = vmax.f32 %v6606_v18, %v6608_v15  ;;  %v6561_v14 = vcombine.high %v6546_v37, %v6546_v37 }
 0x452   : > { %v6597_v7 = vrot.slane %v6590_v33, %v12961_v28  ;;  %6473 = vrot.lane.b32.xlu1 %v6472_v2, %s9207_s24  ;;  %6560 = vst.msk [vmem:[#allocation5 + $0x9] sm:$0x1] %vm12965_vm3, %v6558_v34  ;;  %v6566_v10 = vcombine.high %v6558_v34, %v6558_v34  ;;  %v6600_v5 = vcombine.high %v6585_v53, %v6585_v53  ;;  %v6699_v33 = vsub.s32 1, %v12946_v54 }
 0x453   : > { %v6615_v57 = vmax.f32 %v6613_v23, %v6614_v16  ;;  %6429 = vrot.lane.b32.xlu0 %v6428_v1, %s9208_s25  ;;  %v6695_v2 = vsub.s32 0, %v12946_v54  ;;  %v6707_v1 = vsub.s32 3, %v12946_v54 }
 0x454   : > { %6599 = vst.msk [vmem:[#allocation5 + $0xa] sm:$0x1] %vm12965_vm3, %v6597_v7 }
 0x455   : > { %v6655_v31 = vcombine.high %v6615_v57, %v6615_v57  ;;  %v6623_v22 = vrot.slane %v6615_v57, %v12961_v28 }
 0x456   : > { %6478 = vrot.lane.b32.xlu1 %v6477_v62, %s9208_s25  ;;  %v9008_v62 = vld [vmem:[%s13673_s7 + $0x80] sm:$0xff]  }
 0x457   : > { %v6662_v26 = vrot.slane %v6655_v31, %v12961_v28  ;;  %v6630_v3 = vrot.slane %v6623_v22, %v12961_v28  ;;  %6434 = vrot.lane.b32.xlu0 %v6433_v27, %s9209_s14  ;;  %v6635_v56 = vcombine.high %v6623_v22, %v6623_v22 }
 0x459   : > { %v6669_v21 = vrot.slane %v6662_v26, %v12961_v28  ;;  %v6647_v32 = vcombine.high %v6630_v3, %v6630_v3  ;;  %v6642_v60 = vrot.slane %v6635_v56, %v12961_v28  ;;  %v6674_v29 = vcombine.high %v6662_v26, %v6662_v26  ;;  %v9009_v26 = vld [vmem:[%s13673_s7 + $0xc8] sm:$0xff]  }
 0x45a   : > { %6483 = vrot.lane.b32.xlu1 %v6482_v44, %s9209_s14  ;;  %v9017_v56 = vld [vmem:[%s13673_s7 + $0xe8] sm:$0xff]  }
 0x45b   : > { %v6686_v46 = vcombine.high %v6669_v21, %v6669_v21  ;;  %6649 = vst.msk [vmem:[#allocation5 + $0xb] sm:$0x1] %vm12965_vm3, %v6647_v32  ;;  %6512 = vrot.lane.b32.xlu0 %v6511_v19, %s9207_s24  ;;  %v6650_v0 = vcombine.high %v6642_v60, %v6642_v60  ;;  %v6681_v58 = vrot.slane %v6674_v29, %v12961_v28  ;;  %v9011_v19 = vld [vmem:[%s13673_s7 + $0xd0] sm:$0xff]   ;;  %v6711_v29 = vsub.s32 4, %v12946_v54  ;;  %v9021_v28 = vld [vmem:[%s13673_s7 + $0xf8] sm:$0xff]  }
 0x45d   : > { %6688 = vst.msk [vmem:[#allocation5 + $0xc] sm:$0x1] %vm12965_vm3, %v6686_v46 }
 0x45e   : > { %6562 = vrot.lane.b32.xlu1 %v6561_v14, %s9207_s24  ;;  %v9013_v14 = vld [vmem:[%s13673_s7 + $0xd8] sm:$0xff]  }
 0x45f   : > { %6517 = vrot.lane.b32.xlu0 %v6516_v50, %s9208_s25  ;;  %v9014_v50 = vld [vmem:[%s13673_s7 + $0x98] sm:$0xff]  }
 0x462   : > { %6586 = vrot.lane.b32.xlu1 %v6585_v53, %s9209_s14 }
 0x463   : > { %6547 = vrot.lane.b32.xlu0 %v6546_v37, %s9209_s14  ;;  %v9012_v37 = vld [vmem:[%s13673_s7 + $0x90] sm:$0xff]  }
 0x466   : > { %6567 = vrot.lane.b32.xlu1 %v6566_v10, %s9208_s25  ;;  %v9015_v10 = vld [vmem:[%s13673_s7 + $0xe0] sm:$0xff]  }
 0x467   : > { %6601 = vrot.lane.b32.xlu0 %v6600_v5, %s9207_s24  ;;  %v9016_v5 = vld [vmem:[%s13673_s7 + $0xa0] sm:$0xff]  }
 0x46a   : > { %6670 = vrot.lane.b32.xlu1 %v6669_v21, %s9208_s25  ;;  %v9010_v21 = vld [vmem:[%s13673_s7 + $0x88] sm:$0xff]  }
 0x46b   : > { %6631 = vrot.lane.b32.xlu0 %v6630_v3, %s9208_s25 }
 0x46e   : > { %6651 = vrot.lane.b32.xlu1 %v6650_v0, %s9207_s24  ;;  %v9019_v0 = vld [vmem:[%s13673_s7 + $0xf0] sm:$0xff]  }
 0x46f   : > { %6643 = vrot.lane.b32.xlu0 %v6642_v60, %s9209_s14  ;;  %v9018_v60 = vld [vmem:[%s13673_s7 + $0xa8] sm:$0xff]  }
 0x472   : > { %6682 = vrot.lane.b32.xlu1 %v6681_v58, %s9209_s14  ;;  %s13624_s14 = scalar_lea.hbm %s13675_s9, %s8161_s17 }
 0x49c   : > { %v6128_v55 = vpop.permute.xlu0 %6127 }
 0x49d   : > { %6133 = vst.msk [vmem:[#allocation5] sm:$0x1] %vm13236_vm7, %v6128_v55  ;;  %v9020_v55 = vld [vmem:[%s13673_s7 + $0xb0] sm:$0xff]  }
 0x49f   : > { %v6181_v4 = vpop.permute.xlu1 %6180 }
 0x4a0   : > { %v6136_v17 = vpop.permute.xlu0 %6135 }
 0x4a1   : > { %6141 = vst.msk [vmem:[#allocation5] sm:$0x1] %vm13244_vm10, %v6136_v17  ;;  %v6715_v17 = vsub.s32 5, %v12946_v54 }
 0x4a4   : > { %v6211_v8 = vpop.permute.xlu1 %6210  ;;  %v6176_v45 = vpop.permute.xlu0 %6175 }
 0x4a5   : > { %6178 = vst.msk [vmem:[#allocation5 + $0x1] sm:$0x1] %vm13236_vm7, %v6176_v45  ;;  %v9023_v45 = vld [vmem:[%s13673_s7 + $0x140] sm:$0xff]  }
 0x4a6   : > { %6183 = vst.msk [vmem:[#allocation5 + $0x1] sm:$0x1] %vm13244_vm10, %v6181_v4  ;;  %v6703_v4 = vsub.s32 2, %v12946_v54 }
 0x4a7   : > { %6213 = vst.msk [vmem:[#allocation5 + $0x1] sm:$0x1] %vm13252_vm13, %v6211_v8  ;;  %v9022_v8 = vld [vmem:[%s13673_s7 + $0xb8] sm:$0xff]  }
 0x4a8   : > { %v6226_v13 = vpop.permute.xlu1 %6225  ;;  %v6144_v59 = vpop.permute.xlu0 %6143 }
 0x4a9   : > { %6228 = vst.msk [vmem:[#allocation5 + $0x2] sm:$0x1] %vm13236_vm7, %v6226_v13 }
 0x4aa   : > { %6149 = vst.msk [vmem:[#allocation5] sm:$0x1] %vm13252_vm13, %v6144_v59  ;;  %v9024_v59 = vld [vmem:[%s13673_s7 + $0x100] sm:$0xff]  }
 0x4ac   : > { %v6265_v11 = vpop.permute.xlu1 %6264 }
 0x4ad   : > { %v6250_v42 = vpop.permute.xlu0 %6249  ;;  %6267 = vst.msk [vmem:[#allocation5 + $0x3] sm:$0x1] %vm13236_vm7, %v6265_v11 }
 0x4b0   : > { %v6295_v41 = vpop.permute.xlu1 %6294 }
 0x4b1   : > { %v6231_v48 = vpop.permute.xlu0 %6230  ;;  %6297 = vst.msk [vmem:[#allocation5 + $0x3] sm:$0x1] %vm13244_vm10, %v6295_v41 }
 0x4b2   : > { %6233 = vst.msk [vmem:[#allocation5 + $0x2] sm:$0x1] %vm13244_vm10, %v6231_v48  ;;  %v9026_v48 = vld [vmem:[%s13673_s7 + $0x108] sm:$0xff]  }
 0x4b3   : > { %6252 = vst.msk [vmem:[#allocation5 + $0x2] sm:$0x1] %vm13252_vm13, %v6250_v42  ;;  %v9025_v42 = vld [vmem:[%s13673_s7 + $0x148] sm:$0xff]  }
 0x4b4   : > { %v6307_v52 = vpop.permute.xlu1 %6306 }
 0x4b5   : > { %v6334_v39 = vpop.permute.xlu0 %6333  ;;  %6309 = vst.msk [vmem:[#allocation5 + $0x3] sm:$0x1] %vm13252_vm13, %v6307_v52  ;;  %v9027_v52 = vld [vmem:[%s13673_s7 + $0x150] sm:$0xff]  }
 0x4b8   : > { %v6379_v63 = vpop.permute.xlu1 %6378 }
 0x4b9   : > { %v6315_v9 = vpop.permute.xlu0 %6314  ;;  %6381 = vst.msk [vmem:[#allocation5 + $0x5] sm:$0x1] %vm13236_vm7, %v6379_v63  ;;  %v9029_v63 = vld [vmem:[%s13673_s7 + $0x158] sm:$0xff]  }
 0x4ba   : > { %6317 = vst.msk [vmem:[#allocation5 + $0x4] sm:$0x1] %vm13236_vm7, %v6315_v9  ;;  %v9030_v9 = vld [vmem:[%s13673_s7 + $0x118] sm:$0xff]  }
 0x4bb   : > { %6336 = vst.msk [vmem:[#allocation5 + $0x4] sm:$0x1] %vm13244_vm10, %v6334_v39  ;;  %v9028_v39 = vld [vmem:[%s13673_s7 + $0x110] sm:$0xff]  }
 0x4bc   : > { %v6391_v30 = vpop.permute.xlu1 %6390 }
 0x4bd   : > { %v6346_v40 = vpop.permute.xlu0 %6345  ;;  %6393 = vst.msk [vmem:[#allocation5 + $0x5] sm:$0x1] %vm13244_vm10, %v6391_v30  ;;  %v9031_v30 = vld [vmem:[%s13673_s7 + $0x160] sm:$0xff]  }
 0x4be   : > { %6348 = vst.msk [vmem:[#allocation5 + $0x4] sm:$0x1] %vm13252_vm13, %v6346_v40  ;;  %v9032_v40 = vld [vmem:[%s13673_s7 + $0x120] sm:$0xff]  }
 0x4c0   : > { %v6396_v12 = vpop.permute.xlu1 %6395 }
 0x4c1   : > { %v6418_v25 = vpop.permute.xlu0 %6417  ;;  %6398 = vst.msk [vmem:[#allocation5 + $0x5] sm:$0x1] %vm13252_vm13, %v6396_v12  ;;  %v9033_v12 = vld [vmem:[%s13673_s7 + $0x168] sm:$0xff]  }
 0x4c2   : > { %6420 = vst.msk [vmem:[#allocation5 + $0x6] sm:$0x1] %vm13236_vm7, %v6418_v25  ;;  %v9034_v25 = vld [vmem:[%s13673_s7 + $0x128] sm:$0xff]  }
 0x4c4   : > { %v6474_v6 = vpop.permute.xlu1 %6473 }
 0x4c5   : > { %v6430_v61 = vpop.permute.xlu0 %6429  ;;  %6476 = vst.msk [vmem:[#allocation5 + $0x7] sm:$0x1] %vm13236_vm7, %v6474_v6  ;;  %v9035_v6 = vld [vmem:[%s13673_s7 + $0x170] sm:$0xff]  }
 0x4c6   : > { %6432 = vst.msk [vmem:[#allocation5 + $0x6] sm:$0x1] %vm13244_vm10, %v6430_v61  ;;  %v9036_v61 = vld [vmem:[%s13673_s7 + $0x130] sm:$0xff]  }
 0x4c8   : > { %v6479_v49 = vpop.permute.xlu1 %6478 }
 0x4c9   : > { %v6435_v18 = vpop.permute.xlu0 %6434  ;;  %6481 = vst.msk [vmem:[#allocation5 + $0x7] sm:$0x1] %vm13244_vm10, %v6479_v49  ;;  %v9037_v49 = vld [vmem:[%s13673_s7 + $0x178] sm:$0xff]  }
 0x4ca   : > { %6437 = vst.msk [vmem:[#allocation5 + $0x6] sm:$0x1] %vm13252_vm13, %v6435_v18  ;;  %v6723_v18 = vsub.s32 7, %v12946_v54 }
 0x4cc   : > { %v6484_v15 = vpop.permute.xlu1 %6483 }
 0x4cd   : > { %v6513_v16 = vpop.permute.xlu0 %6512  ;;  %6486 = vst.msk [vmem:[#allocation5 + $0x7] sm:$0x1] %vm13252_vm13, %v6484_v15  ;;  %v9038_v15 = vld [vmem:[%s13673_s7 + $0x138] sm:$0xff]  }
 0x4ce   : > { %6515 = vst.msk [vmem:[#allocation5 + $0x8] sm:$0x1] %vm13236_vm7, %v6513_v16 }
 0x4d0   : > { %v6563_v23 = vpop.permute.xlu1 %6562 }
 0x4d1   : > { %v6518_v35 = vpop.permute.xlu0 %6517  ;;  %6565 = vst.msk [vmem:[#allocation5 + $0x9] sm:$0x1] %vm13236_vm7, %v6563_v23  ;;  %v9039_v23 = vld [vmem:[%s13673_s7 + $0x1c0] sm:$0xff]  }
 0x4d2   : > { %6520 = vst.msk [vmem:[#allocation5 + $0x8] sm:$0x1] %vm13244_vm10, %v6518_v35 }
 0x4d4   : > { %v6587_v36 = vpop.permute.xlu1 %6586  ;;  %v13309_v57 = vld [vmem:[#allocation5] sm:$0xff] }
 0x4d5   : > { %v6548_v34 = vpop.permute.xlu0 %6547  ;;  %v6700_v47 = vrot.slane %v13309_v57, %v6699_v33  ;;  %v6696_v24 = vrot.slane %v13309_v57, %v6695_v2  ;;  %v6708_v7 = vrot.slane %v13309_v57, %v6707_v1  ;;  %v6704_v43 = vrot.slane %v13309_v57, %v6703_v4 }
 0x4d6   : > { %6550 = vst.msk [vmem:[#allocation5 + $0x8] sm:$0x1] %vm13252_vm13, %v6548_v34  ;;  %v6716_v13 = vrot.slane %v13309_v57, %v6715_v17  ;;  %v6712_v16 = vrot.slane %v13309_v57, %v6711_v29  ;;  %v6724_v35 = vrot.slane %v13309_v57, %v6723_v18  ;;  %v9065_v17 = vld [vmem:[%s13673_s7 + $0x268] sm:$0xff]   ;;  %v9084_v18 = vld [vmem:[%s13673_s7 + $0x2b0] sm:$0xff]  }
 0x4d7   : > { %v6759_v31 = vpack.c.bf16 %v6700_v47, %v6700_v47  ;;  %v6758_v22 = vpack.c.bf16 %v6696_v24, %v6696_v24  ;;  %v6761_v3 = vpack.c.bf16 %v6708_v7, %v6708_v7  ;;  %v6760_v11 = vpack.c.bf16 %v6704_v43, %v6704_v43  ;;  %v9041_v47 = vld [vmem:[%s13673_s7 + $0x1c8] sm:$0xff]   ;;  %v9067_v43 = vld [vmem:[%s13673_s7 + $0x270] sm:$0xff]  }
 0x4d8   : > { %v6568_v27 = vpop.permute.xlu1 %6567  ;;  %v6763_v41 = vpack.c.bf16 %v6716_v13, %v6716_v13  ;;  %v6762_v34 = vpack.c.bf16 %v6712_v16, %v6712_v16  ;;  %v6765_v24 = vpack.c.bf16 %v6724_v35, %v6724_v35  ;;  %v9042_v7 = vld [vmem:[%s13673_s7 + $0x188] sm:$0xff]   ;;  %v9069_v13 = vld [vmem:[%s13673_s7 + $0x278] sm:$0xff]   ;;  %v9087_v35 = vld [vmem:[%s13673_s7 + $0x300] sm:$0xff]  }
 0x4d9   : > { %v6602_v20 = vpop.permute.xlu0 %6601  ;;  %6570 = vst.msk [vmem:[#allocation5 + $0x9] sm:$0x1] %vm13244_vm10, %v6568_v27  ;;  %7591 = vmatprep.mubr.bf16.mxu1 %v6759_v31  ;;  %v9043_v31 = vld [vmem:[%s13673_s7 + $0x1d0] sm:$0xff]   ;;  %v9046_v27 = vld [vmem:[%s13673_s7 + $0x198] sm:$0xff]  }
 0x4da   : > { %6604 = vst.msk [vmem:[#allocation5 + $0xa] sm:$0x1] %vm13236_vm7, %v6602_v20  ;;  %7592 = vmatmul.mubr.bf16.vlgmr.msra.gmra.mrb[28].mxu1 %v6758_v22  ;;  %v9044_v22 = vld [vmem:[%s13673_s7 + $0x190] sm:$0xff]   ;;  %v9047_v20 = vld [vmem:[%s13673_s7 + $0x1e0] sm:$0xff]   ;;  %v9086_v16 = vld [vmem:[%s13673_s7 + $0x2b8] sm:$0xff]  }
 0x4db   : > { %6589 = vst.msk [vmem:[#allocation5 + $0x9] sm:$0x1] %vm13252_vm13, %v6587_v36  ;;  %8322 = vmatpush3.bf16.msra.mxu1 %v9008_v62  ;;  %7631 = vmatprep.mubr.bf16.mxu1 %v6761_v3  ;;  %v9040_v36 = vld [vmem:[%s13673_s7 + $0x180] sm:$0xff]   ;;  %v9045_v62 = vld [vmem:[%s13673_s7 + $0x1d8] sm:$0xff]   ;;  %v9049_v3 = vld [vmem:[%s13673_s7 + $0x1e8] sm:$0xff]  }
 0x4dc   : > { %v6671_v32 = vpop.permute.xlu1 %6670  ;;  %8323 = vmatprep.subr.bf16.mxu1 %v9009_v26  ;;  %v9048_v26 = vld [vmem:[%s13673_s7 + $0x1a0] sm:$0xff]  }
 0x4dd   : > { %v6632_v44 = vpop.permute.xlu0 %6631 }
 0x4de   : > { %6634 = vst.msk [vmem:[#allocation5 + $0xa] sm:$0x1] %vm13244_vm10, %v6632_v44  ;;  %v9052_v44 = vld [vmem:[%s13673_s7 + $0x1b0] sm:$0xff]  }
 0x4df   : > { %8324 = vmatpush3.bf16.msra.mxu1 %v9010_v21  ;;  %v9050_v21 = vld [vmem:[%s13673_s7 + $0x1a8] sm:$0xff]  }
 0x4e0   : > { %v6652_v46 = vpop.permute.xlu1 %6651  ;;  %8325 = vmatprep.subr.bf16.mxu1 %v9011_v19  ;;  %v9053_v19 = vld [vmem:[%s13673_s7 + $0x1f8] sm:$0xff]  }
 0x4e1   : > { %v6644_v51 = vpop.permute.xlu0 %6643  ;;  %6654 = vst.msk [vmem:[#allocation5 + $0xb] sm:$0x1] %vm13236_vm7, %v6652_v46  ;;  %v9054_v46 = vld [vmem:[%s13673_s7 + $0x1b8] sm:$0xff]  }
 0x4e2   : > { %6646 = vst.msk [vmem:[#allocation5 + $0xa] sm:$0x1] %vm13252_vm13, %v6644_v51 }
 0x4e3   : > { %6673 = vst.msk [vmem:[#allocation5 + $0xb] sm:$0x1] %vm13244_vm10, %v6671_v32  ;;  %8326 = vmatpush3.bf16.msra.mxu1 %v9012_v37  ;;  %v9051_v32 = vld [vmem:[%s13673_s7 + $0x1f0] sm:$0xff]   ;;  %v6719_v37 = vsub.s32 6, %v12946_v54 }
 0x4e4   : > { %v6683_v53 = vpop.permute.xlu1 %6682  ;;  %8327 = vmatprep.subr.bf16.mxu1 %v9013_v14  ;;  %v9055_v14 = vld [vmem:[%s13673_s7 + $0x240] sm:$0xff]  }
 0x4e5   : > { %6685 = vst.msk [vmem:[#allocation5 + $0xb] sm:$0x1] %vm13252_vm13, %v6683_v53  ;;  %v6720_v51 = vrot.slane %v13309_v57, %v6719_v37  ;;  %v9056_v53 = vld [vmem:[%s13673_s7 + $0x200] sm:$0xff]  }
 0x4e7   : > { %8328 = vmatpush3.bf16.msra.mxu1 %v9014_v50 }
 0x4e8   : > { %8329 = vmatprep.subr.bf16.mxu1 %v9015_v10  ;;  %v6764_v10 = vpack.c.bf16 %v6720_v51, %v6720_v51 }
 0x4eb   : > { %8330 = vmatpush3.bf16.msra.mxu1 %v9016_v5  ;;  %v9057_v5 = vld [vmem:[%s13673_s7 + $0x248] sm:$0xff]  }
 0x4ec   : > { %8331 = vmatprep.subr.bf16.mxu1 %v9017_v56  ;;  %v13375_v58 = vld [vmem:[#allocation5 + $0x8] sm:$0x1f]  ;;  %v9058_v56 = vld [vmem:[%s13673_s7 + $0x208] sm:$0xff]  }
 0x4ed   : > { %v13378_v38 = vrot.slane %v13375_v58, %v6711_v29  ;;  %v6732_v50 = vrot.slane %v13375_v58, %v6699_v33  ;;  %v9059_v33 = vld [vmem:[%s13673_s7 + $0x250] sm:$0xff]   ;;  %v9062_v29 = vld [vmem:[%s13673_s7 + $0x218] sm:$0xff]  }
 0x4ef   : > { %8332 = vmatpush3.bf16.msra.mxu1 %v9018_v60  ;;  %v6767_v57 = vpack.c.bf16 %v6732_v50, %v6732_v50  ;;  %v9060_v60 = vld [vmem:[%s13673_s7 + $0x210] sm:$0xff]   ;;  %v6770_v54 = vpack.c.bf16 %v13378_v38, %v13378_v38 }
 0x4f0   : > { %8333 = vmatprep.subr.bf16.mxu1 %v9019_v0  ;;  %v9061_v0 = vld [vmem:[%s13673_s7 + $0x258] sm:$0xff]  }
 0x4f3   : > { %8334 = vmatpush3.bf16.msra.mxu1 %v9020_v55  ;;  %v9063_v55 = vld [vmem:[%s13673_s7 + $0x260] sm:$0xff]  }
 0x4f4   : > { %8335 = vmatprep.subr.bf16.mxu1 %v9021_v28  ;;  %v9064_v28 = vld [vmem:[%s13673_s7 + $0x220] sm:$0xff]  }
 0x4f7   : > { %8336 = vmatpush3.bf16.msra.mxu1 %v9022_v8  ;;  %v9066_v8 = vld [vmem:[%s13673_s7 + $0x228] sm:$0xff]  }
 0x4f8   : > { %8343 = vmatprep.subr.bf16.mxu1 %v9023_v45  ;;  %v9068_v45 = vld [vmem:[%s13673_s7 + $0x230] sm:$0xff]  }
 0x4fa   : > { %7632 = vmatmul.mubr.bf16.vlgmr.msra.gmra.mrb[32].mxu1 %v6760_v11  ;;  %v6728_v11 = vrot.slane %v13375_v58, %v6695_v2 }
 0x4fb   : > { %8344 = vmatpush3.bf16.msra.mxu1 %v9024_v59  ;;  %7671 = vmatprep.mubr.bf16.mxu1 %v6763_v41  ;;  %v9070_v59 = vld [vmem:[%s13673_s7 + $0x238] sm:$0xff]   ;;  %v6740_v41 = vrot.slane %v13375_v58, %v6707_v1  ;;  %v9075_v1 = vld [vmem:[%s13673_s7 + $0x2d0] sm:$0xff]  }
 0x4fc   : > { %8345 = vmatprep.subr.bf16.mxu1 %v9025_v42  ;;  %v9071_v42 = vld [vmem:[%s13673_s7 + $0x2c0] sm:$0xff]  }
 0x4fd   : > { %v6769_v2 = vpack.c.bf16 %v6740_v41, %v6740_v41 }
 0x4ff   : > { %8346 = vmatpush3.bf16.msra.mxu1 %v9026_v48  ;;  %v9072_v48 = vld [vmem:[%s13673_s7 + $0x280] sm:$0xff]  }
 0x500   : > { %8347 = vmatprep.subr.bf16.mxu1 %v9027_v52  ;;  %v6766_v52 = vpack.c.bf16 %v6728_v11, %v6728_v11 }
 0x503   : > { %8348 = vmatpush3.bf16.msra.mxu1 %v9028_v39  ;;  %v9073_v39 = vld [vmem:[%s13673_s7 + $0x2c8] sm:$0xff]  }
 0x504   : > { %8349 = vmatprep.subr.bf16.mxu1 %v9029_v63  ;;  %v9074_v63 = vld [vmem:[%s13673_s7 + $0x288] sm:$0xff]  }
 0x507   : > { %8350 = vmatpush3.bf16.msra.mxu1 %v9030_v9  ;;  %v9076_v9 = vld [vmem:[%s13673_s7 + $0x290] sm:$0xff]  }
 0x508   : > { %8351 = vmatprep.subr.bf16.mxu1 %v9031_v30  ;;  %v9077_v30 = vld [vmem:[%s13673_s7 + $0x2d8] sm:$0xff]  }
 0x50b   : > { %8352 = vmatpush3.bf16.msra.mxu1 %v9032_v40  ;;  %v9078_v40 = vld [vmem:[%s13673_s7 + $0x298] sm:$0xff]  }
 0x50c   : > { %8353 = vmatprep.subr.bf16.mxu1 %v9033_v12  ;;  %v9079_v12 = vld [vmem:[%s13673_s7 + $0x2e0] sm:$0xff]  }
 0x50f   : > { %8354 = vmatpush3.bf16.msra.mxu1 %v9034_v25  ;;  %v9080_v25 = vld [vmem:[%s13673_s7 + $0x2a0] sm:$0xff]  }
 0x510   : > { %8355 = vmatprep.subr.bf16.mxu1 %v9035_v6  ;;  %v9081_v6 = vld [vmem:[%s13673_s7 + $0x2e8] sm:$0xff]  }
 0x513   : > { %8356 = vmatpush3.bf16.msra.mxu1 %v9036_v61  ;;  %v9082_v61 = vld [vmem:[%s13673_s7 + $0x2a8] sm:$0xff]  }
 0x514   : > { %8357 = vmatprep.subr.bf16.mxu1 %v9037_v49  ;;  %v9083_v49 = vld [vmem:[%s13673_s7 + $0x2f0] sm:$0xff]  }
 0x517   : > { %8358 = vmatpush3.bf16.msra.mxu1 %v9038_v15  ;;  %v9085_v15 = vld [vmem:[%s13673_s7 + $0x2f8] sm:$0xff]  }
 0x518   : > { %8365 = vmatprep.subr.bf16.mxu1 %v9039_v23  ;;  %v6736_v23 = vrot.slane %v13375_v58, %v6703_v4 }
 0x51a   : > { %7672 = vmatmul.mubr.bf16.vlgmr.msra.gmra.mrb[36].mxu1 %v6762_v34  ;;  %v13753_v34 = vmov 0.0  }
 0x51b   : > { %8366 = vmatpush3.bf16.msra.mxu1 %v9040_v36  ;;  %7711 = vmatprep.mubr.bf16.mxu1 %v6765_v24  ;;  %v6768_v36 = vpack.c.bf16 %v6736_v23, %v6736_v23 }
 0x51c   : > { %8367 = vmatprep.subr.bf16.mxu1 %v9041_v47  ;;  %v9088_v47 = vld [vmem:[%s13673_s7 + $0x308] sm:$0xff]  }
 0x51f   : > { %8368 = vmatpush3.bf16.msra.mxu1 %v9042_v7 }
 0x520   : > { %8369 = vmatprep.subr.bf16.mxu1 %v9043_v31 }
 0x523   : > { %8370 = vmatpush3.bf16.msra.mxu1 %v9044_v22  ;;  %v6967_v22 = vld [vmem:[%s13674_s8] sm:$0x1] }
 0x524   : > { %8371 = vmatprep.subr.bf16.mxu1 %v9045_v62 }
 0x527   : > { %8372 = vmatpush3.bf16.msra.mxu1 %v9046_v27 }
 0x528   : > { %8373 = vmatprep.subr.bf16.mxu1 %v9047_v20 }
 0x52b   : > { %8374 = vmatpush3.bf16.msra.mxu1 %v9048_v26 }
 0x52c   : > { %8375 = vmatprep.subr.bf16.mxu1 %v9049_v3 }
 0x52f   : > { %8376 = vmatpush3.bf16.msra.mxu1 %v9050_v21 }
 0x530   : > { %8377 = vmatprep.subr.bf16.mxu1 %v9051_v32 }
 0x533   : > { %8378 = vmatpush3.bf16.msra.mxu1 %v9052_v44 }
 0x534   : > { %8379 = vmatprep.subr.bf16.mxu1 %v9053_v19 }
 0x537   : > { %8380 = vmatpush3.bf16.msra.mxu1 %v9054_v46 }
 0x538   : > { %8387 = vmatprep.subr.bf16.mxu1 %v9055_v14 }
 0x53a   : > { %7712 = vmatmul.mubr.bf16.vlgmr.msra.gmra.mrb[40].mxu1 %v6764_v10 }
 0x53b   : > { %8388 = vmatpush3.bf16.msra.mxu1 %v9056_v53  ;;  %7751 = vmatprep.mubr.bf16.mxu1 %v6767_v57 }
 0x53c   : > { %8389 = vmatprep.subr.bf16.mxu1 %v9057_v5 }
 0x53f   : > { %8390 = vmatpush3.bf16.msra.mxu1 %v9058_v56 }
 0x540   : > { %8391 = vmatprep.subr.bf16.mxu1 %v9059_v33 }
 0x543   : > { %8392 = vmatpush3.bf16.msra.mxu1 %v9060_v60 }
 0x544   : > { %8393 = vmatprep.subr.bf16.mxu1 %v9061_v0 }
 0x547   : > { %8394 = vmatpush3.bf16.msra.mxu1 %v9062_v29 }
 0x548   : > { %8395 = vmatprep.subr.bf16.mxu1 %v9063_v55 }
 0x54b   : > { %8396 = vmatpush3.bf16.msra.mxu1 %v9064_v28 }
 0x54c   : > { %8397 = vmatprep.subr.bf16.mxu1 %v9065_v17 }
 0x54f   : > { %8398 = vmatpush3.bf16.msra.mxu1 %v9066_v8 }
 0x550   : > { %8399 = vmatprep.subr.bf16.mxu1 %v9067_v43 }
 0x553   : > { %8400 = vmatpush3.bf16.msra.mxu1 %v9068_v45 }
 0x554   : > { %8401 = vmatprep.subr.bf16.mxu1 %v9069_v13 }
 0x557   : > { %8402 = vmatpush3.bf16.msra.mxu1 %v9070_v59 }
 0x558   : > { %8409 = vmatprep.subr.bf16.mxu1 %v9071_v42 }
 0x55a   : > { %7752 = vmatmul.mubr.bf16.vlgmr.msra.gmra.mrb[44].mxu1 %v6766_v52 }
 0x55b   : > { %8410 = vmatpush3.bf16.msra.mxu1 %v9072_v48  ;;  %7791 = vmatprep.mubr.bf16.mxu1 %v6769_v2 }
 0x55c   : > { %8411 = vmatprep.subr.bf16.mxu1 %v9073_v39 }
 0x55f   : > { %8412 = vmatpush3.bf16.msra.mxu1 %v9074_v63 }
 0x560   : > { %8413 = vmatprep.subr.bf16.mxu1 %v9075_v1 }
 0x563   : > { %8414 = vmatpush3.bf16.msra.mxu1 %v9076_v9 }
 0x564   : > { %8415 = vmatprep.subr.bf16.mxu1 %v9077_v30 }
 0x567   : > { %8416 = vmatpush3.bf16.msra.mxu1 %v9078_v40 }
 0x568   : > { %8417 = vmatprep.subr.bf16.mxu1 %v9079_v12 }
 0x56b   : > { %8418 = vmatpush3.bf16.msra.mxu1 %v9080_v25 }
 0x56c   : > { %8419 = vmatprep.subr.bf16.mxu1 %v9081_v6 }
 0x56f   : > { %8420 = vmatpush3.bf16.msra.mxu1 %v9082_v61 }
 0x570   : > { %8421 = vmatprep.subr.bf16.mxu1 %v9083_v49 }
 0x573   : > { %8422 = vmatpush3.bf16.msra.mxu1 %v9084_v18 }
 0x574   : > { %8423 = vmatprep.subr.bf16.mxu1 %v9085_v15 }
 0x577   : > { %8424 = vmatpush3.bf16.msra.mxu1 %v9086_v16 }
 0x578   : > { %8704 = vmatprep.subr.bf16.mxu1 %v13753_v34 }
 0x57a   : > { %7792 = vmatmul.mubr.bf16.vlgmr.msra.gmra.mrb[48].mxu1 %v6768_v36 }
 0x57b   : > { %8705 = vmatpush3.bf16.msra.mxu1 %v9087_v35  ;;  %8708 = vmatprep.mubr.msk.bf16.mxu1 %vm9210_vm14, %v13753_v34 }
 0x57c   : > { %8706 = vmatprep.subr.bf16.mxu1 %v13753_v34 }
 0x57f   : > { %8707 = vmatpush3.bf16.msra.mxu1 %v9088_v47 }
 0x582   : > { %8709 = vmatmul.mubr.msk.bf16.vlgmr.msra.gmra.mrb[52].mxu1 %vm6059_vm2, %v6770_v54 }
 0x5ad   : > { %v8315_v58 = vpop.f32.mrb[28].mxu1 }
 0x5ae   : > { %v8316_v4 = vpop.f32.mrb[29].mxu1 }
 0x5af   : > { %v8317_v24 = vadd.f32 %v8316_v4, %v8315_v58  ;;  %v8318_v7 = vpop.f32.mrb[30].mxu1 }
 0x5b0   : > { %v8319_v31 = vpop.f32.mrb[31].mxu1 }
 0x5b1   : > { %v7594_v20 = vadd.f32 %v8317_v24, %v6967_v22 }
 0x5cd   : > { %v8337_v62 = vpop.f32.mrb[32].mxu1 }
 0x5ce   : > { %v8338_v27 = vpop.f32.mrb[33].mxu1 }
 0x5cf   : > { %v8339_v26 = vadd.f32 %v8338_v27, %v8337_v62  ;;  %v8340_v3 = vpop.f32.mrb[34].mxu1 }
 0x5d0   : > { %v8341_v21 = vpop.f32.mrb[35].mxu1 }
 0x5d1   : > { %v7634_v32 = vadd.f32 %v8339_v26, %v7594_v20 }
 0x5ed   : > { %v8359_v44 = vpop.f32.mrb[36].mxu1 }
 0x5ee   : > { %v8360_v38 = vpop.f32.mrb[37].mxu1 }
 0x5ef   : > { %v8361_v19 = vadd.f32 %v8360_v38, %v8359_v44  ;;  %v8362_v37 = vpop.f32.mrb[38].mxu1 }
 0x5f0   : > { %v8363_v46 = vpop.f32.mrb[39].mxu1 }
 0x5f1   : > { %v7674_v51 = vadd.f32 %v8361_v19, %v7634_v32 }
 0x60d   : > { %v8381_v14 = vpop.f32.mrb[40].mxu1 }
 0x60e   : > { %v8382_v50 = vpop.f32.mrb[41].mxu1 }
 0x60f   : > { %v8383_v53 = vadd.f32 %v8382_v50, %v8381_v14  ;;  %v8384_v10 = vpop.f32.mrb[42].mxu1 }
 0x610   : > { %v8385_v5 = vpop.f32.mrb[43].mxu1 }
 0x611   : > { %v7714_v57 = vadd.f32 %v8383_v53, %v7674_v51 }
 0x62d   : > { %v8403_v56 = vpop.f32.mrb[44].mxu1 }
 0x62e   : > { %v8404_v33 = vpop.f32.mrb[45].mxu1 }
 0x62f   : > { %v8405_v60 = vadd.f32 %v8404_v33, %v8403_v56  ;;  %v8406_v0 = vpop.f32.mrb[46].mxu1 }
 0x630   : > { %v8407_v29 = vpop.f32.mrb[47].mxu1 }
 0x631   : > { %v7754_v55 = vadd.f32 %v8405_v60, %v7714_v57 }
 0x64d   : > { %v8425_v28 = vpop.f32.mrb[48].mxu1 }
 0x64e   : > { %v8426_v17 = vpop.f32.mrb[49].mxu1 }
 0x64f   : > { %v8427_v8 = vadd.f32 %v8426_v17, %v8425_v28  ;;  %v8428_v43 = vpop.f32.mrb[50].mxu1 }
 0x650   : > { %v8429_v45 = vpop.f32.mrb[51].mxu1 }
 0x651   : > { %v7794_v13 = vadd.f32 %v8427_v8, %v7754_v55 }
 0x655   : > { %v7833_v59 = vpop.f32.mrb[52].mxu1 }
 0x656   : > { %v7834_v11 = vadd.f32 %v7833_v59, %v7794_v13  ;;  %v8710_v42 = vpop.f32.mrb[53].mxu1 }
 0x657   : > { %v7836_v41 = vpop.f32.mrb[54].mxu1 }
 0x658   : > { %v8711_v48 = vpop.f32.mrb[55].mxu1  ;;  %7840 = vst.msk [vmem:[%s324_s22] sm:$0x1] %vm7839_vm15, %v7834_v11 }
 0x659   : > { %9154 = shalt.err (!%p9151_p3)
}
 0x65a   : > { %s9155_s29 = scalar_lea.hbm %s13624_s14, 16  ;;  %s9159_s22 = scalar_lea.hbm %s13675_s9, 32 }
 0x65b   : > { %p9156_p4 = scmp.ne.s32.totalorder %s13624_s14, %s9155_s29  ;;  %p9160_p9 = scmp.lt.u32.totalorder %s13624_s14, %s13675_s9 }
 0x65c   : > { %p9161_p10 = scmp.lt.u32.totalorder %s9159_s22, %s9155_s29  ;;  %p9163_p12 = scmp.lt.u32.totalorder %s9155_s29, %s13624_s14 }
 0x65d   : > { %p9157_p7 = pnand %p9156_p4, %p9300_p5 }
 0x65e   : > { %p9162_p11 = por %p9161_p10, %p9160_p9 }
 0x65f   : > { %p9158_p8 = pneg %p9157_p7 }
 0x660   : > { %p9164_p13 = por %p9163_p12, %p9162_p11 }
 0x662   : > { %p9165_p0 = pnand %p9164_p13, %p9158_p8 }
 0x664   : > { %9168 = shalt.err (!%p9165_p0)
}
 0x665   : > { %8937 = dma.vmem_to_hbm [thread:$0]  (%p9300_p5), %s13626_s21, 16, %s13624_s14, %s7842_s13  }
 0x666 PF: > { %p8943_p1 = scmp.ge.s32.totalorder %s9203_s12, 2  ;;  %s7866_s23 = sand.u32 1, %s9191_s30  }
 0x667   : > { %s7867_s26 = scalar_lea.sflag [#allocation7], %s7866_s23 }
 0x668   : > { %p8940_p2 = pnand %p8943_p1, %p9304_p6 }
 0x66a   : > { %9186 = dma.done.wait (!%p8940_p2), %s7867_s26, 16  }
 0x66b   : > { %9188 = vsyncadd (!%p8940_p2), %s7867_s26, 4294967280  ;;  %p19_p3 = scmp.ge.s32.totalorder %s9287_s15, 4   ;;  %s13754_s30 = smov %s9195_s10 }
 0x66c   : > { %s13755_s10 = smov %s9199_s11  ;;  %s13756_s11 = smov %s9298_s18 }
 0x66d   : > { %s13757_s12 = smov %s9287_s15  ;;  %21 = sbr.rel (!%p19_p3) target bundleno = 3 (0x3), region = 229 }
 0x674   :  { %7871 = vsyncpa [#allocation7], 1 }
 0x675   :  { %7873 = vsyncpa [#allocation7 + $0x1], 1 }

</bundles_post_ra>
